<compile_context>
chip_gen: v6e
topology: v6e:2x2x1
jax: 0.10.0
libtpu: 0.0.40
codegen_flags: <defaults>
</compile_context>

<pallas_src>
import functools

import jax
import jax.numpy as jnp
from jax import lax
from jax.experimental import pallas as pl
from jax.experimental.pallas import tpu as pltpu


def _round_up(v, m):
    return ((v + m - 1) // m) * m


# ----------------------------------------------------------------------------
# Kernel: one grid step == one layer (both directions, full recurrence).
# ----------------------------------------------------------------------------
def _elmo_layer_kernel(x_f_ref, x_b_ref, mask_ref,
                       w_in_f_ref, w_in_b_ref, w_st_ref, b_f_ref, b_b_ref,
                       w_proj_ref,
                       out_ref,
                       act_f, act_b, gx_f, gx_b, h_st, c_st, pp,
                       *, T, B, H, Cp, cell_clip, proj_clip):
    # x_*_ref:   (T*B, H) f32, row = t*B + b (bwd stream time-REVERSED)
    # mask_ref:  (T*B, 2) f32, col 0 = fwd mask, col 1 = (reversed) bwd mask
    # w_in_*:    (1, H, 4*Cp) bf16 ; w_st_ref: (1, 2H, 4*Cp) bf16 (stacked f;b)
    # b_*_ref:   (1, 1, 4*Cp) f32  ; w_proj_ref: (1, 2*Cp, H) bf16 (stacked f;b)
    # out_ref:   (1, B, T*2H) f32  (layer block)
    f32 = jnp.float32
    bf16 = jnp.bfloat16
    l = pl.program_id(0)

    # Layer 0: seed the persistent activation buffers with the embeddings.
    @pl.when(l == 0)
    def _():
        act_f[...] = x_f_ref[...]
        act_b[...] = x_b_ref[...]

    # ---- hoisted input projection: one big MXU matmul per direction -------
    gx_f[...] = (jnp.dot(act_f[...].astype(bf16), w_in_f_ref[0],
                         preferred_element_type=f32)
                 + b_f_ref[0]).astype(bf16)
    gx_b[...] = (jnp.dot(act_b[...].astype(bf16), w_in_b_ref[0],
                         preferred_element_type=f32)
                 + b_b_ref[0]).astype(bf16)

    # Zero recurrent state (initial_state=None) and the off-diagonal blocks of
    # the block-diagonal staging buffers.
    h_st[...] = jnp.zeros((2 * B, 2 * H), f32)
    c_st[...] = jnp.zeros((2 * B, Cp), f32)
    pp[...] = jnp.zeros((2 * B, 2 * Cp), f32)

    w_st = w_st_ref[0]          # (2H, 4Cp)  [W_st_f ; W_st_b]
    w_pr = w_proj_ref[0]        # (2Cp, H)   [W_proj_f ; W_proj_b]
    res_scale = (l > 0).astype(f32)   # residual only for layers > 0

    def half_cell(gates, c_prev):
        ig = jax.nn.sigmoid(gates[:, 0 * Cp:1 * Cp])
        fg = jax.nn.sigmoid(gates[:, 1 * Cp:2 * Cp])
        gg = jnp.tanh(gates[:, 2 * Cp:3 * Cp])
        og = jax.nn.sigmoid(gates[:, 3 * Cp:4 * Cp])
        c_new = ig * gg + fg * c_prev
        if cell_clip is not None:
            c_new = jnp.clip(c_new, -cell_clip, cell_clip)
        return c_new, og * jnp.tanh(c_new)

    # Fully unrolled time loop (T small & static here).
    # TODO(synk): lax.fori_loop(unroll=2-4) + pl.ds row slices for long T.
    for t in range(T):
        rs = slice(t * B, (t + 1) * B)      # fwd time t, bwd time T-1-t

        # Fused fwd+bwd recurrent matmul (block-diag h @ stacked W_st).
        hh = jnp.dot(h_st[...].astype(bf16), w_st, preferred_element_type=f32)
        g_f = gx_f[rs, :].astype(f32) + hh[0:B]
        g_b = gx_b[rs, :].astype(f32) + hh[B:2 * B]

        c_prev_f = c_st[0:B, :]
        c_prev_b = c_st[B:2 * B, :]
        cf_new, pre_f = half_cell(g_f, c_prev_f)
        cb_new, pre_b = half_cell(g_b, c_prev_b)

        # Fused fwd+bwd state projection (block-diag pre @ stacked W_proj).
        pp[0:B, 0:Cp] = pre_f
        pp[B:2 * B, Cp:2 * Cp] = pre_b
        h_new = jnp.dot(pp[...].astype(bf16), w_pr,
                        preferred_element_type=f32)
        if proj_clip is not None:
            h_new = jnp.clip(h_new, -proj_clip, proj_clip)

        mm = mask_ref[rs, :]
        m_f = mm[:, 0:1] > 0.5
        m_b = mm[:, 1:2] > 0.5

        # Rows past their length hold state (select, not blend).
        c_st[0:B, :] = jnp.where(m_f, cf_new, c_prev_f)
        c_st[B:2 * B, :] = jnp.where(m_b, cb_new, c_prev_b)
        hf = jnp.where(m_f, h_new[0:B], h_st[0:B, 0:H])
        hb = jnp.where(m_b, h_new[B:2 * B], h_st[B:2 * B, H:2 * H])
        h_st[0:B, 0:H] = hf
        h_st[B:2 * B, H:2 * H] = hb

        # Layer output: zeros past length, + residual of this layer's input.
        o_f = jnp.where(m_f, h_new[0:B], 0.0) + res_scale * act_f[rs, :]
        o_b = jnp.where(m_b, h_new[B:2 * B], 0.0) + res_scale * act_b[rs, :]
        act_f[rs, :] = o_f
        act_b[rs, :] = o_b

        # Direct write in the consumer's (B, T, 2H) layout (flattened lanes):
        # fwd at true time t, bwd at true time T-1-t.
        out_ref[0, :, 2 * H * t:2 * H * t + H] = o_f
        tb = T - 1 - t
        out_ref[0, :, 2 * H * tb + H:2 * H * tb + 2 * H] = o_b


# ----------------------------------------------------------------------------
# Wrapper (layout plumbing + weight packing only).
# ----------------------------------------------------------------------------
def _pack_gate_cols(w, C, Cp):
    # (rows, 4*C) -> (rows, 4*Cp) with gate k at columns [k*Cp, k*Cp + C)
    rows = w.shape[0]
    out = jnp.zeros((rows, 4 * Cp), jnp.float32)
    for k in range(4):
        out = out.at[:, k * Cp:k * Cp + C].set(
            w[:, k * C:(k + 1) * C].astype(jnp.float32))
    return out


def _vmem_limit_bytes(T, Bp, H, Cp):
    f32, bf16 = 4, 2
    scratch = (2 * T * Bp * H * f32            # act_f, act_b
               + 2 * T * Bp * 4 * Cp * bf16    # gx_f, gx_b
               + 2 * Bp * 2 * H * f32          # h_state
               + 2 * Bp * Cp * f32             # c_state
               + 2 * Bp * 2 * Cp * f32)        # preproj
    resident = 2 * T * Bp * H * f32 + T * Bp * 2 * f32      # x_f, x_b, mask
    per_layer = (2 * H * 4 * Cp * bf16         # w_in_f + w_in_b
                 + 2 * H * 4 * Cp * bf16       # w_st (stacked)
                 + 2 * Cp * H * bf16           # w_proj (stacked)
                 + 2 * 4 * Cp * f32            # biases
                 + Bp * T * 2 * H * f32)       # out block
    est = scratch + 2 * resident + 2 * per_layer   # 2x for double-buffering
    return min(2 * est + (8 << 20), 48 << 20)


def elmo_bilm_forward(inputs, seq_len, params, *, cell_clip, proj_clip):
    """inputs: (B, T, D) f32, seq_len: (B,) int
    returns: (num_layers, B, T, 2 * hidden) f32"""
    B, T, D = inputs.shape
    L = len(params)
    C, H = params[0]["fwd"]["w_proj"].shape
    assert D == H, "ElmobiLm has input_size == hidden_size (projection_dim)"
    Cp = _round_up(C, 128)                 # lane-aligned gate width
    # Batch padded to a multiple of 16 so bf16 gx row-slices (offset t*B_pad)
    # stay aligned to packed (16, 128) bf16 sublane tiles.
    B_pad = max(16, _round_up(B, 16))

    # NOTE: max(seq_len) is assumed == T (pad_packed_sequence would otherwise
    # shrink the time axis).  # TODO(synk): trim T if max(seq_len) < T.
    x = jnp.zeros((B_pad, T, D), jnp.float32).at[:B].set(
        inputs.astype(jnp.float32))
    lens = jnp.zeros((B_pad,), jnp.int32).at[:B].set(seq_len.astype(jnp.int32))

    # Time-major rows (row = t*B_pad + b); the backward stream is stored in
    # REVERSED time order so both directions use identical row slices/step.
    x_f = jnp.transpose(x, (1, 0, 2)).reshape(T * B_pad, D)
    x_b = jnp.transpose(x[:, ::-1, :], (1, 0, 2)).reshape(T * B_pad, D)

    t_idx = jnp.arange(T, dtype=jnp.int32)[:, None]
    m_fwd = (t_idx < lens[None, :]).astype(jnp.float32)            # (T, B)
    m_bwd = ((T - 1 - t_idx) < lens[None, :]).astype(jnp.float32)  # reversed
    mask = jnp.stack([m_fwd.reshape(-1), m_bwd.reshape(-1)], axis=-1)

    # --- weight packing: lane-aligned gates, bf16, fwd/bwd stacked ----------
    def packed(l, d):
        p = params[l][d]
        return (_pack_gate_cols(p["w_in"], C, Cp),
                _pack_gate_cols(p["w_st"], C, Cp),
                _pack_gate_cols(p["b"], C, Cp),
                jnp.zeros((Cp, H), jnp.float32).at[:C, :].set(
                    p["w_proj"].astype(jnp.float32)))

    pk = [[packed(l, d) for d in ("fwd", "bwd")] for l in range(L)]
    bf16 = jnp.bfloat16
    w_in_f = jnp.stack([pk[l][0][0] for l in range(L)]).astype(bf16)
    w_in_b = jnp.stack([pk[l][1][0] for l in range(L)]).astype(bf16)
    w_st = jnp.stack([jnp.concatenate([pk[l][0][1], pk[l][1][1]], axis=0)
                      for l in range(L)]).astype(bf16)          # (L, 2H, 4Cp)
    b_f = jnp.stack([pk[l][0][2] for l in range(L)])            # (L, 1, 4Cp)
    b_b = jnp.stack([pk[l][1][2] for l in range(L)])
    w_proj = jnp.stack([jnp.concatenate([pk[l][0][3], pk[l][1][3]], axis=0)
                        for l in range(L)]).astype(bf16)        # (L, 2Cp, H)

    kernel = functools.partial(
        _elmo_layer_kernel, T=T, B=B_pad, H=H, Cp=Cp,
        cell_clip=None if cell_clip is None else float(cell_clip),
        proj_clip=None if proj_clip is None else float(proj_clip))

    grid_spec = pltpu.PrefetchScalarGridSpec(
        num_scalar_prefetch=0,
        grid=(L,),
        in_specs=[
            pl.BlockSpec((T * B_pad, H), lambda l: (0, 0)),        # x_f
            pl.BlockSpec((T * B_pad, H), lambda l: (0, 0)),        # x_b
            pl.BlockSpec((T * B_pad, 2), lambda l: (0, 0)),        # mask
            pl.BlockSpec((1, H, 4 * Cp), lambda l: (l, 0, 0)),     # w_in_f
            pl.BlockSpec((1, H, 4 * Cp), lambda l: (l, 0, 0)),     # w_in_b
            pl.BlockSpec((1, 2 * H, 4 * Cp), lambda l: (l, 0, 0)),  # w_st
            pl.BlockSpec((1, 1, 4 * Cp), lambda l: (l, 0, 0)),     # b_f
            pl.BlockSpec((1, 1, 4 * Cp), lambda l: (l, 0, 0)),     # b_b
            pl.BlockSpec((1, 2 * Cp, H), lambda l: (l, 0, 0)),     # w_proj
        ],
        out_specs=pl.BlockSpec((1, B_pad, T * 2 * H), lambda l: (l, 0, 0)),
        scratch_shapes=[
            pltpu.VMEM((T * B_pad, H), jnp.float32),        # fwd activations
            pltpu.VMEM((T * B_pad, H), jnp.float32),        # bwd activations
            pltpu.VMEM((T * B_pad, 4 * Cp), jnp.bfloat16),  # fwd x-proj gates
            pltpu.VMEM((T * B_pad, 4 * Cp), jnp.bfloat16),  # bwd x-proj gates
            pltpu.VMEM((2 * B_pad, 2 * H), jnp.float32),    # block-diag h
            pltpu.VMEM((2 * B_pad, Cp), jnp.float32),       # c (fwd;bwd)
            pltpu.VMEM((2 * B_pad, 2 * Cp), jnp.float32),   # block-diag pre
        ],
    )

    out = pl.pallas_call(
        kernel,
        out_shape=jax.ShapeDtypeStruct((L, B_pad, T * 2 * H), jnp.float32),
        grid_spec=grid_spec,
        compiler_params=pltpu.CompilerParams(
            dimension_semantics=("arbitrary",),          # layers carry state
            vmem_limit_bytes=_vmem_limit_bytes(T, B_pad, H, Cp)),
    )(x_f, x_b, mask, w_in_f, w_in_b, w_st, b_f, b_b, w_proj)

    # Free row-major reshape (no XLA transpose pass) + drop batch padding.
    out = out.reshape(L, B_pad, T, 2 * H)
    return out[:, :B]


# ----------------------------------------------------------------------------
# Pure-JAX reference (mirrors the PyTorch loop) for the correctness check.
# ----------------------------------------------------------------------------
def _ref_layer(x, lens, p, go_forward, cell_clip, proj_clip):
    B, T, _ = x.shape
    C, H = p["w_proj"].shape
    hi = lax.Precision.HIGHEST
    h = jnp.zeros((B, H), jnp.float32)
    c = jnp.zeros((B, C), jnp.float32)
    out = jnp.zeros((B, T, H), jnp.float32)
    steps = range(T) if go_forward else range(T - 1, -1, -1)
    for t in steps:
        gates = (jnp.dot(x[:, t], p["w_in"], precision=hi)
                 + jnp.dot(h, p["w_st"], precision=hi) + p["b"])
        ig = jax.nn.sigmoid(gates[:, :C])
        fg = jax.nn.sigmoid(gates[:, C:2 * C])
        gg = jnp.tanh(gates[:, 2 * C:3 * C])
        og = jax.nn.sigmoid(gates[:, 3 * C:])
        c_new = jnp.clip(ig * gg + fg * c, -cell_clip, cell_clip)
        h_new = jnp.clip(jnp.dot(og * jnp.tanh(c_new), p["w_proj"],
                                 precision=hi), -proj_clip, proj_clip)
        m = (t < lens)[:, None]
        c = jnp.where(m, c_new, c)
        h = jnp.where(m, h_new, h)
        out = out.at[:, t].set(jnp.where(m, h_new, 0.0))
    return out


def _ref_forward(inputs, seq_len, params, cell_clip, proj_clip):
    lens = seq_len.astype(jnp.int32)
    fwd_seq = bwd_seq = inputs
    outs = []
    for li, lp in enumerate(params):
        fc, bc = fwd_seq, bwd_seq
        fo = _ref_layer(fwd_seq, lens, lp["fwd"], True, cell_clip, proj_clip)
        bo = _ref_layer(bwd_seq, lens, lp["bwd"], False, cell_clip, proj_clip)
        if li != 0:
            fo, bo = fo + fc, bo + bc
        outs.append(jnp.concatenate([fo, bo], -1))
        fwd_seq, bwd_seq = fo, bo
    return jnp.stack(outs)


# ----------------------------------------------------------------------------
# Deterministic parameter construction (LstmCellWithProjection shapes).
# ----------------------------------------------------------------------------
def make_params(key, num_layers, input_size, hidden_size, cell_size):
    params = []
    lstm_input = input_size
    for _ in range(num_layers):
        layer = {}
        for name in ("fwd", "bwd"):
            key, k1, k2, k3 = jax.random.split(key, 4)
            w_in = 0.1 * jax.random.normal(k1, (lstm_input, 4 * cell_size),
                                           jnp.float32)
            w_st = 0.1 * jax.random.normal(k2, (hidden_size, 4 * cell_size),
                                           jnp.float32)
            w_proj = 0.1 * jax.random.normal(k3, (cell_size, hidden_size),
                                             jnp.float32)
            # bias: zeros, forget-gate slice = 1 (as in reset_parameters)
            bias = jnp.zeros((4 * cell_size,), jnp.float32)
            bias = bias.at[cell_size:2 * cell_size].set(1.0)
            layer[name] = {"w_in": w_in, "w_st": w_st,
                           "b": bias[None, :], "w_proj": w_proj}
        params.append(layer)
        lstm_input = hidden_size
    return params


if __name__ == "__main__":
    # config: projection_dim=32, dim (cell)=64, n_layers=2, clips=3.0, dropout=0
    INPUT = HIDDEN = 32
    CELL = 64
    N_LAYERS = 2
    CELL_CLIP = 3.0
    PROJ_CLIP = 3.0
    B, T = 2, 8

    key = jax.random.PRNGKey(0)
    key, kx = jax.random.split(key)
    inputs = jax.random.normal(kx, (B, T, INPUT), jnp.float32)
    seq_len = jnp.array([8, 5], jnp.int32)  # max(seq_len) == T

    params = make_params(key, N_LAYERS, INPUT, HIDDEN, CELL)

    out = elmo_bilm_forward(inputs, seq_len, params,
                            cell_clip=CELL_CLIP, proj_clip=PROJ_CLIP)
    out = jax.block_until_ready(out)
    assert out.shape == (N_LAYERS, B, T, 2 * HIDDEN), out.shape

    # reference takes b as (4C,) rows; runs in f32 HIGHEST precision
    ref_params = [{d: {"w_in": p[d]["w_in"], "w_st": p[d]["w_st"],
                       "b": p[d]["b"][0], "w_proj": p[d]["w_proj"]}
                   for d in ("fwd", "bwd")} for p in params]
    ref = _ref_forward(inputs, seq_len, ref_params, CELL_CLIP, PROJ_CLIP)
    max_err = float(jnp.max(jnp.abs(out - ref)))
    # bf16 weights / gate activations in the kernel vs fp32 reference.
    assert jnp.allclose(out, ref, atol=5e-2, rtol=5e-2), max_err
    print("KERNEL_OK")
</pallas_src>

<mosaic_0001>
module attributes {stable_mosaic.version = 11 : i64} {
  func.func @_elmo_layer_kernel(%arg0: i32, %arg1: memref<128x32xf32, #tpu.memory_space<vmem>>, %arg2: memref<128x32xf32, #tpu.memory_space<vmem>>, %arg3: memref<128x2xf32, #tpu.memory_space<vmem>>, %arg4: memref<1x32x512xbf16, #tpu.memory_space<vmem>>, %arg5: memref<1x32x512xbf16, #tpu.memory_space<vmem>>, %arg6: memref<1x64x512xbf16, #tpu.memory_space<vmem>>, %arg7: memref<1x1x512xf32, #tpu.memory_space<vmem>>, %arg8: memref<1x1x512xf32, #tpu.memory_space<vmem>>, %arg9: memref<1x256x32xbf16, #tpu.memory_space<vmem>>, %arg10: memref<1x16x512xf32, #tpu.memory_space<vmem>>, %arg11: memref<128x32xf32, #tpu.memory_space<vmem>>, %arg12: memref<128x32xf32, #tpu.memory_space<vmem>>, %arg13: memref<128x512xbf16, #tpu.memory_space<vmem>>, %arg14: memref<128x512xbf16, #tpu.memory_space<vmem>>, %arg15: memref<32x64xf32, #tpu.memory_space<vmem>>, %arg16: memref<32x128xf32, #tpu.memory_space<vmem>>, %arg17: memref<32x256xf32, #tpu.memory_space<vmem>>) attributes {dimension_semantics = [#tpu.dimension_semantics<arbitrary>], iteration_bounds = array<i64: 2>, scalar_prefetch = 0 : i64, scratch_operands = 7 : i64, tpu.core_type = #tpu.core_type<tc>, window_params = [{pipeline_mode = #tpu.pipeline_mode<synchronous>, transform_indices = @transform_0, window_bounds = array<i64: 128, 32>}, {pipeline_mode = #tpu.pipeline_mode<synchronous>, transform_indices = @transform_1, window_bounds = array<i64: 128, 32>}, {pipeline_mode = #tpu.pipeline_mode<synchronous>, transform_indices = @transform_2, window_bounds = array<i64: 128, 2>}, {transform_indices = @transform_3, window_bounds = array<i64: 1, 32, 512>}, {transform_indices = @transform_4, window_bounds = array<i64: 1, 32, 512>}, {transform_indices = @transform_5, window_bounds = array<i64: 1, 64, 512>}, {transform_indices = @transform_6, window_bounds = array<i64: 1, 1, 512>}, {transform_indices = @transform_7, window_bounds = array<i64: 1, 1, 512>}, {transform_indices = @transform_8, window_bounds = array<i64: 1, 256, 32>}, {transform_indices = @transform_9, window_bounds = array<i64: 1, 16, 512>}]} {
    %c0_i32 = arith.constant 0 : i32
    %0 = arith.cmpi eq, %arg0, %c0_i32 : i32
    %1 = arith.extui %0 : i1 to i32
    %c0_i32_0 = arith.constant 0 : i32
    %2 = arith.cmpi ne, %1, %c0_i32_0 : i32
    scf.if %2 {
      %c0_514 = arith.constant 0 : index
      %c0_515 = arith.constant 0 : index
      %1102 = vector.load %arg1[%c0_514, %c0_515] : memref<128x32xf32, #tpu.memory_space<vmem>>, vector<128x32xf32>
      %c0_516 = arith.constant 0 : index
      %c0_517 = arith.constant 0 : index
      %1103 = vector.load %arg11[%c0_516, %c0_517] : memref<128x32xf32, #tpu.memory_space<vmem>>, vector<128x32xf32>
      tpu.vector_store %arg11[%c0_516, %c0_517], %1102 {strides = array<i32>} : memref<128x32xf32, #tpu.memory_space<vmem>>, vector<128x32xf32>,
      %c0_518 = arith.constant 0 : index
      %c0_519 = arith.constant 0 : index
      %1104 = vector.load %arg2[%c0_518, %c0_519] : memref<128x32xf32, #tpu.memory_space<vmem>>, vector<128x32xf32>
      %c0_520 = arith.constant 0 : index
      %c0_521 = arith.constant 0 : index
      %1105 = vector.load %arg12[%c0_520, %c0_521] : memref<128x32xf32, #tpu.memory_space<vmem>>, vector<128x32xf32>
      tpu.vector_store %arg12[%c0_520, %c0_521], %1104 {strides = array<i32>} : memref<128x32xf32, #tpu.memory_space<vmem>>, vector<128x32xf32>,
    } else {
    }
    %c0 = arith.constant 0 : index
    %c0_1 = arith.constant 0 : index
    %3 = vector.load %arg11[%c0, %c0_1] : memref<128x32xf32, #tpu.memory_space<vmem>>, vector<128x32xf32>
    %4 = arith.truncf %3 : vector<128x32xf32> to vector<128x32xbf16>
    %c0_2 = arith.constant 0 : index
    %c0_3 = arith.constant 0 : index
    %c0_4 = arith.constant 0 : index
    %5 = vector.load %arg4[%c0_2, %c0_3, %c0_4] : memref<1x32x512xbf16, #tpu.memory_space<vmem>>, vector<1x32x512xbf16>
    %6 = vector.shape_cast %5 : vector<1x32x512xbf16> to vector<32x512xbf16>
    %cst = arith.constant dense<0.000000e+00> : vector<128x512xf32>
    %7 = tpu.matmul %4, %6, %cst {dimension_numbers = #tpu.dot_dimension_numbers<[1], [0], [0], [1], [0, 0, 1, 1], [], []>} : vector<128x32xbf16>, vector<32x512xbf16>, vector<128x512xf32> -> vector<128x512xf32>
    %c0_5 = arith.constant 0 : index
    %c0_6 = arith.constant 0 : index
    %c0_7 = arith.constant 0 : index
    %8 = vector.load %arg7[%c0_5, %c0_6, %c0_7] : memref<1x1x512xf32, #tpu.memory_space<vmem>>, vector<1x1x512xf32>
    %9 = vector.shape_cast %8 : vector<1x1x512xf32> to vector<1x512xf32>
    %10 = vector.broadcast %9 : vector<1x512xf32> to vector<128x512xf32>
    %11 = arith.addf %7, %10 : vector<128x512xf32>
    %12 = arith.truncf %11 : vector<128x512xf32> to vector<128x512xbf16>
    %c0_8 = arith.constant 0 : index
    %c0_9 = arith.constant 0 : index
    %13 = vector.load %arg13[%c0_8, %c0_9] : memref<128x512xbf16, #tpu.memory_space<vmem>>, vector<128x512xbf16>
    tpu.vector_store %arg13[%c0_8, %c0_9], %12 {strides = array<i32>} : memref<128x512xbf16, #tpu.memory_space<vmem>>, vector<128x512xbf16>,
    %c0_10 = arith.constant 0 : index
    %c0_11 = arith.constant 0 : index
    %14 = vector.load %arg12[%c0_10, %c0_11] : memref<128x32xf32, #tpu.memory_space<vmem>>, vector<128x32xf32>
    %15 = arith.truncf %14 : vector<128x32xf32> to vector<128x32xbf16>
    %c0_12 = arith.constant 0 : index
    %c0_13 = arith.constant 0 : index
    %c0_14 = arith.constant 0 : index
    %16 = vector.load %arg5[%c0_12, %c0_13, %c0_14] : memref<1x32x512xbf16, #tpu.memory_space<vmem>>, vector<1x32x512xbf16>
    %17 = vector.shape_cast %16 : vector<1x32x512xbf16> to vector<32x512xbf16>
    %cst_15 = arith.constant dense<0.000000e+00> : vector<128x512xf32>
    %18 = tpu.matmul %15, %17, %cst_15 {dimension_numbers = #tpu.dot_dimension_numbers<[1], [0], [0], [1], [0, 0, 1, 1], [], []>} : vector<128x32xbf16>, vector<32x512xbf16>, vector<128x512xf32> -> vector<128x512xf32>
    %c0_16 = arith.constant 0 : index
    %c0_17 = arith.constant 0 : index
    %c0_18 = arith.constant 0 : index
    %19 = vector.load %arg8[%c0_16, %c0_17, %c0_18] : memref<1x1x512xf32, #tpu.memory_space<vmem>>, vector<1x1x512xf32>
    %20 = vector.shape_cast %19 : vector<1x1x512xf32> to vector<1x512xf32>
    %21 = vector.broadcast %20 : vector<1x512xf32> to vector<128x512xf32>
    %22 = arith.addf %18, %21 : vector<128x512xf32>
    %23 = arith.truncf %22 : vector<128x512xf32> to vector<128x512xbf16>
    %c0_19 = arith.constant 0 : index
    %c0_20 = arith.constant 0 : index
    %24 = vector.load %arg14[%c0_19, %c0_20] : memref<128x512xbf16, #tpu.memory_space<vmem>>, vector<128x512xbf16>
    tpu.vector_store %arg14[%c0_19, %c0_20], %23 {strides = array<i32>} : memref<128x512xbf16, #tpu.memory_space<vmem>>, vector<128x512xbf16>,
    %cst_21 = arith.constant 0.000000e+00 : f32
    %25 = vector.broadcast %cst_21 : f32 to vector<32x64xf32>
    %c0_22 = arith.constant 0 : index
    %c0_23 = arith.constant 0 : index
    %26 = vector.load %arg15[%c0_22, %c0_23] : memref<32x64xf32, #tpu.memory_space<vmem>>, vector<32x64xf32>
    tpu.vector_store %arg15[%c0_22, %c0_23], %25 {strides = array<i32>} : memref<32x64xf32, #tpu.memory_space<vmem>>, vector<32x64xf32>,
    %cst_24 = arith.constant 0.000000e+00 : f32
    %27 = vector.broadcast %cst_24 : f32 to vector<32x128xf32>
    %c0_25 = arith.constant 0 : index
    %c0_26 = arith.constant 0 : index
    %28 = vector.load %arg16[%c0_25, %c0_26] : memref<32x128xf32, #tpu.memory_space<vmem>>, vector<32x128xf32>
    tpu.vector_store %arg16[%c0_25, %c0_26], %27 {strides = array<i32>} : memref<32x128xf32, #tpu.memory_space<vmem>>, vector<32x128xf32>,
    %cst_27 = arith.constant 0.000000e+00 : f32
    %29 = vector.broadcast %cst_27 : f32 to vector<32x256xf32>
    %c0_28 = arith.constant 0 : index
    %c0_29 = arith.constant 0 : index
    %30 = vector.load %arg17[%c0_28, %c0_29] : memref<32x256xf32, #tpu.memory_space<vmem>>, vector<32x256xf32>
    tpu.vector_store %arg17[%c0_28, %c0_29], %29 {strides = array<i32>} : memref<32x256xf32, #tpu.memory_space<vmem>>, vector<32x256xf32>,
    %c0_30 = arith.constant 0 : index
    %c0_31 = arith.constant 0 : index
    %c0_32 = arith.constant 0 : index
    %31 = vector.load %arg6[%c0_30, %c0_31, %c0_32] : memref<1x64x512xbf16, #tpu.memory_space<vmem>>, vector<1x64x512xbf16>
    %32 = vector.shape_cast %31 : vector<1x64x512xbf16> to vector<64x512xbf16>
    %c0_33 = arith.constant 0 : index
    %c0_34 = arith.constant 0 : index
    %c0_35 = arith.constant 0 : index
    %33 = vector.load %arg9[%c0_33, %c0_34, %c0_35] : memref<1x256x32xbf16, #tpu.memory_space<vmem>>, vector<1x256x32xbf16>
    %34 = vector.shape_cast %33 : vector<1x256x32xbf16> to vector<256x32xbf16>
    %c0_i32_36 = arith.constant 0 : i32
    %35 = arith.cmpi sgt, %arg0, %c0_i32_36 : i32
    %36 = arith.extui %35 : i1 to i32
    %37 = arith.sitofp %36 : i32 to f32
    %c0_37 = arith.constant 0 : index
    %c0_38 = arith.constant 0 : index
    %38 = vector.load %arg15[%c0_37, %c0_38] : memref<32x64xf32, #tpu.memory_space<vmem>>, vector<32x64xf32>
    %39 = arith.truncf %38 : vector<32x64xf32> to vector<32x64xbf16>
    %cst_39 = arith.constant dense<0.000000e+00> : vector<32x512xf32>
    %40 = tpu.matmul %39, %32, %cst_39 {dimension_numbers = #tpu.dot_dimension_numbers<[1], [0], [0], [1], [0, 0, 1, 1], [], []>} : vector<32x64xbf16>, vector<64x512xbf16>, vector<32x512xf32> -> vector<32x512xf32>
    %c0_40 = arith.constant 0 : index
    %c0_41 = arith.constant 0 : index
    %41 = vector.load %arg13[%c0_40, %c0_41] : memref<128x512xbf16, #tpu.memory_space<vmem>>, vector<16x512xbf16>
    %42 = arith.extf %41 : vector<16x512xbf16> to vector<16x512xf32>
    %43 = vector.extract_strided_slice %40 {offsets = [0, 0], sizes = [16, 512], strides = [1, 1]} : vector<32x512xf32> to vector<16x512xf32>
    %44 = arith.addf %42, %43 : vector<16x512xf32>
    %c0_42 = arith.constant 0 : index
    %c0_43 = arith.constant 0 : index
    %45 = vector.load %arg14[%c0_42, %c0_43] : memref<128x512xbf16, #tpu.memory_space<vmem>>, vector<16x512xbf16>
    %46 = arith.extf %45 : vector<16x512xbf16> to vector<16x512xf32>
    %47 = vector.extract_strided_slice %40 {offsets = [16, 0], sizes = [16, 512], strides = [1, 1]} : vector<32x512xf32> to vector<16x512xf32>
    %48 = arith.addf %46, %47 : vector<16x512xf32>
    %c0_44 = arith.constant 0 : index
    %c0_45 = arith.constant 0 : index
    %49 = vector.load %arg16[%c0_44, %c0_45] : memref<32x128xf32, #tpu.memory_space<vmem>>, vector<16x128xf32>
    %c16 = arith.constant 16 : index
    %c0_46 = arith.constant 0 : index
    %50 = vector.load %arg16[%c16, %c0_46] : memref<32x128xf32, #tpu.memory_space<vmem>>, vector<16x128xf32>
    %51 = vector.extract_strided_slice %44 {offsets = [0, 0], sizes = [16, 128], strides = [1, 1]} : vector<16x512xf32> to vector<16x128xf32>
    %52 = arith.negf %51 : vector<16x128xf32>
    %53 = math.exp %52 : vector<16x128xf32>
    %cst_47 = arith.constant 1.000000e+00 : f32
    %54 = vector.broadcast %cst_47 : f32 to vector<16x128xf32>
    %55 = arith.addf %54, %53 : vector<16x128xf32>
    %56 = arith.divf %54, %55 : vector<16x128xf32>
    %57 = vector.extract_strided_slice %44 {offsets = [0, 128], sizes = [16, 128], strides = [1, 1]} : vector<16x512xf32> to vector<16x128xf32>
    %58 = arith.negf %57 : vector<16x128xf32>
    %59 = math.exp %58 : vector<16x128xf32>
    %cst_48 = arith.constant 1.000000e+00 : f32
    %60 = vector.broadcast %cst_48 : f32 to vector<16x128xf32>
    %61 = arith.addf %60, %59 : vector<16x128xf32>
    %62 = arith.divf %60, %61 : vector<16x128xf32>
    %63 = vector.extract_strided_slice %44 {offsets = [0, 256], sizes = [16, 128], strides = [1, 1]} : vector<16x512xf32> to vector<16x128xf32>
    %64 = math.tanh %63 : vector<16x128xf32>
    %65 = vector.extract_strided_slice %44 {offsets = [0, 384], sizes = [16, 128], strides = [1, 1]} : vector<16x512xf32> to vector<16x128xf32>
    %66 = arith.negf %65 : vector<16x128xf32>
    %67 = math.exp %66 : vector<16x128xf32>
    %cst_49 = arith.constant 1.000000e+00 : f32
    %68 = vector.broadcast %cst_49 : f32 to vector<16x128xf32>
    %69 = arith.addf %68, %67 : vector<16x128xf32>
    %70 = arith.divf %68, %69 : vector<16x128xf32>
    %71 = arith.mulf %56, %64 : vector<16x128xf32>
    %72 = arith.mulf %62, %49 : vector<16x128xf32>
    %73 = arith.addf %71, %72 : vector<16x128xf32>
    %cst_50 = arith.constant -3.000000e+00 : f32
    %cst_51 = arith.constant 3.000000e+00 : f32
    %74 = vector.broadcast %cst_50 : f32 to vector<16x128xf32>
    %75 = arith.maximumf %74, %73 : vector<16x128xf32>
    %76 = vector.broadcast %cst_51 : f32 to vector<16x128xf32>
    %77 = arith.minimumf %76, %75 : vector<16x128xf32>
    %78 = math.tanh %77 : vector<16x128xf32>
    %79 = arith.mulf %70, %78 : vector<16x128xf32>
    %80 = vector.extract_strided_slice %48 {offsets = [0, 0], sizes = [16, 128], strides = [1, 1]} : vector<16x512xf32> to vector<16x128xf32>
    %81 = arith.negf %80 : vector<16x128xf32>
    %82 = math.exp %81 : vector<16x128xf32>
    %cst_52 = arith.constant 1.000000e+00 : f32
    %83 = vector.broadcast %cst_52 : f32 to vector<16x128xf32>
    %84 = arith.addf %83, %82 : vector<16x128xf32>
    %85 = arith.divf %83, %84 : vector<16x128xf32>
    %86 = vector.extract_strided_slice %48 {offsets = [0, 128], sizes = [16, 128], strides = [1, 1]} : vector<16x512xf32> to vector<16x128xf32>
    %87 = arith.negf %86 : vector<16x128xf32>
    %88 = math.exp %87 : vector<16x128xf32>
    %cst_53 = arith.constant 1.000000e+00 : f32
    %89 = vector.broadcast %cst_53 : f32 to vector<16x128xf32>
    %90 = arith.addf %89, %88 : vector<16x128xf32>
    %91 = arith.divf %89, %90 : vector<16x128xf32>
    %92 = vector.extract_strided_slice %48 {offsets = [0, 256], sizes = [16, 128], strides = [1, 1]} : vector<16x512xf32> to vector<16x128xf32>
    %93 = math.tanh %92 : vector<16x128xf32>
    %94 = vector.extract_strided_slice %48 {offsets = [0, 384], sizes = [16, 128], strides = [1, 1]} : vector<16x512xf32> to vector<16x128xf32>
    %95 = arith.negf %94 : vector<16x128xf32>
    %96 = math.exp %95 : vector<16x128xf32>
    %cst_54 = arith.constant 1.000000e+00 : f32
    %97 = vector.broadcast %cst_54 : f32 to vector<16x128xf32>
    %98 = arith.addf %97, %96 : vector<16x128xf32>
    %99 = arith.divf %97, %98 : vector<16x128xf32>
    %100 = arith.mulf %85, %93 : vector<16x128xf32>
    %101 = arith.mulf %91, %50 : vector<16x128xf32>
    %102 = arith.addf %100, %101 : vector<16x128xf32>
    %cst_55 = arith.constant -3.000000e+00 : f32
    %cst_56 = arith.constant 3.000000e+00 : f32
    %103 = vector.broadcast %cst_55 : f32 to vector<16x128xf32>
    %104 = arith.maximumf %103, %102 : vector<16x128xf32>
    %105 = vector.broadcast %cst_56 : f32 to vector<16x128xf32>
    %106 = arith.minimumf %105, %104 : vector<16x128xf32>
    %107 = math.tanh %106 : vector<16x128xf32>
    %108 = arith.mulf %99, %107 : vector<16x128xf32>
    %c0_57 = arith.constant 0 : index
    %c0_58 = arith.constant 0 : index
    %109 = vector.load %arg17[%c0_57, %c0_58] : memref<32x256xf32, #tpu.memory_space<vmem>>, vector<16x128xf32>
    tpu.vector_store %arg17[%c0_57, %c0_58], %79 {strides = array<i32>} : memref<32x256xf32, #tpu.memory_space<vmem>>, vector<16x128xf32>,
    %c16_59 = arith.constant 16 : index
    %c128 = arith.constant 128 : index
    %110 = vector.load %arg17[%c16_59, %c128] : memref<32x256xf32, #tpu.memory_space<vmem>>, vector<16x128xf32>
    tpu.vector_store %arg17[%c16_59, %c128], %108 {strides = array<i32>} : memref<32x256xf32, #tpu.memory_space<vmem>>, vector<16x128xf32>,
    %c0_60 = arith.constant 0 : index
    %c0_61 = arith.constant 0 : index
    %111 = vector.load %arg17[%c0_60, %c0_61] : memref<32x256xf32, #tpu.memory_space<vmem>>, vector<32x256xf32>
    %112 = arith.truncf %111 : vector<32x256xf32> to vector<32x256xbf16>
    %cst_62 = arith.constant dense<0.000000e+00> : vector<32x32xf32>
    %113 = tpu.matmul %112, %34, %cst_62 {dimension_numbers = #tpu.dot_dimension_numbers<[1], [0], [0], [1], [0, 0, 1, 1], [], []>} : vector<32x256xbf16>, vector<256x32xbf16>, vector<32x32xf32> -> vector<32x32xf32>
    %cst_63 = arith.constant -3.000000e+00 : f32
    %cst_64 = arith.constant 3.000000e+00 : f32
    %114 = vector.broadcast %cst_63 : f32 to vector<32x32xf32>
    %115 = arith.maximumf %114, %113 : vector<32x32xf32>
    %116 = vector.broadcast %cst_64 : f32 to vector<32x32xf32>
    %117 = arith.minimumf %116, %115 : vector<32x32xf32>
    %c0_65 = arith.constant 0 : index
    %c0_66 = arith.constant 0 : index
    %118 = vector.load %arg3[%c0_65, %c0_66] : memref<128x2xf32, #tpu.memory_space<vmem>>, vector<16x2xf32>
    %119 = vector.extract_strided_slice %118 {offsets = [0, 0], sizes = [16, 1], strides = [1, 1]} : vector<16x2xf32> to vector<16x1xf32>
    %cst_67 = arith.constant 5.000000e-01 : f32
    %120 = vector.broadcast %cst_67 : f32 to vector<16x1xf32>
    %121 = arith.cmpf ogt, %119, %120 : vector<16x1xf32>
    %122 = vector.extract_strided_slice %118 {offsets = [0, 1], sizes = [16, 1], strides = [1, 1]} : vector<16x2xf32> to vector<16x1xf32>
    %cst_68 = arith.constant 5.000000e-01 : f32
    %123 = vector.broadcast %cst_68 : f32 to vector<16x1xf32>
    %124 = arith.cmpf ogt, %122, %123 : vector<16x1xf32>
    %125 = vector.shape_cast %121 : vector<16x1xi1> to vector<16x1xi1>
    %126 = vector.broadcast %125 : vector<16x1xi1> to vector<16x128xi1>
    %127 = arith.select %126, %77, %49 : vector<16x128xi1>, vector<16x128xf32>
    %c0_69 = arith.constant 0 : index
    %c0_70 = arith.constant 0 : index
    %128 = vector.load %arg16[%c0_69, %c0_70] : memref<32x128xf32, #tpu.memory_space<vmem>>, vector<16x128xf32>
    tpu.vector_store %arg16[%c0_69, %c0_70], %127 {strides = array<i32>} : memref<32x128xf32, #tpu.memory_space<vmem>>, vector<16x128xf32>,
    %129 = vector.shape_cast %124 : vector<16x1xi1> to vector<16x1xi1>
    %130 = vector.broadcast %129 : vector<16x1xi1> to vector<16x128xi1>
    %131 = arith.select %130, %106, %50 : vector<16x128xi1>, vector<16x128xf32>
    %c16_71 = arith.constant 16 : index
    %c0_72 = arith.constant 0 : index
    %132 = vector.load %arg16[%c16_71, %c0_72] : memref<32x128xf32, #tpu.memory_space<vmem>>, vector<16x128xf32>
    tpu.vector_store %arg16[%c16_71, %c0_72], %131 {strides = array<i32>} : memref<32x128xf32, #tpu.memory_space<vmem>>, vector<16x128xf32>,
    %133 = vector.extract_strided_slice %117 {offsets = [0, 0], sizes = [16, 32], strides = [1, 1]} : vector<32x32xf32> to vector<16x32xf32>
    %c0_73 = arith.constant 0 : index
    %c0_74 = arith.constant 0 : index
    %134 = vector.load %arg15[%c0_73, %c0_74] : memref<32x64xf32, #tpu.memory_space<vmem>>, vector<16x32xf32>
    %135 = vector.shape_cast %121 : vector<16x1xi1> to vector<16x1xi1>
    %136 = vector.broadcast %135 : vector<16x1xi1> to vector<16x32xi1>
    %137 = arith.select %136, %133, %134 : vector<16x32xi1>, vector<16x32xf32>
    %138 = vector.extract_strided_slice %117 {offsets = [16, 0], sizes = [16, 32], strides = [1, 1]} : vector<32x32xf32> to vector<16x32xf32>
    %c16_75 = arith.constant 16 : index
    %c32 = arith.constant 32 : index
    %139 = vector.load %arg15[%c16_75, %c32] : memref<32x64xf32, #tpu.memory_space<vmem>>, vector<16x32xf32>
    %140 = vector.shape_cast %124 : vector<16x1xi1> to vector<16x1xi1>
    %141 = vector.broadcast %140 : vector<16x1xi1> to vector<16x32xi1>
    %142 = arith.select %141, %138, %139 : vector<16x32xi1>, vector<16x32xf32>
    %c0_76 = arith.constant 0 : index
    %c0_77 = arith.constant 0 : index
    %143 = vector.load %arg15[%c0_76, %c0_77] : memref<32x64xf32, #tpu.memory_space<vmem>>, vector<16x32xf32>
    tpu.vector_store %arg15[%c0_76, %c0_77], %137 {strides = array<i32>} : memref<32x64xf32, #tpu.memory_space<vmem>>, vector<16x32xf32>,
    %c16_78 = arith.constant 16 : index
    %c32_79 = arith.constant 32 : index
    %144 = vector.load %arg15[%c16_78, %c32_79] : memref<32x64xf32, #tpu.memory_space<vmem>>, vector<16x32xf32>
    tpu.vector_store %arg15[%c16_78, %c32_79], %142 {strides = array<i32>} : memref<32x64xf32, #tpu.memory_space<vmem>>, vector<16x32xf32>,
    %145 = vector.extract_strided_slice %117 {offsets = [0, 0], sizes = [16, 32], strides = [1, 1]} : vector<32x32xf32> to vector<16x32xf32>
    %cst_80 = arith.constant 0.000000e+00 : f32
    %146 = vector.shape_cast %121 : vector<16x1xi1> to vector<16x1xi1>
    %147 = vector.broadcast %146 : vector<16x1xi1> to vector<16x32xi1>
    %148 = vector.broadcast %cst_80 : f32 to vector<16x32xf32>
    %149 = arith.select %147, %145, %148 : vector<16x32xi1>, vector<16x32xf32>
    %c0_81 = arith.constant 0 : index
    %c0_82 = arith.constant 0 : index
    %150 = vector.load %arg11[%c0_81, %c0_82] : memref<128x32xf32, #tpu.memory_space<vmem>>, vector<16x32xf32>
    %151 = vector.broadcast %37 : f32 to vector<16x32xf32>
    %152 = arith.mulf %151, %150 : vector<16x32xf32>
    %153 = arith.addf %149, %152 : vector<16x32xf32>
    %154 = vector.extract_strided_slice %117 {offsets = [16, 0], sizes = [16, 32], strides = [1, 1]} : vector<32x32xf32> to vector<16x32xf32>
    %cst_83 = arith.constant 0.000000e+00 : f32
    %155 = vector.shape_cast %124 : vector<16x1xi1> to vector<16x1xi1>
    %156 = vector.broadcast %155 : vector<16x1xi1> to vector<16x32xi1>
    %157 = vector.broadcast %cst_83 : f32 to vector<16x32xf32>
    %158 = arith.select %156, %154, %157 : vector<16x32xi1>, vector<16x32xf32>
    %c0_84 = arith.constant 0 : index
    %c0_85 = arith.constant 0 : index
    %159 = vector.load %arg12[%c0_84, %c0_85] : memref<128x32xf32, #tpu.memory_space<vmem>>, vector<16x32xf32>
    %160 = vector.broadcast %37 : f32 to vector<16x32xf32>
    %161 = arith.mulf %160, %159 : vector<16x32xf32>
    %162 = arith.addf %158, %161 : vector<16x32xf32>
    %c0_86 = arith.constant 0 : index
    %c0_87 = arith.constant 0 : index
    %163 = vector.load %arg11[%c0_86, %c0_87] : memref<128x32xf32, #tpu.memory_space<vmem>>, vector<16x32xf32>
    tpu.vector_store %arg11[%c0_86, %c0_87], %153 {strides = array<i32>} : memref<128x32xf32, #tpu.memory_space<vmem>>, vector<16x32xf32>,
    %c0_88 = arith.constant 0 : index
    %c0_89 = arith.constant 0 : index
    %164 = vector.load %arg12[%c0_88, %c0_89] : memref<128x32xf32, #tpu.memory_space<vmem>>, vector<16x32xf32>
    tpu.vector_store %arg12[%c0_88, %c0_89], %162 {strides = array<i32>} : memref<128x32xf32, #tpu.memory_space<vmem>>, vector<16x32xf32>,
    %c0_90 = arith.constant 0 : index
    %c0_91 = arith.constant 0 : index
    %c0_92 = arith.constant 0 : index
    %165 = vector.load %arg10[%c0_90, %c0_91, %c0_92] : memref<1x16x512xf32, #tpu.memory_space<vmem>>, vector<1x16x32xf32>
    %166 = vector.shape_cast %165 : vector<1x16x32xf32> to vector<16x32xf32>
    %167 = vector.shape_cast %153 : vector<16x32xf32> to vector<1x16x32xf32>
    tpu.vector_store %arg10[%c0_90, %c0_91, %c0_92], %167 {strides = array<i32>} : memref<1x16x512xf32, #tpu.memory_space<vmem>>, vector<1x16x32xf32>,
    %c0_93 = arith.constant 0 : index
    %c0_94 = arith.constant 0 : index
    %c480 = arith.constant 480 : index
    %168 = vector.load %arg10[%c0_93, %c0_94, %c480] : memref<1x16x512xf32, #tpu.memory_space<vmem>>, vector<1x16x32xf32>
    %169 = vector.shape_cast %168 : vector<1x16x32xf32> to vector<16x32xf32>
    %170 = vector.shape_cast %162 : vector<16x32xf32> to vector<1x16x32xf32>
    tpu.vector_store %arg10[%c0_93, %c0_94, %c480], %170 {strides = array<i32>} : memref<1x16x512xf32, #tpu.memory_space<vmem>>, vector<1x16x32xf32>,
    %c0_95 = arith.constant 0 : index
    %c0_96 = arith.constant 0 : index
    %171 = vector.load %arg15[%c0_95, %c0_96] : memref<32x64xf32, #tpu.memory_space<vmem>>, vector<32x64xf32>
    %172 = arith.truncf %171 : vector<32x64xf32> to vector<32x64xbf16>
    %cst_97 = arith.constant dense<0.000000e+00> : vector<32x512xf32>
    %173 = tpu.matmul %172, %32, %cst_97 {dimension_numbers = #tpu.dot_dimension_numbers<[1], [0], [0], [1], [0, 0, 1, 1], [], []>} : vector<32x64xbf16>, vector<64x512xbf16>, vector<32x512xf32> -> vector<32x512xf32>
    %c16_98 = arith.constant 16 : index
    %c0_99 = arith.constant 0 : index
    %174 = vector.load %arg13[%c16_98, %c0_99] : memref<128x512xbf16, #tpu.memory_space<vmem>>, vector<16x512xbf16>
    %175 = arith.extf %174 : vector<16x512xbf16> to vector<16x512xf32>
    %176 = vector.extract_strided_slice %173 {offsets = [0, 0], sizes = [16, 512], strides = [1, 1]} : vector<32x512xf32> to vector<16x512xf32>
    %177 = arith.addf %175, %176 : vector<16x512xf32>
    %c16_100 = arith.constant 16 : index
    %c0_101 = arith.constant 0 : index
    %178 = vector.load %arg14[%c16_100, %c0_101] : memref<128x512xbf16, #tpu.memory_space<vmem>>, vector<16x512xbf16>
    %179 = arith.extf %178 : vector<16x512xbf16> to vector<16x512xf32>
    %180 = vector.extract_strided_slice %173 {offsets = [16, 0], sizes = [16, 512], strides = [1, 1]} : vector<32x512xf32> to vector<16x512xf32>
    %181 = arith.addf %179, %180 : vector<16x512xf32>
    %c0_102 = arith.constant 0 : index
    %c0_103 = arith.constant 0 : index
    %182 = vector.load %arg16[%c0_102, %c0_103] : memref<32x128xf32, #tpu.memory_space<vmem>>, vector<16x128xf32>
    %c16_104 = arith.constant 16 : index
    %c0_105 = arith.constant 0 : index
    %183 = vector.load %arg16[%c16_104, %c0_105] : memref<32x128xf32, #tpu.memory_space<vmem>>, vector<16x128xf32>
    %184 = vector.extract_strided_slice %177 {offsets = [0, 0], sizes = [16, 128], strides = [1, 1]} : vector<16x512xf32> to vector<16x128xf32>
    %185 = arith.negf %184 : vector<16x128xf32>
    %186 = math.exp %185 : vector<16x128xf32>
    %cst_106 = arith.constant 1.000000e+00 : f32
    %187 = vector.broadcast %cst_106 : f32 to vector<16x128xf32>
    %188 = arith.addf %187, %186 : vector<16x128xf32>
    %189 = arith.divf %187, %188 : vector<16x128xf32>
    %190 = vector.extract_strided_slice %177 {offsets = [0, 128], sizes = [16, 128], strides = [1, 1]} : vector<16x512xf32> to vector<16x128xf32>
    %191 = arith.negf %190 : vector<16x128xf32>
    %192 = math.exp %191 : vector<16x128xf32>
    %cst_107 = arith.constant 1.000000e+00 : f32
    %193 = vector.broadcast %cst_107 : f32 to vector<16x128xf32>
    %194 = arith.addf %193, %192 : vector<16x128xf32>
    %195 = arith.divf %193, %194 : vector<16x128xf32>
    %196 = vector.extract_strided_slice %177 {offsets = [0, 256], sizes = [16, 128], strides = [1, 1]} : vector<16x512xf32> to vector<16x128xf32>
    %197 = math.tanh %196 : vector<16x128xf32>
    %198 = vector.extract_strided_slice %177 {offsets = [0, 384], sizes = [16, 128], strides = [1, 1]} : vector<16x512xf32> to vector<16x128xf32>
    %199 = arith.negf %198 : vector<16x128xf32>
    %200 = math.exp %199 : vector<16x128xf32>
    %cst_108 = arith.constant 1.000000e+00 : f32
    %201 = vector.broadcast %cst_108 : f32 to vector<16x128xf32>
    %202 = arith.addf %201, %200 : vector<16x128xf32>
    %203 = arith.divf %201, %202 : vector<16x128xf32>
    %204 = arith.mulf %189, %197 : vector<16x128xf32>
    %205 = arith.mulf %195, %182 : vector<16x128xf32>
    %206 = arith.addf %204, %205 : vector<16x128xf32>
    %cst_109 = arith.constant -3.000000e+00 : f32
    %cst_110 = arith.constant 3.000000e+00 : f32
    %207 = vector.broadcast %cst_109 : f32 to vector<16x128xf32>
    %208 = arith.maximumf %207, %206 : vector<16x128xf32>
    %209 = vector.broadcast %cst_110 : f32 to vector<16x128xf32>
    %210 = arith.minimumf %209, %208 : vector<16x128xf32>
    %211 = math.tanh %210 : vector<16x128xf32>
    %212 = arith.mulf %203, %211 : vector<16x128xf32>
    %213 = vector.extract_strided_slice %181 {offsets = [0, 0], sizes = [16, 128], strides = [1, 1]} : vector<16x512xf32> to vector<16x128xf32>
    %214 = arith.negf %213 : vector<16x128xf32>
    %215 = math.exp %214 : vector<16x128xf32>
    %cst_111 = arith.constant 1.000000e+00 : f32
    %216 = vector.broadcast %cst_111 : f32 to vector<16x128xf32>
    %217 = arith.addf %216, %215 : vector<16x128xf32>
    %218 = arith.divf %216, %217 : vector<16x128xf32>
    %219 = vector.extract_strided_slice %181 {offsets = [0, 128], sizes = [16, 128], strides = [1, 1]} : vector<16x512xf32> to vector<16x128xf32>
    %220 = arith.negf %219 : vector<16x128xf32>
    %221 = math.exp %220 : vector<16x128xf32>
    %cst_112 = arith.constant 1.000000e+00 : f32
    %222 = vector.broadcast %cst_112 : f32 to vector<16x128xf32>
    %223 = arith.addf %222, %221 : vector<16x128xf32>
    %224 = arith.divf %222, %223 : vector<16x128xf32>
    %225 = vector.extract_strided_slice %181 {offsets = [0, 256], sizes = [16, 128], strides = [1, 1]} : vector<16x512xf32> to vector<16x128xf32>
    %226 = math.tanh %225 : vector<16x128xf32>
    %227 = vector.extract_strided_slice %181 {offsets = [0, 384], sizes = [16, 128], strides = [1, 1]} : vector<16x512xf32> to vector<16x128xf32>
    %228 = arith.negf %227 : vector<16x128xf32>
    %229 = math.exp %228 : vector<16x128xf32>
    %cst_113 = arith.constant 1.000000e+00 : f32
    %230 = vector.broadcast %cst_113 : f32 to vector<16x128xf32>
    %231 = arith.addf %230, %229 : vector<16x128xf32>
    %232 = arith.divf %230, %231 : vector<16x128xf32>
    %233 = arith.mulf %218, %226 : vector<16x128xf32>
    %234 = arith.mulf %224, %183 : vector<16x128xf32>
    %235 = arith.addf %233, %234 : vector<16x128xf32>
    %cst_114 = arith.constant -3.000000e+00 : f32
    %cst_115 = arith.constant 3.000000e+00 : f32
    %236 = vector.broadcast %cst_114 : f32 to vector<16x128xf32>
    %237 = arith.maximumf %236, %235 : vector<16x128xf32>
    %238 = vector.broadcast %cst_115 : f32 to vector<16x128xf32>
    %239 = arith.minimumf %238, %237 : vector<16x128xf32>
    %240 = math.tanh %239 : vector<16x128xf32>
    %241 = arith.mulf %232, %240 : vector<16x128xf32>
    %c0_116 = arith.constant 0 : index
    %c0_117 = arith.constant 0 : index
    %242 = vector.load %arg17[%c0_116, %c0_117] : memref<32x256xf32, #tpu.memory_space<vmem>>, vector<16x128xf32>
    tpu.vector_store %arg17[%c0_116, %c0_117], %212 {strides = array<i32>} : memref<32x256xf32, #tpu.memory_space<vmem>>, vector<16x128xf32>,
    %c16_118 = arith.constant 16 : index
    %c128_119 = arith.constant 128 : index
    %243 = vector.load %arg17[%c16_118, %c128_119] : memref<32x256xf32, #tpu.memory_space<vmem>>, vector<16x128xf32>
    tpu.vector_store %arg17[%c16_118, %c128_119], %241 {strides = array<i32>} : memref<32x256xf32, #tpu.memory_space<vmem>>, vector<16x128xf32>,
    %c0_120 = arith.constant 0 : index
    %c0_121 = arith.constant 0 : index
    %244 = vector.load %arg17[%c0_120, %c0_121] : memref<32x256xf32, #tpu.memory_space<vmem>>, vector<32x256xf32>
    %245 = arith.truncf %244 : vector<32x256xf32> to vector<32x256xbf16>
    %cst_122 = arith.constant dense<0.000000e+00> : vector<32x32xf32>
    %246 = tpu.matmul %245, %34, %cst_122 {dimension_numbers = #tpu.dot_dimension_numbers<[1], [0], [0], [1], [0, 0, 1, 1], [], []>} : vector<32x256xbf16>, vector<256x32xbf16>, vector<32x32xf32> -> vector<32x32xf32>
    %cst_123 = arith.constant -3.000000e+00 : f32
    %cst_124 = arith.constant 3.000000e+00 : f32
    %247 = vector.broadcast %cst_123 : f32 to vector<32x32xf32>
    %248 = arith.maximumf %247, %246 : vector<32x32xf32>
    %249 = vector.broadcast %cst_124 : f32 to vector<32x32xf32>
    %250 = arith.minimumf %249, %248 : vector<32x32xf32>
    %c16_125 = arith.constant 16 : index
    %c0_126 = arith.constant 0 : index
    %251 = vector.load %arg3[%c16_125, %c0_126] : memref<128x2xf32, #tpu.memory_space<vmem>>, vector<16x2xf32>
    %252 = vector.extract_strided_slice %251 {offsets = [0, 0], sizes = [16, 1], strides = [1, 1]} : vector<16x2xf32> to vector<16x1xf32>
    %cst_127 = arith.constant 5.000000e-01 : f32
    %253 = vector.broadcast %cst_127 : f32 to vector<16x1xf32>
    %254 = arith.cmpf ogt, %252, %253 : vector<16x1xf32>
    %255 = vector.extract_strided_slice %251 {offsets = [0, 1], sizes = [16, 1], strides = [1, 1]} : vector<16x2xf32> to vector<16x1xf32>
    %cst_128 = arith.constant 5.000000e-01 : f32
    %256 = vector.broadcast %cst_128 : f32 to vector<16x1xf32>
    %257 = arith.cmpf ogt, %255, %256 : vector<16x1xf32>
    %258 = vector.shape_cast %254 : vector<16x1xi1> to vector<16x1xi1>
    %259 = vector.broadcast %258 : vector<16x1xi1> to vector<16x128xi1>
    %260 = arith.select %259, %210, %182 : vector<16x128xi1>, vector<16x128xf32>
    %c0_129 = arith.constant 0 : index
    %c0_130 = arith.constant 0 : index
    %261 = vector.load %arg16[%c0_129, %c0_130] : memref<32x128xf32, #tpu.memory_space<vmem>>, vector<16x128xf32>
    tpu.vector_store %arg16[%c0_129, %c0_130], %260 {strides = array<i32>} : memref<32x128xf32, #tpu.memory_space<vmem>>, vector<16x128xf32>,
    %262 = vector.shape_cast %257 : vector<16x1xi1> to vector<16x1xi1>
    %263 = vector.broadcast %262 : vector<16x1xi1> to vector<16x128xi1>
    %264 = arith.select %263, %239, %183 : vector<16x128xi1>, vector<16x128xf32>
    %c16_131 = arith.constant 16 : index
    %c0_132 = arith.constant 0 : index
    %265 = vector.load %arg16[%c16_131, %c0_132] : memref<32x128xf32, #tpu.memory_space<vmem>>, vector<16x128xf32>
    tpu.vector_store %arg16[%c16_131, %c0_132], %264 {strides = array<i32>} : memref<32x128xf32, #tpu.memory_space<vmem>>, vector<16x128xf32>,
    %266 = vector.extract_strided_slice %250 {offsets = [0, 0], sizes = [16, 32], strides = [1, 1]} : vector<32x32xf32> to vector<16x32xf32>
    %c0_133 = arith.constant 0 : index
    %c0_134 = arith.constant 0 : index
    %267 = vector.load %arg15[%c0_133, %c0_134] : memref<32x64xf32, #tpu.memory_space<vmem>>, vector<16x32xf32>
    %268 = vector.shape_cast %254 : vector<16x1xi1> to vector<16x1xi1>
    %269 = vector.broadcast %268 : vector<16x1xi1> to vector<16x32xi1>
    %270 = arith.select %269, %266, %267 : vector<16x32xi1>, vector<16x32xf32>
    %271 = vector.extract_strided_slice %250 {offsets = [16, 0], sizes = [16, 32], strides = [1, 1]} : vector<32x32xf32> to vector<16x32xf32>
    %c16_135 = arith.constant 16 : index
    %c32_136 = arith.constant 32 : index
    %272 = vector.load %arg15[%c16_135, %c32_136] : memref<32x64xf32, #tpu.memory_space<vmem>>, vector<16x32xf32>
    %273 = vector.shape_cast %257 : vector<16x1xi1> to vector<16x1xi1>
    %274 = vector.broadcast %273 : vector<16x1xi1> to vector<16x32xi1>
    %275 = arith.select %274, %271, %272 : vector<16x32xi1>, vector<16x32xf32>
    %c0_137 = arith.constant 0 : index
    %c0_138 = arith.constant 0 : index
    %276 = vector.load %arg15[%c0_137, %c0_138] : memref<32x64xf32, #tpu.memory_space<vmem>>, vector<16x32xf32>
    tpu.vector_store %arg15[%c0_137, %c0_138], %270 {strides = array<i32>} : memref<32x64xf32, #tpu.memory_space<vmem>>, vector<16x32xf32>,
    %c16_139 = arith.constant 16 : index
    %c32_140 = arith.constant 32 : index
    %277 = vector.load %arg15[%c16_139, %c32_140] : memref<32x64xf32, #tpu.memory_space<vmem>>, vector<16x32xf32>
    tpu.vector_store %arg15[%c16_139, %c32_140], %275 {strides = array<i32>} : memref<32x64xf32, #tpu.memory_space<vmem>>, vector<16x32xf32>,
    %278 = vector.extract_strided_slice %250 {offsets = [0, 0], sizes = [16, 32], strides = [1, 1]} : vector<32x32xf32> to vector<16x32xf32>
    %cst_141 = arith.constant 0.000000e+00 : f32
    %279 = vector.shape_cast %254 : vector<16x1xi1> to vector<16x1xi1>
    %280 = vector.broadcast %279 : vector<16x1xi1> to vector<16x32xi1>
    %281 = vector.broadcast %cst_141 : f32 to vector<16x32xf32>
    %282 = arith.select %280, %278, %281 : vector<16x32xi1>, vector<16x32xf32>
    %c16_142 = arith.constant 16 : index
    %c0_143 = arith.constant 0 : index
    %283 = vector.load %arg11[%c16_142, %c0_143] : memref<128x32xf32, #tpu.memory_space<vmem>>, vector<16x32xf32>
    %284 = vector.broadcast %37 : f32 to vector<16x32xf32>
    %285 = arith.mulf %284, %283 : vector<16x32xf32>
    %286 = arith.addf %282, %285 : vector<16x32xf32>
    %287 = vector.extract_strided_slice %250 {offsets = [16, 0], sizes = [16, 32], strides = [1, 1]} : vector<32x32xf32> to vector<16x32xf32>
    %cst_144 = arith.constant 0.000000e+00 : f32
    %288 = vector.shape_cast %257 : vector<16x1xi1> to vector<16x1xi1>
    %289 = vector.broadcast %288 : vector<16x1xi1> to vector<16x32xi1>
    %290 = vector.broadcast %cst_144 : f32 to vector<16x32xf32>
    %291 = arith.select %289, %287, %290 : vector<16x32xi1>, vector<16x32xf32>
    %c16_145 = arith.constant 16 : index
    %c0_146 = arith.constant 0 : index
    %292 = vector.load %arg12[%c16_145, %c0_146] : memref<128x32xf32, #tpu.memory_space<vmem>>, vector<16x32xf32>
    %293 = vector.broadcast %37 : f32 to vector<16x32xf32>
    %294 = arith.mulf %293, %292 : vector<16x32xf32>
    %295 = arith.addf %291, %294 : vector<16x32xf32>
    %c16_147 = arith.constant 16 : index
    %c0_148 = arith.constant 0 : index
    %296 = vector.load %arg11[%c16_147, %c0_148] : memref<128x32xf32, #tpu.memory_space<vmem>>, vector<16x32xf32>
    tpu.vector_store %arg11[%c16_147, %c0_148], %286 {strides = array<i32>} : memref<128x32xf32, #tpu.memory_space<vmem>>, vector<16x32xf32>,
    %c16_149 = arith.constant 16 : index
    %c0_150 = arith.constant 0 : index
    %297 = vector.load %arg12[%c16_149, %c0_150] : memref<128x32xf32, #tpu.memory_space<vmem>>, vector<16x32xf32>
    tpu.vector_store %arg12[%c16_149, %c0_150], %295 {strides = array<i32>} : memref<128x32xf32, #tpu.memory_space<vmem>>, vector<16x32xf32>,
    %c0_151 = arith.constant 0 : index
    %c0_152 = arith.constant 0 : index
    %c64 = arith.constant 64 : index
    %298 = vector.load %arg10[%c0_151, %c0_152, %c64] : memref<1x16x512xf32, #tpu.memory_space<vmem>>, vector<1x16x32xf32>
    %299 = vector.shape_cast %298 : vector<1x16x32xf32> to vector<16x32xf32>
    %300 = vector.shape_cast %286 : vector<16x32xf32> to vector<1x16x32xf32>
    tpu.vector_store %arg10[%c0_151, %c0_152, %c64], %300 {strides = array<i32>} : memref<1x16x512xf32, #tpu.memory_space<vmem>>, vector<1x16x32xf32>,
    %c0_153 = arith.constant 0 : index
    %c0_154 = arith.constant 0 : index
    %c416 = arith.constant 416 : index
    %301 = vector.load %arg10[%c0_153, %c0_154, %c416] : memref<1x16x512xf32, #tpu.memory_space<vmem>>, vector<1x16x32xf32>
    %302 = vector.shape_cast %301 : vector<1x16x32xf32> to vector<16x32xf32>
    %303 = vector.shape_cast %295 : vector<16x32xf32> to vector<1x16x32xf32>
    tpu.vector_store %arg10[%c0_153, %c0_154, %c416], %303 {strides = array<i32>} : memref<1x16x512xf32, #tpu.memory_space<vmem>>, vector<1x16x32xf32>,
    %c0_155 = arith.constant 0 : index
    %c0_156 = arith.constant 0 : index
    %304 = vector.load %arg15[%c0_155, %c0_156] : memref<32x64xf32, #tpu.memory_space<vmem>>, vector<32x64xf32>
    %305 = arith.truncf %304 : vector<32x64xf32> to vector<32x64xbf16>
    %cst_157 = arith.constant dense<0.000000e+00> : vector<32x512xf32>
    %306 = tpu.matmul %305, %32, %cst_157 {dimension_numbers = #tpu.dot_dimension_numbers<[1], [0], [0], [1], [0, 0, 1, 1], [], []>} : vector<32x64xbf16>, vector<64x512xbf16>, vector<32x512xf32> -> vector<32x512xf32>
    %c32_158 = arith.constant 32 : index
    %c0_159 = arith.constant 0 : index
    %307 = vector.load %arg13[%c32_158, %c0_159] : memref<128x512xbf16, #tpu.memory_space<vmem>>, vector<16x512xbf16>
    %308 = arith.extf %307 : vector<16x512xbf16> to vector<16x512xf32>
    %309 = vector.extract_strided_slice %306 {offsets = [0, 0], sizes = [16, 512], strides = [1, 1]} : vector<32x512xf32> to vector<16x512xf32>
    %310 = arith.addf %308, %309 : vector<16x512xf32>
    %c32_160 = arith.constant 32 : index
    %c0_161 = arith.constant 0 : index
    %311 = vector.load %arg14[%c32_160, %c0_161] : memref<128x512xbf16, #tpu.memory_space<vmem>>, vector<16x512xbf16>
    %312 = arith.extf %311 : vector<16x512xbf16> to vector<16x512xf32>
    %313 = vector.extract_strided_slice %306 {offsets = [16, 0], sizes = [16, 512], strides = [1, 1]} : vector<32x512xf32> to vector<16x512xf32>
    %314 = arith.addf %312, %313 : vector<16x512xf32>
    %c0_162 = arith.constant 0 : index
    %c0_163 = arith.constant 0 : index
    %315 = vector.load %arg16[%c0_162, %c0_163] : memref<32x128xf32, #tpu.memory_space<vmem>>, vector<16x128xf32>
    %c16_164 = arith.constant 16 : index
    %c0_165 = arith.constant 0 : index
    %316 = vector.load %arg16[%c16_164, %c0_165] : memref<32x128xf32, #tpu.memory_space<vmem>>, vector<16x128xf32>
    %317 = vector.extract_strided_slice %310 {offsets = [0, 0], sizes = [16, 128], strides = [1, 1]} : vector<16x512xf32> to vector<16x128xf32>
    %318 = arith.negf %317 : vector<16x128xf32>
    %319 = math.exp %318 : vector<16x128xf32>
    %cst_166 = arith.constant 1.000000e+00 : f32
    %320 = vector.broadcast %cst_166 : f32 to vector<16x128xf32>
    %321 = arith.addf %320, %319 : vector<16x128xf32>
    %322 = arith.divf %320, %321 : vector<16x128xf32>
    %323 = vector.extract_strided_slice %310 {offsets = [0, 128], sizes = [16, 128], strides = [1, 1]} : vector<16x512xf32> to vector<16x128xf32>
    %324 = arith.negf %323 : vector<16x128xf32>
    %325 = math.exp %324 : vector<16x128xf32>
    %cst_167 = arith.constant 1.000000e+00 : f32
    %326 = vector.broadcast %cst_167 : f32 to vector<16x128xf32>
    %327 = arith.addf %326, %325 : vector<16x128xf32>
    %328 = arith.divf %326, %327 : vector<16x128xf32>
    %329 = vector.extract_strided_slice %310 {offsets = [0, 256], sizes = [16, 128], strides = [1, 1]} : vector<16x512xf32> to vector<16x128xf32>
    %330 = math.tanh %329 : vector<16x128xf32>
    %331 = vector.extract_strided_slice %310 {offsets = [0, 384], sizes = [16, 128], strides = [1, 1]} : vector<16x512xf32> to vector<16x128xf32>
    %332 = arith.negf %331 : vector<16x128xf32>
    %333 = math.exp %332 : vector<16x128xf32>
    %cst_168 = arith.constant 1.000000e+00 : f32
    %334 = vector.broadcast %cst_168 : f32 to vector<16x128xf32>
    %335 = arith.addf %334, %333 : vector<16x128xf32>
    %336 = arith.divf %334, %335 : vector<16x128xf32>
    %337 = arith.mulf %322, %330 : vector<16x128xf32>
    %338 = arith.mulf %328, %315 : vector<16x128xf32>
    %339 = arith.addf %337, %338 : vector<16x128xf32>
    %cst_169 = arith.constant -3.000000e+00 : f32
    %cst_170 = arith.constant 3.000000e+00 : f32
    %340 = vector.broadcast %cst_169 : f32 to vector<16x128xf32>
    %341 = arith.maximumf %340, %339 : vector<16x128xf32>
    %342 = vector.broadcast %cst_170 : f32 to vector<16x128xf32>
    %343 = arith.minimumf %342, %341 : vector<16x128xf32>
    %344 = math.tanh %343 : vector<16x128xf32>
    %345 = arith.mulf %336, %344 : vector<16x128xf32>
    %346 = vector.extract_strided_slice %314 {offsets = [0, 0], sizes = [16, 128], strides = [1, 1]} : vector<16x512xf32> to vector<16x128xf32>
    %347 = arith.negf %346 : vector<16x128xf32>
    %348 = math.exp %347 : vector<16x128xf32>
    %cst_171 = arith.constant 1.000000e+00 : f32
    %349 = vector.broadcast %cst_171 : f32 to vector<16x128xf32>
    %350 = arith.addf %349, %348 : vector<16x128xf32>
    %351 = arith.divf %349, %350 : vector<16x128xf32>
    %352 = vector.extract_strided_slice %314 {offsets = [0, 128], sizes = [16, 128], strides = [1, 1]} : vector<16x512xf32> to vector<16x128xf32>
    %353 = arith.negf %352 : vector<16x128xf32>
    %354 = math.exp %353 : vector<16x128xf32>
    %cst_172 = arith.constant 1.000000e+00 : f32
    %355 = vector.broadcast %cst_172 : f32 to vector<16x128xf32>
    %356 = arith.addf %355, %354 : vector<16x128xf32>
    %357 = arith.divf %355, %356 : vector<16x128xf32>
    %358 = vector.extract_strided_slice %314 {offsets = [0, 256], sizes = [16, 128], strides = [1, 1]} : vector<16x512xf32> to vector<16x128xf32>
    %359 = math.tanh %358 : vector<16x128xf32>
    %360 = vector.extract_strided_slice %314 {offsets = [0, 384], sizes = [16, 128], strides = [1, 1]} : vector<16x512xf32> to vector<16x128xf32>
    %361 = arith.negf %360 : vector<16x128xf32>
    %362 = math.exp %361 : vector<16x128xf32>
    %cst_173 = arith.constant 1.000000e+00 : f32
    %363 = vector.broadcast %cst_173 : f32 to vector<16x128xf32>
    %364 = arith.addf %363, %362 : vector<16x128xf32>
    %365 = arith.divf %363, %364 : vector<16x128xf32>
    %366 = arith.mulf %351, %359 : vector<16x128xf32>
    %367 = arith.mulf %357, %316 : vector<16x128xf32>
    %368 = arith.addf %366, %367 : vector<16x128xf32>
    %cst_174 = arith.constant -3.000000e+00 : f32
    %cst_175 = arith.constant 3.000000e+00 : f32
    %369 = vector.broadcast %cst_174 : f32 to vector<16x128xf32>
    %370 = arith.maximumf %369, %368 : vector<16x128xf32>
    %371 = vector.broadcast %cst_175 : f32 to vector<16x128xf32>
    %372 = arith.minimumf %371, %370 : vector<16x128xf32>
    %373 = math.tanh %372 : vector<16x128xf32>
    %374 = arith.mulf %365, %373 : vector<16x128xf32>
    %c0_176 = arith.constant 0 : index
    %c0_177 = arith.constant 0 : index
    %375 = vector.load %arg17[%c0_176, %c0_177] : memref<32x256xf32, #tpu.memory_space<vmem>>, vector<16x128xf32>
    tpu.vector_store %arg17[%c0_176, %c0_177], %345 {strides = array<i32>} : memref<32x256xf32, #tpu.memory_space<vmem>>, vector<16x128xf32>,
    %c16_178 = arith.constant 16 : index
    %c128_179 = arith.constant 128 : index
    %376 = vector.load %arg17[%c16_178, %c128_179] : memref<32x256xf32, #tpu.memory_space<vmem>>, vector<16x128xf32>
    tpu.vector_store %arg17[%c16_178, %c128_179], %374 {strides = array<i32>} : memref<32x256xf32, #tpu.memory_space<vmem>>, vector<16x128xf32>,
    %c0_180 = arith.constant 0 : index
    %c0_181 = arith.constant 0 : index
    %377 = vector.load %arg17[%c0_180, %c0_181] : memref<32x256xf32, #tpu.memory_space<vmem>>, vector<32x256xf32>
    %378 = arith.truncf %377 : vector<32x256xf32> to vector<32x256xbf16>
    %cst_182 = arith.constant dense<0.000000e+00> : vector<32x32xf32>
    %379 = tpu.matmul %378, %34, %cst_182 {dimension_numbers = #tpu.dot_dimension_numbers<[1], [0], [0], [1], [0, 0, 1, 1], [], []>} : vector<32x256xbf16>, vector<256x32xbf16>, vector<32x32xf32> -> vector<32x32xf32>
    %cst_183 = arith.constant -3.000000e+00 : f32
    %cst_184 = arith.constant 3.000000e+00 : f32
    %380 = vector.broadcast %cst_183 : f32 to vector<32x32xf32>
    %381 = arith.maximumf %380, %379 : vector<32x32xf32>
    %382 = vector.broadcast %cst_184 : f32 to vector<32x32xf32>
    %383 = arith.minimumf %382, %381 : vector<32x32xf32>
    %c32_185 = arith.constant 32 : index
    %c0_186 = arith.constant 0 : index
    %384 = vector.load %arg3[%c32_185, %c0_186] : memref<128x2xf32, #tpu.memory_space<vmem>>, vector<16x2xf32>
    %385 = vector.extract_strided_slice %384 {offsets = [0, 0], sizes = [16, 1], strides = [1, 1]} : vector<16x2xf32> to vector<16x1xf32>
    %cst_187 = arith.constant 5.000000e-01 : f32
    %386 = vector.broadcast %cst_187 : f32 to vector<16x1xf32>
    %387 = arith.cmpf ogt, %385, %386 : vector<16x1xf32>
    %388 = vector.extract_strided_slice %384 {offsets = [0, 1], sizes = [16, 1], strides = [1, 1]} : vector<16x2xf32> to vector<16x1xf32>
    %cst_188 = arith.constant 5.000000e-01 : f32
    %389 = vector.broadcast %cst_188 : f32 to vector<16x1xf32>
    %390 = arith.cmpf ogt, %388, %389 : vector<16x1xf32>
    %391 = vector.shape_cast %387 : vector<16x1xi1> to vector<16x1xi1>
    %392 = vector.broadcast %391 : vector<16x1xi1> to vector<16x128xi1>
    %393 = arith.select %392, %343, %315 : vector<16x128xi1>, vector<16x128xf32>
    %c0_189 = arith.constant 0 : index
    %c0_190 = arith.constant 0 : index
    %394 = vector.load %arg16[%c0_189, %c0_190] : memref<32x128xf32, #tpu.memory_space<vmem>>, vector<16x128xf32>
    tpu.vector_store %arg16[%c0_189, %c0_190], %393 {strides = array<i32>} : memref<32x128xf32, #tpu.memory_space<vmem>>, vector<16x128xf32>,
    %395 = vector.shape_cast %390 : vector<16x1xi1> to vector<16x1xi1>
    %396 = vector.broadcast %395 : vector<16x1xi1> to vector<16x128xi1>
    %397 = arith.select %396, %372, %316 : vector<16x128xi1>, vector<16x128xf32>
    %c16_191 = arith.constant 16 : index
    %c0_192 = arith.constant 0 : index
    %398 = vector.load %arg16[%c16_191, %c0_192] : memref<32x128xf32, #tpu.memory_space<vmem>>, vector<16x128xf32>
    tpu.vector_store %arg16[%c16_191, %c0_192], %397 {strides = array<i32>} : memref<32x128xf32, #tpu.memory_space<vmem>>, vector<16x128xf32>,
    %399 = vector.extract_strided_slice %383 {offsets = [0, 0], sizes = [16, 32], strides = [1, 1]} : vector<32x32xf32> to vector<16x32xf32>
    %c0_193 = arith.constant 0 : index
    %c0_194 = arith.constant 0 : index
    %400 = vector.load %arg15[%c0_193, %c0_194] : memref<32x64xf32, #tpu.memory_space<vmem>>, vector<16x32xf32>
    %401 = vector.shape_cast %387 : vector<16x1xi1> to vector<16x1xi1>
    %402 = vector.broadcast %401 : vector<16x1xi1> to vector<16x32xi1>
    %403 = arith.select %402, %399, %400 : vector<16x32xi1>, vector<16x32xf32>
    %404 = vector.extract_strided_slice %383 {offsets = [16, 0], sizes = [16, 32], strides = [1, 1]} : vector<32x32xf32> to vector<16x32xf32>
    %c16_195 = arith.constant 16 : index
    %c32_196 = arith.constant 32 : index
    %405 = vector.load %arg15[%c16_195, %c32_196] : memref<32x64xf32, #tpu.memory_space<vmem>>, vector<16x32xf32>
    %406 = vector.shape_cast %390 : vector<16x1xi1> to vector<16x1xi1>
    %407 = vector.broadcast %406 : vector<16x1xi1> to vector<16x32xi1>
    %408 = arith.select %407, %404, %405 : vector<16x32xi1>, vector<16x32xf32>
    %c0_197 = arith.constant 0 : index
    %c0_198 = arith.constant 0 : index
    %409 = vector.load %arg15[%c0_197, %c0_198] : memref<32x64xf32, #tpu.memory_space<vmem>>, vector<16x32xf32>
    tpu.vector_store %arg15[%c0_197, %c0_198], %403 {strides = array<i32>} : memref<32x64xf32, #tpu.memory_space<vmem>>, vector<16x32xf32>,
    %c16_199 = arith.constant 16 : index
    %c32_200 = arith.constant 32 : index
    %410 = vector.load %arg15[%c16_199, %c32_200] : memref<32x64xf32, #tpu.memory_space<vmem>>, vector<16x32xf32>
    tpu.vector_store %arg15[%c16_199, %c32_200], %408 {strides = array<i32>} : memref<32x64xf32, #tpu.memory_space<vmem>>, vector<16x32xf32>,
    %411 = vector.extract_strided_slice %383 {offsets = [0, 0], sizes = [16, 32], strides = [1, 1]} : vector<32x32xf32> to vector<16x32xf32>
    %cst_201 = arith.constant 0.000000e+00 : f32
    %412 = vector.shape_cast %387 : vector<16x1xi1> to vector<16x1xi1>
    %413 = vector.broadcast %412 : vector<16x1xi1> to vector<16x32xi1>
    %414 = vector.broadcast %cst_201 : f32 to vector<16x32xf32>
    %415 = arith.select %413, %411, %414 : vector<16x32xi1>, vector<16x32xf32>
    %c32_202 = arith.constant 32 : index
    %c0_203 = arith.constant 0 : index
    %416 = vector.load %arg11[%c32_202, %c0_203] : memref<128x32xf32, #tpu.memory_space<vmem>>, vector<16x32xf32>
    %417 = vector.broadcast %37 : f32 to vector<16x32xf32>
    %418 = arith.mulf %417, %416 : vector<16x32xf32>
    %419 = arith.addf %415, %418 : vector<16x32xf32>
    %420 = vector.extract_strided_slice %383 {offsets = [16, 0], sizes = [16, 32], strides = [1, 1]} : vector<32x32xf32> to vector<16x32xf32>
    %cst_204 = arith.constant 0.000000e+00 : f32
    %421 = vector.shape_cast %390 : vector<16x1xi1> to vector<16x1xi1>
    %422 = vector.broadcast %421 : vector<16x1xi1> to vector<16x32xi1>
    %423 = vector.broadcast %cst_204 : f32 to vector<16x32xf32>
    %424 = arith.select %422, %420, %423 : vector<16x32xi1>, vector<16x32xf32>
    %c32_205 = arith.constant 32 : index
    %c0_206 = arith.constant 0 : index
    %425 = vector.load %arg12[%c32_205, %c0_206] : memref<128x32xf32, #tpu.memory_space<vmem>>, vector<16x32xf32>
    %426 = vector.broadcast %37 : f32 to vector<16x32xf32>
    %427 = arith.mulf %426, %425 : vector<16x32xf32>
    %428 = arith.addf %424, %427 : vector<16x32xf32>
    %c32_207 = arith.constant 32 : index
    %c0_208 = arith.constant 0 : index
    %429 = vector.load %arg11[%c32_207, %c0_208] : memref<128x32xf32, #tpu.memory_space<vmem>>, vector<16x32xf32>
    tpu.vector_store %arg11[%c32_207, %c0_208], %419 {strides = array<i32>} : memref<128x32xf32, #tpu.memory_space<vmem>>, vector<16x32xf32>,
    %c32_209 = arith.constant 32 : index
    %c0_210 = arith.constant 0 : index
    %430 = vector.load %arg12[%c32_209, %c0_210] : memref<128x32xf32, #tpu.memory_space<vmem>>, vector<16x32xf32>
    tpu.vector_store %arg12[%c32_209, %c0_210], %428 {strides = array<i32>} : memref<128x32xf32, #tpu.memory_space<vmem>>, vector<16x32xf32>,
    %c0_211 = arith.constant 0 : index
    %c0_212 = arith.constant 0 : index
    %c128_213 = arith.constant 128 : index
    %431 = vector.load %arg10[%c0_211, %c0_212, %c128_213] : memref<1x16x512xf32, #tpu.memory_space<vmem>>, vector<1x16x32xf32>
    %432 = vector.shape_cast %431 : vector<1x16x32xf32> to vector<16x32xf32>
    %433 = vector.shape_cast %419 : vector<16x32xf32> to vector<1x16x32xf32>
    tpu.vector_store %arg10[%c0_211, %c0_212, %c128_213], %433 {strides = array<i32>} : memref<1x16x512xf32, #tpu.memory_space<vmem>>, vector<1x16x32xf32>,
    %c0_214 = arith.constant 0 : index
    %c0_215 = arith.constant 0 : index
    %c352 = arith.constant 352 : index
    %434 = vector.load %arg10[%c0_214, %c0_215, %c352] : memref<1x16x512xf32, #tpu.memory_space<vmem>>, vector<1x16x32xf32>
    %435 = vector.shape_cast %434 : vector<1x16x32xf32> to vector<16x32xf32>
    %436 = vector.shape_cast %428 : vector<16x32xf32> to vector<1x16x32xf32>
    tpu.vector_store %arg10[%c0_214, %c0_215, %c352], %436 {strides = array<i32>} : memref<1x16x512xf32, #tpu.memory_space<vmem>>, vector<1x16x32xf32>,
    %c0_216 = arith.constant 0 : index
    %c0_217 = arith.constant 0 : index
    %437 = vector.load %arg15[%c0_216, %c0_217] : memref<32x64xf32, #tpu.memory_space<vmem>>, vector<32x64xf32>
    %438 = arith.truncf %437 : vector<32x64xf32> to vector<32x64xbf16>
    %cst_218 = arith.constant dense<0.000000e+00> : vector<32x512xf32>
    %439 = tpu.matmul %438, %32, %cst_218 {dimension_numbers = #tpu.dot_dimension_numbers<[1], [0], [0], [1], [0, 0, 1, 1], [], []>} : vector<32x64xbf16>, vector<64x512xbf16>, vector<32x512xf32> -> vector<32x512xf32>
    %c48 = arith.constant 48 : index
    %c0_219 = arith.constant 0 : index
    %440 = vector.load %arg13[%c48, %c0_219] : memref<128x512xbf16, #tpu.memory_space<vmem>>, vector<16x512xbf16>
    %441 = arith.extf %440 : vector<16x512xbf16> to vector<16x512xf32>
    %442 = vector.extract_strided_slice %439 {offsets = [0, 0], sizes = [16, 512], strides = [1, 1]} : vector<32x512xf32> to vector<16x512xf32>
    %443 = arith.addf %441, %442 : vector<16x512xf32>
    %c48_220 = arith.constant 48 : index
    %c0_221 = arith.constant 0 : index
    %444 = vector.load %arg14[%c48_220, %c0_221] : memref<128x512xbf16, #tpu.memory_space<vmem>>, vector<16x512xbf16>
    %445 = arith.extf %444 : vector<16x512xbf16> to vector<16x512xf32>
    %446 = vector.extract_strided_slice %439 {offsets = [16, 0], sizes = [16, 512], strides = [1, 1]} : vector<32x512xf32> to vector<16x512xf32>
    %447 = arith.addf %445, %446 : vector<16x512xf32>
    %c0_222 = arith.constant 0 : index
    %c0_223 = arith.constant 0 : index
    %448 = vector.load %arg16[%c0_222, %c0_223] : memref<32x128xf32, #tpu.memory_space<vmem>>, vector<16x128xf32>
    %c16_224 = arith.constant 16 : index
    %c0_225 = arith.constant 0 : index
    %449 = vector.load %arg16[%c16_224, %c0_225] : memref<32x128xf32, #tpu.memory_space<vmem>>, vector<16x128xf32>
    %450 = vector.extract_strided_slice %443 {offsets = [0, 0], sizes = [16, 128], strides = [1, 1]} : vector<16x512xf32> to vector<16x128xf32>
    %451 = arith.negf %450 : vector<16x128xf32>
    %452 = math.exp %451 : vector<16x128xf32>
    %cst_226 = arith.constant 1.000000e+00 : f32
    %453 = vector.broadcast %cst_226 : f32 to vector<16x128xf32>
    %454 = arith.addf %453, %452 : vector<16x128xf32>
    %455 = arith.divf %453, %454 : vector<16x128xf32>
    %456 = vector.extract_strided_slice %443 {offsets = [0, 128], sizes = [16, 128], strides = [1, 1]} : vector<16x512xf32> to vector<16x128xf32>
    %457 = arith.negf %456 : vector<16x128xf32>
    %458 = math.exp %457 : vector<16x128xf32>
    %cst_227 = arith.constant 1.000000e+00 : f32
    %459 = vector.broadcast %cst_227 : f32 to vector<16x128xf32>
    %460 = arith.addf %459, %458 : vector<16x128xf32>
    %461 = arith.divf %459, %460 : vector<16x128xf32>
    %462 = vector.extract_strided_slice %443 {offsets = [0, 256], sizes = [16, 128], strides = [1, 1]} : vector<16x512xf32> to vector<16x128xf32>
    %463 = math.tanh %462 : vector<16x128xf32>
    %464 = vector.extract_strided_slice %443 {offsets = [0, 384], sizes = [16, 128], strides = [1, 1]} : vector<16x512xf32> to vector<16x128xf32>
    %465 = arith.negf %464 : vector<16x128xf32>
    %466 = math.exp %465 : vector<16x128xf32>
    %cst_228 = arith.constant 1.000000e+00 : f32
    %467 = vector.broadcast %cst_228 : f32 to vector<16x128xf32>
    %468 = arith.addf %467, %466 : vector<16x128xf32>
    %469 = arith.divf %467, %468 : vector<16x128xf32>
    %470 = arith.mulf %455, %463 : vector<16x128xf32>
    %471 = arith.mulf %461, %448 : vector<16x128xf32>
    %472 = arith.addf %470, %471 : vector<16x128xf32>
    %cst_229 = arith.constant -3.000000e+00 : f32
    %cst_230 = arith.constant 3.000000e+00 : f32
    %473 = vector.broadcast %cst_229 : f32 to vector<16x128xf32>
    %474 = arith.maximumf %473, %472 : vector<16x128xf32>
    %475 = vector.broadcast %cst_230 : f32 to vector<16x128xf32>
    %476 = arith.minimumf %475, %474 : vector<16x128xf32>
    %477 = math.tanh %476 : vector<16x128xf32>
    %478 = arith.mulf %469, %477 : vector<16x128xf32>
    %479 = vector.extract_strided_slice %447 {offsets = [0, 0], sizes = [16, 128], strides = [1, 1]} : vector<16x512xf32> to vector<16x128xf32>
    %480 = arith.negf %479 : vector<16x128xf32>
    %481 = math.exp %480 : vector<16x128xf32>
    %cst_231 = arith.constant 1.000000e+00 : f32
    %482 = vector.broadcast %cst_231 : f32 to vector<16x128xf32>
    %483 = arith.addf %482, %481 : vector<16x128xf32>
    %484 = arith.divf %482, %483 : vector<16x128xf32>
    %485 = vector.extract_strided_slice %447 {offsets = [0, 128], sizes = [16, 128], strides = [1, 1]} : vector<16x512xf32> to vector<16x128xf32>
    %486 = arith.negf %485 : vector<16x128xf32>
    %487 = math.exp %486 : vector<16x128xf32>
    %cst_232 = arith.constant 1.000000e+00 : f32
    %488 = vector.broadcast %cst_232 : f32 to vector<16x128xf32>
    %489 = arith.addf %488, %487 : vector<16x128xf32>
    %490 = arith.divf %488, %489 : vector<16x128xf32>
    %491 = vector.extract_strided_slice %447 {offsets = [0, 256], sizes = [16, 128], strides = [1, 1]} : vector<16x512xf32> to vector<16x128xf32>
    %492 = math.tanh %491 : vector<16x128xf32>
    %493 = vector.extract_strided_slice %447 {offsets = [0, 384], sizes = [16, 128], strides = [1, 1]} : vector<16x512xf32> to vector<16x128xf32>
    %494 = arith.negf %493 : vector<16x128xf32>
    %495 = math.exp %494 : vector<16x128xf32>
    %cst_233 = arith.constant 1.000000e+00 : f32
    %496 = vector.broadcast %cst_233 : f32 to vector<16x128xf32>
    %497 = arith.addf %496, %495 : vector<16x128xf32>
    %498 = arith.divf %496, %497 : vector<16x128xf32>
    %499 = arith.mulf %484, %492 : vector<16x128xf32>
    %500 = arith.mulf %490, %449 : vector<16x128xf32>
    %501 = arith.addf %499, %500 : vector<16x128xf32>
    %cst_234 = arith.constant -3.000000e+00 : f32
    %cst_235 = arith.constant 3.000000e+00 : f32
    %502 = vector.broadcast %cst_234 : f32 to vector<16x128xf32>
    %503 = arith.maximumf %502, %501 : vector<16x128xf32>
    %504 = vector.broadcast %cst_235 : f32 to vector<16x128xf32>
    %505 = arith.minimumf %504, %503 : vector<16x128xf32>
    %506 = math.tanh %505 : vector<16x128xf32>
    %507 = arith.mulf %498, %506 : vector<16x128xf32>
    %c0_236 = arith.constant 0 : index
    %c0_237 = arith.constant 0 : index
    %508 = vector.load %arg17[%c0_236, %c0_237] : memref<32x256xf32, #tpu.memory_space<vmem>>, vector<16x128xf32>
    tpu.vector_store %arg17[%c0_236, %c0_237], %478 {strides = array<i32>} : memref<32x256xf32, #tpu.memory_space<vmem>>, vector<16x128xf32>,
    %c16_238 = arith.constant 16 : index
    %c128_239 = arith.constant 128 : index
    %509 = vector.load %arg17[%c16_238, %c128_239] : memref<32x256xf32, #tpu.memory_space<vmem>>, vector<16x128xf32>
    tpu.vector_store %arg17[%c16_238, %c128_239], %507 {strides = array<i32>} : memref<32x256xf32, #tpu.memory_space<vmem>>, vector<16x128xf32>,
    %c0_240 = arith.constant 0 : index
    %c0_241 = arith.constant 0 : index
    %510 = vector.load %arg17[%c0_240, %c0_241] : memref<32x256xf32, #tpu.memory_space<vmem>>, vector<32x256xf32>
    %511 = arith.truncf %510 : vector<32x256xf32> to vector<32x256xbf16>
    %cst_242 = arith.constant dense<0.000000e+00> : vector<32x32xf32>
    %512 = tpu.matmul %511, %34, %cst_242 {dimension_numbers = #tpu.dot_dimension_numbers<[1], [0], [0], [1], [0, 0, 1, 1], [], []>} : vector<32x256xbf16>, vector<256x32xbf16>, vector<32x32xf32> -> vector<32x32xf32>
    %cst_243 = arith.constant -3.000000e+00 : f32
    %cst_244 = arith.constant 3.000000e+00 : f32
    %513 = vector.broadcast %cst_243 : f32 to vector<32x32xf32>
    %514 = arith.maximumf %513, %512 : vector<32x32xf32>
    %515 = vector.broadcast %cst_244 : f32 to vector<32x32xf32>
    %516 = arith.minimumf %515, %514 : vector<32x32xf32>
    %c48_245 = arith.constant 48 : index
    %c0_246 = arith.constant 0 : index
    %517 = vector.load %arg3[%c48_245, %c0_246] : memref<128x2xf32, #tpu.memory_space<vmem>>, vector<16x2xf32>
    %518 = vector.extract_strided_slice %517 {offsets = [0, 0], sizes = [16, 1], strides = [1, 1]} : vector<16x2xf32> to vector<16x1xf32>
    %cst_247 = arith.constant 5.000000e-01 : f32
    %519 = vector.broadcast %cst_247 : f32 to vector<16x1xf32>
    %520 = arith.cmpf ogt, %518, %519 : vector<16x1xf32>
    %521 = vector.extract_strided_slice %517 {offsets = [0, 1], sizes = [16, 1], strides = [1, 1]} : vector<16x2xf32> to vector<16x1xf32>
    %cst_248 = arith.constant 5.000000e-01 : f32
    %522 = vector.broadcast %cst_248 : f32 to vector<16x1xf32>
    %523 = arith.cmpf ogt, %521, %522 : vector<16x1xf32>
    %524 = vector.shape_cast %520 : vector<16x1xi1> to vector<16x1xi1>
    %525 = vector.broadcast %524 : vector<16x1xi1> to vector<16x128xi1>
    %526 = arith.select %525, %476, %448 : vector<16x128xi1>, vector<16x128xf32>
    %c0_249 = arith.constant 0 : index
    %c0_250 = arith.constant 0 : index
    %527 = vector.load %arg16[%c0_249, %c0_250] : memref<32x128xf32, #tpu.memory_space<vmem>>, vector<16x128xf32>
    tpu.vector_store %arg16[%c0_249, %c0_250], %526 {strides = array<i32>} : memref<32x128xf32, #tpu.memory_space<vmem>>, vector<16x128xf32>,
    %528 = vector.shape_cast %523 : vector<16x1xi1> to vector<16x1xi1>
    %529 = vector.broadcast %528 : vector<16x1xi1> to vector<16x128xi1>
    %530 = arith.select %529, %505, %449 : vector<16x128xi1>, vector<16x128xf32>
    %c16_251 = arith.constant 16 : index
    %c0_252 = arith.constant 0 : index
    %531 = vector.load %arg16[%c16_251, %c0_252] : memref<32x128xf32, #tpu.memory_space<vmem>>, vector<16x128xf32>
    tpu.vector_store %arg16[%c16_251, %c0_252], %530 {strides = array<i32>} : memref<32x128xf32, #tpu.memory_space<vmem>>, vector<16x128xf32>,
    %532 = vector.extract_strided_slice %516 {offsets = [0, 0], sizes = [16, 32], strides = [1, 1]} : vector<32x32xf32> to vector<16x32xf32>
    %c0_253 = arith.constant 0 : index
    %c0_254 = arith.constant 0 : index
    %533 = vector.load %arg15[%c0_253, %c0_254] : memref<32x64xf32, #tpu.memory_space<vmem>>, vector<16x32xf32>
    %534 = vector.shape_cast %520 : vector<16x1xi1> to vector<16x1xi1>
    %535 = vector.broadcast %534 : vector<16x1xi1> to vector<16x32xi1>
    %536 = arith.select %535, %532, %533 : vector<16x32xi1>, vector<16x32xf32>
    %537 = vector.extract_strided_slice %516 {offsets = [16, 0], sizes = [16, 32], strides = [1, 1]} : vector<32x32xf32> to vector<16x32xf32>
    %c16_255 = arith.constant 16 : index
    %c32_256 = arith.constant 32 : index
    %538 = vector.load %arg15[%c16_255, %c32_256] : memref<32x64xf32, #tpu.memory_space<vmem>>, vector<16x32xf32>
    %539 = vector.shape_cast %523 : vector<16x1xi1> to vector<16x1xi1>
    %540 = vector.broadcast %539 : vector<16x1xi1> to vector<16x32xi1>
    %541 = arith.select %540, %537, %538 : vector<16x32xi1>, vector<16x32xf32>
    %c0_257 = arith.constant 0 : index
    %c0_258 = arith.constant 0 : index
    %542 = vector.load %arg15[%c0_257, %c0_258] : memref<32x64xf32, #tpu.memory_space<vmem>>, vector<16x32xf32>
    tpu.vector_store %arg15[%c0_257, %c0_258], %536 {strides = array<i32>} : memref<32x64xf32, #tpu.memory_space<vmem>>, vector<16x32xf32>,
    %c16_259 = arith.constant 16 : index
    %c32_260 = arith.constant 32 : index
    %543 = vector.load %arg15[%c16_259, %c32_260] : memref<32x64xf32, #tpu.memory_space<vmem>>, vector<16x32xf32>
    tpu.vector_store %arg15[%c16_259, %c32_260], %541 {strides = array<i32>} : memref<32x64xf32, #tpu.memory_space<vmem>>, vector<16x32xf32>,
    %544 = vector.extract_strided_slice %516 {offsets = [0, 0], sizes = [16, 32], strides = [1, 1]} : vector<32x32xf32> to vector<16x32xf32>
    %cst_261 = arith.constant 0.000000e+00 : f32
    %545 = vector.shape_cast %520 : vector<16x1xi1> to vector<16x1xi1>
    %546 = vector.broadcast %545 : vector<16x1xi1> to vector<16x32xi1>
    %547 = vector.broadcast %cst_261 : f32 to vector<16x32xf32>
    %548 = arith.select %546, %544, %547 : vector<16x32xi1>, vector<16x32xf32>
    %c48_262 = arith.constant 48 : index
    %c0_263 = arith.constant 0 : index
    %549 = vector.load %arg11[%c48_262, %c0_263] : memref<128x32xf32, #tpu.memory_space<vmem>>, vector<16x32xf32>
    %550 = vector.broadcast %37 : f32 to vector<16x32xf32>
    %551 = arith.mulf %550, %549 : vector<16x32xf32>
    %552 = arith.addf %548, %551 : vector<16x32xf32>
    %553 = vector.extract_strided_slice %516 {offsets = [16, 0], sizes = [16, 32], strides = [1, 1]} : vector<32x32xf32> to vector<16x32xf32>
    %cst_264 = arith.constant 0.000000e+00 : f32
    %554 = vector.shape_cast %523 : vector<16x1xi1> to vector<16x1xi1>
    %555 = vector.broadcast %554 : vector<16x1xi1> to vector<16x32xi1>
    %556 = vector.broadcast %cst_264 : f32 to vector<16x32xf32>
    %557 = arith.select %555, %553, %556 : vector<16x32xi1>, vector<16x32xf32>
    %c48_265 = arith.constant 48 : index
    %c0_266 = arith.constant 0 : index
    %558 = vector.load %arg12[%c48_265, %c0_266] : memref<128x32xf32, #tpu.memory_space<vmem>>, vector<16x32xf32>
    %559 = vector.broadcast %37 : f32 to vector<16x32xf32>
    %560 = arith.mulf %559, %558 : vector<16x32xf32>
    %561 = arith.addf %557, %560 : vector<16x32xf32>
    %c48_267 = arith.constant 48 : index
    %c0_268 = arith.constant 0 : index
    %562 = vector.load %arg11[%c48_267, %c0_268] : memref<128x32xf32, #tpu.memory_space<vmem>>, vector<16x32xf32>
    tpu.vector_store %arg11[%c48_267, %c0_268], %552 {strides = array<i32>} : memref<128x32xf32, #tpu.memory_space<vmem>>, vector<16x32xf32>,
    %c48_269 = arith.constant 48 : index
    %c0_270 = arith.constant 0 : index
    %563 = vector.load %arg12[%c48_269, %c0_270] : memref<128x32xf32, #tpu.memory_space<vmem>>, vector<16x32xf32>
    tpu.vector_store %arg12[%c48_269, %c0_270], %561 {strides = array<i32>} : memref<128x32xf32, #tpu.memory_space<vmem>>, vector<16x32xf32>,
    %c0_271 = arith.constant 0 : index
    %c0_272 = arith.constant 0 : index
    %c192 = arith.constant 192 : index
    %564 = vector.load %arg10[%c0_271, %c0_272, %c192] : memref<1x16x512xf32, #tpu.memory_space<vmem>>, vector<1x16x32xf32>
    %565 = vector.shape_cast %564 : vector<1x16x32xf32> to vector<16x32xf32>
    %566 = vector.shape_cast %552 : vector<16x32xf32> to vector<1x16x32xf32>
    tpu.vector_store %arg10[%c0_271, %c0_272, %c192], %566 {strides = array<i32>} : memref<1x16x512xf32, #tpu.memory_space<vmem>>, vector<1x16x32xf32>,
    %c0_273 = arith.constant 0 : index
    %c0_274 = arith.constant 0 : index
    %c288 = arith.constant 288 : index
    %567 = vector.load %arg10[%c0_273, %c0_274, %c288] : memref<1x16x512xf32, #tpu.memory_space<vmem>>, vector<1x16x32xf32>
    %568 = vector.shape_cast %567 : vector<1x16x32xf32> to vector<16x32xf32>
    %569 = vector.shape_cast %561 : vector<16x32xf32> to vector<1x16x32xf32>
    tpu.vector_store %arg10[%c0_273, %c0_274, %c288], %569 {strides = array<i32>} : memref<1x16x512xf32, #tpu.memory_space<vmem>>, vector<1x16x32xf32>,
    %c0_275 = arith.constant 0 : index
    %c0_276 = arith.constant 0 : index
    %570 = vector.load %arg15[%c0_275, %c0_276] : memref<32x64xf32, #tpu.memory_space<vmem>>, vector<32x64xf32>
    %571 = arith.truncf %570 : vector<32x64xf32> to vector<32x64xbf16>
    %cst_277 = arith.constant dense<0.000000e+00> : vector<32x512xf32>
    %572 = tpu.matmul %571, %32, %cst_277 {dimension_numbers = #tpu.dot_dimension_numbers<[1], [0], [0], [1], [0, 0, 1, 1], [], []>} : vector<32x64xbf16>, vector<64x512xbf16>, vector<32x512xf32> -> vector<32x512xf32>
    %c64_278 = arith.constant 64 : index
    %c0_279 = arith.constant 0 : index
    %573 = vector.load %arg13[%c64_278, %c0_279] : memref<128x512xbf16, #tpu.memory_space<vmem>>, vector<16x512xbf16>
    %574 = arith.extf %573 : vector<16x512xbf16> to vector<16x512xf32>
    %575 = vector.extract_strided_slice %572 {offsets = [0, 0], sizes = [16, 512], strides = [1, 1]} : vector<32x512xf32> to vector<16x512xf32>
    %576 = arith.addf %574, %575 : vector<16x512xf32>
    %c64_280 = arith.constant 64 : index
    %c0_281 = arith.constant 0 : index
    %577 = vector.load %arg14[%c64_280, %c0_281] : memref<128x512xbf16, #tpu.memory_space<vmem>>, vector<16x512xbf16>
    %578 = arith.extf %577 : vector<16x512xbf16> to vector<16x512xf32>
    %579 = vector.extract_strided_slice %572 {offsets = [16, 0], sizes = [16, 512], strides = [1, 1]} : vector<32x512xf32> to vector<16x512xf32>
    %580 = arith.addf %578, %579 : vector<16x512xf32>
    %c0_282 = arith.constant 0 : index
    %c0_283 = arith.constant 0 : index
    %581 = vector.load %arg16[%c0_282, %c0_283] : memref<32x128xf32, #tpu.memory_space<vmem>>, vector<16x128xf32>
    %c16_284 = arith.constant 16 : index
    %c0_285 = arith.constant 0 : index
    %582 = vector.load %arg16[%c16_284, %c0_285] : memref<32x128xf32, #tpu.memory_space<vmem>>, vector<16x128xf32>
    %583 = vector.extract_strided_slice %576 {offsets = [0, 0], sizes = [16, 128], strides = [1, 1]} : vector<16x512xf32> to vector<16x128xf32>
    %584 = arith.negf %583 : vector<16x128xf32>
    %585 = math.exp %584 : vector<16x128xf32>
    %cst_286 = arith.constant 1.000000e+00 : f32
    %586 = vector.broadcast %cst_286 : f32 to vector<16x128xf32>
    %587 = arith.addf %586, %585 : vector<16x128xf32>
    %588 = arith.divf %586, %587 : vector<16x128xf32>
    %589 = vector.extract_strided_slice %576 {offsets = [0, 128], sizes = [16, 128], strides = [1, 1]} : vector<16x512xf32> to vector<16x128xf32>
    %590 = arith.negf %589 : vector<16x128xf32>
    %591 = math.exp %590 : vector<16x128xf32>
    %cst_287 = arith.constant 1.000000e+00 : f32
    %592 = vector.broadcast %cst_287 : f32 to vector<16x128xf32>
    %593 = arith.addf %592, %591 : vector<16x128xf32>
    %594 = arith.divf %592, %593 : vector<16x128xf32>
    %595 = vector.extract_strided_slice %576 {offsets = [0, 256], sizes = [16, 128], strides = [1, 1]} : vector<16x512xf32> to vector<16x128xf32>
    %596 = math.tanh %595 : vector<16x128xf32>
    %597 = vector.extract_strided_slice %576 {offsets = [0, 384], sizes = [16, 128], strides = [1, 1]} : vector<16x512xf32> to vector<16x128xf32>
    %598 = arith.negf %597 : vector<16x128xf32>
    %599 = math.exp %598 : vector<16x128xf32>
    %cst_288 = arith.constant 1.000000e+00 : f32
    %600 = vector.broadcast %cst_288 : f32 to vector<16x128xf32>
    %601 = arith.addf %600, %599 : vector<16x128xf32>
    %602 = arith.divf %600, %601 : vector<16x128xf32>
    %603 = arith.mulf %588, %596 : vector<16x128xf32>
    %604 = arith.mulf %594, %581 : vector<16x128xf32>
    %605 = arith.addf %603, %604 : vector<16x128xf32>
    %cst_289 = arith.constant -3.000000e+00 : f32
    %cst_290 = arith.constant 3.000000e+00 : f32
    %606 = vector.broadcast %cst_289 : f32 to vector<16x128xf32>
    %607 = arith.maximumf %606, %605 : vector<16x128xf32>
    %608 = vector.broadcast %cst_290 : f32 to vector<16x128xf32>
    %609 = arith.minimumf %608, %607 : vector<16x128xf32>
    %610 = math.tanh %609 : vector<16x128xf32>
    %611 = arith.mulf %602, %610 : vector<16x128xf32>
    %612 = vector.extract_strided_slice %580 {offsets = [0, 0], sizes = [16, 128], strides = [1, 1]} : vector<16x512xf32> to vector<16x128xf32>
    %613 = arith.negf %612 : vector<16x128xf32>
    %614 = math.exp %613 : vector<16x128xf32>
    %cst_291 = arith.constant 1.000000e+00 : f32
    %615 = vector.broadcast %cst_291 : f32 to vector<16x128xf32>
    %616 = arith.addf %615, %614 : vector<16x128xf32>
    %617 = arith.divf %615, %616 : vector<16x128xf32>
    %618 = vector.extract_strided_slice %580 {offsets = [0, 128], sizes = [16, 128], strides = [1, 1]} : vector<16x512xf32> to vector<16x128xf32>
    %619 = arith.negf %618 : vector<16x128xf32>
    %620 = math.exp %619 : vector<16x128xf32>
    %cst_292 = arith.constant 1.000000e+00 : f32
    %621 = vector.broadcast %cst_292 : f32 to vector<16x128xf32>
    %622 = arith.addf %621, %620 : vector<16x128xf32>
    %623 = arith.divf %621, %622 : vector<16x128xf32>
    %624 = vector.extract_strided_slice %580 {offsets = [0, 256], sizes = [16, 128], strides = [1, 1]} : vector<16x512xf32> to vector<16x128xf32>
    %625 = math.tanh %624 : vector<16x128xf32>
    %626 = vector.extract_strided_slice %580 {offsets = [0, 384], sizes = [16, 128], strides = [1, 1]} : vector<16x512xf32> to vector<16x128xf32>
    %627 = arith.negf %626 : vector<16x128xf32>
    %628 = math.exp %627 : vector<16x128xf32>
    %cst_293 = arith.constant 1.000000e+00 : f32
    %629 = vector.broadcast %cst_293 : f32 to vector<16x128xf32>
    %630 = arith.addf %629, %628 : vector<16x128xf32>
    %631 = arith.divf %629, %630 : vector<16x128xf32>
    %632 = arith.mulf %617, %625 : vector<16x128xf32>
    %633 = arith.mulf %623, %582 : vector<16x128xf32>
    %634 = arith.addf %632, %633 : vector<16x128xf32>
    %cst_294 = arith.constant -3.000000e+00 : f32
    %cst_295 = arith.constant 3.000000e+00 : f32
    %635 = vector.broadcast %cst_294 : f32 to vector<16x128xf32>
    %636 = arith.maximumf %635, %634 : vector<16x128xf32>
    %637 = vector.broadcast %cst_295 : f32 to vector<16x128xf32>
    %638 = arith.minimumf %637, %636 : vector<16x128xf32>
    %639 = math.tanh %638 : vector<16x128xf32>
    %640 = arith.mulf %631, %639 : vector<16x128xf32>
    %c0_296 = arith.constant 0 : index
    %c0_297 = arith.constant 0 : index
    %641 = vector.load %arg17[%c0_296, %c0_297] : memref<32x256xf32, #tpu.memory_space<vmem>>, vector<16x128xf32>
    tpu.vector_store %arg17[%c0_296, %c0_297], %611 {strides = array<i32>} : memref<32x256xf32, #tpu.memory_space<vmem>>, vector<16x128xf32>,
    %c16_298 = arith.constant 16 : index
    %c128_299 = arith.constant 128 : index
    %642 = vector.load %arg17[%c16_298, %c128_299] : memref<32x256xf32, #tpu.memory_space<vmem>>, vector<16x128xf32>
    tpu.vector_store %arg17[%c16_298, %c128_299], %640 {strides = array<i32>} : memref<32x256xf32, #tpu.memory_space<vmem>>, vector<16x128xf32>,
    %c0_300 = arith.constant 0 : index
    %c0_301 = arith.constant 0 : index
    %643 = vector.load %arg17[%c0_300, %c0_301] : memref<32x256xf32, #tpu.memory_space<vmem>>, vector<32x256xf32>
    %644 = arith.truncf %643 : vector<32x256xf32> to vector<32x256xbf16>
    %cst_302 = arith.constant dense<0.000000e+00> : vector<32x32xf32>
    %645 = tpu.matmul %644, %34, %cst_302 {dimension_numbers = #tpu.dot_dimension_numbers<[1], [0], [0], [1], [0, 0, 1, 1], [], []>} : vector<32x256xbf16>, vector<256x32xbf16>, vector<32x32xf32> -> vector<32x32xf32>
    %cst_303 = arith.constant -3.000000e+00 : f32
    %cst_304 = arith.constant 3.000000e+00 : f32
    %646 = vector.broadcast %cst_303 : f32 to vector<32x32xf32>
    %647 = arith.maximumf %646, %645 : vector<32x32xf32>
    %648 = vector.broadcast %cst_304 : f32 to vector<32x32xf32>
    %649 = arith.minimumf %648, %647 : vector<32x32xf32>
    %c64_305 = arith.constant 64 : index
    %c0_306 = arith.constant 0 : index
    %650 = vector.load %arg3[%c64_305, %c0_306] : memref<128x2xf32, #tpu.memory_space<vmem>>, vector<16x2xf32>
    %651 = vector.extract_strided_slice %650 {offsets = [0, 0], sizes = [16, 1], strides = [1, 1]} : vector<16x2xf32> to vector<16x1xf32>
    %cst_307 = arith.constant 5.000000e-01 : f32
    %652 = vector.broadcast %cst_307 : f32 to vector<16x1xf32>
    %653 = arith.cmpf ogt, %651, %652 : vector<16x1xf32>
    %654 = vector.extract_strided_slice %650 {offsets = [0, 1], sizes = [16, 1], strides = [1, 1]} : vector<16x2xf32> to vector<16x1xf32>
    %cst_308 = arith.constant 5.000000e-01 : f32
    %655 = vector.broadcast %cst_308 : f32 to vector<16x1xf32>
    %656 = arith.cmpf ogt, %654, %655 : vector<16x1xf32>
    %657 = vector.shape_cast %653 : vector<16x1xi1> to vector<16x1xi1>
    %658 = vector.broadcast %657 : vector<16x1xi1> to vector<16x128xi1>
    %659 = arith.select %658, %609, %581 : vector<16x128xi1>, vector<16x128xf32>
    %c0_309 = arith.constant 0 : index
    %c0_310 = arith.constant 0 : index
    %660 = vector.load %arg16[%c0_309, %c0_310] : memref<32x128xf32, #tpu.memory_space<vmem>>, vector<16x128xf32>
    tpu.vector_store %arg16[%c0_309, %c0_310], %659 {strides = array<i32>} : memref<32x128xf32, #tpu.memory_space<vmem>>, vector<16x128xf32>,
    %661 = vector.shape_cast %656 : vector<16x1xi1> to vector<16x1xi1>
    %662 = vector.broadcast %661 : vector<16x1xi1> to vector<16x128xi1>
    %663 = arith.select %662, %638, %582 : vector<16x128xi1>, vector<16x128xf32>
    %c16_311 = arith.constant 16 : index
    %c0_312 = arith.constant 0 : index
    %664 = vector.load %arg16[%c16_311, %c0_312] : memref<32x128xf32, #tpu.memory_space<vmem>>, vector<16x128xf32>
    tpu.vector_store %arg16[%c16_311, %c0_312], %663 {strides = array<i32>} : memref<32x128xf32, #tpu.memory_space<vmem>>, vector<16x128xf32>,
    %665 = vector.extract_strided_slice %649 {offsets = [0, 0], sizes = [16, 32], strides = [1, 1]} : vector<32x32xf32> to vector<16x32xf32>
    %c0_313 = arith.constant 0 : index
    %c0_314 = arith.constant 0 : index
    %666 = vector.load %arg15[%c0_313, %c0_314] : memref<32x64xf32, #tpu.memory_space<vmem>>, vector<16x32xf32>
    %667 = vector.shape_cast %653 : vector<16x1xi1> to vector<16x1xi1>
    %668 = vector.broadcast %667 : vector<16x1xi1> to vector<16x32xi1>
    %669 = arith.select %668, %665, %666 : vector<16x32xi1>, vector<16x32xf32>
    %670 = vector.extract_strided_slice %649 {offsets = [16, 0], sizes = [16, 32], strides = [1, 1]} : vector<32x32xf32> to vector<16x32xf32>
    %c16_315 = arith.constant 16 : index
    %c32_316 = arith.constant 32 : index
    %671 = vector.load %arg15[%c16_315, %c32_316] : memref<32x64xf32, #tpu.memory_space<vmem>>, vector<16x32xf32>
    %672 = vector.shape_cast %656 : vector<16x1xi1> to vector<16x1xi1>
    %673 = vector.broadcast %672 : vector<16x1xi1> to vector<16x32xi1>
    %674 = arith.select %673, %670, %671 : vector<16x32xi1>, vector<16x32xf32>
    %c0_317 = arith.constant 0 : index
    %c0_318 = arith.constant 0 : index
    %675 = vector.load %arg15[%c0_317, %c0_318] : memref<32x64xf32, #tpu.memory_space<vmem>>, vector<16x32xf32>
    tpu.vector_store %arg15[%c0_317, %c0_318], %669 {strides = array<i32>} : memref<32x64xf32, #tpu.memory_space<vmem>>, vector<16x32xf32>,
    %c16_319 = arith.constant 16 : index
    %c32_320 = arith.constant 32 : index
    %676 = vector.load %arg15[%c16_319, %c32_320] : memref<32x64xf32, #tpu.memory_space<vmem>>, vector<16x32xf32>
    tpu.vector_store %arg15[%c16_319, %c32_320], %674 {strides = array<i32>} : memref<32x64xf32, #tpu.memory_space<vmem>>, vector<16x32xf32>,
    %677 = vector.extract_strided_slice %649 {offsets = [0, 0], sizes = [16, 32], strides = [1, 1]} : vector<32x32xf32> to vector<16x32xf32>
    %cst_321 = arith.constant 0.000000e+00 : f32
    %678 = vector.shape_cast %653 : vector<16x1xi1> to vector<16x1xi1>
    %679 = vector.broadcast %678 : vector<16x1xi1> to vector<16x32xi1>
    %680 = vector.broadcast %cst_321 : f32 to vector<16x32xf32>
    %681 = arith.select %679, %677, %680 : vector<16x32xi1>, vector<16x32xf32>
    %c64_322 = arith.constant 64 : index
    %c0_323 = arith.constant 0 : index
    %682 = vector.load %arg11[%c64_322, %c0_323] : memref<128x32xf32, #tpu.memory_space<vmem>>, vector<16x32xf32>
    %683 = vector.broadcast %37 : f32 to vector<16x32xf32>
    %684 = arith.mulf %683, %682 : vector<16x32xf32>
    %685 = arith.addf %681, %684 : vector<16x32xf32>
    %686 = vector.extract_strided_slice %649 {offsets = [16, 0], sizes = [16, 32], strides = [1, 1]} : vector<32x32xf32> to vector<16x32xf32>
    %cst_324 = arith.constant 0.000000e+00 : f32
    %687 = vector.shape_cast %656 : vector<16x1xi1> to vector<16x1xi1>
    %688 = vector.broadcast %687 : vector<16x1xi1> to vector<16x32xi1>
    %689 = vector.broadcast %cst_324 : f32 to vector<16x32xf32>
    %690 = arith.select %688, %686, %689 : vector<16x32xi1>, vector<16x32xf32>
    %c64_325 = arith.constant 64 : index
    %c0_326 = arith.constant 0 : index
    %691 = vector.load %arg12[%c64_325, %c0_326] : memref<128x32xf32, #tpu.memory_space<vmem>>, vector<16x32xf32>
    %692 = vector.broadcast %37 : f32 to vector<16x32xf32>
    %693 = arith.mulf %692, %691 : vector<16x32xf32>
    %694 = arith.addf %690, %693 : vector<16x32xf32>
    %c64_327 = arith.constant 64 : index
    %c0_328 = arith.constant 0 : index
    %695 = vector.load %arg11[%c64_327, %c0_328] : memref<128x32xf32, #tpu.memory_space<vmem>>, vector<16x32xf32>
    tpu.vector_store %arg11[%c64_327, %c0_328], %685 {strides = array<i32>} : memref<128x32xf32, #tpu.memory_space<vmem>>, vector<16x32xf32>,
    %c64_329 = arith.constant 64 : index
    %c0_330 = arith.constant 0 : index
    %696 = vector.load %arg12[%c64_329, %c0_330] : memref<128x32xf32, #tpu.memory_space<vmem>>, vector<16x32xf32>
    tpu.vector_store %arg12[%c64_329, %c0_330], %694 {strides = array<i32>} : memref<128x32xf32, #tpu.memory_space<vmem>>, vector<16x32xf32>,
    %c0_331 = arith.constant 0 : index
    %c0_332 = arith.constant 0 : index
    %c256 = arith.constant 256 : index
    %697 = vector.load %arg10[%c0_331, %c0_332, %c256] : memref<1x16x512xf32, #tpu.memory_space<vmem>>, vector<1x16x32xf32>
    %698 = vector.shape_cast %697 : vector<1x16x32xf32> to vector<16x32xf32>
    %699 = vector.shape_cast %685 : vector<16x32xf32> to vector<1x16x32xf32>
    tpu.vector_store %arg10[%c0_331, %c0_332, %c256], %699 {strides = array<i32>} : memref<1x16x512xf32, #tpu.memory_space<vmem>>, vector<1x16x32xf32>,
    %c0_333 = arith.constant 0 : index
    %c0_334 = arith.constant 0 : index
    %c224 = arith.constant 224 : index
    %700 = vector.load %arg10[%c0_333, %c0_334, %c224] : memref<1x16x512xf32, #tpu.memory_space<vmem>>, vector<1x16x32xf32>
    %701 = vector.shape_cast %700 : vector<1x16x32xf32> to vector<16x32xf32>
    %702 = vector.shape_cast %694 : vector<16x32xf32> to vector<1x16x32xf32>
    tpu.vector_store %arg10[%c0_333, %c0_334, %c224], %702 {strides = array<i32>} : memref<1x16x512xf32, #tpu.memory_space<vmem>>, vector<1x16x32xf32>,
    %c0_335 = arith.constant 0 : index
    %c0_336 = arith.constant 0 : index
    %703 = vector.load %arg15[%c0_335, %c0_336] : memref<32x64xf32, #tpu.memory_space<vmem>>, vector<32x64xf32>
    %704 = arith.truncf %703 : vector<32x64xf32> to vector<32x64xbf16>
    %cst_337 = arith.constant dense<0.000000e+00> : vector<32x512xf32>
    %705 = tpu.matmul %704, %32, %cst_337 {dimension_numbers = #tpu.dot_dimension_numbers<[1], [0], [0], [1], [0, 0, 1, 1], [], []>} : vector<32x64xbf16>, vector<64x512xbf16>, vector<32x512xf32> -> vector<32x512xf32>
    %c80 = arith.constant 80 : index
    %c0_338 = arith.constant 0 : index
    %706 = vector.load %arg13[%c80, %c0_338] : memref<128x512xbf16, #tpu.memory_space<vmem>>, vector<16x512xbf16>
    %707 = arith.extf %706 : vector<16x512xbf16> to vector<16x512xf32>
    %708 = vector.extract_strided_slice %705 {offsets = [0, 0], sizes = [16, 512], strides = [1, 1]} : vector<32x512xf32> to vector<16x512xf32>
    %709 = arith.addf %707, %708 : vector<16x512xf32>
    %c80_339 = arith.constant 80 : index
    %c0_340 = arith.constant 0 : index
    %710 = vector.load %arg14[%c80_339, %c0_340] : memref<128x512xbf16, #tpu.memory_space<vmem>>, vector<16x512xbf16>
    %711 = arith.extf %710 : vector<16x512xbf16> to vector<16x512xf32>
    %712 = vector.extract_strided_slice %705 {offsets = [16, 0], sizes = [16, 512], strides = [1, 1]} : vector<32x512xf32> to vector<16x512xf32>
    %713 = arith.addf %711, %712 : vector<16x512xf32>
    %c0_341 = arith.constant 0 : index
    %c0_342 = arith.constant 0 : index
    %714 = vector.load %arg16[%c0_341, %c0_342] : memref<32x128xf32, #tpu.memory_space<vmem>>, vector<16x128xf32>
    %c16_343 = arith.constant 16 : index
    %c0_344 = arith.constant 0 : index
    %715 = vector.load %arg16[%c16_343, %c0_344] : memref<32x128xf32, #tpu.memory_space<vmem>>, vector<16x128xf32>
    %716 = vector.extract_strided_slice %709 {offsets = [0, 0], sizes = [16, 128], strides = [1, 1]} : vector<16x512xf32> to vector<16x128xf32>
    %717 = arith.negf %716 : vector<16x128xf32>
    %718 = math.exp %717 : vector<16x128xf32>
    %cst_345 = arith.constant 1.000000e+00 : f32
    %719 = vector.broadcast %cst_345 : f32 to vector<16x128xf32>
    %720 = arith.addf %719, %718 : vector<16x128xf32>
    %721 = arith.divf %719, %720 : vector<16x128xf32>
    %722 = vector.extract_strided_slice %709 {offsets = [0, 128], sizes = [16, 128], strides = [1, 1]} : vector<16x512xf32> to vector<16x128xf32>
    %723 = arith.negf %722 : vector<16x128xf32>
    %724 = math.exp %723 : vector<16x128xf32>
    %cst_346 = arith.constant 1.000000e+00 : f32
    %725 = vector.broadcast %cst_346 : f32 to vector<16x128xf32>
    %726 = arith.addf %725, %724 : vector<16x128xf32>
    %727 = arith.divf %725, %726 : vector<16x128xf32>
    %728 = vector.extract_strided_slice %709 {offsets = [0, 256], sizes = [16, 128], strides = [1, 1]} : vector<16x512xf32> to vector<16x128xf32>
    %729 = math.tanh %728 : vector<16x128xf32>
    %730 = vector.extract_strided_slice %709 {offsets = [0, 384], sizes = [16, 128], strides = [1, 1]} : vector<16x512xf32> to vector<16x128xf32>
    %731 = arith.negf %730 : vector<16x128xf32>
    %732 = math.exp %731 : vector<16x128xf32>
    %cst_347 = arith.constant 1.000000e+00 : f32
    %733 = vector.broadcast %cst_347 : f32 to vector<16x128xf32>
    %734 = arith.addf %733, %732 : vector<16x128xf32>
    %735 = arith.divf %733, %734 : vector<16x128xf32>
    %736 = arith.mulf %721, %729 : vector<16x128xf32>
    %737 = arith.mulf %727, %714 : vector<16x128xf32>
    %738 = arith.addf %736, %737 : vector<16x128xf32>
    %cst_348 = arith.constant -3.000000e+00 : f32
    %cst_349 = arith.constant 3.000000e+00 : f32
    %739 = vector.broadcast %cst_348 : f32 to vector<16x128xf32>
    %740 = arith.maximumf %739, %738 : vector<16x128xf32>
    %741 = vector.broadcast %cst_349 : f32 to vector<16x128xf32>
    %742 = arith.minimumf %741, %740 : vector<16x128xf32>
    %743 = math.tanh %742 : vector<16x128xf32>
    %744 = arith.mulf %735, %743 : vector<16x128xf32>
    %745 = vector.extract_strided_slice %713 {offsets = [0, 0], sizes = [16, 128], strides = [1, 1]} : vector<16x512xf32> to vector<16x128xf32>
    %746 = arith.negf %745 : vector<16x128xf32>
    %747 = math.exp %746 : vector<16x128xf32>
    %cst_350 = arith.constant 1.000000e+00 : f32
    %748 = vector.broadcast %cst_350 : f32 to vector<16x128xf32>
    %749 = arith.addf %748, %747 : vector<16x128xf32>
    %750 = arith.divf %748, %749 : vector<16x128xf32>
    %751 = vector.extract_strided_slice %713 {offsets = [0, 128], sizes = [16, 128], strides = [1, 1]} : vector<16x512xf32> to vector<16x128xf32>
    %752 = arith.negf %751 : vector<16x128xf32>
    %753 = math.exp %752 : vector<16x128xf32>
    %cst_351 = arith.constant 1.000000e+00 : f32
    %754 = vector.broadcast %cst_351 : f32 to vector<16x128xf32>
    %755 = arith.addf %754, %753 : vector<16x128xf32>
    %756 = arith.divf %754, %755 : vector<16x128xf32>
    %757 = vector.extract_strided_slice %713 {offsets = [0, 256], sizes = [16, 128], strides = [1, 1]} : vector<16x512xf32> to vector<16x128xf32>
    %758 = math.tanh %757 : vector<16x128xf32>
    %759 = vector.extract_strided_slice %713 {offsets = [0, 384], sizes = [16, 128], strides = [1, 1]} : vector<16x512xf32> to vector<16x128xf32>
    %760 = arith.negf %759 : vector<16x128xf32>
    %761 = math.exp %760 : vector<16x128xf32>
    %cst_352 = arith.constant 1.000000e+00 : f32
    %762 = vector.broadcast %cst_352 : f32 to vector<16x128xf32>
    %763 = arith.addf %762, %761 : vector<16x128xf32>
    %764 = arith.divf %762, %763 : vector<16x128xf32>
    %765 = arith.mulf %750, %758 : vector<16x128xf32>
    %766 = arith.mulf %756, %715 : vector<16x128xf32>
    %767 = arith.addf %765, %766 : vector<16x128xf32>
    %cst_353 = arith.constant -3.000000e+00 : f32
    %cst_354 = arith.constant 3.000000e+00 : f32
    %768 = vector.broadcast %cst_353 : f32 to vector<16x128xf32>
    %769 = arith.maximumf %768, %767 : vector<16x128xf32>
    %770 = vector.broadcast %cst_354 : f32 to vector<16x128xf32>
    %771 = arith.minimumf %770, %769 : vector<16x128xf32>
    %772 = math.tanh %771 : vector<16x128xf32>
    %773 = arith.mulf %764, %772 : vector<16x128xf32>
    %c0_355 = arith.constant 0 : index
    %c0_356 = arith.constant 0 : index
    %774 = vector.load %arg17[%c0_355, %c0_356] : memref<32x256xf32, #tpu.memory_space<vmem>>, vector<16x128xf32>
    tpu.vector_store %arg17[%c0_355, %c0_356], %744 {strides = array<i32>} : memref<32x256xf32, #tpu.memory_space<vmem>>, vector<16x128xf32>,
    %c16_357 = arith.constant 16 : index
    %c128_358 = arith.constant 128 : index
    %775 = vector.load %arg17[%c16_357, %c128_358] : memref<32x256xf32, #tpu.memory_space<vmem>>, vector<16x128xf32>
    tpu.vector_store %arg17[%c16_357, %c128_358], %773 {strides = array<i32>} : memref<32x256xf32, #tpu.memory_space<vmem>>, vector<16x128xf32>,
    %c0_359 = arith.constant 0 : index
    %c0_360 = arith.constant 0 : index
    %776 = vector.load %arg17[%c0_359, %c0_360] : memref<32x256xf32, #tpu.memory_space<vmem>>, vector<32x256xf32>
    %777 = arith.truncf %776 : vector<32x256xf32> to vector<32x256xbf16>
    %cst_361 = arith.constant dense<0.000000e+00> : vector<32x32xf32>
    %778 = tpu.matmul %777, %34, %cst_361 {dimension_numbers = #tpu.dot_dimension_numbers<[1], [0], [0], [1], [0, 0, 1, 1], [], []>} : vector<32x256xbf16>, vector<256x32xbf16>, vector<32x32xf32> -> vector<32x32xf32>
    %cst_362 = arith.constant -3.000000e+00 : f32
    %cst_363 = arith.constant 3.000000e+00 : f32
    %779 = vector.broadcast %cst_362 : f32 to vector<32x32xf32>
    %780 = arith.maximumf %779, %778 : vector<32x32xf32>
    %781 = vector.broadcast %cst_363 : f32 to vector<32x32xf32>
    %782 = arith.minimumf %781, %780 : vector<32x32xf32>
    %c80_364 = arith.constant 80 : index
    %c0_365 = arith.constant 0 : index
    %783 = vector.load %arg3[%c80_364, %c0_365] : memref<128x2xf32, #tpu.memory_space<vmem>>, vector<16x2xf32>
    %784 = vector.extract_strided_slice %783 {offsets = [0, 0], sizes = [16, 1], strides = [1, 1]} : vector<16x2xf32> to vector<16x1xf32>
    %cst_366 = arith.constant 5.000000e-01 : f32
    %785 = vector.broadcast %cst_366 : f32 to vector<16x1xf32>
    %786 = arith.cmpf ogt, %784, %785 : vector<16x1xf32>
    %787 = vector.extract_strided_slice %783 {offsets = [0, 1], sizes = [16, 1], strides = [1, 1]} : vector<16x2xf32> to vector<16x1xf32>
    %cst_367 = arith.constant 5.000000e-01 : f32
    %788 = vector.broadcast %cst_367 : f32 to vector<16x1xf32>
    %789 = arith.cmpf ogt, %787, %788 : vector<16x1xf32>
    %790 = vector.shape_cast %786 : vector<16x1xi1> to vector<16x1xi1>
    %791 = vector.broadcast %790 : vector<16x1xi1> to vector<16x128xi1>
    %792 = arith.select %791, %742, %714 : vector<16x128xi1>, vector<16x128xf32>
    %c0_368 = arith.constant 0 : index
    %c0_369 = arith.constant 0 : index
    %793 = vector.load %arg16[%c0_368, %c0_369] : memref<32x128xf32, #tpu.memory_space<vmem>>, vector<16x128xf32>
    tpu.vector_store %arg16[%c0_368, %c0_369], %792 {strides = array<i32>} : memref<32x128xf32, #tpu.memory_space<vmem>>, vector<16x128xf32>,
    %794 = vector.shape_cast %789 : vector<16x1xi1> to vector<16x1xi1>
    %795 = vector.broadcast %794 : vector<16x1xi1> to vector<16x128xi1>
    %796 = arith.select %795, %771, %715 : vector<16x128xi1>, vector<16x128xf32>
    %c16_370 = arith.constant 16 : index
    %c0_371 = arith.constant 0 : index
    %797 = vector.load %arg16[%c16_370, %c0_371] : memref<32x128xf32, #tpu.memory_space<vmem>>, vector<16x128xf32>
    tpu.vector_store %arg16[%c16_370, %c0_371], %796 {strides = array<i32>} : memref<32x128xf32, #tpu.memory_space<vmem>>, vector<16x128xf32>,
    %798 = vector.extract_strided_slice %782 {offsets = [0, 0], sizes = [16, 32], strides = [1, 1]} : vector<32x32xf32> to vector<16x32xf32>
    %c0_372 = arith.constant 0 : index
    %c0_373 = arith.constant 0 : index
    %799 = vector.load %arg15[%c0_372, %c0_373] : memref<32x64xf32, #tpu.memory_space<vmem>>, vector<16x32xf32>
    %800 = vector.shape_cast %786 : vector<16x1xi1> to vector<16x1xi1>
    %801 = vector.broadcast %800 : vector<16x1xi1> to vector<16x32xi1>
    %802 = arith.select %801, %798, %799 : vector<16x32xi1>, vector<16x32xf32>
    %803 = vector.extract_strided_slice %782 {offsets = [16, 0], sizes = [16, 32], strides = [1, 1]} : vector<32x32xf32> to vector<16x32xf32>
    %c16_374 = arith.constant 16 : index
    %c32_375 = arith.constant 32 : index
    %804 = vector.load %arg15[%c16_374, %c32_375] : memref<32x64xf32, #tpu.memory_space<vmem>>, vector<16x32xf32>
    %805 = vector.shape_cast %789 : vector<16x1xi1> to vector<16x1xi1>
    %806 = vector.broadcast %805 : vector<16x1xi1> to vector<16x32xi1>
    %807 = arith.select %806, %803, %804 : vector<16x32xi1>, vector<16x32xf32>
    %c0_376 = arith.constant 0 : index
    %c0_377 = arith.constant 0 : index
    %808 = vector.load %arg15[%c0_376, %c0_377] : memref<32x64xf32, #tpu.memory_space<vmem>>, vector<16x32xf32>
    tpu.vector_store %arg15[%c0_376, %c0_377], %802 {strides = array<i32>} : memref<32x64xf32, #tpu.memory_space<vmem>>, vector<16x32xf32>,
    %c16_378 = arith.constant 16 : index
    %c32_379 = arith.constant 32 : index
    %809 = vector.load %arg15[%c16_378, %c32_379] : memref<32x64xf32, #tpu.memory_space<vmem>>, vector<16x32xf32>
    tpu.vector_store %arg15[%c16_378, %c32_379], %807 {strides = array<i32>} : memref<32x64xf32, #tpu.memory_space<vmem>>, vector<16x32xf32>,
    %810 = vector.extract_strided_slice %782 {offsets = [0, 0], sizes = [16, 32], strides = [1, 1]} : vector<32x32xf32> to vector<16x32xf32>
    %cst_380 = arith.constant 0.000000e+00 : f32
    %811 = vector.shape_cast %786 : vector<16x1xi1> to vector<16x1xi1>
    %812 = vector.broadcast %811 : vector<16x1xi1> to vector<16x32xi1>
    %813 = vector.broadcast %cst_380 : f32 to vector<16x32xf32>
    %814 = arith.select %812, %810, %813 : vector<16x32xi1>, vector<16x32xf32>
    %c80_381 = arith.constant 80 : index
    %c0_382 = arith.constant 0 : index
    %815 = vector.load %arg11[%c80_381, %c0_382] : memref<128x32xf32, #tpu.memory_space<vmem>>, vector<16x32xf32>
    %816 = vector.broadcast %37 : f32 to vector<16x32xf32>
    %817 = arith.mulf %816, %815 : vector<16x32xf32>
    %818 = arith.addf %814, %817 : vector<16x32xf32>
    %819 = vector.extract_strided_slice %782 {offsets = [16, 0], sizes = [16, 32], strides = [1, 1]} : vector<32x32xf32> to vector<16x32xf32>
    %cst_383 = arith.constant 0.000000e+00 : f32
    %820 = vector.shape_cast %789 : vector<16x1xi1> to vector<16x1xi1>
    %821 = vector.broadcast %820 : vector<16x1xi1> to vector<16x32xi1>
    %822 = vector.broadcast %cst_383 : f32 to vector<16x32xf32>
    %823 = arith.select %821, %819, %822 : vector<16x32xi1>, vector<16x32xf32>
    %c80_384 = arith.constant 80 : index
    %c0_385 = arith.constant 0 : index
    %824 = vector.load %arg12[%c80_384, %c0_385] : memref<128x32xf32, #tpu.memory_space<vmem>>, vector<16x32xf32>
    %825 = vector.broadcast %37 : f32 to vector<16x32xf32>
    %826 = arith.mulf %825, %824 : vector<16x32xf32>
    %827 = arith.addf %823, %826 : vector<16x32xf32>
    %c80_386 = arith.constant 80 : index
    %c0_387 = arith.constant 0 : index
    %828 = vector.load %arg11[%c80_386, %c0_387] : memref<128x32xf32, #tpu.memory_space<vmem>>, vector<16x32xf32>
    tpu.vector_store %arg11[%c80_386, %c0_387], %818 {strides = array<i32>} : memref<128x32xf32, #tpu.memory_space<vmem>>, vector<16x32xf32>,
    %c80_388 = arith.constant 80 : index
    %c0_389 = arith.constant 0 : index
    %829 = vector.load %arg12[%c80_388, %c0_389] : memref<128x32xf32, #tpu.memory_space<vmem>>, vector<16x32xf32>
    tpu.vector_store %arg12[%c80_388, %c0_389], %827 {strides = array<i32>} : memref<128x32xf32, #tpu.memory_space<vmem>>, vector<16x32xf32>,
    %c0_390 = arith.constant 0 : index
    %c0_391 = arith.constant 0 : index
    %c320 = arith.constant 320 : index
    %830 = vector.load %arg10[%c0_390, %c0_391, %c320] : memref<1x16x512xf32, #tpu.memory_space<vmem>>, vector<1x16x32xf32>
    %831 = vector.shape_cast %830 : vector<1x16x32xf32> to vector<16x32xf32>
    %832 = vector.shape_cast %818 : vector<16x32xf32> to vector<1x16x32xf32>
    tpu.vector_store %arg10[%c0_390, %c0_391, %c320], %832 {strides = array<i32>} : memref<1x16x512xf32, #tpu.memory_space<vmem>>, vector<1x16x32xf32>,
    %c0_392 = arith.constant 0 : index
    %c0_393 = arith.constant 0 : index
    %c160 = arith.constant 160 : index
    %833 = vector.load %arg10[%c0_392, %c0_393, %c160] : memref<1x16x512xf32, #tpu.memory_space<vmem>>, vector<1x16x32xf32>
    %834 = vector.shape_cast %833 : vector<1x16x32xf32> to vector<16x32xf32>
    %835 = vector.shape_cast %827 : vector<16x32xf32> to vector<1x16x32xf32>
    tpu.vector_store %arg10[%c0_392, %c0_393, %c160], %835 {strides = array<i32>} : memref<1x16x512xf32, #tpu.memory_space<vmem>>, vector<1x16x32xf32>,
    %c0_394 = arith.constant 0 : index
    %c0_395 = arith.constant 0 : index
    %836 = vector.load %arg15[%c0_394, %c0_395] : memref<32x64xf32, #tpu.memory_space<vmem>>, vector<32x64xf32>
    %837 = arith.truncf %836 : vector<32x64xf32> to vector<32x64xbf16>
    %cst_396 = arith.constant dense<0.000000e+00> : vector<32x512xf32>
    %838 = tpu.matmul %837, %32, %cst_396 {dimension_numbers = #tpu.dot_dimension_numbers<[1], [0], [0], [1], [0, 0, 1, 1], [], []>} : vector<32x64xbf16>, vector<64x512xbf16>, vector<32x512xf32> -> vector<32x512xf32>
    %c96 = arith.constant 96 : index
    %c0_397 = arith.constant 0 : index
    %839 = vector.load %arg13[%c96, %c0_397] : memref<128x512xbf16, #tpu.memory_space<vmem>>, vector<16x512xbf16>
    %840 = arith.extf %839 : vector<16x512xbf16> to vector<16x512xf32>
    %841 = vector.extract_strided_slice %838 {offsets = [0, 0], sizes = [16, 512], strides = [1, 1]} : vector<32x512xf32> to vector<16x512xf32>
    %842 = arith.addf %840, %841 : vector<16x512xf32>
    %c96_398 = arith.constant 96 : index
    %c0_399 = arith.constant 0 : index
    %843 = vector.load %arg14[%c96_398, %c0_399] : memref<128x512xbf16, #tpu.memory_space<vmem>>, vector<16x512xbf16>
    %844 = arith.extf %843 : vector<16x512xbf16> to vector<16x512xf32>
    %845 = vector.extract_strided_slice %838 {offsets = [16, 0], sizes = [16, 512], strides = [1, 1]} : vector<32x512xf32> to vector<16x512xf32>
    %846 = arith.addf %844, %845 : vector<16x512xf32>
    %c0_400 = arith.constant 0 : index
    %c0_401 = arith.constant 0 : index
    %847 = vector.load %arg16[%c0_400, %c0_401] : memref<32x128xf32, #tpu.memory_space<vmem>>, vector<16x128xf32>
    %c16_402 = arith.constant 16 : index
    %c0_403 = arith.constant 0 : index
    %848 = vector.load %arg16[%c16_402, %c0_403] : memref<32x128xf32, #tpu.memory_space<vmem>>, vector<16x128xf32>
    %849 = vector.extract_strided_slice %842 {offsets = [0, 0], sizes = [16, 128], strides = [1, 1]} : vector<16x512xf32> to vector<16x128xf32>
    %850 = arith.negf %849 : vector<16x128xf32>
    %851 = math.exp %850 : vector<16x128xf32>
    %cst_404 = arith.constant 1.000000e+00 : f32
    %852 = vector.broadcast %cst_404 : f32 to vector<16x128xf32>
    %853 = arith.addf %852, %851 : vector<16x128xf32>
    %854 = arith.divf %852, %853 : vector<16x128xf32>
    %855 = vector.extract_strided_slice %842 {offsets = [0, 128], sizes = [16, 128], strides = [1, 1]} : vector<16x512xf32> to vector<16x128xf32>
    %856 = arith.negf %855 : vector<16x128xf32>
    %857 = math.exp %856 : vector<16x128xf32>
    %cst_405 = arith.constant 1.000000e+00 : f32
    %858 = vector.broadcast %cst_405 : f32 to vector<16x128xf32>
    %859 = arith.addf %858, %857 : vector<16x128xf32>
    %860 = arith.divf %858, %859 : vector<16x128xf32>
    %861 = vector.extract_strided_slice %842 {offsets = [0, 256], sizes = [16, 128], strides = [1, 1]} : vector<16x512xf32> to vector<16x128xf32>
    %862 = math.tanh %861 : vector<16x128xf32>
    %863 = vector.extract_strided_slice %842 {offsets = [0, 384], sizes = [16, 128], strides = [1, 1]} : vector<16x512xf32> to vector<16x128xf32>
    %864 = arith.negf %863 : vector<16x128xf32>
    %865 = math.exp %864 : vector<16x128xf32>
    %cst_406 = arith.constant 1.000000e+00 : f32
    %866 = vector.broadcast %cst_406 : f32 to vector<16x128xf32>
    %867 = arith.addf %866, %865 : vector<16x128xf32>
    %868 = arith.divf %866, %867 : vector<16x128xf32>
    %869 = arith.mulf %854, %862 : vector<16x128xf32>
    %870 = arith.mulf %860, %847 : vector<16x128xf32>
    %871 = arith.addf %869, %870 : vector<16x128xf32>
    %cst_407 = arith.constant -3.000000e+00 : f32
    %cst_408 = arith.constant 3.000000e+00 : f32
    %872 = vector.broadcast %cst_407 : f32 to vector<16x128xf32>
    %873 = arith.maximumf %872, %871 : vector<16x128xf32>
    %874 = vector.broadcast %cst_408 : f32 to vector<16x128xf32>
    %875 = arith.minimumf %874, %873 : vector<16x128xf32>
    %876 = math.tanh %875 : vector<16x128xf32>
    %877 = arith.mulf %868, %876 : vector<16x128xf32>
    %878 = vector.extract_strided_slice %846 {offsets = [0, 0], sizes = [16, 128], strides = [1, 1]} : vector<16x512xf32> to vector<16x128xf32>
    %879 = arith.negf %878 : vector<16x128xf32>
    %880 = math.exp %879 : vector<16x128xf32>
    %cst_409 = arith.constant 1.000000e+00 : f32
    %881 = vector.broadcast %cst_409 : f32 to vector<16x128xf32>
    %882 = arith.addf %881, %880 : vector<16x128xf32>
    %883 = arith.divf %881, %882 : vector<16x128xf32>
    %884 = vector.extract_strided_slice %846 {offsets = [0, 128], sizes = [16, 128], strides = [1, 1]} : vector<16x512xf32> to vector<16x128xf32>
    %885 = arith.negf %884 : vector<16x128xf32>
    %886 = math.exp %885 : vector<16x128xf32>
    %cst_410 = arith.constant 1.000000e+00 : f32
    %887 = vector.broadcast %cst_410 : f32 to vector<16x128xf32>
    %888 = arith.addf %887, %886 : vector<16x128xf32>
    %889 = arith.divf %887, %888 : vector<16x128xf32>
    %890 = vector.extract_strided_slice %846 {offsets = [0, 256], sizes = [16, 128], strides = [1, 1]} : vector<16x512xf32> to vector<16x128xf32>
    %891 = math.tanh %890 : vector<16x128xf32>
    %892 = vector.extract_strided_slice %846 {offsets = [0, 384], sizes = [16, 128], strides = [1, 1]} : vector<16x512xf32> to vector<16x128xf32>
    %893 = arith.negf %892 : vector<16x128xf32>
    %894 = math.exp %893 : vector<16x128xf32>
    %cst_411 = arith.constant 1.000000e+00 : f32
    %895 = vector.broadcast %cst_411 : f32 to vector<16x128xf32>
    %896 = arith.addf %895, %894 : vector<16x128xf32>
    %897 = arith.divf %895, %896 : vector<16x128xf32>
    %898 = arith.mulf %883, %891 : vector<16x128xf32>
    %899 = arith.mulf %889, %848 : vector<16x128xf32>
    %900 = arith.addf %898, %899 : vector<16x128xf32>
    %cst_412 = arith.constant -3.000000e+00 : f32
    %cst_413 = arith.constant 3.000000e+00 : f32
    %901 = vector.broadcast %cst_412 : f32 to vector<16x128xf32>
    %902 = arith.maximumf %901, %900 : vector<16x128xf32>
    %903 = vector.broadcast %cst_413 : f32 to vector<16x128xf32>
    %904 = arith.minimumf %903, %902 : vector<16x128xf32>
    %905 = math.tanh %904 : vector<16x128xf32>
    %906 = arith.mulf %897, %905 : vector<16x128xf32>
    %c0_414 = arith.constant 0 : index
    %c0_415 = arith.constant 0 : index
    %907 = vector.load %arg17[%c0_414, %c0_415] : memref<32x256xf32, #tpu.memory_space<vmem>>, vector<16x128xf32>
    tpu.vector_store %arg17[%c0_414, %c0_415], %877 {strides = array<i32>} : memref<32x256xf32, #tpu.memory_space<vmem>>, vector<16x128xf32>,
    %c16_416 = arith.constant 16 : index
    %c128_417 = arith.constant 128 : index
    %908 = vector.load %arg17[%c16_416, %c128_417] : memref<32x256xf32, #tpu.memory_space<vmem>>, vector<16x128xf32>
    tpu.vector_store %arg17[%c16_416, %c128_417], %906 {strides = array<i32>} : memref<32x256xf32, #tpu.memory_space<vmem>>, vector<16x128xf32>,
    %c0_418 = arith.constant 0 : index
    %c0_419 = arith.constant 0 : index
    %909 = vector.load %arg17[%c0_418, %c0_419] : memref<32x256xf32, #tpu.memory_space<vmem>>, vector<32x256xf32>
    %910 = arith.truncf %909 : vector<32x256xf32> to vector<32x256xbf16>
    %cst_420 = arith.constant dense<0.000000e+00> : vector<32x32xf32>
    %911 = tpu.matmul %910, %34, %cst_420 {dimension_numbers = #tpu.dot_dimension_numbers<[1], [0], [0], [1], [0, 0, 1, 1], [], []>} : vector<32x256xbf16>, vector<256x32xbf16>, vector<32x32xf32> -> vector<32x32xf32>
    %cst_421 = arith.constant -3.000000e+00 : f32
    %cst_422 = arith.constant 3.000000e+00 : f32
    %912 = vector.broadcast %cst_421 : f32 to vector<32x32xf32>
    %913 = arith.maximumf %912, %911 : vector<32x32xf32>
    %914 = vector.broadcast %cst_422 : f32 to vector<32x32xf32>
    %915 = arith.minimumf %914, %913 : vector<32x32xf32>
    %c96_423 = arith.constant 96 : index
    %c0_424 = arith.constant 0 : index
    %916 = vector.load %arg3[%c96_423, %c0_424] : memref<128x2xf32, #tpu.memory_space<vmem>>, vector<16x2xf32>
    %917 = vector.extract_strided_slice %916 {offsets = [0, 0], sizes = [16, 1], strides = [1, 1]} : vector<16x2xf32> to vector<16x1xf32>
    %cst_425 = arith.constant 5.000000e-01 : f32
    %918 = vector.broadcast %cst_425 : f32 to vector<16x1xf32>
    %919 = arith.cmpf ogt, %917, %918 : vector<16x1xf32>
    %920 = vector.extract_strided_slice %916 {offsets = [0, 1], sizes = [16, 1], strides = [1, 1]} : vector<16x2xf32> to vector<16x1xf32>
    %cst_426 = arith.constant 5.000000e-01 : f32
    %921 = vector.broadcast %cst_426 : f32 to vector<16x1xf32>
    %922 = arith.cmpf ogt, %920, %921 : vector<16x1xf32>
    %923 = vector.shape_cast %919 : vector<16x1xi1> to vector<16x1xi1>
    %924 = vector.broadcast %923 : vector<16x1xi1> to vector<16x128xi1>
    %925 = arith.select %924, %875, %847 : vector<16x128xi1>, vector<16x128xf32>
    %c0_427 = arith.constant 0 : index
    %c0_428 = arith.constant 0 : index
    %926 = vector.load %arg16[%c0_427, %c0_428] : memref<32x128xf32, #tpu.memory_space<vmem>>, vector<16x128xf32>
    tpu.vector_store %arg16[%c0_427, %c0_428], %925 {strides = array<i32>} : memref<32x128xf32, #tpu.memory_space<vmem>>, vector<16x128xf32>,
    %927 = vector.shape_cast %922 : vector<16x1xi1> to vector<16x1xi1>
    %928 = vector.broadcast %927 : vector<16x1xi1> to vector<16x128xi1>
    %929 = arith.select %928, %904, %848 : vector<16x128xi1>, vector<16x128xf32>
    %c16_429 = arith.constant 16 : index
    %c0_430 = arith.constant 0 : index
    %930 = vector.load %arg16[%c16_429, %c0_430] : memref<32x128xf32, #tpu.memory_space<vmem>>, vector<16x128xf32>
    tpu.vector_store %arg16[%c16_429, %c0_430], %929 {strides = array<i32>} : memref<32x128xf32, #tpu.memory_space<vmem>>, vector<16x128xf32>,
    %931 = vector.extract_strided_slice %915 {offsets = [0, 0], sizes = [16, 32], strides = [1, 1]} : vector<32x32xf32> to vector<16x32xf32>
    %c0_431 = arith.constant 0 : index
    %c0_432 = arith.constant 0 : index
    %932 = vector.load %arg15[%c0_431, %c0_432] : memref<32x64xf32, #tpu.memory_space<vmem>>, vector<16x32xf32>
    %933 = vector.shape_cast %919 : vector<16x1xi1> to vector<16x1xi1>
    %934 = vector.broadcast %933 : vector<16x1xi1> to vector<16x32xi1>
    %935 = arith.select %934, %931, %932 : vector<16x32xi1>, vector<16x32xf32>
    %936 = vector.extract_strided_slice %915 {offsets = [16, 0], sizes = [16, 32], strides = [1, 1]} : vector<32x32xf32> to vector<16x32xf32>
    %c16_433 = arith.constant 16 : index
    %c32_434 = arith.constant 32 : index
    %937 = vector.load %arg15[%c16_433, %c32_434] : memref<32x64xf32, #tpu.memory_space<vmem>>, vector<16x32xf32>
    %938 = vector.shape_cast %922 : vector<16x1xi1> to vector<16x1xi1>
    %939 = vector.broadcast %938 : vector<16x1xi1> to vector<16x32xi1>
    %940 = arith.select %939, %936, %937 : vector<16x32xi1>, vector<16x32xf32>
    %c0_435 = arith.constant 0 : index
    %c0_436 = arith.constant 0 : index
    %941 = vector.load %arg15[%c0_435, %c0_436] : memref<32x64xf32, #tpu.memory_space<vmem>>, vector<16x32xf32>
    tpu.vector_store %arg15[%c0_435, %c0_436], %935 {strides = array<i32>} : memref<32x64xf32, #tpu.memory_space<vmem>>, vector<16x32xf32>,
    %c16_437 = arith.constant 16 : index
    %c32_438 = arith.constant 32 : index
    %942 = vector.load %arg15[%c16_437, %c32_438] : memref<32x64xf32, #tpu.memory_space<vmem>>, vector<16x32xf32>
    tpu.vector_store %arg15[%c16_437, %c32_438], %940 {strides = array<i32>} : memref<32x64xf32, #tpu.memory_space<vmem>>, vector<16x32xf32>,
    %943 = vector.extract_strided_slice %915 {offsets = [0, 0], sizes = [16, 32], strides = [1, 1]} : vector<32x32xf32> to vector<16x32xf32>
    %cst_439 = arith.constant 0.000000e+00 : f32
    %944 = vector.shape_cast %919 : vector<16x1xi1> to vector<16x1xi1>
    %945 = vector.broadcast %944 : vector<16x1xi1> to vector<16x32xi1>
    %946 = vector.broadcast %cst_439 : f32 to vector<16x32xf32>
    %947 = arith.select %945, %943, %946 : vector<16x32xi1>, vector<16x32xf32>
    %c96_440 = arith.constant 96 : index
    %c0_441 = arith.constant 0 : index
    %948 = vector.load %arg11[%c96_440, %c0_441] : memref<128x32xf32, #tpu.memory_space<vmem>>, vector<16x32xf32>
    %949 = vector.broadcast %37 : f32 to vector<16x32xf32>
    %950 = arith.mulf %949, %948 : vector<16x32xf32>
    %951 = arith.addf %947, %950 : vector<16x32xf32>
    %952 = vector.extract_strided_slice %915 {offsets = [16, 0], sizes = [16, 32], strides = [1, 1]} : vector<32x32xf32> to vector<16x32xf32>
    %cst_442 = arith.constant 0.000000e+00 : f32
    %953 = vector.shape_cast %922 : vector<16x1xi1> to vector<16x1xi1>
    %954 = vector.broadcast %953 : vector<16x1xi1> to vector<16x32xi1>
    %955 = vector.broadcast %cst_442 : f32 to vector<16x32xf32>
    %956 = arith.select %954, %952, %955 : vector<16x32xi1>, vector<16x32xf32>
    %c96_443 = arith.constant 96 : index
    %c0_444 = arith.constant 0 : index
    %957 = vector.load %arg12[%c96_443, %c0_444] : memref<128x32xf32, #tpu.memory_space<vmem>>, vector<16x32xf32>
    %958 = vector.broadcast %37 : f32 to vector<16x32xf32>
    %959 = arith.mulf %958, %957 : vector<16x32xf32>
    %960 = arith.addf %956, %959 : vector<16x32xf32>
    %c96_445 = arith.constant 96 : index
    %c0_446 = arith.constant 0 : index
    %961 = vector.load %arg11[%c96_445, %c0_446] : memref<128x32xf32, #tpu.memory_space<vmem>>, vector<16x32xf32>
    tpu.vector_store %arg11[%c96_445, %c0_446], %951 {strides = array<i32>} : memref<128x32xf32, #tpu.memory_space<vmem>>, vector<16x32xf32>,
    %c96_447 = arith.constant 96 : index
    %c0_448 = arith.constant 0 : index
    %962 = vector.load %arg12[%c96_447, %c0_448] : memref<128x32xf32, #tpu.memory_space<vmem>>, vector<16x32xf32>
    tpu.vector_store %arg12[%c96_447, %c0_448], %960 {strides = array<i32>} : memref<128x32xf32, #tpu.memory_space<vmem>>, vector<16x32xf32>,
    %c0_449 = arith.constant 0 : index
    %c0_450 = arith.constant 0 : index
    %c384 = arith.constant 384 : index
    %963 = vector.load %arg10[%c0_449, %c0_450, %c384] : memref<1x16x512xf32, #tpu.memory_space<vmem>>, vector<1x16x32xf32>
    %964 = vector.shape_cast %963 : vector<1x16x32xf32> to vector<16x32xf32>
    %965 = vector.shape_cast %951 : vector<16x32xf32> to vector<1x16x32xf32>
    tpu.vector_store %arg10[%c0_449, %c0_450, %c384], %965 {strides = array<i32>} : memref<1x16x512xf32, #tpu.memory_space<vmem>>, vector<1x16x32xf32>,
    %c0_451 = arith.constant 0 : index
    %c0_452 = arith.constant 0 : index
    %c96_453 = arith.constant 96 : index
    %966 = vector.load %arg10[%c0_451, %c0_452, %c96_453] : memref<1x16x512xf32, #tpu.memory_space<vmem>>, vector<1x16x32xf32>
    %967 = vector.shape_cast %966 : vector<1x16x32xf32> to vector<16x32xf32>
    %968 = vector.shape_cast %960 : vector<16x32xf32> to vector<1x16x32xf32>
    tpu.vector_store %arg10[%c0_451, %c0_452, %c96_453], %968 {strides = array<i32>} : memref<1x16x512xf32, #tpu.memory_space<vmem>>, vector<1x16x32xf32>,
    %c0_454 = arith.constant 0 : index
    %c0_455 = arith.constant 0 : index
    %969 = vector.load %arg15[%c0_454, %c0_455] : memref<32x64xf32, #tpu.memory_space<vmem>>, vector<32x64xf32>
    %970 = arith.truncf %969 : vector<32x64xf32> to vector<32x64xbf16>
    %cst_456 = arith.constant dense<0.000000e+00> : vector<32x512xf32>
    %971 = tpu.matmul %970, %32, %cst_456 {dimension_numbers = #tpu.dot_dimension_numbers<[1], [0], [0], [1], [0, 0, 1, 1], [], []>} : vector<32x64xbf16>, vector<64x512xbf16>, vector<32x512xf32> -> vector<32x512xf32>
    %c112 = arith.constant 112 : index
    %c0_457 = arith.constant 0 : index
    %972 = vector.load %arg13[%c112, %c0_457] : memref<128x512xbf16, #tpu.memory_space<vmem>>, vector<16x512xbf16>
    %973 = arith.extf %972 : vector<16x512xbf16> to vector<16x512xf32>
    %974 = vector.extract_strided_slice %971 {offsets = [0, 0], sizes = [16, 512], strides = [1, 1]} : vector<32x512xf32> to vector<16x512xf32>
    %975 = arith.addf %973, %974 : vector<16x512xf32>
    %c112_458 = arith.constant 112 : index
    %c0_459 = arith.constant 0 : index
    %976 = vector.load %arg14[%c112_458, %c0_459] : memref<128x512xbf16, #tpu.memory_space<vmem>>, vector<16x512xbf16>
    %977 = arith.extf %976 : vector<16x512xbf16> to vector<16x512xf32>
    %978 = vector.extract_strided_slice %971 {offsets = [16, 0], sizes = [16, 512], strides = [1, 1]} : vector<32x512xf32> to vector<16x512xf32>
    %979 = arith.addf %977, %978 : vector<16x512xf32>
    %c0_460 = arith.constant 0 : index
    %c0_461 = arith.constant 0 : index
    %980 = vector.load %arg16[%c0_460, %c0_461] : memref<32x128xf32, #tpu.memory_space<vmem>>, vector<16x128xf32>
    %c16_462 = arith.constant 16 : index
    %c0_463 = arith.constant 0 : index
    %981 = vector.load %arg16[%c16_462, %c0_463] : memref<32x128xf32, #tpu.memory_space<vmem>>, vector<16x128xf32>
    %982 = vector.extract_strided_slice %975 {offsets = [0, 0], sizes = [16, 128], strides = [1, 1]} : vector<16x512xf32> to vector<16x128xf32>
    %983 = arith.negf %982 : vector<16x128xf32>
    %984 = math.exp %983 : vector<16x128xf32>
    %cst_464 = arith.constant 1.000000e+00 : f32
    %985 = vector.broadcast %cst_464 : f32 to vector<16x128xf32>
    %986 = arith.addf %985, %984 : vector<16x128xf32>
    %987 = arith.divf %985, %986 : vector<16x128xf32>
    %988 = vector.extract_strided_slice %975 {offsets = [0, 128], sizes = [16, 128], strides = [1, 1]} : vector<16x512xf32> to vector<16x128xf32>
    %989 = arith.negf %988 : vector<16x128xf32>
    %990 = math.exp %989 : vector<16x128xf32>
    %cst_465 = arith.constant 1.000000e+00 : f32
    %991 = vector.broadcast %cst_465 : f32 to vector<16x128xf32>
    %992 = arith.addf %991, %990 : vector<16x128xf32>
    %993 = arith.divf %991, %992 : vector<16x128xf32>
    %994 = vector.extract_strided_slice %975 {offsets = [0, 256], sizes = [16, 128], strides = [1, 1]} : vector<16x512xf32> to vector<16x128xf32>
    %995 = math.tanh %994 : vector<16x128xf32>
    %996 = vector.extract_strided_slice %975 {offsets = [0, 384], sizes = [16, 128], strides = [1, 1]} : vector<16x512xf32> to vector<16x128xf32>
    %997 = arith.negf %996 : vector<16x128xf32>
    %998 = math.exp %997 : vector<16x128xf32>
    %cst_466 = arith.constant 1.000000e+00 : f32
    %999 = vector.broadcast %cst_466 : f32 to vector<16x128xf32>
    %1000 = arith.addf %999, %998 : vector<16x128xf32>
    %1001 = arith.divf %999, %1000 : vector<16x128xf32>
    %1002 = arith.mulf %987, %995 : vector<16x128xf32>
    %1003 = arith.mulf %993, %980 : vector<16x128xf32>
    %1004 = arith.addf %1002, %1003 : vector<16x128xf32>
    %cst_467 = arith.constant -3.000000e+00 : f32
    %cst_468 = arith.constant 3.000000e+00 : f32
    %1005 = vector.broadcast %cst_467 : f32 to vector<16x128xf32>
    %1006 = arith.maximumf %1005, %1004 : vector<16x128xf32>
    %1007 = vector.broadcast %cst_468 : f32 to vector<16x128xf32>
    %1008 = arith.minimumf %1007, %1006 : vector<16x128xf32>
    %1009 = math.tanh %1008 : vector<16x128xf32>
    %1010 = arith.mulf %1001, %1009 : vector<16x128xf32>
    %1011 = vector.extract_strided_slice %979 {offsets = [0, 0], sizes = [16, 128], strides = [1, 1]} : vector<16x512xf32> to vector<16x128xf32>
    %1012 = arith.negf %1011 : vector<16x128xf32>
    %1013 = math.exp %1012 : vector<16x128xf32>
    %cst_469 = arith.constant 1.000000e+00 : f32
    %1014 = vector.broadcast %cst_469 : f32 to vector<16x128xf32>
    %1015 = arith.addf %1014, %1013 : vector<16x128xf32>
    %1016 = arith.divf %1014, %1015 : vector<16x128xf32>
    %1017 = vector.extract_strided_slice %979 {offsets = [0, 128], sizes = [16, 128], strides = [1, 1]} : vector<16x512xf32> to vector<16x128xf32>
    %1018 = arith.negf %1017 : vector<16x128xf32>
    %1019 = math.exp %1018 : vector<16x128xf32>
    %cst_470 = arith.constant 1.000000e+00 : f32
    %1020 = vector.broadcast %cst_470 : f32 to vector<16x128xf32>
    %1021 = arith.addf %1020, %1019 : vector<16x128xf32>
    %1022 = arith.divf %1020, %1021 : vector<16x128xf32>
    %1023 = vector.extract_strided_slice %979 {offsets = [0, 256], sizes = [16, 128], strides = [1, 1]} : vector<16x512xf32> to vector<16x128xf32>
    %1024 = math.tanh %1023 : vector<16x128xf32>
    %1025 = vector.extract_strided_slice %979 {offsets = [0, 384], sizes = [16, 128], strides = [1, 1]} : vector<16x512xf32> to vector<16x128xf32>
    %1026 = arith.negf %1025 : vector<16x128xf32>
    %1027 = math.exp %1026 : vector<16x128xf32>
    %cst_471 = arith.constant 1.000000e+00 : f32
    %1028 = vector.broadcast %cst_471 : f32 to vector<16x128xf32>
    %1029 = arith.addf %1028, %1027 : vector<16x128xf32>
    %1030 = arith.divf %1028, %1029 : vector<16x128xf32>
    %1031 = arith.mulf %1016, %1024 : vector<16x128xf32>
    %1032 = arith.mulf %1022, %981 : vector<16x128xf32>
    %1033 = arith.addf %1031, %1032 : vector<16x128xf32>
    %cst_472 = arith.constant -3.000000e+00 : f32
    %cst_473 = arith.constant 3.000000e+00 : f32
    %1034 = vector.broadcast %cst_472 : f32 to vector<16x128xf32>
    %1035 = arith.maximumf %1034, %1033 : vector<16x128xf32>
    %1036 = vector.broadcast %cst_473 : f32 to vector<16x128xf32>
    %1037 = arith.minimumf %1036, %1035 : vector<16x128xf32>
    %1038 = math.tanh %1037 : vector<16x128xf32>
    %1039 = arith.mulf %1030, %1038 : vector<16x128xf32>
    %c0_474 = arith.constant 0 : index
    %c0_475 = arith.constant 0 : index
    %1040 = vector.load %arg17[%c0_474, %c0_475] : memref<32x256xf32, #tpu.memory_space<vmem>>, vector<16x128xf32>
    tpu.vector_store %arg17[%c0_474, %c0_475], %1010 {strides = array<i32>} : memref<32x256xf32, #tpu.memory_space<vmem>>, vector<16x128xf32>,
    %c16_476 = arith.constant 16 : index
    %c128_477 = arith.constant 128 : index
    %1041 = vector.load %arg17[%c16_476, %c128_477] : memref<32x256xf32, #tpu.memory_space<vmem>>, vector<16x128xf32>
    tpu.vector_store %arg17[%c16_476, %c128_477], %1039 {strides = array<i32>} : memref<32x256xf32, #tpu.memory_space<vmem>>, vector<16x128xf32>,
    %c0_478 = arith.constant 0 : index
    %c0_479 = arith.constant 0 : index
    %1042 = vector.load %arg17[%c0_478, %c0_479] : memref<32x256xf32, #tpu.memory_space<vmem>>, vector<32x256xf32>
    %1043 = arith.truncf %1042 : vector<32x256xf32> to vector<32x256xbf16>
    %cst_480 = arith.constant dense<0.000000e+00> : vector<32x32xf32>
    %1044 = tpu.matmul %1043, %34, %cst_480 {dimension_numbers = #tpu.dot_dimension_numbers<[1], [0], [0], [1], [0, 0, 1, 1], [], []>} : vector<32x256xbf16>, vector<256x32xbf16>, vector<32x32xf32> -> vector<32x32xf32>
    %cst_481 = arith.constant -3.000000e+00 : f32
    %cst_482 = arith.constant 3.000000e+00 : f32
    %1045 = vector.broadcast %cst_481 : f32 to vector<32x32xf32>
    %1046 = arith.maximumf %1045, %1044 : vector<32x32xf32>
    %1047 = vector.broadcast %cst_482 : f32 to vector<32x32xf32>
    %1048 = arith.minimumf %1047, %1046 : vector<32x32xf32>
    %c112_483 = arith.constant 112 : index
    %c0_484 = arith.constant 0 : index
    %1049 = vector.load %arg3[%c112_483, %c0_484] : memref<128x2xf32, #tpu.memory_space<vmem>>, vector<16x2xf32>
    %1050 = vector.extract_strided_slice %1049 {offsets = [0, 0], sizes = [16, 1], strides = [1, 1]} : vector<16x2xf32> to vector<16x1xf32>
    %cst_485 = arith.constant 5.000000e-01 : f32
    %1051 = vector.broadcast %cst_485 : f32 to vector<16x1xf32>
    %1052 = arith.cmpf ogt, %1050, %1051 : vector<16x1xf32>
    %1053 = vector.extract_strided_slice %1049 {offsets = [0, 1], sizes = [16, 1], strides = [1, 1]} : vector<16x2xf32> to vector<16x1xf32>
    %cst_486 = arith.constant 5.000000e-01 : f32
    %1054 = vector.broadcast %cst_486 : f32 to vector<16x1xf32>
    %1055 = arith.cmpf ogt, %1053, %1054 : vector<16x1xf32>
    %1056 = vector.shape_cast %1052 : vector<16x1xi1> to vector<16x1xi1>
    %1057 = vector.broadcast %1056 : vector<16x1xi1> to vector<16x128xi1>
    %1058 = arith.select %1057, %1008, %980 : vector<16x128xi1>, vector<16x128xf32>
    %c0_487 = arith.constant 0 : index
    %c0_488 = arith.constant 0 : index
    %1059 = vector.load %arg16[%c0_487, %c0_488] : memref<32x128xf32, #tpu.memory_space<vmem>>, vector<16x128xf32>
    tpu.vector_store %arg16[%c0_487, %c0_488], %1058 {strides = array<i32>} : memref<32x128xf32, #tpu.memory_space<vmem>>, vector<16x128xf32>,
    %1060 = vector.shape_cast %1055 : vector<16x1xi1> to vector<16x1xi1>
    %1061 = vector.broadcast %1060 : vector<16x1xi1> to vector<16x128xi1>
    %1062 = arith.select %1061, %1037, %981 : vector<16x128xi1>, vector<16x128xf32>
    %c16_489 = arith.constant 16 : index
    %c0_490 = arith.constant 0 : index
    %1063 = vector.load %arg16[%c16_489, %c0_490] : memref<32x128xf32, #tpu.memory_space<vmem>>, vector<16x128xf32>
    tpu.vector_store %arg16[%c16_489, %c0_490], %1062 {strides = array<i32>} : memref<32x128xf32, #tpu.memory_space<vmem>>, vector<16x128xf32>,
    %1064 = vector.extract_strided_slice %1048 {offsets = [0, 0], sizes = [16, 32], strides = [1, 1]} : vector<32x32xf32> to vector<16x32xf32>
    %c0_491 = arith.constant 0 : index
    %c0_492 = arith.constant 0 : index
    %1065 = vector.load %arg15[%c0_491, %c0_492] : memref<32x64xf32, #tpu.memory_space<vmem>>, vector<16x32xf32>
    %1066 = vector.shape_cast %1052 : vector<16x1xi1> to vector<16x1xi1>
    %1067 = vector.broadcast %1066 : vector<16x1xi1> to vector<16x32xi1>
    %1068 = arith.select %1067, %1064, %1065 : vector<16x32xi1>, vector<16x32xf32>
    %1069 = vector.extract_strided_slice %1048 {offsets = [16, 0], sizes = [16, 32], strides = [1, 1]} : vector<32x32xf32> to vector<16x32xf32>
    %c16_493 = arith.constant 16 : index
    %c32_494 = arith.constant 32 : index
    %1070 = vector.load %arg15[%c16_493, %c32_494] : memref<32x64xf32, #tpu.memory_space<vmem>>, vector<16x32xf32>
    %1071 = vector.shape_cast %1055 : vector<16x1xi1> to vector<16x1xi1>
    %1072 = vector.broadcast %1071 : vector<16x1xi1> to vector<16x32xi1>
    %1073 = arith.select %1072, %1069, %1070 : vector<16x32xi1>, vector<16x32xf32>
    %c0_495 = arith.constant 0 : index
    %c0_496 = arith.constant 0 : index
    %1074 = vector.load %arg15[%c0_495, %c0_496] : memref<32x64xf32, #tpu.memory_space<vmem>>, vector<16x32xf32>
    tpu.vector_store %arg15[%c0_495, %c0_496], %1068 {strides = array<i32>} : memref<32x64xf32, #tpu.memory_space<vmem>>, vector<16x32xf32>,
    %c16_497 = arith.constant 16 : index
    %c32_498 = arith.constant 32 : index
    %1075 = vector.load %arg15[%c16_497, %c32_498] : memref<32x64xf32, #tpu.memory_space<vmem>>, vector<16x32xf32>
    tpu.vector_store %arg15[%c16_497, %c32_498], %1073 {strides = array<i32>} : memref<32x64xf32, #tpu.memory_space<vmem>>, vector<16x32xf32>,
    %1076 = vector.extract_strided_slice %1048 {offsets = [0, 0], sizes = [16, 32], strides = [1, 1]} : vector<32x32xf32> to vector<16x32xf32>
    %cst_499 = arith.constant 0.000000e+00 : f32
    %1077 = vector.shape_cast %1052 : vector<16x1xi1> to vector<16x1xi1>
    %1078 = vector.broadcast %1077 : vector<16x1xi1> to vector<16x32xi1>
    %1079 = vector.broadcast %cst_499 : f32 to vector<16x32xf32>
    %1080 = arith.select %1078, %1076, %1079 : vector<16x32xi1>, vector<16x32xf32>
    %c112_500 = arith.constant 112 : index
    %c0_501 = arith.constant 0 : index
    %1081 = vector.load %arg11[%c112_500, %c0_501] : memref<128x32xf32, #tpu.memory_space<vmem>>, vector<16x32xf32>
    %1082 = vector.broadcast %37 : f32 to vector<16x32xf32>
    %1083 = arith.mulf %1082, %1081 : vector<16x32xf32>
    %1084 = arith.addf %1080, %1083 : vector<16x32xf32>
    %1085 = vector.extract_strided_slice %1048 {offsets = [16, 0], sizes = [16, 32], strides = [1, 1]} : vector<32x32xf32> to vector<16x32xf32>
    %cst_502 = arith.constant 0.000000e+00 : f32
    %1086 = vector.shape_cast %1055 : vector<16x1xi1> to vector<16x1xi1>
    %1087 = vector.broadcast %1086 : vector<16x1xi1> to vector<16x32xi1>
    %1088 = vector.broadcast %cst_502 : f32 to vector<16x32xf32>
    %1089 = arith.select %1087, %1085, %1088 : vector<16x32xi1>, vector<16x32xf32>
    %c112_503 = arith.constant 112 : index
    %c0_504 = arith.constant 0 : index
    %1090 = vector.load %arg12[%c112_503, %c0_504] : memref<128x32xf32, #tpu.memory_space<vmem>>, vector<16x32xf32>
    %1091 = vector.broadcast %37 : f32 to vector<16x32xf32>
    %1092 = arith.mulf %1091, %1090 : vector<16x32xf32>
    %1093 = arith.addf %1089, %1092 : vector<16x32xf32>
    %c112_505 = arith.constant 112 : index
    %c0_506 = arith.constant 0 : index
    %1094 = vector.load %arg11[%c112_505, %c0_506] : memref<128x32xf32, #tpu.memory_space<vmem>>, vector<16x32xf32>
    tpu.vector_store %arg11[%c112_505, %c0_506], %1084 {strides = array<i32>} : memref<128x32xf32, #tpu.memory_space<vmem>>, vector<16x32xf32>,
    %c112_507 = arith.constant 112 : index
    %c0_508 = arith.constant 0 : index
    %1095 = vector.load %arg12[%c112_507, %c0_508] : memref<128x32xf32, #tpu.memory_space<vmem>>, vector<16x32xf32>
    tpu.vector_store %arg12[%c112_507, %c0_508], %1093 {strides = array<i32>} : memref<128x32xf32, #tpu.memory_space<vmem>>, vector<16x32xf32>,
    %c0_509 = arith.constant 0 : index
    %c0_510 = arith.constant 0 : index
    %c448 = arith.constant 448 : index
    %1096 = vector.load %arg10[%c0_509, %c0_510, %c448] : memref<1x16x512xf32, #tpu.memory_space<vmem>>, vector<1x16x32xf32>
    %1097 = vector.shape_cast %1096 : vector<1x16x32xf32> to vector<16x32xf32>
    %1098 = vector.shape_cast %1084 : vector<16x32xf32> to vector<1x16x32xf32>
    tpu.vector_store %arg10[%c0_509, %c0_510, %c448], %1098 {strides = array<i32>} : memref<1x16x512xf32, #tpu.memory_space<vmem>>, vector<1x16x32xf32>,
    %c0_511 = arith.constant 0 : index
    %c0_512 = arith.constant 0 : index
    %c32_513 = arith.constant 32 : index
    %1099 = vector.load %arg10[%c0_511, %c0_512, %c32_513] : memref<1x16x512xf32, #tpu.memory_space<vmem>>, vector<1x16x32xf32>
    %1100 = vector.shape_cast %1099 : vector<1x16x32xf32> to vector<16x32xf32>
    %1101 = vector.shape_cast %1093 : vector<16x32xf32> to vector<1x16x32xf32>
    tpu.vector_store %arg10[%c0_511, %c0_512, %c32_513], %1101 {strides = array<i32>} : memref<1x16x512xf32, #tpu.memory_space<vmem>>, vector<1x16x32xf32>,
    return
  }
  func.func @transform_0(%arg0: i32) -> (i32, i32) {
    %c0_i32 = arith.constant 0 : i32
    %c0_i32_0 = arith.constant 0 : i32
    %c0_i32_1 = arith.constant 0 : i32
    return %c0_i32, %c0_i32_0 : i32, i32
  }
  func.func @transform_1(%arg0: i32) -> (i32, i32) {
    %c0_i32 = arith.constant 0 : i32
    %c0_i32_0 = arith.constant 0 : i32
    %c0_i32_1 = arith.constant 0 : i32
    return %c0_i32, %c0_i32_0 : i32, i32
  }
  func.func @transform_2(%arg0: i32) -> (i32, i32) {
    %c0_i32 = arith.constant 0 : i32
    %c0_i32_0 = arith.constant 0 : i32
    %c0_i32_1 = arith.constant 0 : i32
    return %c0_i32, %c0_i32_0 : i32, i32
  }
  func.func @transform_3(%arg0: i32) -> (i32, i32, i32) {
    %c0_i32 = arith.constant 0 : i32
    %c0_i32_0 = arith.constant 0 : i32
    %c0_i32_1 = arith.constant 0 : i32
    return %arg0, %c0_i32, %c0_i32_0 : i32, i32, i32
  }
  func.func @transform_4(%arg0: i32) -> (i32, i32, i32) {
    %c0_i32 = arith.constant 0 : i32
    %c0_i32_0 = arith.constant 0 : i32
    %c0_i32_1 = arith.constant 0 : i32
    return %arg0, %c0_i32, %c0_i32_0 : i32, i32, i32
  }
  func.func @transform_5(%arg0: i32) -> (i32, i32, i32) {
    %c0_i32 = arith.constant 0 : i32
    %c0_i32_0 = arith.constant 0 : i32
    %c0_i32_1 = arith.constant 0 : i32
    return %arg0, %c0_i32, %c0_i32_0 : i32, i32, i32
  }
  func.func @transform_6(%arg0: i32) -> (i32, i32, i32) {
    %c0_i32 = arith.constant 0 : i32
    %c0_i32_0 = arith.constant 0 : i32
    %c0_i32_1 = arith.constant 0 : i32
    return %arg0, %c0_i32, %c0_i32_0 : i32, i32, i32
  }
  func.func @transform_7(%arg0: i32) -> (i32, i32, i32) {
    %c0_i32 = arith.constant 0 : i32
    %c0_i32_0 = arith.constant 0 : i32
    %c0_i32_1 = arith.constant 0 : i32
    return %arg0, %c0_i32, %c0_i32_0 : i32, i32, i32
  }
  func.func @transform_8(%arg0: i32) -> (i32, i32, i32) {
    %c0_i32 = arith.constant 0 : i32
    %c0_i32_0 = arith.constant 0 : i32
    %c0_i32_1 = arith.constant 0 : i32
    return %arg0, %c0_i32, %c0_i32_0 : i32, i32, i32
  }
  func.func @transform_9(%arg0: i32) -> (i32, i32, i32) {
    %c0_i32 = arith.constant 0 : i32
    %c0_i32_0 = arith.constant 0 : i32
    %c0_i32_1 = arith.constant 0 : i32
    return %arg0, %c0_i32, %c0_i32_0 : i32, i32, i32
  }
}

</mosaic_0001>

<bundles_post_ra>
// kernel: tpu_custom_call.1
= control target key start
LH: loop header
LB: loop body
LE: loop exit
PB: predicated region body
PF: predicated region fallthrough
CT: control target
= control target key end

     0   :  { %s9446_s0 = inlined_call_operand.vmem [shape: f32[128,32], index: 0, kind: input, shape index: {}]   ;;  %s9447_s1 = inlined_call_operand.vmem [shape: f32[128,32], index: 1, kind: input, shape index: {}]   ;;  %s9448_s2 = inlined_call_operand.vmem [shape: f32[128,2], index: 2, kind: input, shape index: {}]   ;;  %s9449_s3 = inlined_call_operand.vmem [shape: bf16[2,32,512], index: 3, kind: input, shape index: {}]   ;;  %s9450_s4 = inlined_call_operand.vmem [shape: bf16[2,32,512], index: 4, kind: input, shape index: {}]   ;;  %s9451_s5 = inlined_call_operand.vmem [shape: bf16[2,64,512], index: 5, kind: input, shape index: {}]   ;;  %s9452_s6 = inlined_call_operand.vmem [shape: f32[2,1,512], index: 6, kind: input, shape index: {}]   ;;  %s9453_s7 = inlined_call_operand.vmem [shape: f32[2,1,512], index: 7, kind: input, shape index: {}]   ;;  %s9454_s8 = inlined_call_operand.vmem [shape: bf16[2,256,32], index: 8, kind: input, shape index: {}]   ;;  %s9455_s9 = inlined_call_operand.hbm [shape: f32[2,16,512], index: 9, kind: output, shape index: {}]  }
   0x1   :  { %9544 = sst [smem:[#allocation71_spill]] %s9449_s3 }
   0x2   :  { %14 = vsyncpa [#allocation10], 0 }
   0x3   :  { %16 = vsyncpa [#allocation10 + $0x1], 0  ;;  %s7010_s30 = smov 0   ;;  %s7012_s10 = smov 0  }
   0x4   :  { %s7014_s11 = smov 0   ;;  %s7016_s12 = smov 0  }
   0x5 LB: > { %9545 = sst [smem:[#allocation12_spill]] %s6937_s30  ;;  %s7031_s13 = sadd.s32 4294967295, %s6949_s12   ;;  %s6949_s12 = sphi %s7016_s12, %s9699_s12   ;;  %s6945_s11 = sphi %s7014_s11, %s9701_s11   ;;  %s6941_s10 = sphi %s7012_s10, %s9703_s10   ;;  %s6937_s30 = sphi %s7010_s30, %s9702_s30  }
   0x6   : > { %9546 = sst [smem:[#allocation13_spill]] %s6945_s11  ;;  %s5480_s14 = sadd.s32 4294967294, %s6949_s12  }
   0x7   : > { %9547 = sst [smem:[#allocation14_spill]] %s6949_s12  ;;  %s7035_s15 = sadd.s32 1, %s6949_s12  }
   0x8   : > { %9548 = sst [smem:[#allocation15_spill]] %s7035_s15  ;;  %s248_s16 = sadd.s32 1, %s6945_s11 }
   0x9   : > { %s245_s17 = ssub.s32 %s6949_s12, %s7035_s15  ;;  %p258_p0 = scmp.ne.s32.totalorder %s6945_s11, %s6941_s10 }
   0xa   : > { %p246_p1 = scmp.eq.s32.totalorder %s245_s17, 0  ;;  %p259_p2 = scmp.eq.s32.totalorder %s7031_s13, 1 }
   0xb   : > { %p264_p3 = scmp.ne.s32.totalorder %s6941_s10, %s6937_s30  ;;  %p265_p4 = scmp.eq.s32.totalorder %s5480_s14, 1 }
   0xc   : > { %s7046_s18 = scalar_select %p246_p1, %s6945_s11, %s248_s16  }
   0xd   : > { %p7048_p5 = por %p259_p2, %p258_p0  ;;  %p7052_p6 = por %p265_p4, %p264_p3 }
   0xe   : > { %9549 = sst [smem:[#allocation16_spill]] %s7046_s18  ;;  %p5483_p7 = scmp.ge.s32.totalorder %s6949_s12, 1 }
   0xf   : > { %s9551_s20 = scalar_select %p7052_p6, 1, 0 }
  0x10   : > { %p338_p8 = scmp.lt.s32.totalorder %s6949_s12, 3 }
  0x11   : > { %9552 = sst [smem:[#allocation17_spill]] %s9551_s20 }
  0x12   : > { %p339_p9 = pnand %p5483_p7, %p338_p8 }
  0x14   : > { %342 = sbr.rel (%p339_p9) target bundleno = 4898 (0x1322), region = 56 }
  0x19   : > { %s9459_s21 = sand.u32 1, %s6941_s10   ;;  %p397_p10 = scmp.lt.s32.totalorder %s7031_s13, 1 }
  0x1a   : > { %s5484_s22 = sshll.u32 %s9459_s21, 6  ;;  %s9553_s3 = sld [smem:[#allocation71_spill]] }
  0x1b   : > { %s398_s23 = scalar_select %p397_p10, %s7031_s13, 1 }
  0x1c   : > { %s7093_s14 = scalar_lea.vmem [#allocation9], %s5484_s22  ;;  %p5495_p11 = scmp.ne.s32.totalorder %s7031_s13, 0 }
  0x1d   : > { %s5837_s24 = sshll.u32 %s398_s23, 6  ;;  %s5839_s25 = sshll.u32 %s398_s23, 7 }
  0x1e   : > { %s7071_s16 = scalar_lea.vmem %s9450_s4, %s5837_s24  ;;  %s7076_s11 = scalar_lea.vmem %s9451_s5, %s5839_s25 }
  0x1f   : > { %s5491_s15 = sshll.u32 %s398_s23, 2  ;;  %429 = sbr.rel (%p5495_p11) target bundleno = 53 (0x35), region = 60 }
  0x20   : > { %s7066_s28 = scalar_lea.vmem %s9553_s3, %s5837_s24  ;;  %s7081_s30 = scalar_lea.vmem %s9452_s6, %s5491_s15 }
  0x21   : > { %s7086_s27 = scalar_lea.vmem %s9453_s7, %s5491_s15  ;;  %s7091_s24 = scalar_lea.vmem %s9454_s8, %s5839_s25 }
  0x24   : > { %v430_v0 = vld [vmem:[%s9446_s0] sm:$0xff]  ;;  %vm446_vm0 = vcmask 261120   ;;  %v431_v1 = vld [vmem:[%s9446_s0 + $0x8] sm:$0xff]  ;;  %v432_v2 = vld [vmem:[%s9446_s0 + $0x10] sm:$0xff] }
  0x25   : > { %447 = vst.msk [vmem:[#allocation2] sm:$0xff] %vm446_vm0, %v430_v0  ;;  %448 = vst.msk [vmem:[#allocation2 + $0x8] sm:$0xff] %vm446_vm0, %v431_v1  ;;  %v433_v3 = vld [vmem:[%s9446_s0 + $0x18] sm:$0xff]  ;;  %v434_v4 = vld [vmem:[%s9446_s0 + $0x20] sm:$0xff] }
  0x26   : > { %449 = vst.msk [vmem:[#allocation2 + $0x10] sm:$0xff] %vm446_vm0, %v432_v2  ;;  %v435_v5 = vld [vmem:[%s9446_s0 + $0x28] sm:$0xff]  ;;  %450 = vst.msk [vmem:[#allocation2 + $0x18] sm:$0xff] %vm446_vm0, %v433_v3  ;;  %v436_v6 = vld [vmem:[%s9446_s0 + $0x30] sm:$0xff] }
  0x27   : > { %451 = vst.msk [vmem:[#allocation2 + $0x20] sm:$0xff] %vm446_vm0, %v434_v4  ;;  %452 = vst.msk [vmem:[#allocation2 + $0x28] sm:$0xff] %vm446_vm0, %v435_v5  ;;  %v437_v7 = vld [vmem:[%s9446_s0 + $0x38] sm:$0xff]  ;;  %v438_v8 = vld [vmem:[%s9446_s0 + $0x40] sm:$0xff] }
  0x28   : > { %453 = vst.msk [vmem:[#allocation2 + $0x30] sm:$0xff] %vm446_vm0, %v436_v6  ;;  %454 = vst.msk [vmem:[#allocation2 + $0x38] sm:$0xff] %vm446_vm0, %v437_v7  ;;  %v439_v9 = vld [vmem:[%s9446_s0 + $0x48] sm:$0xff]  ;;  %v440_v10 = vld [vmem:[%s9446_s0 + $0x50] sm:$0xff] }
  0x29   : > { %455 = vst.msk [vmem:[#allocation2 + $0x40] sm:$0xff] %vm446_vm0, %v438_v8  ;;  %v441_v11 = vld [vmem:[%s9446_s0 + $0x58] sm:$0xff]  ;;  %456 = vst.msk [vmem:[#allocation2 + $0x48] sm:$0xff] %vm446_vm0, %v439_v9  ;;  %v442_v12 = vld [vmem:[%s9446_s0 + $0x60] sm:$0xff] }
  0x2a   : > { %457 = vst.msk [vmem:[#allocation2 + $0x50] sm:$0xff] %vm446_vm0, %v440_v10  ;;  %458 = vst.msk [vmem:[#allocation2 + $0x58] sm:$0xff] %vm446_vm0, %v441_v11  ;;  %v443_v13 = vld [vmem:[%s9446_s0 + $0x68] sm:$0xff]  ;;  %v444_v14 = vld [vmem:[%s9446_s0 + $0x70] sm:$0xff] }
  0x2b   : > { %459 = vst.msk [vmem:[#allocation2 + $0x60] sm:$0xff] %vm446_vm0, %v442_v12  ;;  %460 = vst.msk [vmem:[#allocation2 + $0x68] sm:$0xff] %vm446_vm0, %v443_v13  ;;  %v445_v15 = vld [vmem:[%s9446_s0 + $0x78] sm:$0xff]  ;;  %v463_v16 = vld [vmem:[%s9447_s1] sm:$0xff] }
  0x2c   : > { %461 = vst.msk [vmem:[#allocation2 + $0x70] sm:$0xff] %vm446_vm0, %v444_v14  ;;  %v464_v17 = vld [vmem:[%s9447_s1 + $0x8] sm:$0xff]  ;;  %462 = vst.msk [vmem:[#allocation2 + $0x78] sm:$0xff] %vm446_vm0, %v445_v15  ;;  %v465_v18 = vld [vmem:[%s9447_s1 + $0x10] sm:$0xff] }
  0x2d   : > { %479 = vst.msk [vmem:[#allocation3] sm:$0xff] %vm446_vm0, %v463_v16  ;;  %480 = vst.msk [vmem:[#allocation3 + $0x8] sm:$0xff] %vm446_vm0, %v464_v17  ;;  %v466_v19 = vld [vmem:[%s9447_s1 + $0x18] sm:$0xff]  ;;  %v467_v20 = vld [vmem:[%s9447_s1 + $0x20] sm:$0xff] }
  0x2e   : > { %481 = vst.msk [vmem:[#allocation3 + $0x10] sm:$0xff] %vm446_vm0, %v465_v18  ;;  %482 = vst.msk [vmem:[#allocation3 + $0x18] sm:$0xff] %vm446_vm0, %v466_v19  ;;  %v468_v21 = vld [vmem:[%s9447_s1 + $0x28] sm:$0xff]  ;;  %v469_v22 = vld [vmem:[%s9447_s1 + $0x30] sm:$0xff] }
  0x2f   : > { %483 = vst.msk [vmem:[#allocation3 + $0x20] sm:$0xff] %vm446_vm0, %v467_v20  ;;  %v470_v23 = vld [vmem:[%s9447_s1 + $0x38] sm:$0xff]  ;;  %484 = vst.msk [vmem:[#allocation3 + $0x28] sm:$0xff] %vm446_vm0, %v468_v21  ;;  %v471_v24 = vld [vmem:[%s9447_s1 + $0x40] sm:$0xff] }
  0x30   : > { %485 = vst.msk [vmem:[#allocation3 + $0x30] sm:$0xff] %vm446_vm0, %v469_v22  ;;  %486 = vst.msk [vmem:[#allocation3 + $0x38] sm:$0xff] %vm446_vm0, %v470_v23  ;;  %v472_v25 = vld [vmem:[%s9447_s1 + $0x48] sm:$0xff]  ;;  %v473_v26 = vld [vmem:[%s9447_s1 + $0x50] sm:$0xff] }
  0x31   : > { %487 = vst.msk [vmem:[#allocation3 + $0x40] sm:$0xff] %vm446_vm0, %v471_v24  ;;  %488 = vst.msk [vmem:[#allocation3 + $0x48] sm:$0xff] %vm446_vm0, %v472_v25  ;;  %v474_v27 = vld [vmem:[%s9447_s1 + $0x58] sm:$0xff]  ;;  %v475_v28 = vld [vmem:[%s9447_s1 + $0x60] sm:$0xff] }
  0x32   : > { %489 = vst.msk [vmem:[#allocation3 + $0x50] sm:$0xff] %vm446_vm0, %v473_v26  ;;  %v476_v29 = vld [vmem:[%s9447_s1 + $0x68] sm:$0xff]  ;;  %490 = vst.msk [vmem:[#allocation3 + $0x58] sm:$0xff] %vm446_vm0, %v474_v27  ;;  %v477_v30 = vld [vmem:[%s9447_s1 + $0x70] sm:$0xff] }
  0x33   : > { %491 = vst.msk [vmem:[#allocation3 + $0x60] sm:$0xff] %vm446_vm0, %v475_v28  ;;  %492 = vst.msk [vmem:[#allocation3 + $0x68] sm:$0xff] %vm446_vm0, %v476_v29  ;;  %v478_v31 = vld [vmem:[%s9447_s1 + $0x78] sm:$0xff] }
  0x34   : > { %493 = vst.msk [vmem:[#allocation3 + $0x70] sm:$0xff] %vm446_vm0, %v477_v30  ;;  %494 = vst.msk [vmem:[#allocation3 + $0x78] sm:$0xff] %vm446_vm0, %v478_v31 }
  0x35 PF: > { %v6210_v32 = vld [vmem:[%s7066_s28 + $0x24] ss:$16 sps:$4 sm:$0xff]   ;;  %v6212_v33 = vld [vmem:[%s7066_s28 + $0x20] ss:$16 sps:$4 sm:$0xff]   ;;  %v9465_v34 = vmov 0   ;;  %vm1632_vm1 = vcmask 523264  }
  0x36   : > { %646 = vmatprep.mubr.bf16.mxu0 %v9465_v34  ;;  %706 = vmatprep.mubr.bf16.mxu1 %v9465_v34  ;;  %v6213_v35 = vld [vmem:[%s7066_s28 + $0x4] ss:$16 sps:$4 sm:$0xff]   ;;  %v6215_v36 = vld [vmem:[%s7066_s28] ss:$16 sps:$4 sm:$0xff]   ;;  %v6952_v38 = vmov 0.0   ;;  %v496_v39 = vld [vmem:[#allocation2 + $0x8] sm:$0xff] }
  0x37   : > { %626 = vmatprep.subr.bf16.mxu0 %v6210_v32  ;;  %6130 = vmatprep.subr.bf16.mxu1 %v6210_v32  ;;  %v495_v37 = vld [vmem:[#allocation2] sm:$0xff]  ;;  %1633 = vst.msk [vmem:[#allocation6] sm:$0xff] %vm1632_vm1, %v6952_v38  ;;  %1634 = vst.msk [vmem:[#allocation6 + $0x8] sm:$0xff] %vm1632_vm1, %v6952_v38  ;;  %v508_v41 = vld [vmem:[#allocation2 + $0x68] sm:$0xff]  ;;  %vm589_vm2 = vcmask 261120   ;;  %s6954_s3 = smov 96  }
  0x38   : > { %1635 = vst.msk [vmem:[#allocation6 + $0x10] sm:$0xff] %vm1632_vm1, %v6952_v38  ;;  %1636 = vst.msk [vmem:[#allocation6 + $0x18] sm:$0xff] %vm1632_vm1, %v6952_v38  ;;  %627 = vmatpush1.bf16.msra.mxu0 %v6212_v33  ;;  %6132 = vmatpush1.bf16.msra.mxu1 %v6212_v33  ;;  %v507_v40 = vld [vmem:[#allocation2 + $0x60] sm:$0xff]  ;;  %v6218_v42 = vld [vmem:[%s7066_s28 + $0x2c] ss:$16 sps:$4 sm:$0xff]   ;;  %v511_v43 = vpack.c.bf16 %v496_v39, %v495_v37  ;;  %p1697_p12 = scmp.gt.s32.totalorder %s7031_s13, 0 }
  0x39   : > { %628 = vmatprep.subr.bf16.mxu0 %v6213_v35  ;;  %6131 = vmatprep.subr.bf16.mxu1 %v6213_v35  ;;  %v7236_v44 = vpack.c.bf16 %v508_v41, %v507_v40  ;;  %v6216_v45 = vld [vmem:[%s7066_s28 + $0x28] ss:$16 sps:$4 sm:$0xff]   ;;  %v6221_v46 = vld [vmem:[%s7066_s28 + $0xc] ss:$16 sps:$4 sm:$0xff]   ;;  %v497_v47 = vld [vmem:[#allocation2 + $0x10] sm:$0xff]  ;;  %s6956_s17 = smov 32  }
  0x3a   : > { %6183 = vset.pattern.permute.xlu1 %v9465_v34  ;;  %v498_v48 = vld [vmem:[#allocation2 + $0x18] sm:$0xff]  ;;  %v6224_v49 = vld [vmem:[%s7071_s16 + $0x24] ss:$16 sps:$4 sm:$0xff]   ;;  %v6222_v50 = vld [vmem:[%s7071_s16 + $0x20] ss:$16 sps:$4 sm:$0xff]   ;;  %vm2271_vm11 = vcmask 523520  }
  0x3b   : > { %v509_v51 = vld [vmem:[#allocation2 + $0x70] sm:$0xff]  ;;  %v510_v52 = vld [vmem:[#allocation2 + $0x78] sm:$0xff]  ;;  %v512_v56 = vpack.c.bf16 %v498_v48, %v497_v47  ;;  %v499_v60 = vld [vmem:[#allocation2 + $0x20] sm:$0xff]  ;;  %s6958_s23 = smov [#allocation9]  }
  0x3c   : > { %629 = vmatpush1.bf16.msra.mxu0 %v6215_v36  ;;  %6133 = vmatpush1.bf16.msra.mxu1 %v6215_v36  ;;  %v6219_v53 = vld [vmem:[%s7066_s28 + $0x8] ss:$16 sps:$4 sm:$0xff]   ;;  %v6227_v54 = vld [vmem:[%s7071_s16 + $0x2c] ss:$16 sps:$4 sm:$0xff]   ;;  %v6230_v55 = vld [vmem:[%s7071_s16 + $0x4] ss:$16 sps:$4 sm:$0xff]   ;;  %v7250_v57 = vpack.c.bf16 %v510_v52, %v509_v51 }
  0x3d   : > { %739 = vmatprep.subr.bf16.mxu1 %v6218_v42  ;;  %1194 = vmatprep.subr.bf16.mxu0 %v6224_v49  ;;  %v6228_v58 = vld [vmem:[%s7071_s16] ss:$16 sps:$4 sm:$0xff]   ;;  %v7257_v59 = vld [vmem:[%s7076_s11 + $0x64] ss:$16 sps:$4 sm:$0xff]   ;;  %v500_v61 = vld [vmem:[#allocation2 + $0x28] sm:$0xff]  ;;  %v9463_v52 = vmov 1  }
  0x3e   : > { %v513_v62 = vpack.c.bf16 %v500_v61, %v499_v60  ;;  %v6225_v63 = vld [vmem:[%s7071_s16 + $0x28] ss:$16 sps:$4 sm:$0xff]   ;;  %v6233_v0 = vld [vmem:[%s7071_s16 + $0xc] ss:$16 sps:$4 sm:$0xff]   ;;  %v501_v1 = vld [vmem:[#allocation2 + $0x30] sm:$0xff]  ;;  %6181 = vset.pattern.permute.xlu0 %v9463_v52 }
  0x3f   : > { %5504 = vmatmul.mubr.msk.bf16.vlgmr.msra.gmra.mxu0 %vm589_vm2, %v511_v43  ;;  %5510 = vmatmul.mubr.msk.bf16.vlgmr.msra.gmra.mxu1 %vm589_vm2, %v7236_v44  ;;  %v502_v2 = vld [vmem:[#allocation2 + $0x38] sm:$0xff]  ;;  %v503_v6 = vld [vmem:[#allocation2 + $0x40] sm:$0xff]  ;;  %v504_v7 = vld [vmem:[#allocation2 + $0x48] sm:$0xff] }
  0x40   : > { %740 = vmatpush1.bf16.msra.mxu1 %v6216_v45  ;;  %656 = vmatprep.mubr.bf16.mxu0 %v9465_v34  ;;  %v6231_v3 = vld [vmem:[%s7071_s16 + $0x8] ss:$16 sps:$4 sm:$0xff]   ;;  %v7270_v4 = vld [vmem:[%s7076_s11 + $0x6c] ss:$16 sps:$4 sm:$0xff]   ;;  %v514_v5 = vpack.c.bf16 %v502_v2, %v501_v1  ;;  %v515_v8 = vpack.c.bf16 %v504_v7, %v503_v6  ;;  %v505_v9 = vld [vmem:[#allocation2 + $0x50] sm:$0xff] }
  0x41   : > { %716 = vmatprep.mubr.bf16.mxu1 %v9465_v34  ;;  %741 = vmatprep.subr.bf16.mxu1 %v6221_v46  ;;  %v506_v10 = vld [vmem:[#allocation2 + $0x58] sm:$0xff]  ;;  %v1064_v12 = vld [vmem:[#allocation3] sm:$0xff]  ;;  %v1065_v13 = vld [vmem:[#allocation3 + $0x8] sm:$0xff] }
  0x42   : > { %1195 = vmatpush1.bf16.msra.mxu0 %v6222_v50  ;;  %v516_v11 = vpack.c.bf16 %v506_v10, %v505_v9  ;;  %v1080_v14 = vpack.c.bf16 %v1065_v13, %v1064_v12  ;;  %v7286_v15 = vld [vmem:[%s7076_s11 + $0x60] ss:$16 sps:$4 sm:$0xff]   ;;  %v7289_v16 = vld [vmem:[%s7076_s11 + $0x44] ss:$16 sps:$4 sm:$0xff]   ;;  %v1067_v18 = vld [vmem:[#allocation3 + $0x18] sm:$0xff] }
  0x43   : > { %1196 = vmatprep.subr.bf16.mxu0 %v6230_v55  ;;  %v1066_v17 = vld [vmem:[#allocation3 + $0x10] sm:$0xff]  ;;  %v1068_v24 = vld [vmem:[#allocation3 + $0x20] sm:$0xff]  ;;  %v1069_v25 = vld [vmem:[#allocation3 + $0x28] sm:$0xff] }
  0x44   : > { %742 = vmatpush1.bf16.msra.mxu1 %v6219_v53  ;;  %v7297_v19 = vld [vmem:[%s7076_s11 + $0x40] ss:$16 sps:$4 sm:$0xff]   ;;  %v7301_v20 = vld [vmem:[%s7076_s11 + $0x24] ss:$16 sps:$4 sm:$0xff]   ;;  %v1081_v21 = vpack.c.bf16 %v1067_v18, %v1066_v17  ;;  %v1082_v27 = vpack.c.bf16 %v1069_v25, %v1068_v24  ;;  %v1071_v29 = vld [vmem:[#allocation3 + $0x38] sm:$0xff] }
  0x45   : > { %1307 = vmatprep.subr.bf16.mxu1 %v6227_v54  ;;  %v7305_v22 = vld [vmem:[%s7076_s11 + $0x20] ss:$16 sps:$4 sm:$0xff]   ;;  %v7309_v23 = vld [vmem:[%s7076_s11 + $0x4] ss:$16 sps:$4 sm:$0xff]   ;;  %v1073_v32 = vld [vmem:[#allocation3 + $0x48] sm:$0xff] }
  0x46   : > { %1197 = vmatpush1.bf16.msra.mxu0 %v6228_v58  ;;  %v7317_v26 = vld [vmem:[%s7076_s11] ss:$16 sps:$4 sm:$0xff]   ;;  %v6242_v35 = vld [vmem:[%s7076_s11 + $0x68] ss:$16 sps:$4 sm:$0xff]   ;;  %v6246_v36 = vld [vmem:[%s7076_s11 + $0x4c] ss:$16 sps:$4 sm:$0xff]  }
  0x47   : > { %5505 = vmatmul.mubr.msk.bf16.gmra.mxu0 %vm589_vm2, %v512_v56  ;;  %5511 = vmatmul.mubr.msk.bf16.gmra.mxu1 %vm589_vm2, %v7250_v57  ;;  %v1070_v28 = vld [vmem:[#allocation3 + $0x30] sm:$0xff]  ;;  %v1072_v31 = vld [vmem:[#allocation3 + $0x40] sm:$0xff]  ;;  %v1075_v38 = vld [vmem:[#allocation3 + $0x58] sm:$0xff] }
  0x48   : > { %666 = vmatprep.mubr.bf16.mxu0 %v9465_v34  ;;  %759 = vmatprep.mubr.bf16.mxu1 %v9465_v34  ;;  %v1083_v30 = vpack.c.bf16 %v1071_v29, %v1070_v28  ;;  %v1084_v33 = vpack.c.bf16 %v1073_v32, %v1072_v31  ;;  %v1074_v37 = vld [vmem:[#allocation3 + $0x50] sm:$0xff]  ;;  %v6248_v39 = vld [vmem:[%s7076_s11 + $0x48] ss:$16 sps:$4 sm:$0xff]   ;;  %v6252_v40 = vld [vmem:[%s7076_s11 + $0x2c] ss:$16 sps:$4 sm:$0xff]  }
  0x49   : > { %1800 = vmatprep.subr.bf16.mxu0 %v7257_v59  ;;  %v1085_v41 = vpack.c.bf16 %v1075_v38, %v1074_v37  ;;  %v6254_v42 = vld [vmem:[%s7076_s11 + $0x28] ss:$16 sps:$4 sm:$0xff]   ;;  %v2215_v48 = vld [vmem:[%s9448_s2] sm:$0xff]  ;;  %v1078_v50 = vld [vmem:[#allocation3 + $0x70] sm:$0xff] }
  0x4a   : > { %v1077_v45 = vld [vmem:[#allocation3 + $0x68] sm:$0xff]  ;;  %vm2217_vm3 = vcmp.gt.f32.partialorder %v2215_v48, 0.5  ;;  %v1079_v51 = vld [vmem:[#allocation3 + $0x78] sm:$0xff]  ;;  %v527_v1 = vld [vmem:[%s7081_s30] sm:$0xf] }
  0x4b   : > { %v6257_v46 = vld [vmem:[%s7076_s11 + $0x8] ss:$16 sps:$4 sm:$0xff]   ;;  %v2219_v49 = vsel %vm2217_vm3, 1, %v9465_v34  ;;  %v1087_v54 = vpack.c.bf16 %v1079_v51, %v1078_v50  ;;  %s1698_s30 = scalar_select %p1697_p12, 1, 0 }
  0x4c   : > { %v2216_v53 = vld [vmem:[%s9448_s2 + $0x8] sm:$0xff]  ;;  %2234 = vperm.xlu0 %6181, %v2219_v49  }
  0x4d   : > { %vm2218_vm4 = vcmp.gt.f32.partialorder %v2216_v53, 0.5  ;;  %v1701_v58 = vld [vmem:[#allocation6 + $0x8] sm:$0xff] }
  0x4e   : > { %v2220_v55 = vsel %vm2218_vm4, 1, %v9465_v34 }
  0x4f   : > { %5506 = vmatmul.mubr.msk.bf16.gmra.mxu0 %vm589_vm2, %v513_v62  ;;  %5512 = vmatmul.mubr.msk.bf16.vlgmr.msra.gmra.mxu1 %vm589_vm2, %v511_v43  ;;  %v6255_v43 = vld [vmem:[%s7076_s11 + $0xc] ss:$16 sps:$4 sm:$0xff]  }
  0x50   : > { %1308 = vmatpush1.bf16.msra.mxu1 %v6225_v63  ;;  %676 = vmatprep.mubr.bf16.mxu0 %v9465_v34 }
  0x51   : > { %769 = vmatprep.mubr.bf16.mxu1 %v9465_v34  ;;  %1309 = vmatprep.subr.bf16.mxu1 %v6233_v0 }
  0x52   : > { %2237 = vperm.xlu0 %6181, %v2220_v55  }
  0x54   : > { %1310 = vmatpush1.bf16.msra.mxu1 %v6231_v3 }
  0x55   : > { %1853 = vmatprep.subr.bf16.mxu1 %v7270_v4 }
  0x56   : > { %6182 = vset.pattern.permute.xlu0 %v9465_v34 }
  0x57   : > { %5507 = vmatmul.mubr.msk.bf16.gmra.mxu0 %vm589_vm2, %v514_v5  ;;  %5513 = vmatmul.mubr.msk.bf16.gmra.mxu1 %vm589_vm2, %v512_v56  ;;  %v1702_v56 = vld [vmem:[#allocation6 + $0x10] sm:$0xff] }
  0x58   : > { %686 = vmatprep.mubr.bf16.mxu0 %v9465_v34  ;;  %779 = vmatprep.mubr.bf16.mxu1 %v9465_v34 }
  0x59   : > { %2253 = vrot.lane.b32.xlu1 %v1702_v56, %s6954_s3  ;;  %2222 = vperm.xlu0 %6182, %v2219_v49  }
  0x5d   : > { %6185 = vset.pattern.permute.xlu0 %v9463_v52 }
  0x5f   : > { %5508 = vmatmul.mubr.msk.bf16.gmra.mxu0 %vm589_vm2, %v515_v8  ;;  %5514 = vmatmul.mubr.msk.bf16.gmra.mxu1 %vm589_vm2, %v513_v62  ;;  %v529_v62 = vlaneseq }
  0x60   : > { %696 = vmatprep.mubr.bf16.mxu0 %v9465_v34  ;;  %789 = vmatprep.mubr.bf16.mxu1 %v9465_v34 }
  0x61   : > { %v7392_v63 = vshrl.u32 %v529_v62, 7 }
  0x63   : > { %v531_v0 = vsub.s32 0, %v7392_v63  ;;  %v535_v2 = vsub.s32 1, %v7392_v63  ;;  %v9467_v31 = vsub.s32 3, %v7392_v63 }
  0x65   : > { %v7399_v3 = vrot.slane %v527_v1, %v531_v0 }
  0x67   : > { %5509 = vmatmul.mubr.msk.bf16.gmra.mxu0 %vm589_vm2, %v516_v11  ;;  %5515 = vmatmul.mubr.msk.bf16.gmra.mxu1 %vm589_vm2, %v514_v5  ;;  %v7403_v5 = vrot.slane %v527_v1, %v535_v2 }
  0x68   : > { %799 = vmatprep.mubr.bf16.mxu1 %v9465_v34  ;;  %1214 = vmatprep.mubr.bf16.mxu0 %v9465_v34 }
  0x6f   : > { %5516 = vmatmul.mubr.msk.bf16.gmra.mxu1 %vm589_vm2, %v515_v8  ;;  %5560 = vmatmul.mubr.msk.bf16.vlgmr.msra.gmra.mxu0 %vm589_vm2, %v1080_v14 }
  0x70   : > { %809 = vmatprep.mubr.bf16.mxu1 %v9465_v34  ;;  %1224 = vmatprep.mubr.bf16.mxu0 %v9465_v34 }
  0x71   : > { %1801 = vmatpush1.bf16.msra.mxu0 %v7286_v15 }
  0x72   : > { %1802 = vmatprep.subr.bf16.mxu0 %v7289_v16 }
  0x75   : > { %1803 = vmatpush1.bf16.msra.mxu0 %v7297_v19 }
  0x76   : > { %1804 = vmatprep.subr.bf16.mxu0 %v7301_v20 }
  0x77   : > { %5517 = vmatmul.mubr.msk.bf16.gmra.mxu1 %vm589_vm2, %v516_v11  ;;  %5561 = vmatmul.mubr.msk.bf16.gmra.mxu0 %vm589_vm2, %v1081_v21 }
  0x78   : > { %819 = vmatprep.mubr.bf16.mxu1 %v9465_v34  ;;  %1234 = vmatprep.mubr.bf16.mxu0 %v9465_v34 }
  0x79   : > { %1805 = vmatpush1.bf16.msra.mxu0 %v7305_v22 }
  0x7a   : > { %1806 = vmatprep.subr.bf16.mxu0 %v7309_v23 }
  0x7d   : > { %1807 = vmatpush1.bf16.msra.mxu0 %v7317_v26 }
  0x7f   : > { %5518 = vmatmul.mubr.msk.bf16.gmra.mxu1 %vm589_vm2, %v7236_v44  ;;  %5562 = vmatmul.mubr.msk.bf16.gmra.mxu0 %vm589_vm2, %v1082_v27  ;;  %v1076_v44 = vld [vmem:[#allocation3 + $0x60] sm:$0xff] }
  0x80   : > { %829 = vmatprep.mubr.bf16.mxu1 %v9465_v34  ;;  %1244 = vmatprep.mubr.bf16.mxu0 %v9465_v34  ;;  %v1086_v47 = vpack.c.bf16 %v1077_v45, %v1076_v44  ;;  %v7441_v44 = vrot.slane %v527_v1, %v9467_v31 }
  0x87   : > { %5519 = vmatmul.mubr.msk.bf16.gmra.mxu1 %vm589_vm2, %v7250_v57  ;;  %5563 = vmatmul.mubr.msk.bf16.gmra.mxu0 %vm589_vm2, %v1083_v30  ;;  %v1700_v57 = vld [vmem:[#allocation6] sm:$0xff] }
  0x88   : > { %1254 = vmatprep.mubr.bf16.mxu0 %v9465_v34  ;;  %1327 = vmatprep.mubr.bf16.mxu1 %v9465_v34  ;;  %v1704_v60 = vpack.c.bf16 %v1701_v58, %v1700_v57 }
  0x8f   : > { %5564 = vmatmul.mubr.msk.bf16.gmra.mxu0 %vm589_vm2, %v1084_v33  ;;  %5568 = vmatmul.mubr.msk.bf16.vlgmr.msra.gmra.mxu1 %vm589_vm2, %v1080_v14 }
  0x90   : > { %1854 = vmatpush1.bf16.msra.mxu1 %v6242_v35  ;;  %1264 = vmatprep.mubr.bf16.mxu0 %v9465_v34 }
  0x91   : > { %1337 = vmatprep.mubr.bf16.mxu1 %v9465_v34  ;;  %1855 = vmatprep.subr.bf16.mxu1 %v6246_v36 }
  0x94   : > { %1856 = vmatpush1.bf16.msra.mxu1 %v6248_v39 }
  0x95   : > { %1857 = vmatprep.subr.bf16.mxu1 %v6252_v40 }
  0x97   : > { %5565 = vmatmul.mubr.msk.bf16.gmra.mxu0 %vm589_vm2, %v1085_v41  ;;  %5569 = vmatmul.mubr.msk.bf16.gmra.mxu1 %vm589_vm2, %v1081_v21 }
  0x98   : > { %1274 = vmatprep.mubr.bf16.mxu0 %v9465_v34  ;;  %1347 = vmatprep.mubr.bf16.mxu1 %v9465_v34 }
  0x99   : > { %1858 = vmatpush1.bf16.msra.mxu1 %v6254_v42 }
  0x9a   : > { %1859 = vmatprep.subr.bf16.mxu1 %v6255_v43 }
  0x9d   : > { %1860 = vmatpush1.bf16.msra.mxu1 %v6257_v46 }
  0x9e   : > { %2328 = vmatprep.subr.bf16.mxu1 %v7257_v59  ;;  %v1703_v59 = vld [vmem:[#allocation6 + $0x18] sm:$0xff] }
  0x9f   : > { %5566 = vmatmul.mubr.msk.bf16.gmra.mxu0 %vm589_vm2, %v1086_v47  ;;  %5570 = vmatmul.mubr.msk.bf16.gmra.mxu1 %vm589_vm2, %v1082_v27  ;;  %v1705_v61 = vpack.c.bf16 %v1703_v59, %v1702_v56 }
  0xa0   : > { %1284 = vmatprep.mubr.bf16.mxu0 %v9465_v34  ;;  %1357 = vmatprep.mubr.bf16.mxu1 %v9465_v34 }
  0xa1   : > { %2255 = vrot.lane.b32.xlu1 %v1703_v59, %s6954_s3 }
  0xa5   : > { %2225 = vperm.xlu1 %6183, %v2220_v55  }
  0xa7   : > { %5567 = vmatmul.mubr.msk.bf16.gmra.mxu0 %vm589_vm2, %v1087_v54  ;;  %5571 = vmatmul.mubr.msk.bf16.gmra.mxu1 %vm589_vm2, %v1083_v30  ;;  %v9468_v30 = vsub.s32 2, %v7392_v63 }
  0xa8   : > { %1367 = vmatprep.mubr.bf16.mxu1 %v9465_v34  ;;  %1824 = vmatprep.mubr.bf16.mxu0 %v9465_v34 }
  0xa9   : > { %6184 = vset.pattern.permute.xlu1 %v9463_v52  ;;  %v7437_v43 = vrot.slane %v527_v1, %v9468_v30 }
  0xaf   : > { %5572 = vmatmul.mubr.msk.bf16.gmra.mxu1 %vm589_vm2, %v1084_v33  ;;  %5624 = vmatmul.mubr.msk.bf16.vlgmr.msra.gmra.mxu0 %vm1632_vm1, %v1704_v60 }
  0xb0   : > { %1377 = vmatprep.mubr.bf16.mxu1 %v9465_v34  ;;  %1834 = vmatprep.mubr.bf16.mxu0 %v9465_v34 }
  0xb7   : > { %5573 = vmatmul.mubr.msk.bf16.gmra.mxu1 %vm589_vm2, %v1085_v41  ;;  %5625 = vmatmul.mubr.msk.bf16.gmra.mxu0 %vm1632_vm1, %v1705_v61 }
  0xb8   : > { %1387 = vmatprep.mubr.bf16.mxu1 %v9465_v34 }
  0xbf   : > { %5574 = vmatmul.mubr.msk.bf16.gmra.mxu1 %vm589_vm2, %v1086_v47 }
  0xc0   : > { %1397 = vmatprep.mubr.bf16.mxu1 %v9465_v34 }
  0xc7   : > { %5575 = vmatmul.mubr.msk.bf16.gmra.mxu1 %vm589_vm2, %v1087_v54 }
  0xc8   : > { %1877 = vmatprep.mubr.bf16.mxu1 %v9465_v34 }
  0xcf   : > { %5626 = vmatmul.mubr.msk.bf16.vlgmr.msra.gmra.mxu1 %vm1632_vm1, %v1704_v60 }
  0xd0   : > { %1887 = vmatprep.mubr.bf16.mxu1 %v9465_v34  ;;  %2329 = vmatpush1.bf16.msra.mxu1 %v7286_v15 }
  0xd1   : > { %2330 = vmatprep.subr.bf16.mxu1 %v7289_v16 }
  0xd4   : > { %2331 = vmatpush1.bf16.msra.mxu1 %v7297_v19 }
  0xd5   : > { %2332 = vmatprep.subr.bf16.mxu1 %v7301_v20 }
  0xd7   : > { %5627 = vmatmul.mubr.msk.bf16.gmra.mxu1 %vm1632_vm1, %v1705_v61 }
  0xd8   : > { %2333 = vmatpush1.bf16.msra.mxu1 %v7305_v22  ;;  %2352 = vmatprep.mubr.bf16.mxu1 %v9465_v34 }
  0xd9   : > { %2334 = vmatprep.subr.bf16.mxu1 %v7309_v23 }
  0xdc   : > { %2335 = vmatpush1.bf16.msra.mxu1 %v7317_v26 }
  0xdd   : > { %2381 = vmatprep.subr.bf16.mxu1 %v7270_v4 }
  0xff   : > { %v648_v6 = vpop.f32.mrf.mxu0  ;;  %v708_v7 = vpop.f32.mrf.mxu1 }
 0x100   : > { %v649_v4 = vadd.f32 %v648_v6, %v7399_v3  ;;  %v709_v8 = vadd.f32 %v708_v7, %v7399_v3 }
 0x101   : > { %v650_v9 = vpop.f32.mrf.mxu0  ;;  %v710_v10 = vpop.f32.mrf.mxu1 }
 0x102   : > { %v651_v11 = vadd.f32 %v650_v9, %v7403_v5  ;;  %v711_v12 = vadd.f32 %v710_v10, %v7403_v5 }
 0x103   : > { %v7409_v13 = vpop.f32.mrf.mxu0  ;;  %v712_v14 = vpop.f32.mrf.mxu1 }
 0x104   : > { %v7411_v15 = vpack.c.bf16 %v651_v11, %v649_v4  ;;  %v7413_v16 = vpack.c.bf16 %v711_v12, %v709_v8  ;;  %v713_v17 = vadd.f32 %v712_v14, %v7399_v3 }
 0x105   : > { %v7416_v18 = vpop.f32.mrf.mxu0  ;;  %v714_v19 = vpop.f32.mrf.mxu1 }
 0x106   : > { %9554 = vst [vmem:[#allocation18_spill] sm:$0xff] %v7413_v16  ;;  %v715_v20 = vadd.f32 %v714_v19, %v7403_v5 }
 0x107   : > { %v658_v21 = vpop.f32.mrf.mxu0  ;;  %v718_v22 = vpop.f32.mrf.mxu1 }
 0x108   : > { %v7419_v23 = vpack.c.bf16 %v715_v20, %v713_v17  ;;  %v659_v24 = vadd.f32 %v658_v21, %v7399_v3  ;;  %v719_v25 = vadd.f32 %v718_v22, %v7399_v3  ;;  %v7468_v20 = vld [vmem:[%s7091_s24 + $0x78] sm:$0xff]  }
 0x109   : > { %v660_v26 = vpop.f32.mrf.mxu0  ;;  %v720_v27 = vpop.f32.mrf.mxu1  ;;  %5906 = vmatprep.subr.bf16.mxu0 %v7468_v20 }
 0x10a   : > { %9555 = vst [vmem:[#allocation19_spill] sm:$0xff] %v7419_v23  ;;  %v661_v28 = vadd.f32 %v660_v26, %v7403_v5  ;;  %v721_v29 = vadd.f32 %v720_v27, %v7403_v5  ;;  %v7477_v26 = vld [vmem:[%s7091_s24 + $0x38] sm:$0xff]  }
 0x10b   : > { %v662_v32 = vpop.f32.mrf.mxu0  ;;  %v722_v33 = vpop.f32.mrf.mxu1  ;;  %5907 = vmatpush3.bf16.msra.mxu0 %v7477_v26 }
 0x10c   : > { %v7427_v35 = vpack.c.bf16 %v661_v28, %v659_v24  ;;  %v7429_v36 = vpack.c.bf16 %v721_v29, %v719_v25  ;;  %v663_v37 = vadd.f32 %v662_v32, %v7399_v3  ;;  %v723_v38 = vadd.f32 %v722_v33, %v7399_v3 }
 0x10d   : > { %v664_v39 = vpop.f32.mrf.mxu0  ;;  %v724_v40 = vpop.f32.mrf.mxu1 }
 0x10e   : > { %9556 = vst [vmem:[#allocation20_spill] sm:$0xff] %v7429_v36  ;;  %v665_v41 = vadd.f32 %v664_v39, %v7403_v5  ;;  %v725_v42 = vadd.f32 %v724_v40, %v7403_v5 }
 0x10f   : > { %v668_v45 = vpop.f32.mrf.mxu0  ;;  %v761_v46 = vpop.f32.mrf.mxu1 }
 0x110   : > { %v7443_v47 = vpack.c.bf16 %v665_v41, %v663_v37  ;;  %v7445_v48 = vpack.c.bf16 %v725_v42, %v723_v38  ;;  %v669_v49 = vadd.f32 %v668_v45, %v7399_v3  ;;  %v762_v53 = vadd.f32 %v761_v46, %v7437_v43  ;;  %v7484_v38 = vld [vmem:[%s7091_s24 + $0x70] sm:$0xff]  }
 0x111   : > { %v670_v50 = vpop.f32.mrf.mxu0  ;;  %v763_v51 = vpop.f32.mrf.mxu1  ;;  %v7493_v45 = vld [vmem:[%s7091_s24 + $0x30] sm:$0xff]   ;;  %5908 = vmatprep.subr.bf16.mxu0 %v7484_v38 }
 0x112   : > { %9557 = vst [vmem:[#allocation21_spill] sm:$0xff] %v7445_v48  ;;  %v671_v54 = vadd.f32 %v670_v50, %v7403_v5  ;;  %v764_v55 = vadd.f32 %v763_v51, %v7441_v44  ;;  %5909 = vmatpush3.bf16.msra.mxu0 %v7493_v45 }
 0x113   : > { %v672_v56 = vpop.f32.mrf.mxu0  ;;  %v7451_v57 = vpop.f32.mrf.mxu1 }
 0x114   : > { %v7453_v58 = vpack.c.bf16 %v671_v54, %v669_v49  ;;  %v7455_v59 = vpack.c.bf16 %v764_v55, %v762_v53  ;;  %v673_v60 = vadd.f32 %v672_v56, %v7399_v3  ;;  %v7500_v55 = vld [vmem:[%s7091_s24 + $0x68] sm:$0xff]  }
 0x115   : > { %v674_v61 = vpop.f32.mrf.mxu0  ;;  %v7458_v62 = vpop.f32.mrf.mxu1  ;;  %5910 = vmatprep.subr.bf16.mxu0 %v7500_v55 }
 0x116   : > { %v675_v1 = vadd.f32 %v674_v61, %v7403_v5 }
 0x117   : > { %v678_v6 = vpop.f32.mrf.mxu0  ;;  %v771_v7 = vpop.f32.mrf.mxu1 }
 0x118   : > { %v7461_v4 = vpack.c.bf16 %v675_v1, %v673_v60  ;;  %v679_v8 = vadd.f32 %v678_v6, %v7399_v3  ;;  %v772_v9 = vadd.f32 %v771_v7, %v7437_v43  ;;  %v7509_v6 = vld [vmem:[%s7091_s24 + $0x28] sm:$0xff]  }
 0x119   : > { %v680_v10 = vpop.f32.mrf.mxu0  ;;  %v773_v11 = vpop.f32.mrf.mxu1  ;;  %5911 = vmatpush3.bf16.msra.mxu0 %v7509_v6 }
 0x11a   : > { %v681_v12 = vadd.f32 %v680_v10, %v7403_v5  ;;  %v774_v14 = vadd.f32 %v773_v11, %v7441_v44 }
 0x11b   : > { %v682_v17 = vpop.f32.mrf.mxu0  ;;  %v775_v19 = vpop.f32.mrf.mxu1 }
 0x11c   : > { %v7470_v21 = vpack.c.bf16 %v681_v12, %v679_v8  ;;  %v7472_v22 = vpack.c.bf16 %v774_v14, %v772_v9  ;;  %v683_v24 = vadd.f32 %v682_v17, %v7399_v3  ;;  %v776_v25 = vadd.f32 %v775_v19, %v7437_v43  ;;  %v7516_v14 = vld [vmem:[%s7091_s24 + $0x60] sm:$0xff]  }
 0x11d   : > { %v684_v27 = vpop.f32.mrf.mxu0  ;;  %v777_v28 = vpop.f32.mrf.mxu1  ;;  %5912 = vmatprep.subr.bf16.mxu0 %v7516_v14 }
 0x11e   : > { %9558 = vst [vmem:[#allocation22_spill] sm:$0xff] %v7470_v21  ;;  %v685_v29 = vadd.f32 %v684_v27, %v7403_v5  ;;  %v778_v32 = vadd.f32 %v777_v28, %v7441_v44  ;;  %v7525_v27 = vld [vmem:[%s7086_s27] sm:$0xf]  ;;  %s1699_s27 = scvt.s32.f32 %s1698_s30 }
 0x11f   : > { %v688_v33 = vpop.f32.mrf.mxu0  ;;  %v781_v37 = vpop.f32.mrf.mxu1  ;;  %v7528_v28 = vld [vmem:[%s7091_s24 + $0x20] sm:$0xff]  }
 0x120   : > { %v7486_v39 = vpack.c.bf16 %v685_v29, %v683_v24  ;;  %v7488_v40 = vpack.c.bf16 %v778_v32, %v776_v25  ;;  %v689_v41 = vadd.f32 %v688_v33, %v7399_v3  ;;  %v782_v42 = vadd.f32 %v781_v37, %v7437_v43  ;;  %5913 = vmatpush3.bf16.msra.mxu0 %v7528_v28 }
 0x121   : > { %v690_v46 = vpop.f32.mrf.mxu0  ;;  %v783_v49 = vpop.f32.mrf.mxu1 }
 0x122   : > { %9559 = vst [vmem:[#allocation23_spill] sm:$0xff] %v7486_v39  ;;  %v691_v50 = vadd.f32 %v690_v46, %v7403_v5  ;;  %v784_v51 = vadd.f32 %v783_v49, %v7441_v44  ;;  %v7537_v46 = vrot.slane %v7525_v27, %v531_v0  ;;  %v7540_v49 = vld [vmem:[%s7091_s24 + $0x58] sm:$0xff]  }
 0x123   : > { %v692_v53 = vpop.f32.mrf.mxu0  ;;  %v785_v54 = vpop.f32.mrf.mxu1  ;;  %5914 = vmatprep.subr.bf16.mxu0 %v7540_v49 }
 0x124   : > { %v7502_v56 = vpack.c.bf16 %v691_v50, %v689_v41  ;;  %v7504_v60 = vpack.c.bf16 %v784_v51, %v782_v42  ;;  %v693_v61 = vadd.f32 %v692_v53, %v7399_v3  ;;  %v786_v1 = vadd.f32 %v785_v54, %v7437_v43 }
 0x125   : > { %v694_v7 = vpop.f32.mrf.mxu0  ;;  %v787_v8 = vpop.f32.mrf.mxu1 }
 0x126   : > { %9560 = vst [vmem:[#allocation24_spill] sm:$0xff] %v7502_v56  ;;  %9561 = vst [vmem:[#allocation25_spill] sm:$0xff] %v7504_v60  ;;  %v695_v9 = vadd.f32 %v694_v7, %v7403_v5  ;;  %v788_v10 = vadd.f32 %v787_v8, %v7441_v44 }
 0x127   : > { %v698_v11 = vpop.f32.mrf.mxu0  ;;  %v791_v12 = vpop.f32.mrf.mxu1 }
 0x128   : > { %v7518_v17 = vpack.c.bf16 %v695_v9, %v693_v61  ;;  %v7520_v19 = vpack.c.bf16 %v788_v10, %v786_v1  ;;  %v699_v24 = vadd.f32 %v698_v11, %v7399_v3  ;;  %v792_v25 = vadd.f32 %v791_v12, %v7437_v43  ;;  %v7549_v61 = vld [vmem:[%s7091_s24 + $0x18] sm:$0xff]   ;;  %v7561_v12 = vld [vmem:[%s7091_s24 + $0x50] sm:$0xff]  }
 0x129   : > { %v700_v29 = vpop.f32.mrf.mxu0  ;;  %v793_v32 = vpop.f32.mrf.mxu1  ;;  %v7557_v9 = vrot.slane %v7525_v27, %v535_v2  ;;  %5915 = vmatpush3.bf16.msra.mxu0 %v7549_v61 }
 0x12a   : > { %9562 = vst [vmem:[#allocation26_spill] sm:$0xff] %v7518_v17  ;;  %9563 = vst [vmem:[#allocation27_spill] sm:$0xff] %v7520_v19  ;;  %v701_v33 = vadd.f32 %v700_v29, %v7403_v5  ;;  %v794_v37 = vadd.f32 %v793_v32, %v7441_v44  ;;  %5916 = vmatprep.subr.bf16.mxu0 %v7561_v12 }
 0x12b   : > { %v702_v41 = vpop.f32.mrf.mxu0  ;;  %v795_v42 = vpop.f32.mrf.mxu1 }
 0x12c   : > { %v7542_v50 = vpack.c.bf16 %v701_v33, %v699_v24  ;;  %v7544_v51 = vpack.c.bf16 %v794_v37, %v792_v25  ;;  %v703_v53 = vadd.f32 %v702_v41, %v7399_v3  ;;  %v796_v54 = vadd.f32 %v795_v42, %v7437_v43  ;;  %v7570_v33 = vld [vmem:[%s7091_s24 + $0x10] sm:$0xff]  }
 0x12d   : > { %v704_v1 = vpop.f32.mrf.mxu0  ;;  %v797_v7 = vpop.f32.mrf.mxu1  ;;  %5917 = vmatpush3.bf16.msra.mxu0 %v7570_v33 }
 0x12e   : > { %9564 = vst [vmem:[#allocation28_spill] sm:$0xff] %v7542_v50  ;;  %9565 = vst [vmem:[#allocation29_spill] sm:$0xff] %v7544_v51  ;;  %v705_v0 = vadd.f32 %v704_v1, %v7403_v5  ;;  %v798_v8 = vadd.f32 %v797_v7, %v7441_v44  ;;  %v7580_v7 = vld [vmem:[%s7091_s24 + $0x8] sm:$0xff]  }
 0x12f   : > { %v801_v10 = vpop.f32.mrf.mxu1  ;;  %v1216_v11 = vpop.f32.mrf.mxu0 }
 0x130   : > { %v7563_v24 = vpack.c.bf16 %v705_v0, %v703_v53  ;;  %v7565_v25 = vpack.c.bf16 %v798_v8, %v796_v54  ;;  %v802_v29 = vadd.f32 %v801_v10, %v7437_v43  ;;  %v1217_v32 = vadd.f32 %v1216_v11, %v7537_v46  ;;  %v7577_v54 = vld [vmem:[%s7091_s24 + $0x48] sm:$0xff]   ;;  %v7583_v0 = vld [vmem:[%s7091_s24 + $0x40] sm:$0xff]  }
 0x131   : > { %v803_v2 = vpop.f32.mrf.mxu1  ;;  %v1218_v37 = vpop.f32.mrf.mxu0  ;;  %5918 = vmatprep.subr.bf16.mxu0 %v7577_v54 }
 0x132   : > { %9566 = vst [vmem:[#allocation30_spill] sm:$0xff] %v7563_v24  ;;  %9567 = vst [vmem:[#allocation31_spill] sm:$0xff] %v7565_v25  ;;  %v804_v41 = vadd.f32 %v803_v2, %v7441_v44  ;;  %v1219_v42 = vadd.f32 %v1218_v37, %v7557_v9  ;;  %v9469_v37 = vmov 0.0|0.0   ;;  %5919 = vmatpush3.bf16.msra.mxu0 %v7580_v7 }
 0x133   : > { %v805_v53 = vpop.f32.mrf.mxu1  ;;  %v1220_v1 = vpop.f32.mrf.mxu0  ;;  %2190 = vmatprep.mubr.bf16.mxu0 %v9469_v37  ;;  %5920 = vmatprep.subr.bf16.mxu0 %v7583_v0 }
 0x134   : > { %v7585_v8 = vpack.c.bf16 %v804_v41, %v802_v29  ;;  %v7587_v10 = vpack.c.bf16 %v1219_v42, %v1217_v32  ;;  %v806_v11 = vadd.f32 %v805_v53, %v7437_v43  ;;  %v1221_v2 = vadd.f32 %v1220_v1, %v7537_v46  ;;  %v7597_v29 = vld [vmem:[%s7091_s24] sm:$0xff]  }
 0x135   : > { %v807_v52 = vpop.f32.mrf.mxu1  ;;  %v1222_v34 = vpop.f32.mrf.mxu0 }
 0x136   : > { %9568 = vst [vmem:[#allocation32_spill] sm:$0xff] %v7585_v8  ;;  %v808_v31 = vadd.f32 %v807_v52, %v7441_v44  ;;  %v1223_v30 = vadd.f32 %v1222_v34, %v7557_v9  ;;  %5921 = vmatpush3.bf16.msra.mxu0 %v7597_v29 }
 0x137   : > { %v811_v32 = vpop.f32.mrf.mxu1  ;;  %v1226_v41 = vpop.f32.mrf.mxu0  ;;  %5934 = vmatprep.subr.bf16.mxu0 %v7468_v20 }
 0x138   : > { %v7600_v42 = vpack.c.bf16 %v808_v31, %v806_v11  ;;  %v7602_v53 = vpack.c.bf16 %v1223_v30, %v1221_v2  ;;  %v812_v1 = vadd.f32 %v811_v32, %v7437_v43  ;;  %v1227_v37 = vadd.f32 %v1226_v41, %v7537_v46 }
 0x139   : > { %v813_v48 = vpop.f32.mrf.mxu1  ;;  %v1228_v52 = vpop.f32.mrf.mxu0 }
 0x13a   : > { %9569 = vst [vmem:[#allocation33_spill] sm:$0xff] %v7600_v42  ;;  %v814_v34 = vadd.f32 %v813_v48, %v7441_v44  ;;  %v1229_v36 = vadd.f32 %v1228_v52, %v7557_v9 }
 0x13b   : > { %v815_v23 = vpop.f32.mrf.mxu1  ;;  %v1230_v16 = vpop.f32.mrf.mxu0 }
 0x13c   : > { %v7610_v31 = vpack.c.bf16 %v814_v34, %v812_v1  ;;  %v7612_v30 = vpack.c.bf16 %v1229_v36, %v1227_v37  ;;  %v816_v11 = vadd.f32 %v815_v23, %v7437_v43  ;;  %v1231_v2 = vadd.f32 %v1230_v16, %v7537_v46 }
 0x13d   : > { %v817_v32 = vpop.f32.mrf.mxu1  ;;  %v1232_v41 = vpop.f32.mrf.mxu0 }
 0x13e   : > { %9570 = vst [vmem:[#allocation34_spill] sm:$0xff] %v7610_v31  ;;  %v818_v48 = vadd.f32 %v817_v32, %v7441_v44  ;;  %v1233_v52 = vadd.f32 %v1232_v41, %v7557_v9 }
 0x13f   : > { %v821_v24 = vpop.f32.mrf.mxu1  ;;  %v1236_v50 = vpop.f32.mrf.mxu0 }
 0x140   : > { %v7618_v42 = vpack.c.bf16 %v818_v48, %v816_v11  ;;  %v7620_v8 = vpack.c.bf16 %v1233_v52, %v1231_v2  ;;  %v822_v1 = vadd.f32 %v821_v24, %v7437_v43  ;;  %v1237_v36 = vadd.f32 %v1236_v50, %v7537_v46 }
 0x141   : > { %v823_v37 = vpop.f32.mrf.mxu1  ;;  %v1238_v23 = vpop.f32.mrf.mxu0 }
 0x142   : > { %9571 = vst [vmem:[#allocation35_spill] sm:$0xff] %v7618_v42  ;;  %v824_v16 = vadd.f32 %v823_v37, %v7441_v44  ;;  %v1239_v34 = vadd.f32 %v1238_v23, %v7557_v9 }
 0x143   : > { %v825_v31 = vpop.f32.mrf.mxu1  ;;  %v1240_v32 = vpop.f32.mrf.mxu0 }
 0x144   : > { %v7626_v17 = vpack.c.bf16 %v824_v16, %v822_v1  ;;  %v7628_v41 = vpack.c.bf16 %v1239_v34, %v1237_v36  ;;  %v826_v11 = vadd.f32 %v825_v31, %v7437_v43  ;;  %v1241_v2 = vadd.f32 %v1240_v32, %v7537_v46 }
 0x145   : > { %v827_v48 = vpop.f32.mrf.mxu1  ;;  %v1242_v24 = vpop.f32.mrf.mxu0 }
 0x146   : > { %9572 = vst [vmem:[#allocation36_spill] sm:$0xff] %v7626_v17  ;;  %v828_v50 = vadd.f32 %v827_v48, %v7441_v44  ;;  %v1243_v52 = vadd.f32 %v1242_v24, %v7557_v9 }
 0x147   : > { %v831_v42 = vpop.f32.mrf.mxu1  ;;  %v1246_v37 = vpop.f32.mrf.mxu0 }
 0x148   : > { %v7634_v56 = vpack.c.bf16 %v828_v50, %v826_v11  ;;  %v7636_v23 = vpack.c.bf16 %v1243_v52, %v1241_v2  ;;  %v832_v1 = vadd.f32 %v831_v42, %v7437_v43  ;;  %v1247_v36 = vadd.f32 %v1246_v37, %v7537_v46 }
 0x149   : > { %v833_v16 = vpop.f32.mrf.mxu1  ;;  %v1248_v31 = vpop.f32.mrf.mxu0 }
 0x14a   : > { %9573 = vst [vmem:[#allocation37_spill] sm:$0xff] %v7634_v56  ;;  %9574 = vst [vmem:[#allocation38_spill] sm:$0xff] %v7636_v23  ;;  %v834_v34 = vadd.f32 %v833_v16, %v7441_v44  ;;  %v1249_v32 = vadd.f32 %v1248_v31, %v7557_v9  ;;  %v9577_v16 = vsub.s32 2, %v7392_v63 }
 0x14b   : > { %v835_v17 = vpop.f32.mrf.mxu1  ;;  %v1250_v48 = vpop.f32.mrf.mxu0 }
 0x14c   : > { %v7642_v25 = vpack.c.bf16 %v834_v34, %v832_v1  ;;  %v7644_v24 = vpack.c.bf16 %v1249_v32, %v1247_v36  ;;  %v836_v11 = vadd.f32 %v835_v17, %v7437_v43  ;;  %v1251_v2 = vadd.f32 %v1250_v48, %v7537_v46 }
 0x14d   : > { %v837_v50 = vpop.f32.mrf.mxu1  ;;  %v1252_v42 = vpop.f32.mrf.mxu0  ;;  %v7653_v31 = vrot.slane %v7525_v27, %v9577_v16  ;;  %v9578_v1 = vsub.s32 3, %v7392_v63 }
 0x14e   : > { %9575 = vst [vmem:[#allocation39_spill] sm:$0xff] %v7642_v25  ;;  %9576 = vst [vmem:[#allocation40_spill] sm:$0xff] %v7644_v24  ;;  %v838_v52 = vadd.f32 %v837_v50, %v7441_v44  ;;  %v1253_v37 = vadd.f32 %v1252_v42, %v7557_v9 }
 0x14f   : > { %v7658_v36 = vrot.slane %v7525_v27, %v9578_v1  ;;  %v1256_v34 = vpop.f32.mrf.mxu0  ;;  %v1329_v17 = vpop.f32.mrf.mxu1 }
 0x150   : > { %v7660_v32 = vpack.c.bf16 %v838_v52, %v836_v11  ;;  %v7662_v48 = vpack.c.bf16 %v1253_v37, %v1251_v2  ;;  %v1257_v50 = vadd.f32 %v1256_v34, %v7537_v46  ;;  %v1330_v56 = vadd.f32 %v1329_v17, %v7653_v31 }
 0x151   : > { %v1258_v25 = vpop.f32.mrf.mxu0  ;;  %v1331_v42 = vpop.f32.mrf.mxu1 }
 0x152   : > { %9579 = vst [vmem:[#allocation41_spill] sm:$0xff] %v7660_v32  ;;  %9580 = vst [vmem:[#allocation42_spill] sm:$0xff] %v7662_v48  ;;  %v1259_v16 = vadd.f32 %v1258_v25, %v7557_v9  ;;  %v1332_v51 = vadd.f32 %v1331_v42, %v7658_v36 }
 0x153   : > { %v1260_v63 = vpop.f32.mrf.mxu0  ;;  %v7668_v24 = vpop.f32.mrf.mxu1 }
 0x154   : > { %v7670_v27 = vpack.c.bf16 %v1259_v16, %v1257_v50  ;;  %v7672_v1 = vpack.c.bf16 %v1332_v51, %v1330_v56  ;;  %v1261_v11 = vadd.f32 %v1260_v63, %v7537_v46 }
 0x155   : > { %v1262_v2 = vpop.f32.mrf.mxu0  ;;  %v7675_v52 = vpop.f32.mrf.mxu1 }
 0x156   : > { %9581 = vst [vmem:[#allocation43_spill] sm:$0xff] %v7670_v27  ;;  %v1263_v37 = vadd.f32 %v1262_v2, %v7557_v9 }
 0x157   : > { %v1266_v34 = vpop.f32.mrf.mxu0  ;;  %v1339_v17 = vpop.f32.mrf.mxu1 }
 0x158   : > { %v7678_v32 = vpack.c.bf16 %v1263_v37, %v1261_v11  ;;  %v1267_v25 = vadd.f32 %v1266_v34, %v7537_v46  ;;  %v1340_v42 = vadd.f32 %v1339_v17, %v7653_v31 }
 0x159   : > { %v1268_v48 = vpop.f32.mrf.mxu0  ;;  %v1341_v50 = vpop.f32.mrf.mxu1 }
 0x15a   : > { %9582 = vst [vmem:[#allocation44_spill] sm:$0xff] %v7678_v32  ;;  %v1269_v56 = vadd.f32 %v1268_v48, %v7557_v9  ;;  %v1342_v51 = vadd.f32 %v1341_v50, %v7658_v36 }
 0x15b   : > { %v1270_v16 = vpop.f32.mrf.mxu0  ;;  %v1343_v63 = vpop.f32.mrf.mxu1 }
 0x15c   : > { %v7684_v27 = vpack.c.bf16 %v1269_v56, %v1267_v25  ;;  %v7686_v39 = vpack.c.bf16 %v1342_v51, %v1340_v42  ;;  %v1271_v2 = vadd.f32 %v1270_v16, %v7537_v46  ;;  %v1344_v11 = vadd.f32 %v1343_v63, %v7653_v31 }
 0x15d   : > { %v1272_v37 = vpop.f32.mrf.mxu0  ;;  %v1345_v34 = vpop.f32.mrf.mxu1 }
 0x15e   : > { %9583 = vst [vmem:[#allocation45_spill] sm:$0xff] %v7684_v27  ;;  %v1273_v17 = vadd.f32 %v1272_v37, %v7557_v9  ;;  %v1346_v32 = vadd.f32 %v1345_v34, %v7658_v36 }
 0x15f   : > { %v1276_v21 = vpop.f32.mrf.mxu0  ;;  %v1349_v48 = vpop.f32.mrf.mxu1 }
 0x160   : > { %v7692_v19 = vpack.c.bf16 %v1273_v17, %v1271_v2  ;;  %v7694_v50 = vpack.c.bf16 %v1346_v32, %v1344_v11  ;;  %v1277_v25 = vadd.f32 %v1276_v21, %v7537_v46  ;;  %v1350_v42 = vadd.f32 %v1349_v48, %v7653_v31 }
 0x161   : > { %v1278_v56 = vpop.f32.mrf.mxu0  ;;  %v1351_v51 = vpop.f32.mrf.mxu1 }
 0x162   : > { %9584 = vst [vmem:[#allocation46_spill] sm:$0xff] %v7692_v19  ;;  %v1279_v16 = vadd.f32 %v1278_v56, %v7557_v9  ;;  %v1352_v63 = vadd.f32 %v1351_v51, %v7658_v36 }
 0x163   : > { %v1280_v27 = vpop.f32.mrf.mxu0  ;;  %v1353_v37 = vpop.f32.mrf.mxu1 }
 0x164   : > { %v7700_v60 = vpack.c.bf16 %v1279_v16, %v1277_v25  ;;  %v7702_v34 = vpack.c.bf16 %v1352_v63, %v1350_v42  ;;  %v1281_v2 = vadd.f32 %v1280_v27, %v7537_v46  ;;  %v1354_v32 = vadd.f32 %v1353_v37, %v7653_v31 }
 0x165   : > { %v1282_v11 = vpop.f32.mrf.mxu0  ;;  %v1355_v21 = vpop.f32.mrf.mxu1 }
 0x166   : > { %9585 = vst [vmem:[#allocation47_spill] sm:$0xff] %v7700_v60  ;;  %9586 = vst [vmem:[#allocation48_spill] sm:$0xff] %v7702_v34  ;;  %v1283_v17 = vadd.f32 %v1282_v11, %v7557_v9  ;;  %v1356_v48 = vadd.f32 %v1355_v21, %v7658_v36 }
 0x167   : > { %v1286_v19 = vpop.f32.mrf.mxu0  ;;  %v1359_v56 = vpop.f32.mrf.mxu1 }
 0x168   : > { %v7708_v23 = vpack.c.bf16 %v1283_v17, %v1281_v2  ;;  %v7710_v51 = vpack.c.bf16 %v1356_v48, %v1354_v32  ;;  %v1287_v25 = vadd.f32 %v1286_v19, %v7537_v46  ;;  %v1360_v42 = vadd.f32 %v1359_v56, %v7653_v31 }
 0x169   : > { %v1288_v16 = vpop.f32.mrf.mxu0  ;;  %v1361_v27 = vpop.f32.mrf.mxu1  ;;  %v653_v19 = vadd.f32 %v7409_v13, %v7399_v3  ;;  %v655_v17 = vadd.f32 %v7416_v18, %v7403_v5  ;;  %v1903_v5 = vunpack.c.h.bf16 %v7411_v15 }
 0x16a   : > { %9587 = vst [vmem:[#allocation49_spill] sm:$0xff] %v7708_v23  ;;  %v1289_v63 = vadd.f32 %v1288_v16, %v7557_v9  ;;  %v1362_v37 = vadd.f32 %v1361_v27, %v7658_v36 }
 0x16b   : > { %v1290_v60 = vpop.f32.mrf.mxu0  ;;  %v1363_v11 = vpop.f32.mrf.mxu1 }
 0x16c   : > { %v7716_v34 = vpack.c.bf16 %v1289_v63, %v1287_v25  ;;  %v7718_v21 = vpack.c.bf16 %v1362_v37, %v1360_v42  ;;  %v1291_v2 = vadd.f32 %v1290_v60, %v7537_v46  ;;  %v1364_v32 = vadd.f32 %v1363_v11, %v7653_v31 }
 0x16d   : > { %v1292_v48 = vpop.f32.mrf.mxu0  ;;  %v1365_v56 = vpop.f32.mrf.mxu1  ;;  %v5843_v46 = vpack.c.bf16 %v655_v17, %v653_v19 }
 0x16e   : > { %9588 = vst [vmem:[#allocation50_spill] sm:$0xff] %v7716_v34  ;;  %9589 = vst [vmem:[#allocation51_spill] sm:$0xff] %v7718_v21  ;;  %v1293_v16 = vadd.f32 %v1292_v48, %v7557_v9  ;;  %v1366_v27 = vadd.f32 %v1365_v56, %v7658_v36  ;;  %v1902_v9 = vunpack.c.l.bf16 %v7411_v15 }
 0x16f   : > { %v1369_v25 = vpop.f32.mrf.mxu1  ;;  %v1826_v63 = vpop.f32.mrf.mxu0 }
 0x170   : > { %v7728_v42 = vpack.c.bf16 %v1293_v16, %v1291_v2  ;;  %v7730_v37 = vpack.c.bf16 %v1366_v27, %v1364_v32  ;;  %v1370_v60 = vadd.f32 %v1369_v25, %v7653_v31  ;;  %v1906_v32 = vunpack.c.l.bf16 %v5843_v46 }
 0x171   : > { %v1371_v11 = vpop.f32.mrf.mxu1  ;;  %v1828_v3 = vpop.f32.mrf.mxu0  ;;  %v1910_v25 = vadd.f32 %v1902_v9, %v1826_v63  ;;  %v1923_v9 = vunpack.c.h.bf16 %v7587_v10 }
 0x172   : > { %9590 = vst [vmem:[#allocation52_spill] sm:$0xff] %v7728_v42  ;;  %9591 = vst [vmem:[#allocation53_spill] sm:$0xff] %v7730_v37  ;;  %v1372_v13 = vadd.f32 %v1371_v11, %v7658_v36  ;;  %v1911_v56 = vadd.f32 %v1903_v5, %v1828_v3  ;;  %v1907_v42 = vunpack.c.h.bf16 %v5843_v46  ;;  %v1922_v3 = vunpack.c.l.bf16 %v7587_v10 }
 0x173   : > { %v1373_v18 = vpop.f32.mrf.mxu1  ;;  %v1830_v34 = vpop.f32.mrf.mxu0  ;;  %v1927_v10 = vunpack.c.h.bf16 %v7602_v53 }
 0x174   : > { %v7736_v48 = vpack.c.bf16 %v1372_v13, %v1370_v60  ;;  %v1374_v2 = vadd.f32 %v1373_v18, %v7653_v31  ;;  %v1914_v17 = vadd.f32 %v1906_v32, %v1830_v34  ;;  %v5630_v15 = vmul.f32 -1.442695, %v1911_v56 }
 0x175   : > { %v1375_v16 = vpop.f32.mrf.mxu1  ;;  %v1832_v27 = vpop.f32.mrf.mxu0  ;;  %v5628_v18 = vmul.f32 -1.442695, %v1910_v25  ;;  %v1926_v25 = vunpack.c.l.bf16 %v7602_v53 }
 0x176   : > { %9592 = vst [vmem:[#allocation54_spill] sm:$0xff] %v7736_v48  ;;  %v1376_v19 = vadd.f32 %v1375_v16, %v7658_v36  ;;  %v1915_v60 = vadd.f32 %v1907_v42, %v1832_v27  ;;  %v5629_v63 = vmul.f32 -1.442695, %v1914_v17  ;;  %6274 = vpow2.f32 %v5630_v15 }
 0x177   : > { %v1379_v11 = vpop.f32.mrf.mxu1  ;;  %v1836_v23 = vpop.f32.mrf.mxu0  ;;  %6276 = vpow2.f32 %v5628_v18 }
 0x178   : > { %v7740_v37 = vpack.c.bf16 %v1376_v19, %v1374_v2  ;;  %v1380_v21 = vadd.f32 %v1379_v11, %v7653_v31  ;;  %v1930_v32 = vadd.f32 %v1922_v3, %v1836_v23  ;;  %v5631_v56 = vmul.f32 -1.442695, %v1915_v60 }
 0x179   : > { %v1381_v13 = vpop.f32.mrf.mxu1  ;;  %v1838_v48 = vpop.f32.mrf.mxu0  ;;  %6278 = vpow2.f32 %v5629_v63 }
 0x17a   : > { %9593 = vst [vmem:[#allocation55_spill] sm:$0xff] %v7740_v37  ;;  %v1382_v5 = vadd.f32 %v1381_v13, %v7658_v36  ;;  %v1931_v42 = vadd.f32 %v1923_v9, %v1838_v48  ;;  %v5636_v13 = vmul.f32 -1.442695, %v1930_v32  ;;  %6280 = vpow2.f32 %v5631_v56 }
 0x17b   : > { %v1383_v34 = vpop.f32.mrf.mxu1  ;;  %v1840_v46 = vpop.f32.mrf.mxu0 }
 0x17c   : > { %v7746_v16 = vpack.c.bf16 %v1382_v5, %v1380_v21  ;;  %v1384_v2 = vadd.f32 %v1383_v34, %v7653_v31  ;;  %v1934_v23 = vadd.f32 %v1926_v25, %v1840_v46  ;;  %v5638_v15 = vmul.f32 -1.442695, %v1931_v42 }
 0x17d   : > { %v1385_v27 = vpop.f32.mrf.mxu1  ;;  %v1842_v11 = vpop.f32.mrf.mxu0  ;;  %6282 = vpow2.f32 %v5636_v13 }
 0x17e   : > { %9594 = vst [vmem:[#allocation56_spill] sm:$0xff] %v7746_v16  ;;  %v1386_v19 = vadd.f32 %v1385_v27, %v7658_v36  ;;  %v1935_v48 = vadd.f32 %v1927_v10, %v1842_v11  ;;  %v5637_v9 = vmul.f32 -1.442695, %v1934_v23  ;;  %6284 = vpow2.f32 %v5638_v15 }
 0x17f   : > { %v1389_v17 = vpop.f32.mrf.mxu1  ;;  %v766_v23 = vadd.f32 %v7451_v57, %v7437_v43  ;;  %v1905_v43 = vunpack.c.h.bf16 %v7455_v59 }
 0x180   : > { %v7752_v21 = vpack.c.bf16 %v1386_v19, %v1384_v2  ;;  %v1390_v3 = vadd.f32 %v1389_v17, %v7653_v31  ;;  %v5639_v63 = vmul.f32 -1.442695, %v1935_v48  ;;  %6286 = vpow2.f32 %v5637_v9 }
 0x181   : > { %v1391_v60 = vpop.f32.mrf.mxu1  ;;  %v768_v19 = vadd.f32 %v7458_v62, %v7441_v44  ;;  %v1904_v44 = vunpack.c.l.bf16 %v7455_v59 }
 0x182   : > { %9595 = vst [vmem:[#allocation57_spill] sm:$0xff] %v7752_v21  ;;  %v1392_v18 = vadd.f32 %v1391_v60, %v7658_v36  ;;  %6288 = vpow2.f32 %v5639_v63 }
 0x183   : > { %v1393_v5 = vpop.f32.mrf.mxu1  ;;  %v6275_v25 = vpop.eup %6274 }
 0x184   : > { %v7756_v34 = vpack.c.bf16 %v1392_v18, %v1390_v3  ;;  %v1394_v53 = vadd.f32 %v1393_v5, %v7653_v31  ;;  %v6277_v10 = vpop.eup %6276  ;;  %v1960_v48 = vadd.f32 1.0, %v6275_v25  ;;  %v5844_v5 = vpack.c.bf16 %v768_v19, %v766_v23 }
 0x185   : > { %v1395_v46 = vpop.f32.mrf.mxu1  ;;  %v1948_v9 = vadd.f32 1.0, %v6277_v10  ;;  %v1336_v25 = vadd.f32 %v7675_v52, %v7658_v36  ;;  %v1334_v10 = vadd.f32 %v7668_v24, %v7653_v31  ;;  %v1924_v52 = vunpack.c.l.bf16 %v7672_v1 }
 0x186   : > { %9596 = vst [vmem:[#allocation58_spill] sm:$0xff] %v7756_v34  ;;  %v1396_v32 = vadd.f32 %v1395_v46, %v7658_v36  ;;  %v6279_v13 = vpop.eup %6278  ;;  %6290 = vrcp.f32 %v1960_v48  ;;  %v1925_v24 = vunpack.c.h.bf16 %v7672_v1  ;;  %v2708_v34 = vld [vmem:[#allocation2 + $0x18] sm:$0xff] }
 0x187   : > { %v1399_v2 = vpop.f32.mrf.mxu1  ;;  %v6281_v18 = vpop.eup %6280  ;;  %v1949_v63 = vadd.f32 1.0, %v6279_v13  ;;  %6292 = vrcp.f32 %v1948_v9  ;;  %v1909_v13 = vunpack.c.h.bf16 %v5844_v5 }
 0x188   : > { %v7760_v56 = vpack.c.bf16 %v1396_v32, %v1394_v53  ;;  %v1400_v42 = vadd.f32 %v1399_v2, %v7653_v31  ;;  %v1961_v2 = vadd.f32 1.0, %v6281_v18 }
 0x189   : > { %v1401_v27 = vpop.f32.mrf.mxu1 }
 0x18a   : > { %9597 = vst [vmem:[#allocation59_spill] sm:$0xff] %v7760_v56  ;;  %v1402_v11 = vadd.f32 %v1401_v27, %v7658_v36  ;;  %v6283_v57 = vpop.eup %6282 }
 0x18b   : > { %v1403_v17 = vpop.f32.mrf.mxu1  ;;  %v6285_v27 = vpop.eup %6284  ;;  %v2000_v23 = vadd.f32 1.0, %v6283_v57 }
 0x18c   : > { %v7768_v3 = vpack.c.bf16 %v1402_v11, %v1400_v42  ;;  %v1404_v15 = vadd.f32 %v1403_v17, %v7653_v31  ;;  %v1908_v11 = vunpack.c.l.bf16 %v5844_v5 }
 0x18d   : > { %v1405_v60 = vpop.f32.mrf.mxu1  ;;  %v6287_v48 = vpop.eup %6286 }
 0x18e   : > { %9598 = vst [vmem:[#allocation60_spill] sm:$0xff] %v7768_v3  ;;  %v1406_v53 = vadd.f32 %v1405_v60, %v7658_v36  ;;  %v2012_v60 = vadd.f32 1.0, %v6285_v27  ;;  %v2001_v31 = vadd.f32 1.0, %v6287_v48 }
 0x18f   : > { %v1879_v62 = vpop.f32.mrf.mxu1 }
 0x190   : > { %v7773_v46 = vpack.c.bf16 %v1406_v53, %v1404_v15  ;;  %v1912_v32 = vadd.f32 %v1904_v44, %v1879_v62  ;;  %v6289_v53 = vpop.eup %6288  ;;  %v5876_v44 = vpack.c.bf16 %v1336_v25, %v1334_v10 }
 0x191   : > { %v1881_v42 = vpop.f32.mrf.mxu1 }
 0x192   : > { %9599 = vst [vmem:[#allocation61_spill] sm:$0xff] %v7773_v46  ;;  %v1913_v19 = vadd.f32 %v1905_v43, %v1881_v42  ;;  %6294 = vtanh.f32 %v1912_v32  ;;  %v1928_v57 = vunpack.c.l.bf16 %v5876_v44  ;;  %v1929_v25 = vunpack.c.h.bf16 %v5876_v44 }
 0x193   : > { %v1883_v17 = vpop.f32.mrf.mxu1  ;;  %6296 = vrcp.f32 %v1949_v63  ;;  %v2013_v63 = vadd.f32 1.0, %v6289_v53 }
 0x194   : > { %v5632_v59 = vmul.f32 -1.442695, %v1913_v19  ;;  %v1916_v15 = vadd.f32 %v1908_v11, %v1883_v17  ;;  %6298 = vrcp.f32 %v1961_v2  ;;  %v6291_v11 = vpop.eup %6290 }
 0x195   : > { %v1885_v18 = vpop.f32.mrf.mxu1  ;;  %v6293_v10 = vpop.eup %6292 }
 0x196   : > { %6300 = vpow2.f32 %v5632_v59  ;;  %v1917_v36 = vadd.f32 %v1909_v13, %v1885_v18 }
 0x197   : > { %6302 = vtanh.f32 %v1916_v15  ;;  %v1889_v9 = vpop.f32.mrf.mxu1  ;;  %v1982_v15 = vmul.f32 0.0, %v6291_v11 }
 0x198   : > { %6304 = vrcp.f32 %v2000_v23  ;;  %v5633_v5 = vmul.f32 -1.442695, %v1917_v36  ;;  %v1932_v62 = vadd.f32 %v1924_v52, %v1889_v9 }
 0x199   : > { %6306 = vrcp.f32 %v2012_v60  ;;  %v1891_v32 = vpop.f32.mrf.mxu1 }
 0x19a   : > { %6308 = vpow2.f32 %v5633_v5  ;;  %v1933_v43 = vadd.f32 %v1925_v24, %v1891_v32 }
 0x19b   : > { %6310 = vtanh.f32 %v1932_v62  ;;  %v1893_v2 = vpop.f32.mrf.mxu1 }
 0x19c   : > { %6312 = vrcp.f32 %v2001_v31  ;;  %v5640_v42 = vmul.f32 -1.442695, %v1933_v43  ;;  %v1936_v27 = vadd.f32 %v1928_v57, %v1893_v2 }
 0x19d   : > { %6314 = vrcp.f32 %v2013_v63  ;;  %v1895_v19 = vpop.f32.mrf.mxu1 }
 0x19e   : > { %6316 = vpow2.f32 %v5640_v42  ;;  %v1937_v1 = vadd.f32 %v1929_v25, %v1895_v19 }
 0x19f   : > { %6318 = vtanh.f32 %v1936_v27  ;;  %v6295_v17 = vpop.eup %6294 }
 0x1a0   : > { %v5641_v13 = vmul.f32 -1.442695, %v1937_v1  ;;  %v6297_v23 = vpop.eup %6296  ;;  %v1980_v59 = vmul.f32 %v6295_v17, %v6293_v10 }
 0x1a1   : > { %v6299_v48 = vpop.eup %6298 }
 0x1a2   : > { %6320 = vpow2.f32 %v5641_v13  ;;  %v7782_v18 = vadd.f32 %v1982_v15, %v1980_v59  ;;  %v1983_v24 = vmul.f32 0.0, %v6299_v48 }
 0x1a3   : > { %v6301_v60 = vpop.eup %6300 }
 0x1a4   : > { %v6303_v53 = vpop.eup %6302  ;;  %v1974_v36 = vadd.f32 1.0, %v6301_v60  ;;  %v9511_v52 = vclamps-f32 %v7782_v18, 3.0 }
 0x1a5   : > { %v6305_v44 = vpop.eup %6304  ;;  %v1981_v9 = vmul.f32 %v6303_v53, %v6297_v23 }
 0x1a6   : > { %v6307_v31 = vpop.eup %6306  ;;  %6322 = vrcp.f32 %v1974_v36 }
 0x1a7   : > { %v6309_v5 = vpop.eup %6308  ;;  %6324 = vtanh.f32 %v9511_v52  ;;  %v7787_v62 = vadd.f32 %v1983_v24, %v1981_v9  ;;  %v2034_v2 = vmul.f32 0.0, %v6307_v31 }
 0x1a8   : > { %v6311_v63 = vpop.eup %6310  ;;  %v1975_v32 = vadd.f32 1.0, %v6309_v5 }
 0x1a9   : > { %v6313_v43 = vpop.eup %6312  ;;  %v2032_v57 = vmul.f32 %v6311_v63, %v6305_v44  ;;  %v9510_v42 = vclamps-f32 %v7787_v62, 3.0 }
 0x1aa   : > { %v6315_v27 = vpop.eup %6314  ;;  %6326 = vrcp.f32 %v1975_v32 }
 0x1ab   : > { %v6317_v25 = vpop.eup %6316  ;;  %v7790_v19 = vadd.f32 %v2034_v2, %v2032_v57  ;;  %6328 = vtanh.f32 %v9510_v42  ;;  %v2035_v13 = vmul.f32 0.0, %v6315_v27 }
 0x1ac   : > { %v6319_v11 = vpop.eup %6318  ;;  %v2026_v1 = vadd.f32 1.0, %v6317_v25  ;;  %v9600_v25 = vmov 0.0|0.0  }
 0x1ad   : > { %v9509_v10 = vclamps-f32 %v7790_v19, 3.0  ;;  %v2033_v17 = vmul.f32 %v6319_v11, %v6313_v43 }
 0x1ae   : > { %6330 = vrcp.f32 %v2026_v1 }
 0x1af   : > { %v6321_v23 = vpop.eup %6320  ;;  %6332 = vtanh.f32 %v9509_v10  ;;  %v7797_v59 = vadd.f32 %v2035_v13, %v2033_v17  ;;  %v2435_v10 = vunpack.c.h.bf16 %v7443_v47 }
 0x1b0   : > { %v2027_v15 = vadd.f32 1.0, %v6321_v23 }
 0x1b1   : > { %v9508_v48 = vclamps-f32 %v7797_v59, 3.0 }
 0x1b2   : > { %6334 = vrcp.f32 %v2027_v15  ;;  %v2246_v15 = vld [vmem:[#allocation6 + $0x8] sm:$0xff] }
 0x1b3   : > { %v6323_v60 = vpop.eup %6322  ;;  %6336 = vtanh.f32 %v9508_v48 }
 0x1b4   : > { %v6325_v53 = vpop.eup %6324 }
 0x1b5   : > { %v1992_v36 = vmul.f32 %v6325_v53, %v6323_v60 }
 0x1b7   : > { %v6327_v44 = vpop.eup %6326 }
 0x1b8   : > { %v6329_v9 = vpop.eup %6328 }
 0x1b9   : > { %v1993_v24 = vmul.f32 %v6329_v9, %v6327_v44  ;;  %v2285_v44 = vld [vmem:[#allocation3] sm:$0xff] }
 0x1bb   : > { %v6331_v31 = vpop.eup %6330  ;;  %v2058_v5 = vpack.c.bf16 %v1993_v24, %v1992_v36 }
 0x1bc   : > { %v6333_v63 = vpop.eup %6332 }
 0x1bd   : > { %2191 = vmatmul.mubr.bf16.vlgmr.msra.gmra.mxu0 %v2058_v5  ;;  %v2044_v32 = vmul.f32 %v6333_v63, %v6331_v31 }
 0x1be   : > { %5935 = vmatpush3.bf16.msra.mxu0 %v7477_v26  ;;  %v7821_v26 = vpop.permute.xlu0 %2234 }
 0x1bf   : > { %v6335_v43 = vpop.eup %6334  ;;  %5936 = vmatprep.subr.bf16.mxu0 %v7484_v38  ;;  %v2254_v38 = vpop.permute.xlu1 %2253  ;;  %vm2239_vm7 = vcmp.eq.s32.totalorder %v7821_v26, 1 }
 0x1c0   : > { %v6337_v57 = vpop.eup %6336 }
 0x1c1   : > { %v2045_v2 = vmul.f32 %v6337_v57, %v6335_v43 }
 0x1c2   : > { %5937 = vmatpush3.bf16.msra.mxu0 %v7493_v45  ;;  %v7823_v45 = vpop.permute.xlu0 %2237 }
 0x1c3   : > { %v2061_v27 = vpack.c.bf16 %v2045_v2, %v2044_v32  ;;  %5938 = vmatprep.subr.bf16.mxu0 %v7500_v55  ;;  %v2647_v32 = vld [vmem:[%s9448_s2 + $0x10] sm:$0xff]  ;;  %vm2240_vm9 = vcmp.eq.s32.totalorder %v7823_v45, 1 }
 0x1c4   : > { %vm2649_vm8 = vcmp.gt.f32.partialorder %v2647_v32, 0.5 }
 0x1c5   : > { %2198 = vmatprep.mubr.bf16.mxu0 %v2061_v27  ;;  %v2286_v27 = vld [vmem:[#allocation3 + $0x8] sm:$0xff] }
 0x1c6   : > { %2199 = vmatmul.mubr.bf16.gmra.mxu0 %v9600_v25 }
 0x1c7   : > { %5939 = vmatpush3.bf16.msra.mxu0 %v7509_v6  ;;  %2622 = vmatprep.mubr.bf16.mxu0 %v9600_v25  ;;  %v2256_v6 = vpop.permute.xlu1 %2255 }
 0x1c8   : > { %5940 = vmatprep.subr.bf16.mxu0 %v7516_v14  ;;  %v2276_v14 = vld [vmem:[#allocation2] sm:$0xff] }
 0x1cb   : > { %5941 = vmatpush3.bf16.msra.mxu0 %v7528_v28  ;;  %v7825_v28 = vstv %s1699_s27  ;;  %v7831_v11 = vpop.permute.xlu1 %2225  ;;  %s6957_s27 = smov 64  }
 0x1cc   : > { %5942 = vmatprep.subr.bf16.mxu0 %v7540_v49  ;;  %vm2228_vm6 = vcmp.eq.s32.totalorder %v7831_v11, 1  ;;  %v2287_v57 = vmul.f32 %v2285_v44, %v7825_v28  ;;  %v7907_v44 = vld [vmem:[%s7076_s11 + $0xc] ss:$16 sps:$4 sm:$0xff]  }
 0x1cf   : > { %5943 = vmatpush3.bf16.msra.mxu0 %v7549_v61  ;;  %v7827_v61 = vpop.permute.xlu0 %2222 }
 0x1d0   : > { %5944 = vmatprep.subr.bf16.mxu0 %v7561_v12  ;;  %vm2227_vm5 = vcmp.eq.s32.totalorder %v7827_v61, 1 }
 0x1d3   : > { %5945 = vmatpush3.bf16.msra.mxu0 %v7570_v33  ;;  %v2245_v33 = vld [vmem:[#allocation6] sm:$0xff] }
 0x1d4   : > { %5946 = vmatprep.subr.bf16.mxu0 %v7577_v54 }
 0x1d7   : > { %5947 = vmatpush3.bf16.msra.mxu0 %v7580_v7 }
 0x1d8   : > { %5948 = vmatprep.subr.bf16.mxu0 %v7583_v0  ;;  %v2277_v0 = vld [vmem:[#allocation2 + $0x8] sm:$0xff] }
 0x1d9   : > { %v2280_v60 = vmul.f32 %v7825_v28, %v2277_v0 }
 0x1db   : > { %5949 = vmatpush3.bf16.msra.mxu0 %v7597_v29 }
 0x1dc   : > { %5962 = vmatprep.subr.bf16.mxu0 %v7468_v20  ;;  %v2279_v20 = vmul.f32 %v7825_v28, %v2276_v14 }
 0x27d   : > { %v5922_v55 = vpop.f32.mrf.mxu0 }
 0x27f   : > { %v5923_v49 = vpop.f32.mrf.mxu0 }
 0x280   : > { %v5924_v12 = vadd.f32 %v5923_v49, %v5922_v55 }
 0x281   : > { %v5925_v54 = vpop.f32.mrf.mxu0 }
 0x282   : > { %v5660_v7 = vclamps-f32 %v5924_v12, 3.0 }
 0x283   : > { %v5926_v29 = vpop.f32.mrf.mxu0 }
 0x284   : > { %v2247_v1 = vsel %vm2227_vm5, %v5660_v7, %v2245_v33  ;;  %v2274_v17 = vsel %vm2227_vm5, %v5660_v7, 0.0  ;;  %v5927_v13 = vadd.f32 %v5926_v29, %v5925_v54  ;;  %v9602_v7 = vmov 0  }
 0x285   : > { %2261 = vst.msk [vmem:[#allocation6] sm:$0xff] %vm589_vm2, %v2247_v1  ;;  %v2281_v23 = vadd.f32 %v2279_v20, %v2274_v17  ;;  %v2288_v20 = vmul.f32 %v2286_v27, %v7825_v28  ;;  %v2651_v0 = vsel %vm2649_vm8, 1, %v9602_v7 }
 0x286   : > { %v5661_v53 = vclamps-f32 %v5927_v13, 3.0  ;;  %v5928_v36 = vpop.f32.mrf.mxu0 }
 0x287   : > { %2291 = vst.msk [vmem:[#allocation2] sm:$0xff] %vm589_vm2, %v2281_v23  ;;  %2295 = vst.msk [vmem:[%s7093_s14] sm:$0xff] %vm589_vm2, %v2281_v23 }
 0x288   : > { %v2248_v9 = vsel %vm2228_vm6, %v5661_v53, %v2246_v15  ;;  %v2275_v24 = vsel %vm2228_vm6, %v5661_v53, 0.0  ;;  %v5929_v31 = vpop.f32.mrf.mxu0  ;;  %v7883_v15 = vld [vmem:[%s7076_s11 + $0x68] ss:$16 sps:$4 sm:$0xff]   ;;  %v7899_v53 = vld [vmem:[%s7076_s11 + $0x2c] ss:$16 sps:$4 sm:$0xff]  }
 0x289   : > { %2262 = vst.msk [vmem:[#allocation6 + $0x8] sm:$0xff] %vm589_vm2, %v2248_v9  ;;  %v2282_v5 = vadd.f32 %v2280_v60, %v2275_v24  ;;  %v5930_v63 = vadd.f32 %v5929_v31, %v5928_v36  ;;  %v7895_v60 = vld [vmem:[%s7076_s11 + $0x48] ss:$16 sps:$4 sm:$0xff]   ;;  %v7915_v24 = vld [vmem:[%s7076_s11 + $0x64] ss:$16 sps:$4 sm:$0xff]  }
 0x28a   : > { %v5931_v43 = vpop.f32.mrf.mxu0  ;;  %v7903_v36 = vld [vmem:[%s7076_s11 + $0x28] ss:$16 sps:$4 sm:$0xff]  }
 0x28b   : > { %2292 = vst.msk [vmem:[#allocation2 + $0x8] sm:$0xff] %vm589_vm2, %v2282_v5  ;;  %2296 = vst.msk [vmem:[%s7093_s14 + $0x20] sm:$0xff] %vm589_vm2, %v2282_v5  ;;  %v5662_v2 = vclamps-f32 %v5930_v63, 3.0  ;;  %v7911_v9 = vld [vmem:[%s7076_s11 + $0x8] ss:$16 sps:$4 sm:$0xff]   ;;  %v9604_v63 = vmov 1  }
 0x28c   : > { %v5932_v55 = vpop.f32.mrf.mxu0  ;;  %v7866_v29 = vld [vmem:[#allocation6] sm:$0xff]  ;;  %v2648_v31 = vld [vmem:[%s9448_s2 + $0x18] sm:$0xff] }
 0x28d   : > { %v2283_v14 = vsel %vm2239_vm7, %v5662_v2, 0.0  ;;  %v5933_v49 = vadd.f32 %v5932_v55, %v5931_v43  ;;  %v2259_v12 = vsel %vm2239_vm7, %v5662_v2, %v2254_v38  ;;  %vm2650_vm10 = vcmp.gt.f32.partialorder %v2648_v31, 0.5  ;;  %v7934_v55 = vld [vmem:[%s7076_s11 + $0x60] ss:$16 sps:$4 sm:$0xff]  }
 0x28e   : > { %2265 = vrot.lane.b32.xlu1 %v2259_v12, %s6956_s17  ;;  %v7861_v33 = vadd.f32 %v2287_v57, %v2283_v14  ;;  %v2652_v5 = vsel %vm2650_vm10, 1, %v9602_v7  ;;  %v7938_v14 = vld [vmem:[%s7076_s11 + $0x44] ss:$16 sps:$4 sm:$0xff]   ;;  %v2430_v31 = vunpack.c.l.bf16 %v7427_v35 }
 0x28f   : > { %v5663_v54 = vclamps-f32 %v5933_v49, 3.0  ;;  %v7942_v49 = vld [vmem:[%s7076_s11 + $0x40] ss:$16 sps:$4 sm:$0xff]   ;;  %v7946_v12 = vld [vmem:[%s7076_s11 + $0x24] ss:$16 sps:$4 sm:$0xff]  }
 0x290   : > { %9601 = vst [vmem:[#allocation62_spill] sm:$0xff] %v7861_v33  ;;  %v7868_v1 = vld [vmem:[#allocation6 + $0x8] sm:$0xff]  ;;  %2293 = vst.msk [vmem:[#allocation3] sm:$0xff] %vm589_vm2, %v7861_v33 }
 0x291   : > { %v2284_v38 = vsel %vm2240_vm9, %v5663_v54, 0.0  ;;  %v2260_v17 = vsel %vm2240_vm9, %v5663_v54, %v2256_v6  ;;  %v2312_v13 = vpack.c.bf16 %v7868_v1, %v7866_v29  ;;  %v7890_v6 = vld [vmem:[%s7076_s11 + $0x4c] ss:$16 sps:$4 sm:$0xff]   ;;  %v7956_v54 = vld [vmem:[%s7076_s11 + $0x4] ss:$16 sps:$4 sm:$0xff]  }
 0x292   : > { %2267 = vrot.lane.b32.xlu0 %v2260_v17, %s6956_s17  ;;  %2666 = vperm.xlu1 %6184, %v2651_v0   ;;  %v7879_v23 = vadd.f32 %v2288_v20, %v2284_v38  ;;  %v7951_v20 = vld [vmem:[%s7076_s11 + $0x20] ss:$16 sps:$4 sm:$0xff]   ;;  %v7964_v38 = vld [vmem:[%s7076_s11 + $0x6c] ss:$16 sps:$4 sm:$0xff]  }
 0x293   : > { %5664 = vmatmul.mubr.msk.bf16.vlgmr.msra.gmra.mxu1 %vm1632_vm1, %v2312_v13 }
 0x294   : > { %9603 = vst [vmem:[#allocation63_spill] sm:$0xff] %v7879_v23  ;;  %2382 = vmatpush1.bf16.msra.mxu1 %v7883_v15  ;;  %2362 = vmatprep.mubr.bf16.mxu1 %v9602_v7  ;;  %2294 = vst.msk [vmem:[#allocation3 + $0x8] sm:$0xff] %vm589_vm2, %v7879_v23 }
 0x295   : > { %2383 = vmatprep.subr.bf16.mxu1 %v7890_v6 }
 0x296   : > { %6187 = vset.pattern.permute.xlu1 %v9602_v7  ;;  %2669 = vperm.xlu0 %6185, %v2652_v5  }
 0x298   : > { %2384 = vmatpush1.bf16.msra.mxu1 %v7895_v60 }
 0x299   : > { %2385 = vmatprep.subr.bf16.mxu1 %v7899_v53 }
 0x29a   : > { %6186 = vset.pattern.permute.xlu0 %v9602_v7 }
 0x29b   : > { %2654 = vperm.xlu0 %6186, %v2651_v0   ;;  %v7960_v0 = vld [vmem:[%s7076_s11] ss:$16 sps:$4 sm:$0xff]  }
 0x29c   : > { %2386 = vmatpush1.bf16.msra.mxu1 %v7903_v36 }
 0x29d   : > { %2387 = vmatprep.subr.bf16.mxu1 %v7907_v44 }
 0x29f   : > { %6189 = vset.pattern.permute.xlu0 %v9604_v63 }
 0x2a0   : > { %2388 = vmatpush1.bf16.msra.mxu1 %v7911_v9 }
 0x2a1   : > { %2766 = vmatprep.subr.bf16.mxu1 %v7915_v24 }
 0x300   : > { %v2266_v32 = vpop.permute.xlu1 %2265 }
 0x301   : > { %2272 = vst.msk [vmem:[#allocation6 + $0x10] sm:$0xff] %vm2271_vm11, %v2266_v32 }
 0x304   : > { %v2268_v43 = vpop.permute.xlu0 %2267 }
 0x305   : > { %2273 = vst.msk [vmem:[#allocation6 + $0x18] sm:$0xff] %vm2271_vm11, %v2268_v43  ;;  %v2431_v43 = vunpack.c.h.bf16 %v7427_v35 }
 0x308   : > { %v2681_v57 = vld [vmem:[#allocation6 + $0x10] sm:$0xff] }
 0x309   : > { %2685 = vrot.lane.b32.xlu1 %v2681_v57, %s6954_s3 }
 0x30c   : > { %v2682_v2 = vld [vmem:[#allocation6 + $0x18] sm:$0xff] }
 0x30d   : > { %2687 = vrot.lane.b32.xlu1 %v2682_v2, %s6954_s3  ;;  %v2313_v27 = vpack.c.bf16 %v2682_v2, %v2681_v57  ;;  %v2434_v2 = vunpack.c.l.bf16 %v7443_v47 }
 0x30f   : > { %5665 = vmatmul.mubr.msk.bf16.gmra.mxu1 %vm1632_vm1, %v2313_v27 }
 0x310   : > { %2405 = vmatprep.mubr.bf16.mxu1 %v9602_v7 }
 0x311   : > { %2657 = vperm.xlu1 %6187, %v2652_v5  }
 0x315   : > { %6188 = vset.pattern.permute.xlu1 %v9604_v63 }
 0x317   : > { %5666 = vmatmul.mubr.msk.bf16.vlgmr.msra.gmra.mxu1 %vm1632_vm1, %v2312_v13 }
 0x318   : > { %2415 = vmatprep.mubr.bf16.mxu1 %v9602_v7  ;;  %2767 = vmatpush1.bf16.msra.mxu1 %v7934_v55 }
 0x319   : > { %2768 = vmatprep.subr.bf16.mxu1 %v7938_v14 }
 0x31c   : > { %2769 = vmatpush1.bf16.msra.mxu1 %v7942_v49 }
 0x31d   : > { %2770 = vmatprep.subr.bf16.mxu1 %v7946_v12 }
 0x31f   : > { %5667 = vmatmul.mubr.msk.bf16.gmra.mxu1 %vm1632_vm1, %v2313_v27 }
 0x320   : > { %2771 = vmatpush1.bf16.msra.mxu1 %v7951_v20  ;;  %2790 = vmatprep.mubr.bf16.mxu1 %v9602_v7 }
 0x321   : > { %2772 = vmatprep.subr.bf16.mxu1 %v7956_v54 }
 0x324   : > { %2773 = vmatpush1.bf16.msra.mxu1 %v7960_v0 }
 0x325   : > { %2819 = vmatprep.subr.bf16.mxu1 %v7964_v38 }
 0x353   : > { %v2354_v17 = vpop.f32.mrf.mxu1 }
 0x354   : > { %v2438_v32 = vadd.f32 %v2430_v31, %v2354_v17  ;;  %v2450_v17 = vunpack.c.l.bf16 %v7612_v30 }
 0x355   : > { %v2356_v13 = vpop.f32.mrf.mxu1 }
 0x356   : > { %v2439_v57 = vadd.f32 %v2431_v43, %v2356_v13  ;;  %v5668_v48 = vmul.f32 -1.442695, %v2438_v32  ;;  %v2451_v43 = vunpack.c.h.bf16 %v7612_v30 }
 0x357   : > { %v2358_v5 = vpop.f32.mrf.mxu1 }
 0x358   : > { %v2442_v42 = vadd.f32 %v2434_v2, %v2358_v5  ;;  %v5670_v52 = vmul.f32 -1.442695, %v2439_v57  ;;  %6338 = vpow2.f32 %v5668_v48  ;;  %v2454_v5 = vunpack.c.l.bf16 %v7620_v8 }
 0x359   : > { %v2360_v27 = vpop.f32.mrf.mxu1 }
 0x35a   : > { %v2443_v46 = vadd.f32 %v2435_v10, %v2360_v27  ;;  %v5669_v3 = vmul.f32 -1.442695, %v2442_v42  ;;  %6340 = vpow2.f32 %v5670_v52 }
 0x35c   : > { %v5671_v23 = vmul.f32 -1.442695, %v2443_v46  ;;  %6342 = vpow2.f32 %v5669_v3  ;;  %v2455_v3 = vunpack.c.h.bf16 %v7620_v8 }
 0x35e   : > { %6344 = vpow2.f32 %v5671_v23 }
 0x365   : > { %v6339_v35 = vpop.eup %6338 }
 0x366   : > { %v2476_v10 = vadd.f32 1.0, %v6339_v35 }
 0x367   : > { %v6341_v32 = vpop.eup %6340 }
 0x368   : > { %v2488_v23 = vadd.f32 1.0, %v6341_v32 }
 0x369   : > { %v6343_v42 = vpop.eup %6342 }
 0x36a   : > { %v2477_v35 = vadd.f32 1.0, %v6343_v42 }
 0x36b   : > { %v6345_v2 = vpop.eup %6344 }
 0x3cf   : > { %v2364_v31 = vpop.f32.mrf.mxu1 }
 0x3d0   : > { %v2458_v13 = vadd.f32 %v2450_v17, %v2364_v31  ;;  %v2432_v17 = vunpack.c.l.bf16 %v7472_v22  ;;  %v2433_v31 = vunpack.c.h.bf16 %v7472_v22 }
 0x3d1   : > { %v2366_v33 = vpop.f32.mrf.mxu1 }
 0x3d2   : > { %v5676_v56 = vmul.f32 -1.442695, %v2458_v13  ;;  %v2459_v47 = vadd.f32 %v2451_v43, %v2366_v33  ;;  %v2489_v43 = vadd.f32 1.0, %v6345_v2  ;;  %v2453_v2 = vunpack.c.h.bf16 %v7686_v39 }
 0x3d3   : > { %v2368_v48 = vpop.f32.mrf.mxu1 }
 0x3d4   : > { %6346 = vpow2.f32 %v5676_v56  ;;  %v5678_v52 = vmul.f32 -1.442695, %v2459_v47  ;;  %v2462_v46 = vadd.f32 %v2454_v5, %v2368_v48  ;;  %v2436_v47 = vunpack.c.l.bf16 %v7488_v40 }
 0x3d5   : > { %v2370_v57 = vpop.f32.mrf.mxu1 }
 0x3d6   : > { %6348 = vpow2.f32 %v5678_v52  ;;  %v5677_v27 = vmul.f32 -1.442695, %v2462_v46  ;;  %v2463_v30 = vadd.f32 %v2455_v3, %v2370_v57  ;;  %v2452_v3 = vunpack.c.l.bf16 %v7686_v39 }
 0x3d7   : > { %6350 = vrcp.f32 %v2476_v10  ;;  %v2407_v33 = vpop.f32.mrf.mxu1  ;;  %v2437_v10 = vunpack.c.h.bf16 %v7488_v40 }
 0x3d8   : > { %6352 = vpow2.f32 %v5677_v27  ;;  %v5679_v56 = vmul.f32 -1.442695, %v2463_v30  ;;  %v2440_v13 = vadd.f32 %v2432_v17, %v2407_v33 }
 0x3d9   : > { %6354 = vrcp.f32 %v2488_v23  ;;  %v2409_v8 = vpop.f32.mrf.mxu1 }
 0x3da   : > { %6356 = vpow2.f32 %v5679_v56  ;;  %v2441_v32 = vadd.f32 %v2433_v31, %v2409_v8  ;;  %v2457_v8 = vunpack.c.h.bf16 %v7694_v50 }
 0x3db   : > { %6358 = vtanh.f32 %v2440_v13  ;;  %v2411_v5 = vpop.f32.mrf.mxu1 }
 0x3dc   : > { %6360 = vrcp.f32 %v2477_v35  ;;  %v5672_v48 = vmul.f32 -1.442695, %v2441_v32  ;;  %v2444_v52 = vadd.f32 %v2436_v47, %v2411_v5  ;;  %v2456_v35 = vunpack.c.l.bf16 %v7694_v50 }
 0x3dd   : > { %6362 = vrcp.f32 %v2489_v43  ;;  %v2413_v22 = vpop.f32.mrf.mxu1 }
 0x3de   : > { %6364 = vpow2.f32 %v5672_v48  ;;  %v2445_v46 = vadd.f32 %v2437_v10, %v2413_v22 }
 0x3df   : > { %6366 = vtanh.f32 %v2444_v52  ;;  %v2417_v42 = vpop.f32.mrf.mxu1 }
 0x3e0   : > { %v5673_v23 = vmul.f32 -1.442695, %v2445_v46  ;;  %v2460_v57 = vadd.f32 %v2452_v3, %v2417_v42  ;;  %v9605_v46 = vclamps-f32 %v7782_v18, 3.0  ;;  %v9606_v18 = vclamps-f32 %v7787_v62, 3.0 }
 0x3e1   : > { %v6347_v27 = vpop.eup %6346  ;;  %v2419_v30 = vpop.f32.mrf.mxu1 }
 0x3e2   : > { %v2528_v17 = vadd.f32 1.0, %v6347_v27  ;;  %6368 = vpow2.f32 %v5673_v23  ;;  %v2461_v33 = vadd.f32 %v2453_v2, %v2419_v30  ;;  %v7987_v3 = vsel %vm2227_vm5, %v9605_v46, 0.0 }
 0x3e3   : > { %v6349_v31 = vpop.eup %6348  ;;  %6370 = vtanh.f32 %v2460_v57  ;;  %v2421_v40 = vpop.f32.mrf.mxu1  ;;  %v7996_v61 = vsel %vm2228_vm6, %v9606_v18, 0.0 }
 0x3e4   : > { %v6351_v56 = vpop.eup %6350  ;;  %6372 = vrcp.f32 %v2528_v17  ;;  %v2540_v13 = vadd.f32 1.0, %v6349_v31  ;;  %v5680_v43 = vmul.f32 -1.442695, %v2461_v33  ;;  %v2464_v47 = vadd.f32 %v2456_v35, %v2421_v40 }
 0x3e5   : > { %v6353_v32 = vpop.eup %6352  ;;  %v2423_v5 = vpop.f32.mrf.mxu1 }
 0x3e6   : > { %v6355_v39 = vpop.eup %6354  ;;  %6374 = vrcp.f32 %v2540_v13  ;;  %v2529_v48 = vadd.f32 1.0, %v6353_v32  ;;  %v2465_v52 = vadd.f32 %v2457_v8, %v2423_v5 }
 0x3e7   : > { %v6357_v10 = vpop.eup %6356  ;;  %6376 = vpow2.f32 %v5680_v43  ;;  %v2510_v2 = vmul.f32 %v6355_v39, %v7987_v3  ;;  %v9607_v39 = vclamps-f32 %v7790_v19, 3.0 }
 0x3e8   : > { %v6359_v22 = vpop.eup %6358  ;;  %6378 = vrcp.f32 %v2529_v48  ;;  %v2541_v42 = vadd.f32 1.0, %v6357_v10  ;;  %v5681_v23 = vmul.f32 -1.442695, %v2465_v52 }
 0x3e9   : > { %v6361_v50 = vpop.eup %6360  ;;  %6380 = vtanh.f32 %v2464_v47  ;;  %v2508_v57 = vmul.f32 %v6359_v22, %v6351_v56  ;;  %v2241_v48 = vsel %vm2239_vm7, %v9607_v39, 0.0 }
 0x3ea   : > { %v6363_v27 = vpop.eup %6362  ;;  %6382 = vrcp.f32 %v2541_v42 }
 0x3eb   : > { %v6365_v30 = vpop.eup %6364  ;;  %6384 = vpow2.f32 %v5681_v23  ;;  %v7990_v17 = vadd.f32 %v2510_v2, %v2508_v57  ;;  %v2511_v56 = vmul.f32 %v6363_v27, %v7996_v61  ;;  %v8011_v23 = vpop.permute.xlu1 %2666  ;;  %v9608_v2 = vclamps-f32 %v7797_v59, 3.0 }
 0x3ec   : > { %v6367_v33 = vpop.eup %6366  ;;  %v2502_v31 = vadd.f32 1.0, %v6365_v30  ;;  %vm2671_vm12 = vcmp.eq.s32.totalorder %v8011_v23, 1 }
 0x3ed   : > { %v9518_v40 = vclamps-f32 %v7990_v17, 3.0  ;;  %v2509_v35 = vmul.f32 %v6367_v33, %v6361_v50  ;;  %v2242_v19 = vsel %vm2240_vm9, %v9608_v2, 0.0  ;;  %v8042_v2 = vld [vmem:[%s7091_s24 + $0x68] sm:$0xff]  }
 0x3ee   : > { %6386 = vrcp.f32 %v2502_v31  ;;  %v8018_v31 = vpop.permute.xlu0 %2669 }
 0x3ef   : > { %v6369_v13 = vpop.eup %6368  ;;  %6388 = vtanh.f32 %v9518_v40  ;;  %v8002_v43 = vadd.f32 %v2511_v56, %v2509_v35  ;;  %vm2672_vm13 = vcmp.eq.s32.totalorder %v8018_v31, 1 }
 0x3f0   : > { %v6371_v8 = vpop.eup %6370  ;;  %v2503_v32 = vadd.f32 1.0, %v6369_v13 }
 0x3f1   : > { %v6373_v62 = vpop.eup %6372  ;;  %v9517_v11 = vclamps-f32 %v8002_v43, 3.0 }
 0x3f2   : > { %6390 = vrcp.f32 %v2503_v32  ;;  %v2560_v47 = vmul.f32 %v6373_v62, %v6371_v8 }
 0x3f3   : > { %v6375_v5 = vpop.eup %6374  ;;  %6392 = vtanh.f32 %v9517_v11 }
 0x3f4   : > { %v6377_v52 = vpop.eup %6376  ;;  %v2562_v10 = vmul.f32 %v6375_v5, %v2241_v48 }
 0x3f5   : > { %v6379_v22 = vpop.eup %6378  ;;  %v2554_v46 = vadd.f32 1.0, %v6377_v52  ;;  %v8030_v52 = vld [vmem:[%s7091_s24 + $0x38] sm:$0xff]  }
 0x3f6   : > { %v6381_v42 = vpop.eup %6380  ;;  %v2564_v50 = vadd.f32 %v2562_v10, %v2560_v47 }
 0x3f7   : > { %v6383_v57 = vpop.eup %6382  ;;  %v2561_v26 = vmul.f32 %v6381_v42, %v6379_v22  ;;  %6394 = vrcp.f32 %v2554_v46  ;;  %v8034_v22 = vld [vmem:[%s7091_s24 + $0x70] sm:$0xff]  }
 0x3f8   : > { %v6385_v27 = vpop.eup %6384  ;;  %v5682_v30 = vclamps-f32 %v2564_v50, 3.0  ;;  %v2563_v33 = vmul.f32 %v6383_v57, %v2242_v19  ;;  %v8038_v50 = vld [vmem:[%s7091_s24 + $0x30] sm:$0xff]  }
 0x3f9   : > { %v2555_v18 = vadd.f32 1.0, %v6385_v27  ;;  %v8046_v27 = vld [vmem:[%s7091_s24 + $0x28] sm:$0xff]  }
 0x3fa   : > { %6396 = vtanh.f32 %v5682_v30  ;;  %v2565_v35 = vadd.f32 %v2563_v33, %v2561_v26  ;;  %v8022_v56 = vsel %vm2671_vm12, %v5682_v30, %v2241_v48  ;;  %v8050_v30 = vld [vmem:[%s7091_s24 + $0x60] sm:$0xff]  }
 0x3fb   : > { %v6387_v59 = vpop.eup %6386  ;;  %6398 = vrcp.f32 %v2555_v18  ;;  %v8055_v33 = vld [vmem:[%s7091_s24 + $0x20] sm:$0xff]   ;;  %v8060_v18 = vld [vmem:[%s7091_s24 + $0x58] sm:$0xff]  }
 0x3fc   : > { %v6389_v45 = vpop.eup %6388  ;;  %v5683_v13 = vclamps-f32 %v2565_v35, 3.0  ;;  %v8064_v35 = vld [vmem:[%s7091_s24 + $0x18] sm:$0xff]  }
 0x3fd   : > { %v2520_v8 = vmul.f32 %v6389_v45, %v6387_v59  ;;  %v8068_v59 = vld [vmem:[%s7091_s24 + $0x50] sm:$0xff]  }
 0x3fe   : > { %6400 = vtanh.f32 %v5683_v13  ;;  %v8027_v32 = vsel %vm2672_vm13, %v5683_v13, %v2242_v19  ;;  %v8072_v45 = vld [vmem:[%s7091_s24 + $0x10] sm:$0xff]   ;;  %v8076_v13 = vld [vmem:[%s7091_s24 + $0x48] sm:$0xff]  }
 0x3ff   : > { %v6391_v62 = vpop.eup %6390 }
 0x400   : > { %v6393_v47 = vpop.eup %6392 }
 0x401   : > { %v2521_v5 = vmul.f32 %v6393_v47, %v6391_v62  ;;  %v8084_v62 = vld [vmem:[%s7091_s24 + $0x40] sm:$0xff]  }
 0x402   : > { %9609 = vst [vmem:[#allocation64_spill] sm:$0xff] %v8084_v62  ;;  %v8088_v47 = vld [vmem:[%s7091_s24] sm:$0xff]  }
 0x403   : > { %v2586_v39 = vpack.c.bf16 %v2521_v5, %v2520_v8  ;;  %v8080_v8 = vld [vmem:[%s7091_s24 + $0x8] sm:$0xff]   ;;  %9610 = vst [vmem:[#allocation65_spill] sm:$0xff] %v8088_v47  ;;  %v8092_v5 = vld [vmem:[%s7091_s24 + $0x78] sm:$0xff]  }
 0x404   : > { %v6395_v48 = vpop.eup %6394  ;;  %9611 = vst [vmem:[#allocation66_spill] sm:$0xff] %v8092_v5 }
 0x405   : > { %2623 = vmatmul.mubr.bf16.vlgmr.msra.gmra.mxu0 %v2586_v39  ;;  %v2686_v39 = vpop.permute.xlu1 %2685 }
 0x406   : > { %5963 = vmatpush3.bf16.msra.mxu0 %v8030_v52 }
 0x407   : > { %v6397_v10 = vpop.eup %6396  ;;  %5964 = vmatprep.subr.bf16.mxu0 %v8034_v22 }
 0x408   : > { %v2572_v46 = vmul.f32 %v6397_v10, %v6395_v48  ;;  %v6399_v42 = vpop.eup %6398  ;;  %v2707_v10 = vld [vmem:[#allocation2 + $0x10] sm:$0xff] }
 0x409   : > { %v2709_v11 = vmul.f32 %v2707_v10, %v7825_v28  ;;  %v2710_v10 = vmul.f32 %v2708_v34, %v7825_v28 }
 0x40a   : > { %5965 = vmatpush3.bf16.msra.mxu0 %v8038_v50 }
 0x40b   : > { %v6401_v57 = vpop.eup %6400  ;;  %5966 = vmatprep.subr.bf16.mxu0 %v8042_v2 }
 0x40c   : > { %v2573_v19 = vmul.f32 %v6401_v57, %v6399_v42  ;;  %v2688_v42 = vpop.permute.xlu1 %2687  ;;  %v8095_v57 = vpop.permute.xlu0 %2654 }
 0x40d   : > { %vm2659_vm14 = vcmp.eq.s32.totalorder %v8095_v57, 1 }
 0x40e   : > { %v2589_v26 = vpack.c.bf16 %v2573_v19, %v2572_v46  ;;  %5967 = vmatpush3.bf16.msra.mxu0 %v8046_v27 }
 0x40f   : > { %5968 = vmatprep.subr.bf16.mxu0 %v8050_v30 }
 0x410   : > { %2630 = vmatprep.mubr.bf16.mxu0 %v2589_v26  ;;  %v8099_v16 = vpop.permute.xlu1 %2657 }
 0x411   : > { %2631 = vmatmul.mubr.bf16.gmra.mxu0 %v9600_v25  ;;  %vm2660_vm15 = vcmp.eq.s32.totalorder %v8099_v16, 1 }
 0x412   : > { %5969 = vmatpush3.bf16.msra.mxu0 %v8055_v33  ;;  %3060 = vmatprep.mubr.bf16.mxu0 %v9600_v25 }
 0x413   : > { %5970 = vmatprep.subr.bf16.mxu0 %v8060_v18 }
 0x416   : > { %5971 = vmatpush3.bf16.msra.mxu0 %v8064_v35 }
 0x417   : > { %5972 = vmatprep.subr.bf16.mxu0 %v8068_v59 }
 0x41a   : > { %5973 = vmatpush3.bf16.msra.mxu0 %v8072_v45 }
 0x41b   : > { %5974 = vmatprep.subr.bf16.mxu0 %v8076_v13 }
 0x41e   : > { %5975 = vmatpush3.bf16.msra.mxu0 %v8080_v8 }
 0x41f   : > { %5976 = vmatprep.subr.bf16.mxu0 %v8084_v62 }
 0x422   : > { %5977 = vmatpush3.bf16.msra.mxu0 %v8088_v47 }
 0x423   : > { %5990 = vmatprep.subr.bf16.mxu0 %v8092_v5 }
 0x4c5   : > { %v5950_v48 = vpop.f32.mrf.mxu0 }
 0x4c7   : > { %v5951_v46 = vpop.f32.mrf.mxu0 }
 0x4c8   : > { %v5952_v19 = vadd.f32 %v5951_v46, %v5950_v48 }
 0x4c9   : > { %v5953_v26 = vpop.f32.mrf.mxu0 }
 0x4ca   : > { %v5684_v40 = vclamps-f32 %v5952_v19, 3.0 }
 0x4cb   : > { %v5954_v21 = vpop.f32.mrf.mxu0 }
 0x4cc   : > { %v2679_v37 = vsel %vm2659_vm14, %v5684_v40, %v7866_v29  ;;  %v2705_v5 = vsel %vm2659_vm14, %v5684_v40, 0.0  ;;  %v5955_v47 = vadd.f32 %v5954_v21, %v5953_v26 }
 0x4cd   : > { %2693 = vst.msk [vmem:[#allocation6] sm:$0xff] %vm589_vm2, %v2679_v37  ;;  %v8107_v48 = vadd.f32 %v2709_v11, %v2705_v5  ;;  %v2715_v11 = vld [vmem:[#allocation3 + $0x10] sm:$0xff]  ;;  %v3085_v5 = vld [vmem:[%s9448_s2 + $0x20] sm:$0xff] }
 0x4ce   : > { %v5685_v46 = vclamps-f32 %v5955_v47, 3.0  ;;  %vm3087_vm0 = vcmp.gt.f32.partialorder %v3085_v5, 0.5 }
 0x4cf   : > { %9612 = vst [vmem:[#allocation67_spill] sm:$0xff] %v8107_v48  ;;  %2721 = vst.msk [vmem:[#allocation2 + $0x10] sm:$0xff] %vm589_vm2, %v8107_v48  ;;  %v3089_v62 = vsel %vm3087_vm0, 1, %v9602_v7 }
 0x4d0   : > { %v2680_v29 = vsel %vm2660_vm15, %v5685_v46, %v7868_v1  ;;  %v2706_v40 = vsel %vm2660_vm15, %v5685_v46, 0.0  ;;  %v2717_v1 = vmul.f32 %v2715_v11, %v7825_v28  ;;  %v2716_v46 = vld [vmem:[#allocation3 + $0x18] sm:$0xff] }
 0x4d1   : > { %2694 = vst.msk [vmem:[#allocation6 + $0x8] sm:$0xff] %vm589_vm2, %v2680_v29  ;;  %v5956_v37 = vpop.f32.mrf.mxu0  ;;  %v8119_v21 = vadd.f32 %v2710_v10, %v2706_v40 }
 0x4d3   : > { %9613 = vst [vmem:[#allocation68_spill] sm:$0xff] %v8119_v21  ;;  %v5957_v34 = vpop.f32.mrf.mxu0  ;;  %2722 = vst.msk [vmem:[#allocation2 + $0x18] sm:$0xff] %vm589_vm2, %v8119_v21 }
 0x4d4   : > { %v5958_v47 = vadd.f32 %v5957_v34, %v5956_v37  ;;  %v8131_v21 = vld [vmem:[#allocation6] sm:$0xff] }
 0x4d5   : > { %v5959_v19 = vpop.f32.mrf.mxu0 }
 0x4d6   : > { %v5686_v26 = vclamps-f32 %v5958_v47, 3.0  ;;  %v2718_v47 = vmul.f32 %v2716_v46, %v7825_v28 }
 0x4d7   : > { %v5960_v48 = vpop.f32.mrf.mxu0 }
 0x4d8   : > { %v2713_v10 = vsel %vm2671_vm12, %v5686_v26, 0.0  ;;  %v5961_v29 = vadd.f32 %v5960_v48, %v5959_v19  ;;  %v2691_v40 = vsel %vm2671_vm12, %v5686_v26, %v2686_v39  ;;  %v8133_v37 = vld [vmem:[#allocation6 + $0x8] sm:$0xff] }
 0x4d9   : > { %2697 = vrot.lane.b32.xlu1 %v2691_v40, %s6956_s17  ;;  %v2750_v11 = vpack.c.bf16 %v8133_v37, %v8131_v21  ;;  %v8138_v34 = vadd.f32 %v2717_v1, %v2713_v10  ;;  %v2873_v1 = vunpack.c.h.bf16 %v7461_v4  ;;  %v2888_v10 = vunpack.c.l.bf16 %v7628_v41 }
 0x4da   : > { %v5687_v5 = vclamps-f32 %v5961_v29, 3.0 }
 0x4db   : > { %9614 = vst [vmem:[#allocation69_spill] sm:$0xff] %v8138_v34  ;;  %5688 = vmatmul.mubr.msk.bf16.vlgmr.msra.gmra.mxu1 %vm1632_vm1, %v2750_v11  ;;  %2723 = vst.msk [vmem:[#allocation3 + $0x10] sm:$0xff] %vm589_vm2, %v8138_v34 }
 0x4dc   : > { %v2714_v23 = vsel %vm2672_vm13, %v5687_v5, 0.0  ;;  %v2692_v39 = vsel %vm2672_vm13, %v5687_v5, %v2688_v42  ;;  %2820 = vmatpush1.bf16.msra.mxu1 %v7883_v15  ;;  %2800 = vmatprep.mubr.bf16.mxu1 %v9602_v7  ;;  %v3086_v15 = vld [vmem:[%s9448_s2 + $0x28] sm:$0xff]  ;;  %v2872_v42 = vunpack.c.l.bf16 %v7461_v4 }
 0x4dd   : > { %2699 = vrot.lane.b32.xlu0 %v2692_v39, %s6956_s17  ;;  %3104 = vperm.xlu1 %6188, %v3089_v62   ;;  %v8152_v48 = vadd.f32 %v2718_v47, %v2714_v23  ;;  %vm3088_vm3 = vcmp.gt.f32.partialorder %v3086_v15, 0.5  ;;  %v9616_v39 = vld [vmem:[#allocation38_spill] sm:$0xff] }
 0x4de   : > { %2821 = vmatprep.subr.bf16.mxu1 %v7890_v6  ;;  %v3090_v6 = vsel %vm3088_vm3, 1, %v9602_v7  ;;  %v2892_v15 = vunpack.c.l.bf16 %v9616_v39 }
 0x4df   : > { %9615 = vst [vmem:[#allocation70_spill] sm:$0xff] %v8152_v48  ;;  %2724 = vst.msk [vmem:[#allocation3 + $0x18] sm:$0xff] %vm589_vm2, %v8152_v48 }
 0x4e0   : > { %2822 = vmatpush1.bf16.msra.mxu1 %v7895_v60 }
 0x4e1   : > { %2823 = vmatprep.subr.bf16.mxu1 %v7899_v53  ;;  %6191 = vset.pattern.permute.xlu1 %v9602_v7 }
 0x4e2   : > { %3107 = vperm.xlu0 %6189, %v3090_v6  }
 0x4e4   : > { %2824 = vmatpush1.bf16.msra.mxu1 %v7903_v36 }
 0x4e5   : > { %2825 = vmatprep.subr.bf16.mxu1 %v7907_v44 }
 0x4e6   : > { %6190 = vset.pattern.permute.xlu0 %v9602_v7 }
 0x4e7   : > { %3092 = vperm.xlu0 %6190, %v3089_v62  }
 0x4e8   : > { %2826 = vmatpush1.bf16.msra.mxu1 %v7911_v9 }
 0x4e9   : > { %3195 = vmatprep.subr.bf16.mxu1 %v7915_v24 }
 0x4eb   : > { %6193 = vset.pattern.permute.xlu0 %v9604_v63 }
 0x54b   : > { %v2698_v60 = vpop.permute.xlu1 %2697 }
 0x54c   : > { %2703 = vst.msk [vmem:[#allocation6 + $0x10] sm:$0xff] %vm2271_vm11, %v2698_v60 }
 0x54f   : > { %v2700_v53 = vpop.permute.xlu0 %2699 }
 0x550   : > { %2704 = vst.msk [vmem:[#allocation6 + $0x18] sm:$0xff] %vm2271_vm11, %v2700_v53 }
 0x553   : > { %v3119_v36 = vld [vmem:[#allocation6 + $0x10] sm:$0xff] }
 0x554   : > { %3123 = vrot.lane.b32.xlu1 %v3119_v36, %s6954_s3 }
 0x557   : > { %v3120_v44 = vld [vmem:[#allocation6 + $0x18] sm:$0xff] }
 0x558   : > { %3125 = vrot.lane.b32.xlu1 %v3120_v44, %s6954_s3  ;;  %v2751_v9 = vpack.c.bf16 %v3120_v44, %v3119_v36  ;;  %v2893_v44 = vunpack.c.h.bf16 %v9616_v39 }
 0x55a   : > { %5689 = vmatmul.mubr.msk.bf16.gmra.mxu1 %vm1632_vm1, %v2751_v9 }
 0x55b   : > { %2843 = vmatprep.mubr.bf16.mxu1 %v9602_v7 }
 0x55c   : > { %3095 = vperm.xlu1 %6191, %v3090_v6  }
 0x560   : > { %6192 = vset.pattern.permute.xlu1 %v9604_v63 }
 0x562   : > { %5690 = vmatmul.mubr.msk.bf16.vlgmr.msra.gmra.mxu1 %vm1632_vm1, %v2750_v11  ;;  %v2889_v11 = vunpack.c.h.bf16 %v7628_v41 }
 0x563   : > { %2853 = vmatprep.mubr.bf16.mxu1 %v9602_v7  ;;  %3196 = vmatpush1.bf16.msra.mxu1 %v7934_v55 }
 0x564   : > { %3197 = vmatprep.subr.bf16.mxu1 %v7938_v14  ;;  %v2868_v14 = vunpack.c.l.bf16 %v7453_v58 }
 0x567   : > { %3198 = vmatpush1.bf16.msra.mxu1 %v7942_v49 }
 0x568   : > { %3199 = vmatprep.subr.bf16.mxu1 %v7946_v12  ;;  %v2869_v12 = vunpack.c.h.bf16 %v7453_v58 }
 0x56a   : > { %5691 = vmatmul.mubr.msk.bf16.gmra.mxu1 %vm1632_vm1, %v2751_v9 }
 0x56b   : > { %3200 = vmatpush1.bf16.msra.mxu1 %v7951_v20  ;;  %3219 = vmatprep.mubr.bf16.mxu1 %v9602_v7 }
 0x56c   : > { %3201 = vmatprep.subr.bf16.mxu1 %v7956_v54 }
 0x56f   : > { %3202 = vmatpush1.bf16.msra.mxu1 %v7960_v0 }
 0x570   : > { %3248 = vmatprep.subr.bf16.mxu1 %v7964_v38 }
 0x59b   : > { %v2792_v24 = vpop.f32.mrf.mxu1 }
 0x59c   : > { %v2876_v49 = vadd.f32 %v2868_v14, %v2792_v24 }
 0x59d   : > { %v2794_v55 = vpop.f32.mrf.mxu1 }
 0x59e   : > { %v2877_v62 = vadd.f32 %v2869_v12, %v2794_v55  ;;  %v5692_v19 = vmul.f32 -1.442695, %v2876_v49  ;;  %v9617_v49 = vld [vmem:[#allocation25_spill] sm:$0xff] }
 0x59f   : > { %v2796_v31 = vpop.f32.mrf.mxu1  ;;  %v2870_v12 = vunpack.c.l.bf16 %v9617_v49 }
 0x5a0   : > { %v2880_v54 = vadd.f32 %v2872_v42, %v2796_v31  ;;  %v5694_v26 = vmul.f32 -1.442695, %v2877_v62  ;;  %6402 = vpow2.f32 %v5692_v19  ;;  %v2871_v42 = vunpack.c.h.bf16 %v9617_v49 }
 0x5a1   : > { %v2798_v20 = vpop.f32.mrf.mxu1  ;;  %v2895_v49 = vunpack.c.h.bf16 %v7710_v51 }
 0x5a2   : > { %v2881_v0 = vadd.f32 %v2873_v1, %v2798_v20  ;;  %v5693_v38 = vmul.f32 -1.442695, %v2880_v54  ;;  %6404 = vpow2.f32 %v5694_v26 }
 0x5a4   : > { %v5695_v46 = vmul.f32 -1.442695, %v2881_v0  ;;  %6406 = vpow2.f32 %v5693_v38  ;;  %v9618_v38 = vld [vmem:[#allocation27_spill] sm:$0xff] }
 0x5a6   : > { %6408 = vpow2.f32 %v5695_v46  ;;  %v2874_v46 = vunpack.c.l.bf16 %v9618_v38 }
 0x5ad   : > { %v6403_v58 = vpop.eup %6402 }
 0x5ae   : > { %v2914_v6 = vadd.f32 1.0, %v6403_v58 }
 0x5af   : > { %v6405_v5 = vpop.eup %6404 }
 0x5b0   : > { %v2926_v24 = vadd.f32 1.0, %v6405_v5  ;;  %v9619_v5 = vld [vmem:[#allocation48_spill] sm:$0xff] }
 0x5b1   : > { %v6407_v9 = vpop.eup %6406 }
 0x5b2   : > { %v2915_v20 = vadd.f32 1.0, %v6407_v9 }
 0x5b3   : > { %v6409_v14 = vpop.eup %6408 }
 0x5b4   : > { %v2927_v54 = vadd.f32 1.0, %v6409_v14 }
 0x61a   : > { %v2802_v29 = vpop.f32.mrf.mxu1 }
 0x61b   : > { %v2896_v40 = vadd.f32 %v2888_v10, %v2802_v29 }
 0x61c   : > { %v2804_v47 = vpop.f32.mrf.mxu1 }
 0x61d   : > { %v5700_v23 = vmul.f32 -1.442695, %v2896_v40  ;;  %v2897_v4 = vadd.f32 %v2889_v11, %v2804_v47  ;;  %v2875_v40 = vunpack.c.h.bf16 %v9618_v38 }
 0x61e   : > { %v2806_v60 = vpop.f32.mrf.mxu1 }
 0x61f   : > { %6410 = vpow2.f32 %v5700_v23  ;;  %v5702_v53 = vmul.f32 -1.442695, %v2897_v4  ;;  %v2900_v36 = vadd.f32 %v2892_v15, %v2806_v60  ;;  %v2890_v23 = vunpack.c.l.bf16 %v9619_v5 }
 0x620   : > { %v2808_v55 = vpop.f32.mrf.mxu1 }
 0x621   : > { %6412 = vpow2.f32 %v5702_v53  ;;  %v5701_v31 = vmul.f32 -1.442695, %v2900_v36  ;;  %v2901_v41 = vadd.f32 %v2893_v44, %v2808_v55  ;;  %v2894_v55 = vunpack.c.l.bf16 %v7710_v51 }
 0x622   : > { %6414 = vrcp.f32 %v2914_v6  ;;  %v2845_v62 = vpop.f32.mrf.mxu1  ;;  %v2891_v6 = vunpack.c.h.bf16 %v9619_v5 }
 0x623   : > { %6416 = vpow2.f32 %v5701_v31  ;;  %v5703_v19 = vmul.f32 -1.442695, %v2901_v41  ;;  %v2878_v1 = vadd.f32 %v2870_v12, %v2845_v62 }
 0x624   : > { %6418 = vrcp.f32 %v2926_v24  ;;  %v2847_v26 = vpop.f32.mrf.mxu1 }
 0x625   : > { %6420 = vpow2.f32 %v5703_v19  ;;  %v2879_v0 = vadd.f32 %v2871_v42, %v2847_v26 }
 0x626   : > { %6422 = vtanh.f32 %v2878_v1  ;;  %v2849_v10 = vpop.f32.mrf.mxu1 }
 0x627   : > { %6424 = vrcp.f32 %v2915_v20  ;;  %v5696_v29 = vmul.f32 -1.442695, %v2879_v0  ;;  %v2882_v58 = vadd.f32 %v2874_v46, %v2849_v10  ;;  %v9620_v0 = vclamps-f32 %v7990_v17, 3.0 }
 0x628   : > { %6426 = vrcp.f32 %v2927_v54  ;;  %v2851_v11 = vpop.f32.mrf.mxu1  ;;  %v9621_v17 = vclamps-f32 %v8002_v43, 3.0 }
 0x629   : > { %6428 = vpow2.f32 %v5696_v29  ;;  %v2883_v47 = vadd.f32 %v2875_v40, %v2851_v11  ;;  %v8210_v38 = vsel %vm2659_vm14, %v9620_v0, %v7987_v3 }
 0x62a   : > { %6430 = vtanh.f32 %v2882_v58  ;;  %v2855_v4 = vpop.f32.mrf.mxu1  ;;  %v8220_v3 = vsel %vm2660_vm15, %v9621_v17, %v7996_v61 }
 0x62b   : > { %v5697_v39 = vmul.f32 -1.442695, %v2883_v47  ;;  %v2898_v15 = vadd.f32 %v2890_v23, %v2855_v4 }
 0x62c   : > { %v6411_v60 = vpop.eup %6410  ;;  %v2857_v53 = vpop.f32.mrf.mxu1 }
 0x62d   : > { %v2966_v36 = vadd.f32 1.0, %v6411_v60  ;;  %6432 = vpow2.f32 %v5697_v39  ;;  %v2899_v44 = vadd.f32 %v2891_v6, %v2857_v53 }
 0x62e   : > { %v6413_v9 = vpop.eup %6412  ;;  %6434 = vtanh.f32 %v2898_v15  ;;  %v2859_v24 = vpop.f32.mrf.mxu1 }
 0x62f   : > { %v6415_v14 = vpop.eup %6414  ;;  %6436 = vrcp.f32 %v2966_v36  ;;  %v2978_v31 = vadd.f32 1.0, %v6413_v9  ;;  %v5704_v41 = vmul.f32 -1.442695, %v2899_v44  ;;  %v2902_v62 = vadd.f32 %v2894_v55, %v2859_v24 }
 0x630   : > { %v6417_v12 = vpop.eup %6416  ;;  %v2861_v42 = vpop.f32.mrf.mxu1 }
 0x631   : > { %v6419_v20 = vpop.eup %6418  ;;  %6438 = vrcp.f32 %v2978_v31  ;;  %v2967_v19 = vadd.f32 1.0, %v6417_v12  ;;  %v2903_v1 = vadd.f32 %v2895_v49, %v2861_v42  ;;  %v8232_v31 = vpop.permute.xlu1 %3104 }
 0x632   : > { %v6421_v54 = vpop.eup %6420  ;;  %6440 = vpow2.f32 %v5704_v41  ;;  %v2948_v29 = vmul.f32 %v6419_v20, %v8210_v38  ;;  %vm3109_vm4 = vcmp.eq.s32.totalorder %v8232_v31, 1 }
 0x633   : > { %v6423_v26 = vpop.eup %6422  ;;  %6442 = vrcp.f32 %v2967_v19  ;;  %v2979_v46 = vadd.f32 1.0, %v6421_v54  ;;  %v5705_v51 = vmul.f32 -1.442695, %v2903_v1  ;;  %v8236_v1 = vpop.permute.xlu0 %3107 }
 0x634   : > { %v6425_v10 = vpop.eup %6424  ;;  %6444 = vtanh.f32 %v2902_v62  ;;  %v2946_v58 = vmul.f32 %v6423_v26, %v6415_v14  ;;  %vm3110_vm5 = vcmp.eq.s32.totalorder %v8236_v1, 1  ;;  %v8334_v1 = vld [vmem:[%s7076_s11 + $0x48] ss:$16 sps:$4 sm:$0xff]  }
 0x635   : > { %v6427_v40 = vpop.eup %6426  ;;  %6446 = vrcp.f32 %v2979_v46 }
 0x636   : > { %v6429_v11 = vpop.eup %6428  ;;  %6448 = vpow2.f32 %v5705_v51  ;;  %v8213_v47 = vadd.f32 %v2948_v29, %v2946_v58  ;;  %v2949_v39 = vmul.f32 %v6427_v40, %v8220_v3 }
 0x637   : > { %v6431_v5 = vpop.eup %6430  ;;  %v2940_v57 = vadd.f32 1.0, %v6429_v11 }
 0x638   : > { %v5698_v23 = vclamps-f32 %v8213_v47, 3.0  ;;  %v2947_v4 = vmul.f32 %v6431_v5, %v6425_v10 }
 0x639   : > { %6450 = vrcp.f32 %v2940_v57 }
 0x63a   : > { %v6433_v15 = vpop.eup %6432  ;;  %6452 = vtanh.f32 %v5698_v23  ;;  %v8226_v6 = vadd.f32 %v2949_v39, %v2947_v4 }
 0x63b   : > { %v6435_v60 = vpop.eup %6434  ;;  %v2941_v53 = vadd.f32 1.0, %v6433_v15 }
 0x63c   : > { %v6437_v43 = vpop.eup %6436  ;;  %v5699_v16 = vclamps-f32 %v8226_v6, 3.0 }
 0x63d   : > { %6454 = vrcp.f32 %v2941_v53  ;;  %v2998_v61 = vmul.f32 %v6437_v43, %v6435_v60 }
 0x63e   : > { %v6439_v36 = vpop.eup %6438  ;;  %6456 = vtanh.f32 %v5699_v16 }
 0x63f   : > { %v6441_v44 = vpop.eup %6440  ;;  %v3000_v9 = vmul.f32 %v6439_v36, %v8022_v56 }
 0x640   : > { %v6443_v24 = vpop.eup %6442  ;;  %v2992_v55 = vadd.f32 1.0, %v6441_v44 }
 0x641   : > { %v6445_v14 = vpop.eup %6444  ;;  %v3002_v41 = vadd.f32 %v3000_v9, %v2998_v61 }
 0x642   : > { %v6447_v49 = vpop.eup %6446  ;;  %v2999_v12 = vmul.f32 %v6445_v14, %v6443_v24  ;;  %6458 = vrcp.f32 %v2992_v55 }
 0x643   : > { %v6449_v62 = vpop.eup %6448  ;;  %v5706_v42 = vclamps-f32 %v3002_v41, 3.0  ;;  %v3001_v20 = vmul.f32 %v6447_v49, %v8027_v32 }
 0x644   : > { %v2993_v19 = vadd.f32 1.0, %v6449_v62 }
 0x645   : > { %6460 = vtanh.f32 %v5706_v42  ;;  %v3003_v54 = vadd.f32 %v3001_v20, %v2999_v12  ;;  %v8241_v26 = vsel %vm3109_vm4, %v5706_v42, %v8022_v56  ;;  %v3153_v12 = vld [vmem:[#allocation3 + $0x20] sm:$0xff]  ;;  %v3514_v20 = vld [vmem:[%s9448_s2 + $0x30] sm:$0xff] }
 0x646   : > { %v6451_v0 = vpop.eup %6450  ;;  %6462 = vrcp.f32 %v2993_v19  ;;  %vm3516_vm8 = vcmp.gt.f32.partialorder %v3514_v20, 0.5 }
 0x647   : > { %v6453_v46 = vpop.eup %6452  ;;  %v5707_v51 = vclamps-f32 %v3003_v54, 3.0 }
 0x648   : > { %v2958_v10 = vmul.f32 %v6453_v46, %v6451_v0  ;;  %v3154_v0 = vld [vmem:[#allocation3 + $0x28] sm:$0xff] }
 0x649   : > { %6464 = vtanh.f32 %v5707_v51  ;;  %v8247_v29 = vsel %vm3110_vm5, %v5707_v51, %v8027_v32 }
 0x64a   : > { %v6455_v58 = vpop.eup %6454 }
 0x64b   : > { %v6457_v40 = vpop.eup %6456 }
 0x64c   : > { %v2959_v11 = vmul.f32 %v6457_v40, %v6455_v58 }
 0x64e   : > { %v3024_v5 = vpack.c.bf16 %v2959_v11, %v2958_v10 }
 0x64f   : > { %v6459_v56 = vpop.eup %6458 }
 0x650   : > { %3061 = vmatmul.mubr.bf16.vlgmr.msra.gmra.mxu0 %v3024_v5 }
 0x651   : > { %5991 = vmatpush3.bf16.msra.mxu0 %v8030_v52  ;;  %v9622_v52 = vld [vmem:[#allocation64_spill] sm:$0xff] }
 0x652   : > { %v6461_v17 = vpop.eup %6460  ;;  %5992 = vmatprep.subr.bf16.mxu0 %v8034_v22  ;;  %v9623_v22 = vld [vmem:[#allocation65_spill] sm:$0xff] }
 0x653   : > { %v3010_v57 = vmul.f32 %v6461_v17, %v6459_v56  ;;  %v6463_v4 = vpop.eup %6462  ;;  %v3156_v17 = vmul.f32 %v3154_v0, %v7825_v28 }
 0x655   : > { %5993 = vmatpush3.bf16.msra.mxu0 %v8038_v50  ;;  %v9624_v50 = vld [vmem:[#allocation66_spill] sm:$0xff] }
 0x656   : > { %v6465_v39 = vpop.eup %6464  ;;  %5994 = vmatprep.subr.bf16.mxu0 %v8042_v2  ;;  %v3124_v2 = vpop.permute.xlu1 %3123 }
 0x657   : > { %v3011_v32 = vmul.f32 %v6465_v39, %v6463_v4  ;;  %v3518_v4 = vsel %vm3516_vm8, 1, %v9602_v7 }
 0x659   : > { %v3027_v15 = vpack.c.bf16 %v3011_v32, %v3010_v57  ;;  %5995 = vmatpush3.bf16.msra.mxu0 %v8046_v27  ;;  %v8320_v32 = vld [vmem:[%s7076_s11 + $0x68] ss:$16 sps:$4 sm:$0xff]  }
 0x65a   : > { %5996 = vmatprep.subr.bf16.mxu0 %v8050_v30  ;;  %v3145_v30 = vld [vmem:[#allocation2 + $0x20] sm:$0xff] }
 0x65b   : > { %3068 = vmatprep.mubr.bf16.mxu0 %v3027_v15 }
 0x65c   : > { %3069 = vmatmul.mubr.bf16.gmra.mxu0 %v9600_v25 }
 0x65d   : > { %5997 = vmatpush3.bf16.msra.mxu0 %v8055_v33  ;;  %3489 = vmatprep.mubr.bf16.mxu0 %v9600_v25 }
 0x65e   : > { %5998 = vmatprep.subr.bf16.mxu0 %v8060_v18  ;;  %v3126_v18 = vpop.permute.xlu1 %3125 }
 0x661   : > { %5999 = vmatpush3.bf16.msra.mxu0 %v8064_v35  ;;  %v8267_v35 = vpop.permute.xlu0 %3092 }
 0x662   : > { %6000 = vmatprep.subr.bf16.mxu0 %v8068_v59  ;;  %vm3097_vm6 = vcmp.eq.s32.totalorder %v8267_v35, 1  ;;  %v8271_v43 = vpop.permute.xlu1 %3095 }
 0x663   : > { %vm3098_vm7 = vcmp.eq.s32.totalorder %v8271_v43, 1 }
 0x665   : > { %6001 = vmatpush3.bf16.msra.mxu0 %v8072_v45  ;;  %v3147_v45 = vmul.f32 %v3145_v30, %v7825_v28  ;;  %v8355_v30 = vld [vmem:[%s7076_s11 + $0x64] ss:$16 sps:$4 sm:$0xff]  }
 0x666   : > { %6002 = vmatprep.subr.bf16.mxu0 %v8076_v13 }
 0x669   : > { %6003 = vmatpush3.bf16.msra.mxu0 %v8080_v8  ;;  %v3146_v8 = vld [vmem:[#allocation2 + $0x28] sm:$0xff] }
 0x66a   : > { %6004 = vmatprep.subr.bf16.mxu0 %v9622_v52  ;;  %v3148_v24 = vmul.f32 %v3146_v8, %v7825_v28  ;;  %v8328_v52 = vld [vmem:[%s7076_s11 + $0x4c] ss:$16 sps:$4 sm:$0xff]  }
 0x66d   : > { %6005 = vmatpush3.bf16.msra.mxu0 %v9623_v22  ;;  %v8338_v22 = vld [vmem:[%s7076_s11 + $0x2c] ss:$16 sps:$4 sm:$0xff]  }
 0x66e   : > { %6018 = vmatprep.subr.bf16.mxu0 %v9624_v50  ;;  %v8343_v50 = vld [vmem:[%s7076_s11 + $0x28] ss:$16 sps:$4 sm:$0xff]  }
 0x710   : > { %v5978_v27 = vpop.f32.mrf.mxu0 }
 0x712   : > { %v5979_v33 = vpop.f32.mrf.mxu0 }
 0x713   : > { %v5980_v59 = vadd.f32 %v5979_v33, %v5978_v27  ;;  %v8351_v27 = vld [vmem:[%s7076_s11 + $0x8] ss:$16 sps:$4 sm:$0xff]  }
 0x714   : > { %v5981_v13 = vpop.f32.mrf.mxu0  ;;  %v3515_v33 = vld [vmem:[%s9448_s2 + $0x38] sm:$0xff] }
 0x715   : > { %v5708_v60 = vclamps-f32 %v5980_v59, 3.0  ;;  %vm3517_vm9 = vcmp.gt.f32.partialorder %v3515_v33, 0.5 }
 0x716   : > { %v5982_v53 = vpop.f32.mrf.mxu0 }
 0x717   : > { %v3117_v61 = vsel %vm3097_vm6, %v5708_v60, %v8131_v21  ;;  %v3143_v36 = vsel %vm3097_vm6, %v5708_v60, 0.0  ;;  %v5983_v44 = vadd.f32 %v5982_v53, %v5981_v13  ;;  %v8374_v53 = vld [vmem:[%s7076_s11 + $0x60] ss:$16 sps:$4 sm:$0xff]  }
 0x718   : > { %3131 = vst.msk [vmem:[#allocation6] sm:$0xff] %vm589_vm2, %v3117_v61  ;;  %v3149_v9 = vadd.f32 %v3147_v45, %v3143_v36  ;;  %v8378_v61 = vld [vmem:[%s7076_s11 + $0x44] ss:$16 sps:$4 sm:$0xff]   ;;  %v8382_v36 = vld [vmem:[%s7076_s11 + $0x40] ss:$16 sps:$4 sm:$0xff]  }
 0x719   : > { %v5709_v55 = vclamps-f32 %v5983_v44, 3.0  ;;  %v8386_v44 = vld [vmem:[%s7076_s11 + $0x24] ss:$16 sps:$4 sm:$0xff]  }
 0x71a   : > { %3159 = vst.msk [vmem:[#allocation2 + $0x20] sm:$0xff] %vm589_vm2, %v3149_v9  ;;  %3163 = vst.msk [vmem:[%s7093_s14 + $0x8] sm:$0xff] %vm589_vm2, %v3149_v9  ;;  %v8391_v9 = vld [vmem:[%s7076_s11 + $0x20] ss:$16 sps:$4 sm:$0xff]  }
 0x71b   : > { %v3118_v21 = vsel %vm3098_vm7, %v5709_v55, %v8133_v37  ;;  %v3144_v14 = vsel %vm3098_vm7, %v5709_v55, 0.0  ;;  %v3155_v37 = vmul.f32 %v3153_v12, %v7825_v28  ;;  %v8400_v55 = vld [vmem:[%s7076_s11] ss:$16 sps:$4 sm:$0xff]  }
 0x71c   : > { %3132 = vst.msk [vmem:[#allocation6 + $0x8] sm:$0xff] %vm589_vm2, %v3118_v21  ;;  %v3150_v41 = vadd.f32 %v3148_v24, %v3144_v14  ;;  %v5984_v49 = vpop.f32.mrf.mxu0  ;;  %v8396_v24 = vld [vmem:[%s7076_s11 + $0x4] ss:$16 sps:$4 sm:$0xff]   ;;  %v8404_v21 = vld [vmem:[%s7076_s11 + $0x6c] ss:$16 sps:$4 sm:$0xff]  }
 0x71e   : > { %3160 = vst.msk [vmem:[#allocation2 + $0x28] sm:$0xff] %vm589_vm2, %v3150_v41  ;;  %3164 = vst.msk [vmem:[%s7093_s14 + $0x28] sm:$0xff] %vm589_vm2, %v3150_v41  ;;  %v5985_v62 = vpop.f32.mrf.mxu0 }
 0x71f   : > { %v5986_v42 = vadd.f32 %v5985_v62, %v5984_v49  ;;  %v8301_v40 = vld [vmem:[#allocation6] sm:$0xff] }
 0x720   : > { %v5987_v19 = vpop.f32.mrf.mxu0  ;;  %v9626_v49 = vld [vmem:[#allocation22_spill] sm:$0xff] }
 0x721   : > { %v5710_v54 = vclamps-f32 %v5986_v42, 3.0  ;;  %v3297_v12 = vunpack.c.l.bf16 %v9626_v49  ;;  %v3298_v20 = vunpack.c.h.bf16 %v9626_v49 }
 0x722   : > { %v5988_v46 = vpop.f32.mrf.mxu0 }
 0x723   : > { %v3151_v51 = vsel %vm3109_vm4, %v5710_v54, 0.0  ;;  %v5989_v10 = vadd.f32 %v5988_v46, %v5987_v19  ;;  %v3129_v58 = vsel %vm3109_vm4, %v5710_v54, %v3124_v2  ;;  %v8303_v11 = vld [vmem:[#allocation6 + $0x8] sm:$0xff] }
 0x724   : > { %3135 = vrot.lane.b32.xlu1 %v3129_v58, %s6956_s17  ;;  %v3179_v5 = vpack.c.bf16 %v8303_v11, %v8301_v40  ;;  %v8308_v56 = vadd.f32 %v3155_v37, %v3151_v51  ;;  %v8347_v2 = vld [vmem:[%s7076_s11 + $0xc] ss:$16 sps:$4 sm:$0xff]  }
 0x725   : > { %v5711_v57 = vclamps-f32 %v5989_v10, 3.0  ;;  %v9627_v37 = vld [vmem:[#allocation23_spill] sm:$0xff] }
 0x726   : > { %5712 = vmatmul.mubr.msk.bf16.vlgmr.msra.gmra.mxu1 %vm1632_vm1, %v3179_v5  ;;  %3161 = vst.msk [vmem:[#allocation3 + $0x20] sm:$0xff] %vm589_vm2, %v8308_v56  ;;  %v3301_v54 = vunpack.c.l.bf16 %v9627_v37  ;;  %v3302_v51 = vunpack.c.h.bf16 %v9627_v37 }
 0x727   : > { %v3152_v31 = vsel %vm3110_vm5, %v5711_v57, 0.0  ;;  %v3130_v39 = vsel %vm3110_vm5, %v5711_v57, %v3126_v18  ;;  %3249 = vmatpush1.bf16.msra.mxu1 %v8320_v32  ;;  %3229 = vmatprep.mubr.bf16.mxu1 %v9602_v7  ;;  %v3519_v18 = vsel %vm3517_vm9, 1, %v9602_v7 }
 0x728   : > { %3137 = vrot.lane.b32.xlu0 %v3130_v39, %s6956_s17  ;;  %3533 = vperm.xlu1 %6192, %v3518_v4   ;;  %v8325_v15 = vadd.f32 %v3156_v17, %v3152_v31 }
 0x729   : > { %3250 = vmatprep.subr.bf16.mxu1 %v8328_v52 }
 0x72a   : > { %9625 = vst [vmem:[#allocation38_spill] sm:$0xff] %v8325_v15  ;;  %3162 = vst.msk [vmem:[#allocation3 + $0x28] sm:$0xff] %vm589_vm2, %v8325_v15 }
 0x72b   : > { %3251 = vmatpush1.bf16.msra.mxu1 %v8334_v1 }
 0x72c   : > { %3252 = vmatprep.subr.bf16.mxu1 %v8338_v22  ;;  %6195 = vset.pattern.permute.xlu1 %v9602_v7 }
 0x72d   : > { %3536 = vperm.xlu0 %6193, %v3519_v18  }
 0x72f   : > { %3253 = vmatpush1.bf16.msra.mxu1 %v8343_v50 }
 0x730   : > { %3254 = vmatprep.subr.bf16.mxu1 %v8347_v2 }
 0x731   : > { %6194 = vset.pattern.permute.xlu0 %v9602_v7 }
 0x732   : > { %3521 = vperm.xlu0 %6194, %v3518_v4   ;;  %v9628_v4 = vld [vmem:[#allocation40_spill] sm:$0xff] }
 0x733   : > { %3255 = vmatpush1.bf16.msra.mxu1 %v8351_v27  ;;  %v3317_v31 = vunpack.c.l.bf16 %v9628_v4 }
 0x734   : > { %3632 = vmatprep.subr.bf16.mxu1 %v8355_v30 }
 0x736   : > { %6197 = vset.pattern.permute.xlu0 %v9604_v63 }
 0x796   : > { %v3136_v59 = vpop.permute.xlu1 %3135 }
 0x797   : > { %3141 = vst.msk [vmem:[#allocation6 + $0x10] sm:$0xff] %vm2271_vm11, %v3136_v59  ;;  %v3318_v59 = vunpack.c.h.bf16 %v9628_v4 }
 0x79a   : > { %v3138_v45 = vpop.permute.xlu0 %3137 }
 0x79b   : > { %3142 = vst.msk [vmem:[#allocation6 + $0x18] sm:$0xff] %vm2271_vm11, %v3138_v45 }
 0x79e   : > { %v3548_v13 = vld [vmem:[#allocation6 + $0x10] sm:$0xff] }
 0x79f   : > { %3552 = vrot.lane.b32.xlu1 %v3548_v13, %s6954_s3 }
 0x7a2   : > { %v3549_v60 = vld [vmem:[#allocation6 + $0x18] sm:$0xff] }
 0x7a3   : > { %3554 = vrot.lane.b32.xlu1 %v3549_v60, %s6954_s3  ;;  %v3180_v8 = vpack.c.bf16 %v3549_v60, %v3548_v13 }
 0x7a5   : > { %5713 = vmatmul.mubr.msk.bf16.gmra.mxu1 %vm1632_vm1, %v3180_v8 }
 0x7a6   : > { %3272 = vmatprep.mubr.bf16.mxu1 %v9602_v7 }
 0x7a7   : > { %3524 = vperm.xlu1 %6195, %v3519_v18  }
 0x7ab   : > { %6196 = vset.pattern.permute.xlu1 %v9604_v63 }
 0x7ad   : > { %5714 = vmatmul.mubr.msk.bf16.vlgmr.msra.gmra.mxu1 %vm1632_vm1, %v3179_v5 }
 0x7ae   : > { %3282 = vmatprep.mubr.bf16.mxu1 %v9602_v7  ;;  %3633 = vmatpush1.bf16.msra.mxu1 %v8374_v53 }
 0x7af   : > { %3634 = vmatprep.subr.bf16.mxu1 %v8378_v61 }
 0x7b2   : > { %3635 = vmatpush1.bf16.msra.mxu1 %v8382_v36 }
 0x7b3   : > { %3636 = vmatprep.subr.bf16.mxu1 %v8386_v44 }
 0x7b5   : > { %5715 = vmatmul.mubr.msk.bf16.gmra.mxu1 %vm1632_vm1, %v3180_v8 }
 0x7b6   : > { %3637 = vmatpush1.bf16.msra.mxu1 %v8391_v9  ;;  %3656 = vmatprep.mubr.bf16.mxu1 %v9602_v7 }
 0x7b7   : > { %3638 = vmatprep.subr.bf16.mxu1 %v8396_v24 }
 0x7ba   : > { %3639 = vmatpush1.bf16.msra.mxu1 %v8400_v55 }
 0x7bb   : > { %3685 = vmatprep.subr.bf16.mxu1 %v8404_v21 }
 0x7e6   : > { %v3221_v14 = vpop.f32.mrf.mxu1 }
 0x7e7   : > { %v3305_v42 = vadd.f32 %v3297_v12, %v3221_v14  ;;  %v9629_v14 = vld [vmem:[#allocation42_spill] sm:$0xff] }
 0x7e8   : > { %v3223_v41 = vpop.f32.mrf.mxu1 }
 0x7e9   : > { %v3306_v19 = vadd.f32 %v3298_v20, %v3223_v41  ;;  %v5716_v46 = vmul.f32 -1.442695, %v3305_v42  ;;  %v3321_v41 = vunpack.c.l.bf16 %v9629_v14  ;;  %v3322_v20 = vunpack.c.h.bf16 %v9629_v14 }
 0x7ea   : > { %v3225_v62 = vpop.f32.mrf.mxu1 }
 0x7eb   : > { %v3309_v10 = vadd.f32 %v3301_v54, %v3225_v62  ;;  %v5718_v58 = vmul.f32 -1.442695, %v3306_v19  ;;  %6466 = vpow2.f32 %v5716_v46 }
 0x7ec   : > { %v3227_v0 = vpop.f32.mrf.mxu1 }
 0x7ed   : > { %v3310_v5 = vadd.f32 %v3302_v51, %v3227_v0  ;;  %v5717_v17 = vmul.f32 -1.442695, %v3309_v10  ;;  %6468 = vpow2.f32 %v5718_v58  ;;  %v9630_v10 = vld [vmem:[#allocation29_spill] sm:$0xff] }
 0x7ee   : > { %v3299_v58 = vunpack.c.l.bf16 %v9630_v10 }
 0x7ef   : > { %v5719_v57 = vmul.f32 -1.442695, %v3310_v5  ;;  %6470 = vpow2.f32 %v5717_v17  ;;  %v3300_v17 = vunpack.c.h.bf16 %v9630_v10 }
 0x7f1   : > { %6472 = vpow2.f32 %v5719_v57 }
 0x7f8   : > { %v6467_v33 = vpop.eup %6466 }
 0x7f9   : > { %v3343_v49 = vadd.f32 1.0, %v6467_v33 }
 0x7fa   : > { %v6469_v13 = vpop.eup %6468 }
 0x7fb   : > { %v3355_v37 = vadd.f32 1.0, %v6469_v13 }
 0x7fc   : > { %v6471_v19 = vpop.eup %6470 }
 0x7fd   : > { %v3344_v57 = vadd.f32 1.0, %v6471_v19 }
 0x7fe   : > { %v6473_v0 = vpop.eup %6472 }
 0x865   : > { %v3231_v39 = vpop.f32.mrf.mxu1 }
 0x866   : > { %v3325_v18 = vadd.f32 %v3317_v31, %v3231_v39  ;;  %v3356_v39 = vadd.f32 1.0, %v6473_v0 }
 0x867   : > { %v3233_v45 = vpop.f32.mrf.mxu1 }
 0x868   : > { %v5724_v60 = vmul.f32 -1.442695, %v3325_v18  ;;  %v3326_v8 = vadd.f32 %v3318_v59, %v3233_v45  ;;  %v9631_v59 = vld [vmem:[#allocation31_spill] sm:$0xff] }
 0x869   : > { %v3235_v12 = vpop.f32.mrf.mxu1  ;;  %v3303_v45 = vunpack.c.l.bf16 %v9631_v59  ;;  %v3304_v14 = vunpack.c.h.bf16 %v9631_v59 }
 0x86a   : > { %6474 = vpow2.f32 %v5724_v60  ;;  %v5726_v62 = vmul.f32 -1.442695, %v3326_v8  ;;  %v3329_v42 = vadd.f32 %v3321_v41, %v3235_v12  ;;  %v9632_v12 = vld [vmem:[#allocation51_spill] sm:$0xff] }
 0x86b   : > { %v3237_v54 = vpop.f32.mrf.mxu1 }
 0x86c   : > { %6476 = vpow2.f32 %v5726_v62  ;;  %v5725_v46 = vmul.f32 -1.442695, %v3329_v42  ;;  %v3330_v51 = vadd.f32 %v3322_v20, %v3237_v54  ;;  %v3319_v62 = vunpack.c.l.bf16 %v9632_v12 }
 0x86d   : > { %6478 = vrcp.f32 %v3343_v49  ;;  %v3274_v5 = vpop.f32.mrf.mxu1 }
 0x86e   : > { %6480 = vpow2.f32 %v5725_v46  ;;  %v5727_v4 = vmul.f32 -1.442695, %v3330_v51  ;;  %v3307_v31 = vadd.f32 %v3299_v58, %v3274_v5  ;;  %v9633_v5 = vld [vmem:[#allocation53_spill] sm:$0xff] }
 0x86f   : > { %6482 = vrcp.f32 %v3355_v37  ;;  %v3276_v33 = vpop.f32.mrf.mxu1  ;;  %v3320_v37 = vunpack.c.h.bf16 %v9632_v12 }
 0x870   : > { %6484 = vpow2.f32 %v5727_v4  ;;  %v3308_v18 = vadd.f32 %v3300_v17, %v3276_v33  ;;  %v3323_v17 = vunpack.c.l.bf16 %v9633_v5 }
 0x871   : > { %6486 = vtanh.f32 %v3307_v31  ;;  %v3278_v13 = vpop.f32.mrf.mxu1 }
 0x872   : > { %6488 = vrcp.f32 %v3344_v57  ;;  %v5720_v60 = vmul.f32 -1.442695, %v3308_v18  ;;  %v3311_v8 = vadd.f32 %v3303_v45, %v3278_v13 }
 0x873   : > { %6490 = vrcp.f32 %v3356_v39  ;;  %v3280_v41 = vpop.f32.mrf.mxu1  ;;  %v3324_v39 = vunpack.c.h.bf16 %v9633_v5 }
 0x874   : > { %6492 = vpow2.f32 %v5720_v60  ;;  %v3312_v49 = vadd.f32 %v3304_v14, %v3280_v41  ;;  %v8428_v41 = vsel %vm3097_vm6, %v5698_v23, %v8210_v38  ;;  %v8438_v38 = vsel %vm3098_vm7, %v5699_v16, %v8220_v3 }
 0x875   : > { %6494 = vtanh.f32 %v3311_v8  ;;  %v3284_v42 = vpop.f32.mrf.mxu1 }
 0x876   : > { %v5721_v20 = vmul.f32 -1.442695, %v3312_v49  ;;  %v3327_v19 = vadd.f32 %v3319_v62, %v3284_v42 }
 0x877   : > { %v6475_v54 = vpop.eup %6474  ;;  %v3286_v0 = vpop.f32.mrf.mxu1 }
 0x878   : > { %v3395_v46 = vadd.f32 1.0, %v6475_v54  ;;  %6496 = vpow2.f32 %v5721_v20  ;;  %v3328_v51 = vadd.f32 %v3320_v37, %v3286_v0 }
 0x879   : > { %v6477_v10 = vpop.eup %6476  ;;  %6498 = vtanh.f32 %v3327_v19  ;;  %v3288_v58 = vpop.f32.mrf.mxu1 }
 0x87a   : > { %v6479_v57 = vpop.eup %6478  ;;  %6500 = vrcp.f32 %v3395_v46  ;;  %v3407_v4 = vadd.f32 1.0, %v6477_v10  ;;  %v5728_v31 = vmul.f32 -1.442695, %v3328_v51  ;;  %v3331_v18 = vadd.f32 %v3323_v17, %v3288_v58 }
 0x87b   : > { %v6481_v33 = vpop.eup %6480  ;;  %v3290_v59 = vpop.f32.mrf.mxu1 }
 0x87c   : > { %v6483_v45 = vpop.eup %6482  ;;  %6502 = vrcp.f32 %v3407_v4  ;;  %v3396_v13 = vadd.f32 1.0, %v6481_v33  ;;  %v3332_v60 = vadd.f32 %v3324_v39, %v3290_v59  ;;  %v8450_v33 = vpop.permute.xlu1 %3533 }
 0x87d   : > { %v6485_v8 = vpop.eup %6484  ;;  %6504 = vpow2.f32 %v5728_v31  ;;  %v3377_v20 = vmul.f32 %v6483_v45, %v8428_v41  ;;  %vm3538_vm10 = vcmp.eq.s32.totalorder %v8450_v33, 1 }
 0x87e   : > { %v6487_v14 = vpop.eup %6486  ;;  %6506 = vrcp.f32 %v3396_v13  ;;  %v3408_v49 = vadd.f32 1.0, %v6485_v8  ;;  %v5729_v12 = vmul.f32 -1.442695, %v3332_v60 }
 0x87f   : > { %v6489_v62 = vpop.eup %6488  ;;  %6508 = vtanh.f32 %v3331_v18  ;;  %v3375_v42 = vmul.f32 %v6487_v14, %v6479_v57 }
 0x880   : > { %v6491_v19 = vpop.eup %6490  ;;  %6510 = vrcp.f32 %v3408_v49  ;;  %v8454_v49 = vpop.permute.xlu0 %3536 }
 0x881   : > { %v6493_v37 = vpop.eup %6492  ;;  %6512 = vpow2.f32 %v5729_v12  ;;  %v8431_v54 = vadd.f32 %v3377_v20, %v3375_v42  ;;  %v3378_v46 = vmul.f32 %v6491_v19, %v8438_v38  ;;  %vm3539_vm12 = vcmp.eq.s32.totalorder %v8454_v49, 1 }
 0x882   : > { %v6495_v0 = vpop.eup %6494  ;;  %v3369_v47 = vadd.f32 1.0, %v6493_v37 }
 0x883   : > { %v9529_v23 = vclamps-f32 %v8431_v54, 3.0  ;;  %v3376_v35 = vmul.f32 %v6495_v0, %v6489_v62 }
 0x884   : > { %6514 = vrcp.f32 %v3369_v47 }
 0x885   : > { %v6497_v51 = vpop.eup %6496  ;;  %6516 = vtanh.f32 %v9529_v23  ;;  %v8444_v10 = vadd.f32 %v3378_v46, %v3376_v35 }
 0x886   : > { %v6499_v58 = vpop.eup %6498  ;;  %v3370_v5 = vadd.f32 1.0, %v6497_v51 }
 0x887   : > { %v6501_v6 = vpop.eup %6500  ;;  %v9528_v43 = vclamps-f32 %v8444_v10, 3.0 }
 0x888   : > { %6518 = vrcp.f32 %v3370_v5  ;;  %v3427_v3 = vmul.f32 %v6501_v6, %v6499_v58  ;;  %v8468_v58 = vld [vmem:[%s7091_s24 + $0x38] sm:$0xff]   ;;  %v8472_v6 = vld [vmem:[%s7091_s24 + $0x70] sm:$0xff]  }
 0x889   : > { %v6503_v16 = vpop.eup %6502  ;;  %6520 = vtanh.f32 %v9528_v43 }
 0x88a   : > { %v6505_v17 = vpop.eup %6504  ;;  %v3429_v57 = vmul.f32 %v6503_v16, %v8241_v26  ;;  %v8476_v16 = vld [vmem:[%s7091_s24 + $0x30] sm:$0xff]  }
 0x88b   : > { %v6507_v4 = vpop.eup %6506  ;;  %v3421_v31 = vadd.f32 1.0, %v6505_v17 }
 0x88c   : > { %v6509_v39 = vpop.eup %6508  ;;  %v3431_v18 = vadd.f32 %v3429_v57, %v3427_v3  ;;  %v8480_v57 = vld [vmem:[%s7091_s24 + $0x68] sm:$0xff]  }
 0x88d   : > { %v6511_v59 = vpop.eup %6510  ;;  %v3428_v45 = vmul.f32 %v6509_v39, %v6507_v4  ;;  %6522 = vrcp.f32 %v3421_v31  ;;  %v8484_v39 = vld [vmem:[%s7091_s24 + $0x28] sm:$0xff]  }
 0x88e   : > { %v6513_v13 = vpop.eup %6512  ;;  %v5730_v60 = vclamps-f32 %v3431_v18, 3.0  ;;  %v3430_v8 = vmul.f32 %v6511_v59, %v8247_v29  ;;  %v8488_v18 = vld [vmem:[%s7091_s24 + $0x60] sm:$0xff]  }
 0x88f   : > { %v3422_v14 = vadd.f32 1.0, %v6513_v13  ;;  %v8493_v59 = vld [vmem:[%s7091_s24 + $0x20] sm:$0xff]   ;;  %v8502_v13 = vld [vmem:[%s7091_s24 + $0x18] sm:$0xff]  }
 0x890   : > { %6524 = vtanh.f32 %v5730_v60  ;;  %v3432_v12 = vadd.f32 %v3430_v8, %v3428_v45  ;;  %v8459_v62 = vsel %vm3538_vm10, %v5730_v60, %v8241_v26  ;;  %v8498_v45 = vld [vmem:[%s7091_s24 + $0x58] sm:$0xff]   ;;  %v8506_v60 = vld [vmem:[%s7091_s24 + $0x50] sm:$0xff]  }
 0x891   : > { %v6515_v42 = vpop.eup %6514  ;;  %6526 = vrcp.f32 %v3422_v14  ;;  %v8510_v8 = vld [vmem:[%s7091_s24 + $0x10] sm:$0xff]   ;;  %v8514_v14 = vld [vmem:[%s7091_s24 + $0x48] sm:$0xff]  }
 0x892   : > { %v6517_v20 = vpop.eup %6516  ;;  %v5731_v19 = vclamps-f32 %v3432_v12, 3.0  ;;  %v8518_v12 = vld [vmem:[%s7091_s24 + $0x8] sm:$0xff]  }
 0x893   : > { %v3387_v37 = vmul.f32 %v6517_v20, %v6515_v42  ;;  %v8522_v42 = vld [vmem:[%s7091_s24 + $0x40] sm:$0xff]  }
 0x894   : > { %6528 = vtanh.f32 %v5731_v19  ;;  %v8465_v0 = vsel %vm3539_vm12, %v5731_v19, %v8247_v29  ;;  %v8526_v20 = vld [vmem:[%s7091_s24] sm:$0xff]   ;;  %v8530_v19 = vld [vmem:[%s7091_s24 + $0x78] sm:$0xff]  }
 0x895   : > { %v6519_v47 = vpop.eup %6518 }
 0x896   : > { %v6521_v35 = vpop.eup %6520 }
 0x897   : > { %v3388_v26 = vmul.f32 %v6521_v35, %v6519_v47  ;;  %v3574_v35 = vld [vmem:[#allocation2 + $0x30] sm:$0xff] }
 0x899   : > { %v3453_v46 = vpack.c.bf16 %v3388_v26, %v3387_v37  ;;  %v3553_v37 = vpop.permute.xlu1 %3552 }
 0x89a   : > { %v6523_v51 = vpop.eup %6522 }
 0x89b   : > { %3490 = vmatmul.mubr.bf16.vlgmr.msra.gmra.mxu0 %v3453_v46 }
 0x89c   : > { %6019 = vmatpush3.bf16.msra.mxu0 %v8468_v58 }
 0x89d   : > { %v6525_v5 = vpop.eup %6524  ;;  %6020 = vmatprep.subr.bf16.mxu0 %v8472_v6  ;;  %v3555_v46 = vpop.permute.xlu1 %3554 }
 0x89e   : > { %v3439_v29 = vmul.f32 %v6525_v5, %v6523_v51  ;;  %v6527_v3 = vpop.eup %6526  ;;  %v8533_v51 = vpop.permute.xlu0 %3521 }
 0x89f   : > { %vm3526_vm13 = vcmp.eq.s32.totalorder %v8533_v51, 1 }
 0x8a0   : > { %6021 = vmatpush3.bf16.msra.mxu0 %v8476_v16 }
 0x8a1   : > { %v6529_v17 = vpop.eup %6528  ;;  %6022 = vmatprep.subr.bf16.mxu0 %v8480_v57  ;;  %v8537_v43 = vpop.permute.xlu1 %3524 }
 0x8a2   : > { %v3440_v4 = vmul.f32 %v6529_v17, %v6527_v3  ;;  %v3576_v3 = vmul.f32 %v3574_v35, %v7825_v28  ;;  %vm3527_vm14 = vcmp.eq.s32.totalorder %v8537_v43, 1 }
 0x8a4   : > { %v3456_v31 = vpack.c.bf16 %v3440_v4, %v3439_v29  ;;  %6023 = vmatpush3.bf16.msra.mxu0 %v8484_v39  ;;  %v3575_v4 = vld [vmem:[#allocation2 + $0x38] sm:$0xff] }
 0x8a5   : > { %6024 = vmatprep.subr.bf16.mxu0 %v8488_v18  ;;  %v3577_v35 = vmul.f32 %v3575_v4, %v7825_v28 }
 0x8a6   : > { %3497 = vmatprep.mubr.bf16.mxu0 %v3456_v31 }
 0x8a7   : > { %3498 = vmatmul.mubr.bf16.gmra.mxu0 %v9600_v25 }
 0x8a8   : > { %6025 = vmatpush3.bf16.msra.mxu0 %v8493_v59  ;;  %3926 = vmatprep.mubr.bf16.mxu0 %v9600_v25 }
 0x8a9   : > { %6026 = vmatprep.subr.bf16.mxu0 %v8498_v45 }
 0x8ac   : > { %6027 = vmatpush3.bf16.msra.mxu0 %v8502_v13 }
 0x8ad   : > { %6028 = vmatprep.subr.bf16.mxu0 %v8506_v60 }
 0x8b0   : > { %6029 = vmatpush3.bf16.msra.mxu0 %v8510_v8 }
 0x8b1   : > { %6030 = vmatprep.subr.bf16.mxu0 %v8514_v14 }
 0x8b4   : > { %6031 = vmatpush3.bf16.msra.mxu0 %v8518_v12 }
 0x8b5   : > { %6032 = vmatprep.subr.bf16.mxu0 %v8522_v42 }
 0x8b8   : > { %6033 = vmatpush3.bf16.msra.mxu0 %v8526_v20 }
 0x8b9   : > { %6046 = vmatprep.subr.bf16.mxu0 %v8530_v19 }
 0x95b   : > { %v6006_v47 = vpop.f32.mrf.mxu0 }
 0x95d   : > { %v6007_v26 = vpop.f32.mrf.mxu0 }
 0x95e   : > { %v6008_v5 = vadd.f32 %v6007_v26, %v6006_v47 }
 0x95f   : > { %v6009_v29 = vpop.f32.mrf.mxu0 }
 0x960   : > { %v5732_v17 = vclamps-f32 %v6008_v5, 3.0 }
 0x961   : > { %v6010_v31 = vpop.f32.mrf.mxu0 }
 0x962   : > { %v3546_v23 = vsel %vm3526_vm13, %v5732_v17, %v8301_v40  ;;  %v3572_v48 = vsel %vm3526_vm13, %v5732_v17, 0.0  ;;  %v6011_v15 = vadd.f32 %v6010_v31, %v6009_v29  ;;  %v3582_v29 = vld [vmem:[#allocation3 + $0x30] sm:$0xff]  ;;  %v3951_v17 = vld [vmem:[%s9448_s2 + $0x40] sm:$0xff] }
 0x963   : > { %3560 = vst.msk [vmem:[#allocation6] sm:$0xff] %vm589_vm2, %v3546_v23  ;;  %v8545_v47 = vadd.f32 %v3576_v3, %v3572_v48  ;;  %vm3953_vm15 = vcmp.gt.f32.partialorder %v3951_v17, 0.5 }
 0x964   : > { %v5733_v26 = vclamps-f32 %v6011_v15, 3.0  ;;  %v3955_v34 = vsel %vm3953_vm15, 1, %v9602_v7 }
 0x965   : > { %9634 = vst [vmem:[#allocation25_spill] sm:$0xff] %v8545_v47  ;;  %3588 = vst.msk [vmem:[#allocation2 + $0x30] sm:$0xff] %vm589_vm2, %v8545_v47 }
 0x966   : > { %v3547_v40 = vsel %vm3527_vm14, %v5733_v26, %v8303_v11  ;;  %v3573_v5 = vsel %vm3527_vm14, %v5733_v26, 0.0  ;;  %v3584_v11 = vmul.f32 %v3582_v29, %v7825_v28  ;;  %v3583_v26 = vld [vmem:[#allocation3 + $0x38] sm:$0xff] }
 0x967   : > { %3561 = vst.msk [vmem:[#allocation6 + $0x8] sm:$0xff] %vm589_vm2, %v3547_v40  ;;  %v6012_v23 = vpop.f32.mrf.mxu0  ;;  %v8557_v48 = vadd.f32 %v3577_v35, %v3573_v5 }
 0x969   : > { %9635 = vst [vmem:[#allocation27_spill] sm:$0xff] %v8557_v48  ;;  %v6013_v3 = vpop.f32.mrf.mxu0  ;;  %3589 = vst.msk [vmem:[#allocation2 + $0x38] sm:$0xff] %vm589_vm2, %v8557_v48 }
 0x96a   : > { %v6014_v15 = vadd.f32 %v6013_v3, %v6012_v23  ;;  %v8569_v48 = vld [vmem:[#allocation6] sm:$0xff] }
 0x96b   : > { %v6015_v4 = vpop.f32.mrf.mxu0 }
 0x96c   : > { %v5734_v31 = vclamps-f32 %v6014_v15, 3.0  ;;  %v3585_v15 = vmul.f32 %v3583_v26, %v7825_v28 }
 0x96d   : > { %v6016_v47 = vpop.f32.mrf.mxu0 }
 0x96e   : > { %v3580_v35 = vsel %vm3538_vm10, %v5734_v31, 0.0  ;;  %v6017_v40 = vadd.f32 %v6016_v47, %v6015_v4  ;;  %v3558_v5 = vsel %vm3538_vm10, %v5734_v31, %v3553_v37  ;;  %v8571_v23 = vld [vmem:[#allocation6 + $0x8] sm:$0xff]  ;;  %v9638_v4 = vld [vmem:[#allocation26_spill] sm:$0xff] }
 0x96f   : > { %3564 = vrot.lane.b32.xlu1 %v3558_v5, %s6956_s17  ;;  %v3616_v29 = vpack.c.bf16 %v8571_v23, %v8569_v48  ;;  %v8576_v3 = vadd.f32 %v3584_v11, %v3580_v35  ;;  %v3738_v11 = vunpack.c.l.bf16 %v9638_v4  ;;  %v3739_v26 = vunpack.c.h.bf16 %v9638_v4  ;;  %v9639_v5 = vld [vmem:[#allocation43_spill] sm:$0xff] }
 0x970   : > { %v5735_v17 = vclamps-f32 %v6017_v40, 3.0 }
 0x971   : > { %5736 = vmatmul.mubr.msk.bf16.vlgmr.msra.gmra.mxu1 %vm1632_vm1, %v3616_v29  ;;  %3590 = vst.msk [vmem:[#allocation3 + $0x30] sm:$0xff] %vm589_vm2, %v8576_v3 }
 0x972   : > { %v3581_v33 = vsel %vm3539_vm12, %v5735_v17, 0.0  ;;  %v3559_v37 = vsel %vm3539_vm12, %v5735_v17, %v3555_v46  ;;  %3686 = vmatpush1.bf16.msra.mxu1 %v8320_v32  ;;  %3666 = vmatprep.mubr.bf16.mxu1 %v9602_v7  ;;  %v3952_v32 = vld [vmem:[%s9448_s2 + $0x48] sm:$0xff] }
 0x973   : > { %3566 = vrot.lane.b32.xlu0 %v3559_v37, %s6956_s17  ;;  %3970 = vperm.xlu1 %6196, %v3955_v34   ;;  %v8590_v47 = vadd.f32 %v3585_v15, %v3581_v33  ;;  %vm3954_vm0 = vcmp.gt.f32.partialorder %v3952_v32, 0.5  ;;  %v3755_v37 = vunpack.c.h.bf16 %v9639_v5 }
 0x974   : > { %3687 = vmatprep.subr.bf16.mxu1 %v8328_v52  ;;  %v3956_v52 = vsel %vm3954_vm0, 1, %v9602_v7 }
 0x975   : > { %9636 = vst [vmem:[#allocation48_spill] sm:$0xff] %v8590_v47  ;;  %3591 = vst.msk [vmem:[#allocation3 + $0x38] sm:$0xff] %vm589_vm2, %v8590_v47 }
 0x976   : > { %3688 = vmatpush1.bf16.msra.mxu1 %v8334_v1 }
 0x977   : > { %3689 = vmatprep.subr.bf16.mxu1 %v8338_v22  ;;  %6199 = vset.pattern.permute.xlu1 %v9602_v7 }
 0x978   : > { %3973 = vperm.xlu0 %6197, %v3956_v52  }
 0x97a   : > { %3690 = vmatpush1.bf16.msra.mxu1 %v8343_v50 }
 0x97b   : > { %3691 = vmatprep.subr.bf16.mxu1 %v8347_v2 }
 0x97c   : > { %6198 = vset.pattern.permute.xlu0 %v9602_v7 }
 0x97d   : > { %3958 = vperm.xlu0 %6198, %v3955_v34  }
 0x97e   : > { %3692 = vmatpush1.bf16.msra.mxu1 %v8351_v27 }
 0x97f   : > { %4061 = vmatprep.subr.bf16.mxu1 %v8355_v30 }
 0x981   : > { %6201 = vset.pattern.permute.xlu0 %v9604_v63 }
 0x9e1   : > { %v3565_v1 = vpop.permute.xlu1 %3564 }
 0x9e2   : > { %3570 = vst.msk [vmem:[#allocation6 + $0x10] sm:$0xff] %vm2271_vm11, %v3565_v1 }
 0x9e5   : > { %v3567_v22 = vpop.permute.xlu0 %3566 }
 0x9e6   : > { %3571 = vst.msk [vmem:[#allocation6 + $0x18] sm:$0xff] %vm2271_vm11, %v3567_v22 }
 0x9e9   : > { %v3985_v50 = vld [vmem:[#allocation6 + $0x10] sm:$0xff] }
 0x9ea   : > { %3989 = vrot.lane.b32.xlu1 %v3985_v50, %s6954_s3 }
 0x9ed   : > { %v3986_v2 = vld [vmem:[#allocation6 + $0x18] sm:$0xff] }
 0x9ee   : > { %3991 = vrot.lane.b32.xlu1 %v3986_v2, %s6954_s3  ;;  %v3617_v27 = vpack.c.bf16 %v3986_v2, %v3985_v50  ;;  %v9640_v50 = vld [vmem:[#allocation44_spill] sm:$0xff] }
 0x9ef   : > { %v3758_v2 = vunpack.c.l.bf16 %v9640_v50 }
 0x9f0   : > { %5737 = vmatmul.mubr.msk.bf16.gmra.mxu1 %vm1632_vm1, %v3617_v27 }
 0x9f1   : > { %3709 = vmatprep.mubr.bf16.mxu1 %v9602_v7 }
 0x9f2   : > { %3961 = vperm.xlu1 %6199, %v3956_v52  }
 0x9f6   : > { %6200 = vset.pattern.permute.xlu1 %v9604_v63 }
 0x9f8   : > { %5738 = vmatmul.mubr.msk.bf16.vlgmr.msra.gmra.mxu1 %vm1632_vm1, %v3616_v29  ;;  %v3754_v29 = vunpack.c.l.bf16 %v9639_v5 }
 0x9f9   : > { %3719 = vmatprep.mubr.bf16.mxu1 %v9602_v7  ;;  %4062 = vmatpush1.bf16.msra.mxu1 %v8374_v53  ;;  %v9637_v53 = vld [vmem:[#allocation24_spill] sm:$0xff] }
 0x9fa   : > { %4063 = vmatprep.subr.bf16.mxu1 %v8378_v61  ;;  %v3734_v61 = vunpack.c.l.bf16 %v9637_v53 }
 0x9fd   : > { %4064 = vmatpush1.bf16.msra.mxu1 %v8382_v36 }
 0x9fe   : > { %4065 = vmatprep.subr.bf16.mxu1 %v8386_v44  ;;  %v3735_v44 = vunpack.c.h.bf16 %v9637_v53 }
 0xa00   : > { %5739 = vmatmul.mubr.msk.bf16.gmra.mxu1 %vm1632_vm1, %v3617_v27 }
 0xa01   : > { %4066 = vmatpush1.bf16.msra.mxu1 %v8391_v9  ;;  %4085 = vmatprep.mubr.bf16.mxu1 %v9602_v7 }
 0xa02   : > { %4067 = vmatprep.subr.bf16.mxu1 %v8396_v24 }
 0xa05   : > { %4068 = vmatpush1.bf16.msra.mxu1 %v8400_v55 }
 0xa06   : > { %4114 = vmatprep.subr.bf16.mxu1 %v8404_v21 }
 0xa31   : > { %v3658_v34 = vpop.f32.mrf.mxu1 }
 0xa32   : > { %v3742_v36 = vadd.f32 %v3734_v61, %v3658_v34  ;;  %v3759_v61 = vunpack.c.h.bf16 %v9640_v50  ;;  %v9643_v50 = vld [vmem:[#allocation54_spill] sm:$0xff] }
 0xa33   : > { %v3660_v30 = vpop.f32.mrf.mxu1 }
 0xa34   : > { %v3743_v46 = vadd.f32 %v3735_v44, %v3660_v30  ;;  %v5740_v31 = vmul.f32 -1.442695, %v3742_v36 }
 0xa35   : > { %v3662_v49 = vpop.f32.mrf.mxu1 }
 0xa36   : > { %v3746_v24 = vadd.f32 %v3738_v11, %v3662_v49  ;;  %v5742_v35 = vmul.f32 -1.442695, %v3743_v46  ;;  %6530 = vpow2.f32 %v5740_v31 }
 0xa37   : > { %v3664_v9 = vpop.f32.mrf.mxu1 }
 0xa38   : > { %v3747_v55 = vadd.f32 %v3739_v26, %v3664_v9  ;;  %v5741_v21 = vmul.f32 -1.442695, %v3746_v24  ;;  %6532 = vpow2.f32 %v5742_v35  ;;  %v9641_v9 = vld [vmem:[#allocation32_spill] sm:$0xff] }
 0xa39   : > { %v3736_v31 = vunpack.c.l.bf16 %v9641_v9  ;;  %v3737_v24 = vunpack.c.h.bf16 %v9641_v9 }
 0xa3a   : > { %v5743_v40 = vmul.f32 -1.442695, %v3747_v55  ;;  %6534 = vpow2.f32 %v5741_v21 }
 0xa3c   : > { %6536 = vpow2.f32 %v5743_v40 }
 0xa43   : > { %v6531_v17 = vpop.eup %6530 }
 0xa44   : > { %v3780_v27 = vadd.f32 1.0, %v6531_v17 }
 0xa45   : > { %v6533_v52 = vpop.eup %6532 }
 0xa46   : > { %v3792_v36 = vadd.f32 1.0, %v6533_v52 }
 0xa47   : > { %v6535_v49 = vpop.eup %6534 }
 0xa48   : > { %v3781_v35 = vadd.f32 1.0, %v6535_v49 }
 0xa49   : > { %v6537_v46 = vpop.eup %6536 }
 0xa4a   : > { %v3793_v40 = vadd.f32 1.0, %v6537_v46 }
 0xab0   : > { %v3668_v15 = vpop.f32.mrf.mxu1 }
 0xab1   : > { %v3762_v33 = vadd.f32 %v3754_v29, %v3668_v15  ;;  %v9642_v15 = vld [vmem:[#allocation33_spill] sm:$0xff] }
 0xab2   : > { %v3670_v32 = vpop.f32.mrf.mxu1  ;;  %v3740_v17 = vunpack.c.l.bf16 %v9642_v15  ;;  %v3741_v52 = vunpack.c.h.bf16 %v9642_v15 }
 0xab3   : > { %v5748_v1 = vmul.f32 -1.442695, %v3762_v33  ;;  %v3763_v22 = vadd.f32 %v3755_v37, %v3670_v32 }
 0xab4   : > { %v3672_v34 = vpop.f32.mrf.mxu1 }
 0xab5   : > { %6538 = vpow2.f32 %v5748_v1  ;;  %v5750_v30 = vmul.f32 -1.442695, %v3763_v22  ;;  %v3766_v53 = vadd.f32 %v3758_v2, %v3672_v34  ;;  %v3756_v2 = vunpack.c.l.bf16 %v9643_v50 }
 0xab6   : > { %v3674_v44 = vpop.f32.mrf.mxu1 }
 0xab7   : > { %6540 = vpow2.f32 %v5750_v30  ;;  %v5749_v4 = vmul.f32 -1.442695, %v3766_v53  ;;  %v3767_v11 = vadd.f32 %v3759_v61, %v3674_v44  ;;  %v3757_v53 = vunpack.c.h.bf16 %v9643_v50 }
 0xab8   : > { %6542 = vrcp.f32 %v3780_v27  ;;  %v3711_v26 = vpop.f32.mrf.mxu1 }
 0xab9   : > { %6544 = vpow2.f32 %v5749_v4  ;;  %v5751_v55 = vmul.f32 -1.442695, %v3767_v11  ;;  %v3744_v21 = vadd.f32 %v3736_v31, %v3711_v26  ;;  %v9644_v11 = vld [vmem:[#allocation55_spill] sm:$0xff] }
 0xaba   : > { %6546 = vrcp.f32 %v3792_v36  ;;  %v3713_v5 = vpop.f32.mrf.mxu1  ;;  %v3760_v9 = vunpack.c.l.bf16 %v9644_v11 }
 0xabb   : > { %6548 = vpow2.f32 %v5751_v55  ;;  %v3745_v29 = vadd.f32 %v3737_v24, %v3713_v5 }
 0xabc   : > { %6550 = vtanh.f32 %v3744_v21  ;;  %v3715_v33 = vpop.f32.mrf.mxu1 }
 0xabd   : > { %6552 = vrcp.f32 %v3781_v35  ;;  %v5744_v37 = vmul.f32 -1.442695, %v3745_v29  ;;  %v3748_v32 = vadd.f32 %v3740_v17, %v3715_v33  ;;  %v3761_v35 = vunpack.c.h.bf16 %v9644_v11 }
 0xabe   : > { %6554 = vrcp.f32 %v3793_v40  ;;  %v3717_v1 = vpop.f32.mrf.mxu1 }
 0xabf   : > { %6556 = vpow2.f32 %v5744_v37  ;;  %v3749_v22 = vadd.f32 %v3741_v52, %v3717_v1  ;;  %v9645_v37 = vclamps-f32 %v8431_v54, 3.0  ;;  %v9646_v54 = vclamps-f32 %v8444_v10, 3.0 }
 0xac0   : > { %6558 = vtanh.f32 %v3748_v32  ;;  %v3721_v27 = vpop.f32.mrf.mxu1 }
 0xac1   : > { %v5745_v34 = vmul.f32 -1.442695, %v3749_v22  ;;  %v3764_v30 = vadd.f32 %v3756_v2, %v3721_v27  ;;  %v8648_v32 = vsel %vm3526_vm13, %v9645_v37, %v8428_v41  ;;  %v8658_v41 = vsel %vm3527_vm14, %v9646_v54, %v8438_v38 }
 0xac2   : > { %v6539_v61 = vpop.eup %6538  ;;  %v3723_v49 = vpop.f32.mrf.mxu1 }
 0xac3   : > { %v3832_v36 = vadd.f32 1.0, %v6539_v61  ;;  %6560 = vpow2.f32 %v5745_v34  ;;  %v3765_v44 = vadd.f32 %v3757_v53, %v3723_v49 }
 0xac4   : > { %v6541_v46 = vpop.eup %6540  ;;  %6562 = vtanh.f32 %v3764_v30  ;;  %v3725_v4 = vpop.f32.mrf.mxu1 }
 0xac5   : > { %v6543_v31 = vpop.eup %6542  ;;  %6564 = vrcp.f32 %v3832_v36  ;;  %v3844_v26 = vadd.f32 1.0, %v6541_v46  ;;  %v5752_v24 = vmul.f32 -1.442695, %v3765_v44  ;;  %v3768_v21 = vadd.f32 %v3760_v9, %v3725_v4 }
 0xac6   : > { %v6545_v55 = vpop.eup %6544  ;;  %v3727_v40 = vpop.f32.mrf.mxu1 }
 0xac7   : > { %v6547_v5 = vpop.eup %6546  ;;  %6566 = vrcp.f32 %v3844_v26  ;;  %v3833_v29 = vadd.f32 1.0, %v6545_v55  ;;  %v3769_v15 = vadd.f32 %v3761_v35, %v3727_v40 }
 0xac8   : > { %v6549_v17 = vpop.eup %6548  ;;  %6568 = vpow2.f32 %v5752_v24  ;;  %v3814_v2 = vmul.f32 %v6547_v5, %v8648_v32 }
 0xac9   : > { %v6551_v33 = vpop.eup %6550  ;;  %6570 = vrcp.f32 %v3833_v29  ;;  %v3845_v52 = vadd.f32 1.0, %v6549_v17  ;;  %v5753_v1 = vmul.f32 -1.442695, %v3769_v15 }
 0xaca   : > { %v6553_v22 = vpop.eup %6552  ;;  %6572 = vtanh.f32 %v3768_v21  ;;  %v3812_v50 = vmul.f32 %v6551_v33, %v6543_v31  ;;  %v8670_v21 = vpop.permute.xlu1 %3970 }
 0xacb   : > { %v6555_v27 = vpop.eup %6554  ;;  %6574 = vrcp.f32 %v3845_v52  ;;  %vm3975_vm3 = vcmp.eq.s32.totalorder %v8670_v21, 1  ;;  %v8674_v52 = vpop.permute.xlu0 %3973 }
 0xacc   : > { %v6557_v34 = vpop.eup %6556  ;;  %6576 = vpow2.f32 %v5753_v1  ;;  %v8651_v30 = vadd.f32 %v3814_v2, %v3812_v50  ;;  %v3815_v36 = vmul.f32 %v6555_v27, %v8658_v41  ;;  %vm3976_vm4 = vcmp.eq.s32.totalorder %v8674_v52, 1  ;;  %v8774_v52 = vld [vmem:[%s7076_s11 + $0x48] ss:$16 sps:$4 sm:$0xff]  }
 0xacd   : > { %v6559_v53 = vpop.eup %6558  ;;  %v3806_v51 = vadd.f32 1.0, %v6557_v34 }
 0xace   : > { %v5746_v61 = vclamps-f32 %v8651_v30, 3.0  ;;  %v3813_v49 = vmul.f32 %v6559_v53, %v6553_v22 }
 0xacf   : > { %6578 = vrcp.f32 %v3806_v51 }
 0xad0   : > { %v6561_v44 = vpop.eup %6560  ;;  %6580 = vtanh.f32 %v5746_v61  ;;  %v8664_v46 = vadd.f32 %v3815_v36, %v3813_v49 }
 0xad1   : > { %v6563_v4 = vpop.eup %6562  ;;  %v3807_v11 = vadd.f32 1.0, %v6561_v44 }
 0xad2   : > { %v6565_v10 = vpop.eup %6564  ;;  %v5747_v43 = vclamps-f32 %v8664_v46, 3.0 }
 0xad3   : > { %6582 = vrcp.f32 %v3807_v11  ;;  %v3864_v38 = vmul.f32 %v6565_v10, %v6563_v4 }
 0xad4   : > { %v6567_v9 = vpop.eup %6566  ;;  %6584 = vtanh.f32 %v5747_v43 }
 0xad5   : > { %v6569_v31 = vpop.eup %6568  ;;  %v3866_v26 = vmul.f32 %v6567_v9, %v8459_v62 }
 0xad6   : > { %v6571_v24 = vpop.eup %6570  ;;  %v3858_v35 = vadd.f32 1.0, %v6569_v31 }
 0xad7   : > { %v6573_v55 = vpop.eup %6572  ;;  %v3868_v40 = vadd.f32 %v3866_v26, %v3864_v38 }
 0xad8   : > { %v6575_v5 = vpop.eup %6574  ;;  %v3865_v29 = vmul.f32 %v6573_v55, %v6571_v24  ;;  %6586 = vrcp.f32 %v3858_v35 }
 0xad9   : > { %v6577_v15 = vpop.eup %6576  ;;  %v5754_v17 = vclamps-f32 %v3868_v40, 3.0  ;;  %v3867_v33 = vmul.f32 %v6575_v5, %v8465_v0  ;;  %v4019_v40 = vld [vmem:[#allocation3 + $0x40] sm:$0xff] }
 0xada   : > { %v3859_v37 = vadd.f32 1.0, %v6577_v15  ;;  %v4380_v15 = vld [vmem:[%s9448_s2 + $0x50] sm:$0xff] }
 0xadb   : > { %6588 = vtanh.f32 %v5754_v17  ;;  %v3869_v1 = vadd.f32 %v3867_v33, %v3865_v29  ;;  %v8679_v22 = vsel %vm3975_vm3, %v5754_v17, %v8459_v62  ;;  %vm4382_vm7 = vcmp.gt.f32.partialorder %v4380_v15, 0.5 }
 0xadc   : > { %v6579_v50 = vpop.eup %6578  ;;  %6590 = vrcp.f32 %v3859_v37  ;;  %v4020_v37 = vld [vmem:[#allocation3 + $0x48] sm:$0xff] }
 0xadd   : > { %v6581_v2 = vpop.eup %6580  ;;  %v5755_v27 = vclamps-f32 %v3869_v1, 3.0 }
 0xade   : > { %v3824_v34 = vmul.f32 %v6581_v2, %v6579_v50 }
 0xadf   : > { %6592 = vtanh.f32 %v5755_v27  ;;  %v8685_v53 = vsel %vm3976_vm4, %v5755_v27, %v8465_v0 }
 0xae0   : > { %v6583_v54 = vpop.eup %6582 }
 0xae1   : > { %v6585_v51 = vpop.eup %6584 }
 0xae2   : > { %v3825_v49 = vmul.f32 %v6585_v51, %v6583_v54 }
 0xae4   : > { %v3890_v36 = vpack.c.bf16 %v3825_v49, %v3824_v34 }
 0xae5   : > { %v6587_v62 = vpop.eup %6586 }
 0xae6   : > { %3927 = vmatmul.mubr.bf16.vlgmr.msra.gmra.mxu0 %v3890_v36  ;;  %v4022_v36 = vmul.f32 %v4020_v37, %v7825_v28 }
 0xae7   : > { %6047 = vmatpush3.bf16.msra.mxu0 %v8468_v58  ;;  %v3990_v58 = vpop.permute.xlu1 %3989 }
 0xae8   : > { %v6589_v44 = vpop.eup %6588  ;;  %6048 = vmatprep.subr.bf16.mxu0 %v8472_v6 }
 0xae9   : > { %v3876_v4 = vmul.f32 %v6589_v44, %v6587_v62  ;;  %v6591_v11 = vpop.eup %6590  ;;  %v4384_v44 = vsel %vm4382_vm7, 1, %v9602_v7 }
 0xaeb   : > { %6049 = vmatpush3.bf16.msra.mxu0 %v8476_v16  ;;  %v4011_v16 = vld [vmem:[#allocation2 + $0x40] sm:$0xff] }
 0xaec   : > { %v6593_v10 = vpop.eup %6592  ;;  %6050 = vmatprep.subr.bf16.mxu0 %v8480_v57 }
 0xaed   : > { %v3877_v0 = vmul.f32 %v6593_v10, %v6591_v11  ;;  %v8760_v11 = vld [vmem:[%s7076_s11 + $0x68] ss:$16 sps:$4 sm:$0xff]  }
 0xaef   : > { %v3893_v38 = vpack.c.bf16 %v3877_v0, %v3876_v4  ;;  %6051 = vmatpush3.bf16.msra.mxu0 %v8484_v39  ;;  %v3992_v39 = vpop.permute.xlu1 %3991  ;;  %v8768_v0 = vld [vmem:[%s7076_s11 + $0x4c] ss:$16 sps:$4 sm:$0xff]  }
 0xaf0   : > { %6052 = vmatprep.subr.bf16.mxu0 %v8488_v18  ;;  %v8705_v18 = vpop.permute.xlu0 %3958 }
 0xaf1   : > { %3934 = vmatprep.mubr.bf16.mxu0 %v3893_v38  ;;  %vm3963_vm5 = vcmp.eq.s32.totalorder %v8705_v18, 1  ;;  %v8778_v38 = vld [vmem:[%s7076_s11 + $0x2c] ss:$16 sps:$4 sm:$0xff]  }
 0xaf2   : > { %3935 = vmatmul.mubr.bf16.gmra.mxu0 %v9600_v25 }
 0xaf3   : > { %6053 = vmatpush3.bf16.msra.mxu0 %v8493_v59  ;;  %4355 = vmatprep.mubr.bf16.mxu0 %v9600_v25 }
 0xaf4   : > { %6054 = vmatprep.subr.bf16.mxu0 %v8498_v45  ;;  %v4013_v45 = vmul.f32 %v4011_v16, %v7825_v28  ;;  %v8791_v16 = vld [vmem:[%s7076_s11 + $0x8] ss:$16 sps:$4 sm:$0xff]  }
 0xaf7   : > { %6055 = vmatpush3.bf16.msra.mxu0 %v8502_v13 }
 0xaf8   : > { %6056 = vmatprep.subr.bf16.mxu0 %v8506_v60 }
 0xafb   : > { %6057 = vmatpush3.bf16.msra.mxu0 %v8510_v8  ;;  %v4012_v8 = vld [vmem:[#allocation2 + $0x48] sm:$0xff] }
 0xafc   : > { %6058 = vmatprep.subr.bf16.mxu0 %v8514_v14  ;;  %v4014_v31 = vmul.f32 %v4012_v8, %v7825_v28 }
 0xaff   : > { %6059 = vmatpush3.bf16.msra.mxu0 %v8518_v12  ;;  %v8709_v12 = vpop.permute.xlu1 %3961 }
 0xb00   : > { %6060 = vmatprep.subr.bf16.mxu0 %v8522_v42  ;;  %vm3964_vm6 = vcmp.eq.s32.totalorder %v8709_v12, 1 }
 0xb03   : > { %6061 = vmatpush3.bf16.msra.mxu0 %v8526_v20 }
 0xb04   : > { %6074 = vmatprep.subr.bf16.mxu0 %v8530_v19 }
 0xba6   : > { %v6034_v6 = vpop.f32.mrf.mxu0 }
 0xba8   : > { %v6035_v57 = vpop.f32.mrf.mxu0 }
 0xba9   : > { %v6036_v59 = vadd.f32 %v6035_v57, %v6034_v6  ;;  %v8787_v6 = vld [vmem:[%s7076_s11 + $0xc] ss:$16 sps:$4 sm:$0xff]   ;;  %v8795_v57 = vld [vmem:[%s7076_s11 + $0x64] ss:$16 sps:$4 sm:$0xff]  }
 0xbaa   : > { %v6037_v13 = vpop.f32.mrf.mxu0 }
 0xbab   : > { %v5756_v60 = vclamps-f32 %v6036_v59, 3.0 }
 0xbac   : > { %v6038_v14 = vpop.f32.mrf.mxu0 }
 0xbad   : > { %v3983_v42 = vsel %vm3963_vm5, %v5756_v60, %v8569_v48  ;;  %v4009_v20 = vsel %vm3963_vm5, %v5756_v60, 0.0  ;;  %v6039_v19 = vadd.f32 %v6038_v14, %v6037_v13 }
 0xbae   : > { %3997 = vst.msk [vmem:[#allocation6] sm:$0xff] %vm589_vm2, %v3983_v42  ;;  %v8717_v9 = vadd.f32 %v4013_v45, %v4009_v20  ;;  %v8814_v42 = vld [vmem:[%s7076_s11 + $0x60] ss:$16 sps:$4 sm:$0xff]   ;;  %v8818_v20 = vld [vmem:[%s7076_s11 + $0x44] ss:$16 sps:$4 sm:$0xff]  }
 0xbaf   : > { %v5757_v26 = vclamps-f32 %v6039_v19, 3.0  ;;  %v8822_v19 = vld [vmem:[%s7076_s11 + $0x40] ss:$16 sps:$4 sm:$0xff]  }
 0xbb0   : > { %9647 = vst [vmem:[#allocation64_spill] sm:$0xff] %v8717_v9  ;;  %4025 = vst.msk [vmem:[#allocation2 + $0x40] sm:$0xff] %vm589_vm2, %v8717_v9 }
 0xbb1   : > { %v3984_v48 = vsel %vm3964_vm6, %v5757_v26, %v8571_v23  ;;  %v4010_v24 = vsel %vm3964_vm6, %v5757_v26, 0.0  ;;  %v4021_v23 = vmul.f32 %v4019_v40, %v7825_v28  ;;  %v8831_v26 = vld [vmem:[%s7076_s11 + $0x20] ss:$16 sps:$4 sm:$0xff]  }
 0xbb2   : > { %3998 = vst.msk [vmem:[#allocation6 + $0x8] sm:$0xff] %vm589_vm2, %v3984_v48  ;;  %v8729_v35 = vadd.f32 %v4014_v31, %v4010_v24  ;;  %v6040_v55 = vpop.f32.mrf.mxu0  ;;  %v8826_v31 = vld [vmem:[%s7076_s11 + $0x24] ss:$16 sps:$4 sm:$0xff]   ;;  %v8840_v24 = vld [vmem:[%s7076_s11] ss:$16 sps:$4 sm:$0xff]  }
 0xbb3   : > { %v8836_v48 = vld [vmem:[%s7076_s11 + $0x4] ss:$16 sps:$4 sm:$0xff]  }
 0xbb4   : > { %9648 = vst [vmem:[#allocation65_spill] sm:$0xff] %v8729_v35  ;;  %4026 = vst.msk [vmem:[#allocation2 + $0x48] sm:$0xff] %vm589_vm2, %v8729_v35  ;;  %v6041_v5 = vpop.f32.mrf.mxu0 }
 0xbb5   : > { %v6042_v29 = vadd.f32 %v6041_v5, %v6040_v55  ;;  %v8741_v34 = vld [vmem:[#allocation6] sm:$0xff]  ;;  %v8844_v55 = vld [vmem:[%s7076_s11 + $0x6c] ss:$16 sps:$4 sm:$0xff]  }
 0xbb6   : > { %v6043_v17 = vpop.f32.mrf.mxu0 }
 0xbb7   : > { %v5758_v33 = vclamps-f32 %v6042_v29, 3.0  ;;  %v9651_v29 = vld [vmem:[#allocation28_spill] sm:$0xff] }
 0xbb8   : > { %v6044_v1 = vpop.f32.mrf.mxu0  ;;  %v4163_v15 = vunpack.c.l.bf16 %v9651_v29 }
 0xbb9   : > { %v4017_v50 = vsel %vm3975_vm3, %v5758_v33, 0.0  ;;  %v6045_v2 = vadd.f32 %v6044_v1, %v6043_v17  ;;  %v3995_v27 = vsel %vm3975_vm3, %v5758_v33, %v3990_v58  ;;  %v8743_v54 = vld [vmem:[#allocation6 + $0x8] sm:$0xff]  ;;  %v4164_v33 = vunpack.c.h.bf16 %v9651_v29  ;;  %v9652_v1 = vld [vmem:[#allocation30_spill] sm:$0xff] }
 0xbba   : > { %4001 = vrot.lane.b32.xlu1 %v3995_v27, %s6956_s17  ;;  %v4045_v51 = vpack.c.bf16 %v8743_v54, %v8741_v34  ;;  %v8748_v49 = vadd.f32 %v4021_v23, %v4017_v50  ;;  %v8783_v58 = vld [vmem:[%s7076_s11 + $0x28] ss:$16 sps:$4 sm:$0xff]   ;;  %v4167_v50 = vunpack.c.l.bf16 %v9652_v1 }
 0xbbb   : > { %v5759_v62 = vclamps-f32 %v6045_v2, 3.0 }
 0xbbc   : > { %9649 = vst [vmem:[#allocation66_spill] sm:$0xff] %v8748_v49  ;;  %5760 = vmatmul.mubr.msk.bf16.vlgmr.msra.gmra.mxu1 %vm1632_vm1, %v4045_v51  ;;  %4027 = vst.msk [vmem:[#allocation3 + $0x40] sm:$0xff] %vm589_vm2, %v8748_v49 }
 0xbbd   : > { %v4018_v21 = vsel %vm3976_vm4, %v5759_v62, 0.0  ;;  %v3996_v4 = vsel %vm3976_vm4, %v5759_v62, %v3992_v39  ;;  %4115 = vmatpush1.bf16.msra.mxu1 %v8760_v11  ;;  %4095 = vmatprep.mubr.bf16.mxu1 %v9602_v7  ;;  %v4381_v39 = vld [vmem:[%s9448_s2 + $0x58] sm:$0xff] }
 0xbbe   : > { %4003 = vrot.lane.b32.xlu0 %v3996_v4, %s6956_s17  ;;  %4399 = vperm.xlu1 %6200, %v4384_v44   ;;  %v8765_v10 = vadd.f32 %v4022_v36, %v4018_v21  ;;  %vm4383_vm8 = vcmp.gt.f32.partialorder %v4381_v39, 0.5  ;;  %v9653_v39 = vld [vmem:[#allocation45_spill] sm:$0xff] }
 0xbbf   : > { %4116 = vmatprep.subr.bf16.mxu1 %v8768_v0  ;;  %v4385_v59 = vsel %vm4383_vm8, 1, %v9602_v7  ;;  %vm2305_vm8 = vcmask 1048320  }
 0xbc0   : > { %9650 = vst [vmem:[#allocation22_spill] sm:$0xff] %v8765_v10  ;;  %4028 = vst.msk [vmem:[#allocation3 + $0x48] sm:$0xff] %vm589_vm2, %v8765_v10 }
 0xbc1   : > { %4117 = vmatpush1.bf16.msra.mxu1 %v8774_v52 }
 0xbc2   : > { %4118 = vmatprep.subr.bf16.mxu1 %v8778_v38  ;;  %6203 = vset.pattern.permute.xlu1 %v9602_v7 }
 0xbc3   : > { %4402 = vperm.xlu0 %6201, %v4385_v59  }
 0xbc5   : > { %4119 = vmatpush1.bf16.msra.mxu1 %v8783_v58 }
 0xbc6   : > { %4120 = vmatprep.subr.bf16.mxu1 %v8787_v6 }
 0xbc7   : > { %6202 = vset.pattern.permute.xlu0 %v9602_v7 }
 0xbc8   : > { %4387 = vperm.xlu0 %6202, %v4384_v44  }
 0xbc9   : > { %4121 = vmatpush1.bf16.msra.mxu1 %v8791_v16 }
 0xbca   : > { %4498 = vmatprep.subr.bf16.mxu1 %v8795_v57 }
 0xbcc   : > { %6205 = vset.pattern.permute.xlu0 %v9604_v63 }
 0xc2c   : > { %v4002_v45 = vpop.permute.xlu1 %4001 }
 0xc2d   : > { %4007 = vst.msk [vmem:[#allocation6 + $0x10] sm:$0xff] %vm2271_vm11, %v4002_v45 }
 0xc30   : > { %v4004_v13 = vpop.permute.xlu0 %4003 }
 0xc31   : > { %4008 = vst.msk [vmem:[#allocation6 + $0x18] sm:$0xff] %vm2271_vm11, %v4004_v13 }
 0xc34   : > { %v4414_v60 = vld [vmem:[#allocation6 + $0x10] sm:$0xff] }
 0xc35   : > { %4418 = vrot.lane.b32.xlu1 %v4414_v60, %s6954_s3 }
 0xc38   : > { %v4415_v8 = vld [vmem:[#allocation6 + $0x18] sm:$0xff] }
 0xc39   : > { %4420 = vrot.lane.b32.xlu1 %v4415_v8, %s6954_s3  ;;  %v4046_v14 = vpack.c.bf16 %v4415_v8, %v4414_v60  ;;  %v4184_v8 = vunpack.c.h.bf16 %v9653_v39 }
 0xc3b   : > { %5761 = vmatmul.mubr.msk.bf16.gmra.mxu1 %vm1632_vm1, %v4046_v14 }
 0xc3c   : > { %4138 = vmatprep.mubr.bf16.mxu1 %v9602_v7 }
 0xc3d   : > { %4390 = vperm.xlu1 %6203, %v4385_v59   ;;  %v4183_v59 = vunpack.c.l.bf16 %v9653_v39 }
 0xc41   : > { %6204 = vset.pattern.permute.xlu1 %v9604_v63 }
 0xc43   : > { %5762 = vmatmul.mubr.msk.bf16.vlgmr.msra.gmra.mxu1 %vm1632_vm1, %v4045_v51  ;;  %v4168_v51 = vunpack.c.h.bf16 %v9652_v1 }
 0xc44   : > { %4148 = vmatprep.mubr.bf16.mxu1 %v9602_v7  ;;  %4499 = vmatpush1.bf16.msra.mxu1 %v8814_v42 }
 0xc45   : > { %4500 = vmatprep.subr.bf16.mxu1 %v8818_v20 }
 0xc48   : > { %4501 = vmatpush1.bf16.msra.mxu1 %v8822_v19 }
 0xc49   : > { %4502 = vmatprep.subr.bf16.mxu1 %v8826_v31 }
 0xc4b   : > { %5763 = vmatmul.mubr.msk.bf16.gmra.mxu1 %vm1632_vm1, %v4046_v14 }
 0xc4c   : > { %4503 = vmatpush1.bf16.msra.mxu1 %v8831_v26  ;;  %4522 = vmatprep.mubr.bf16.mxu1 %v9602_v7 }
 0xc4d   : > { %4504 = vmatprep.subr.bf16.mxu1 %v8836_v48 }
 0xc50   : > { %4505 = vmatpush1.bf16.msra.mxu1 %v8840_v24 }
 0xc51   : > { %4551 = vmatprep.subr.bf16.mxu1 %v8844_v55 }
 0xc7c   : > { %v4087_v40 = vpop.f32.mrf.mxu1 }
 0xc7d   : > { %v4171_v23 = vadd.f32 %v4163_v15, %v4087_v40  ;;  %v9654_v15 = vld [vmem:[#allocation46_spill] sm:$0xff] }
 0xc7e   : > { %v4089_v5 = vpop.f32.mrf.mxu1 }
 0xc7f   : > { %v4172_v37 = vadd.f32 %v4164_v33, %v4089_v5  ;;  %v5764_v27 = vmul.f32 -1.442695, %v4171_v23 }
 0xc80   : > { %v4091_v17 = vpop.f32.mrf.mxu1 }
 0xc81   : > { %v4175_v36 = vadd.f32 %v4167_v50, %v4091_v17  ;;  %v5766_v62 = vmul.f32 -1.442695, %v4172_v37  ;;  %6594 = vpow2.f32 %v5764_v27  ;;  %v4187_v17 = vunpack.c.l.bf16 %v9654_v15 }
 0xc82   : > { %v4093_v2 = vpop.f32.mrf.mxu1  ;;  %v4188_v50 = vunpack.c.h.bf16 %v9654_v15 }
 0xc83   : > { %v4176_v44 = vadd.f32 %v4168_v51, %v4093_v2  ;;  %v5765_v21 = vmul.f32 -1.442695, %v4175_v36  ;;  %6596 = vpow2.f32 %v5766_v62 }
 0xc85   : > { %v5767_v4 = vmul.f32 -1.442695, %v4176_v44  ;;  %6598 = vpow2.f32 %v5765_v21  ;;  %v9655_v21 = vld [vmem:[#allocation34_spill] sm:$0xff] }
 0xc87   : > { %6600 = vpow2.f32 %v5767_v4  ;;  %v4165_v4 = vunpack.c.l.bf16 %v9655_v21 }
 0xc8e   : > { %v6595_v13 = vpop.eup %6594 }
 0xc8f   : > { %v4209_v23 = vadd.f32 1.0, %v6595_v13 }
 0xc90   : > { %v6597_v40 = vpop.eup %6596 }
 0xc91   : > { %v4221_v27 = vadd.f32 1.0, %v6597_v40 }
 0xc92   : > { %v6599_v2 = vpop.eup %6598 }
 0xc94   : > { %v6601_v36 = vpop.eup %6600 }
 0xcfb   : > { %v4097_v45 = vpop.f32.mrf.mxu1 }
 0xcfc   : > { %v4191_v60 = vadd.f32 %v4183_v59, %v4097_v45  ;;  %v4166_v59 = vunpack.c.h.bf16 %v9655_v21  ;;  %v4210_v45 = vadd.f32 1.0, %v6599_v2 }
 0xcfd   : > { %v4099_v14 = vpop.f32.mrf.mxu1 }
 0xcfe   : > { %v5772_v5 = vmul.f32 -1.442695, %v4191_v60  ;;  %v4192_v29 = vadd.f32 %v4184_v8, %v4099_v14  ;;  %v4222_v8 = vadd.f32 1.0, %v6601_v36 }
 0xcff   : > { %v4101_v33 = vpop.f32.mrf.mxu1 }
 0xd00   : > { %6602 = vpow2.f32 %v5772_v5  ;;  %v5774_v37 = vmul.f32 -1.442695, %v4192_v29  ;;  %v4195_v1 = vadd.f32 %v4187_v17, %v4101_v33  ;;  %v9656_v5 = vld [vmem:[#allocation35_spill] sm:$0xff] }
 0xd01   : > { %v4103_v51 = vpop.f32.mrf.mxu1  ;;  %v4169_v29 = vunpack.c.l.bf16 %v9656_v5 }
 0xd02   : > { %6604 = vpow2.f32 %v5774_v37  ;;  %v5773_v62 = vmul.f32 -1.442695, %v4195_v1  ;;  %v4196_v44 = vadd.f32 %v4188_v50, %v4103_v51  ;;  %v9657_v50 = vld [vmem:[#allocation56_spill] sm:$0xff] }
 0xd03   : > { %6606 = vrcp.f32 %v4209_v23  ;;  %v4140_v39 = vpop.f32.mrf.mxu1  ;;  %v4170_v23 = vunpack.c.h.bf16 %v9656_v5  ;;  %v4185_v2 = vunpack.c.l.bf16 %v9657_v50 }
 0xd04   : > { %6608 = vpow2.f32 %v5773_v62  ;;  %v5775_v13 = vmul.f32 -1.442695, %v4196_v44  ;;  %v4173_v60 = vadd.f32 %v4165_v4, %v4140_v39  ;;  %v4186_v62 = vunpack.c.h.bf16 %v9657_v50 }
 0xd05   : > { %6610 = vrcp.f32 %v4221_v27  ;;  %v4142_v14 = vpop.f32.mrf.mxu1 }
 0xd06   : > { %6612 = vpow2.f32 %v5775_v13  ;;  %v4174_v40 = vadd.f32 %v4166_v59, %v4142_v14  ;;  %v9658_v13 = vld [vmem:[#allocation57_spill] sm:$0xff] }
 0xd07   : > { %6614 = vtanh.f32 %v4173_v60  ;;  %v4144_v15 = vpop.f32.mrf.mxu1  ;;  %v4189_v60 = vunpack.c.l.bf16 %v9658_v13  ;;  %v4190_v5 = vunpack.c.h.bf16 %v9658_v13 }
 0xd08   : > { %6616 = vrcp.f32 %v4210_v45  ;;  %v5768_v17 = vmul.f32 -1.442695, %v4174_v40  ;;  %v4177_v33 = vadd.f32 %v4169_v29, %v4144_v15 }
 0xd09   : > { %6618 = vrcp.f32 %v4222_v8  ;;  %v4146_v37 = vpop.f32.mrf.mxu1 }
 0xd0a   : > { %6620 = vpow2.f32 %v5768_v17  ;;  %v4178_v1 = vadd.f32 %v4170_v23, %v4146_v37 }
 0xd0b   : > { %6622 = vtanh.f32 %v4177_v33  ;;  %v4150_v27 = vpop.f32.mrf.mxu1 }
 0xd0c   : > { %v5769_v51 = vmul.f32 -1.442695, %v4178_v1  ;;  %v4193_v36 = vadd.f32 %v4185_v2, %v4150_v27  ;;  %v8868_v2 = vsel %vm3963_vm5, %v5746_v61, %v8648_v32  ;;  %v8878_v32 = vsel %vm3964_vm6, %v5747_v43, %v8658_v41 }
 0xd0d   : > { %v6603_v44 = vpop.eup %6602  ;;  %v4152_v21 = vpop.f32.mrf.mxu1 }
 0xd0e   : > { %v4261_v4 = vadd.f32 1.0, %v6603_v44  ;;  %6624 = vpow2.f32 %v5769_v51  ;;  %v4194_v39 = vadd.f32 %v4186_v62, %v4152_v21 }
 0xd0f   : > { %v6605_v59 = vpop.eup %6604  ;;  %6626 = vtanh.f32 %v4193_v36  ;;  %v4154_v45 = vpop.f32.mrf.mxu1 }
 0xd10   : > { %v6607_v8 = vpop.eup %6606  ;;  %6628 = vrcp.f32 %v4261_v4  ;;  %v4273_v14 = vadd.f32 1.0, %v6605_v59  ;;  %v5776_v40 = vmul.f32 -1.442695, %v4194_v39  ;;  %v4197_v15 = vadd.f32 %v4189_v60, %v4154_v45 }
 0xd11   : > { %v6609_v29 = vpop.eup %6608  ;;  %v4156_v17 = vpop.f32.mrf.mxu1 }
 0xd12   : > { %v6611_v33 = vpop.eup %6610  ;;  %6630 = vrcp.f32 %v4273_v14  ;;  %v4262_v23 = vadd.f32 1.0, %v6609_v29  ;;  %v4198_v37 = vadd.f32 %v4190_v5, %v4156_v17 }
 0xd13   : > { %v6613_v1 = vpop.eup %6612  ;;  %6632 = vpow2.f32 %v5776_v40  ;;  %v4243_v44 = vmul.f32 %v6611_v33, %v8868_v2  ;;  %v8890_v33 = vpop.permute.xlu1 %4399 }
 0xd14   : > { %v6615_v50 = vpop.eup %6614  ;;  %6634 = vrcp.f32 %v4262_v23  ;;  %v4274_v27 = vadd.f32 1.0, %v6613_v1  ;;  %v5777_v51 = vmul.f32 -1.442695, %v4198_v37  ;;  %vm4404_vm9 = vcmp.eq.s32.totalorder %v8890_v33, 1 }
 0xd15   : > { %v6617_v36 = vpop.eup %6616  ;;  %6636 = vtanh.f32 %v4197_v15  ;;  %v4241_v62 = vmul.f32 %v6615_v50, %v6607_v8 }
 0xd16   : > { %v6619_v21 = vpop.eup %6618  ;;  %6638 = vrcp.f32 %v4274_v27 }
 0xd17   : > { %v6621_v4 = vpop.eup %6620  ;;  %6640 = vpow2.f32 %v5777_v51  ;;  %v8871_v39 = vadd.f32 %v4243_v44, %v4241_v62  ;;  %v4244_v45 = vmul.f32 %v6619_v21, %v8878_v32  ;;  %v8894_v62 = vpop.permute.xlu0 %4402 }
 0xd18   : > { %v6623_v59 = vpop.eup %6622  ;;  %v4235_v30 = vadd.f32 1.0, %v6621_v4  ;;  %vm4405_vm10 = vcmp.eq.s32.totalorder %v8894_v62, 1 }
 0xd19   : > { %v9536_v61 = vclamps-f32 %v8871_v39, 3.0  ;;  %v4242_v18 = vmul.f32 %v6623_v59, %v6617_v36 }
 0xd1a   : > { %6642 = vrcp.f32 %v4235_v30 }
 0xd1b   : > { %v6625_v13 = vpop.eup %6624  ;;  %6644 = vtanh.f32 %v9536_v61  ;;  %v8884_v60 = vadd.f32 %v4244_v45, %v4242_v18  ;;  %v4441_v61 = vld [vmem:[#allocation2 + $0x58] sm:$0xff] }
 0xd1c   : > { %v6627_v8 = vpop.eup %6626  ;;  %v4236_v14 = vadd.f32 1.0, %v6625_v13 }
 0xd1d   : > { %v6629_v46 = vpop.eup %6628  ;;  %v9535_v12 = vclamps-f32 %v8884_v60, 3.0 }
 0xd1e   : > { %6646 = vrcp.f32 %v4236_v14  ;;  %v4293_v41 = vmul.f32 %v6629_v46, %v6627_v8 }
 0xd1f   : > { %v6631_v43 = vpop.eup %6630  ;;  %6648 = vtanh.f32 %v9535_v12 }
 0xd20   : > { %v6633_v40 = vpop.eup %6632  ;;  %v4295_v5 = vmul.f32 %v6631_v43, %v8679_v22 }
 0xd21   : > { %v6635_v29 = vpop.eup %6634  ;;  %v4287_v15 = vadd.f32 1.0, %v6633_v40  ;;  %v8912_v40 = vld [vmem:[%s7091_s24 + $0x70] sm:$0xff]  }
 0xd22   : > { %v6637_v17 = vpop.eup %6636  ;;  %v4297_v23 = vadd.f32 %v4295_v5, %v4293_v41  ;;  %v8908_v41 = vld [vmem:[%s7091_s24 + $0x38] sm:$0xff]  }
 0xd23   : > { %v6639_v37 = vpop.eup %6638  ;;  %v4294_v1 = vmul.f32 %v6637_v17, %v6635_v29  ;;  %6650 = vrcp.f32 %v4287_v15  ;;  %v8916_v29 = vld [vmem:[%s7091_s24 + $0x30] sm:$0xff]   ;;  %v8920_v17 = vld [vmem:[%s7091_s24 + $0x68] sm:$0xff]  }
 0xd24   : > { %v6641_v50 = vpop.eup %6640  ;;  %v5778_v27 = vclamps-f32 %v4297_v23, 3.0  ;;  %v4296_v51 = vmul.f32 %v6639_v37, %v8685_v53 }
 0xd25   : > { %v4288_v36 = vadd.f32 1.0, %v6641_v50  ;;  %v8928_v50 = vld [vmem:[%s7091_s24 + $0x60] sm:$0xff]  }
 0xd26   : > { %6652 = vtanh.f32 %v5778_v27  ;;  %v4298_v44 = vadd.f32 %v4296_v51, %v4294_v1  ;;  %v8899_v21 = vsel %vm4404_vm9, %v5778_v27, %v8679_v22  ;;  %v8924_v1 = vld [vmem:[%s7091_s24 + $0x28] sm:$0xff]   ;;  %v8933_v27 = vld [vmem:[%s7091_s24 + $0x20] sm:$0xff]   ;;  %v8938_v51 = vld [vmem:[%s7091_s24 + $0x58] sm:$0xff]  }
 0xd27   : > { %v6643_v4 = vpop.eup %6642  ;;  %6654 = vrcp.f32 %v4288_v36  ;;  %v8942_v36 = vld [vmem:[%s7091_s24 + $0x18] sm:$0xff]  }
 0xd28   : > { %v6645_v59 = vpop.eup %6644  ;;  %v5779_v30 = vclamps-f32 %v4298_v44, 3.0  ;;  %v8946_v44 = vld [vmem:[%s7091_s24 + $0x50] sm:$0xff]  }
 0xd29   : > { %v4253_v18 = vmul.f32 %v6645_v59, %v6643_v4  ;;  %v8950_v4 = vld [vmem:[%s7091_s24 + $0x10] sm:$0xff]   ;;  %v8954_v59 = vld [vmem:[%s7091_s24 + $0x48] sm:$0xff]  }
 0xd2a   : > { %6656 = vtanh.f32 %v5779_v30  ;;  %v8905_v45 = vsel %vm4405_vm10, %v5779_v30, %v8685_v53  ;;  %v8958_v30 = vld [vmem:[%s7091_s24 + $0x8] sm:$0xff]  }
 0xd2b   : > { %v6647_v13 = vpop.eup %6646 }
 0xd2c   : > { %v6649_v8 = vpop.eup %6648 }
 0xd2d   : > { %v4254_v22 = vmul.f32 %v6649_v8, %v6647_v13  ;;  %v8966_v13 = vld [vmem:[%s7091_s24] sm:$0xff]   ;;  %v6881_v8 = vld [vmem:[%s7091_s24 + $0x78] sm:$0xff]  }
 0xd2f   : > { %v4319_v14 = vpack.c.bf16 %v4254_v22, %v4253_v18  ;;  %v8962_v18 = vld [vmem:[%s7091_s24 + $0x40] sm:$0xff]   ;;  %v4419_v22 = vpop.permute.xlu1 %4418  ;;  %s6893_s24 = sshll.u32 %s6958_s23, 4  ;;  %s6894_s24 = int_to_ptr.vmem [resolvable:$false] %s6893_s24 }
 0xd30   : > { %v6651_v46 = vpop.eup %6650  ;;  %s6895_s20 = scalar_lea.vmem %s6894_s24, 2048 }
 0xd31   : > { %4356 = vmatmul.mubr.bf16.vlgmr.msra.gmra.mxu0 %v4319_v14 }
 0xd32   : > { %6075 = vmatpush3.bf16.msra.mxu0 %v8908_v41 }
 0xd33   : > { %v6653_v43 = vpop.eup %6652  ;;  %6076 = vmatprep.subr.bf16.mxu0 %v8912_v40 }
 0xd34   : > { %v4305_v53 = vmul.f32 %v6653_v43, %v6651_v46  ;;  %v6655_v5 = vpop.eup %6654  ;;  %v4440_v46 = vld [vmem:[#allocation2 + $0x50] sm:$0xff] }
 0xd36   : > { %6077 = vmatpush3.bf16.msra.mxu0 %v8916_v29 }
 0xd37   : > { %v6657_v15 = vpop.eup %6656  ;;  %6078 = vmatprep.subr.bf16.mxu0 %v8920_v17 }
 0xd38   : > { %v4306_v23 = vmul.f32 %v6657_v15, %v6655_v5  ;;  %v8970_v5 = vpop.permute.xlu0 %4387 }
 0xd39   : > { %vm4392_vm12 = vcmp.eq.s32.totalorder %v8970_v5, 1 }
 0xd3a   : > { %v4322_v37 = vpack.c.bf16 %v4306_v23, %v4305_v53  ;;  %6079 = vmatpush3.bf16.msra.mxu0 %v8924_v1  ;;  %v4421_v53 = vpop.permute.xlu1 %4420 }
 0xd3b   : > { %6080 = vmatprep.subr.bf16.mxu0 %v8928_v50 }
 0xd3c   : > { %4363 = vmatprep.mubr.bf16.mxu0 %v4322_v37  ;;  %v4442_v37 = vmul.f32 %v4440_v46, %v7825_v28  ;;  %v4443_v46 = vmul.f32 %v4441_v61, %v7825_v28 }
 0xd3d   : > { %4364 = vmatmul.mubr.bf16.gmra.mxu0 %v9600_v25 }
 0xd3e   : > { %6081 = vmatpush3.bf16.msra.mxu0 %v8933_v27  ;;  %4792 = vmatprep.mubr.bf16.mxu0 %v9600_v25  ;;  %v8974_v9 = vpop.permute.xlu1 %4390 }
 0xd3f   : > { %6082 = vmatprep.subr.bf16.mxu0 %v8938_v51  ;;  %vm4393_vm13 = vcmp.eq.s32.totalorder %v8974_v9, 1 }
 0xd42   : > { %6083 = vmatpush3.bf16.msra.mxu0 %v8942_v36 }
 0xd43   : > { %6084 = vmatprep.subr.bf16.mxu0 %v8946_v44 }
 0xd46   : > { %6085 = vmatpush3.bf16.msra.mxu0 %v8950_v4 }
 0xd47   : > { %6086 = vmatprep.subr.bf16.mxu0 %v8954_v59 }
 0xd4a   : > { %6087 = vmatpush3.bf16.msra.mxu0 %v8958_v30 }
 0xd4b   : > { %6088 = vmatprep.subr.bf16.mxu0 %v8962_v18 }
 0xd4e   : > { %6089 = vmatpush3.bf16.msra.mxu0 %v8966_v13 }
 0xd4f   : > { %6102 = vmatprep.subr.bf16.mxu0 %v6881_v8 }
 0xdf1   : > { %v6062_v14 = vpop.f32.mrf.mxu0 }
 0xdf3   : > { %v6063_v43 = vpop.f32.mrf.mxu0 }
 0xdf4   : > { %v6064_v15 = vadd.f32 %v6063_v43, %v6062_v14 }
 0xdf5   : > { %v6065_v23 = vpop.f32.mrf.mxu0 }
 0xdf6   : > { %v5780_v12 = vclamps-f32 %v6064_v15, 3.0  ;;  %v4448_v15 = vld [vmem:[#allocation3 + $0x50] sm:$0xff] }
 0xdf7   : > { %v6066_v35 = vpop.f32.mrf.mxu0 }
 0xdf8   : > { %v4412_v8 = vsel %vm4392_vm12, %v5780_v12, %v8741_v34  ;;  %v4438_v10 = vsel %vm4392_vm12, %v5780_v12, 0.0  ;;  %v6067_v47 = vadd.f32 %v6066_v35, %v6065_v23  ;;  %v4817_v23 = vld [vmem:[%s9448_s2 + $0x60] sm:$0xff] }
 0xdf9   : > { %4426 = vst.msk [vmem:[#allocation6] sm:$0xff] %vm589_vm2, %v4412_v8  ;;  %v8982_v14 = vadd.f32 %v4442_v37, %v4438_v10  ;;  %vm4819_vm14 = vcmp.gt.f32.partialorder %v4817_v23, 0.5 }
 0xdfa   : > { %v5781_v43 = vclamps-f32 %v6067_v47, 3.0  ;;  %v4821_v49 = vsel %vm4819_vm14, 1, %v9602_v7 }
 0xdfb   : > { %9659 = vst [vmem:[#allocation23_spill] sm:$0xff] %v8982_v14  ;;  %4454 = vst.msk [vmem:[#allocation2 + $0x50] sm:$0xff] %vm589_vm2, %v8982_v14 }
 0xdfc   : > { %v4413_v34 = vsel %vm4393_vm13, %v5781_v43, %v8743_v54  ;;  %v4439_v12 = vsel %vm4393_vm13, %v5781_v43, 0.0  ;;  %v4450_v54 = vmul.f32 %v4448_v15, %v7825_v28  ;;  %v4449_v43 = vld [vmem:[#allocation3 + $0x58] sm:$0xff] }
 0xdfd   : > { %4427 = vst.msk [vmem:[#allocation6 + $0x8] sm:$0xff] %vm589_vm2, %v4413_v34  ;;  %v6068_v35 = vpop.f32.mrf.mxu0  ;;  %v8994_v10 = vadd.f32 %v4443_v46, %v4439_v12 }
 0xdff   : > { %9660 = vst [vmem:[#allocation40_spill] sm:$0xff] %v8994_v10  ;;  %v6069_v61 = vpop.f32.mrf.mxu0  ;;  %4455 = vst.msk [vmem:[#allocation2 + $0x58] sm:$0xff] %vm589_vm2, %v8994_v10 }
 0xe00   : > { %v6070_v47 = vadd.f32 %v6069_v61, %v6068_v35  ;;  %v9006_v10 = vld [vmem:[#allocation6] sm:$0xff] }
 0xe01   : > { %v6071_v37 = vpop.f32.mrf.mxu0 }
 0xe02   : > { %v5782_v8 = vclamps-f32 %v6070_v47, 3.0  ;;  %v4451_v47 = vmul.f32 %v4449_v43, %v7825_v28 }
 0xe03   : > { %v6072_v14 = vpop.f32.mrf.mxu0 }
 0xe04   : > { %v4446_v46 = vsel %vm4404_vm9, %v5782_v8, 0.0  ;;  %v6073_v34 = vadd.f32 %v6072_v14, %v6071_v37  ;;  %v4424_v12 = vsel %vm4404_vm9, %v5782_v8, %v4419_v22  ;;  %v9008_v35 = vld [vmem:[#allocation6 + $0x8] sm:$0xff]  ;;  %vm2733_vm9 = vcmask 785920  }
 0xe05   : > { %4430 = vrot.lane.b32.xlu1 %v4424_v12, %s6956_s17  ;;  %v4482_v15 = vpack.c.bf16 %v9008_v35, %v9006_v10  ;;  %v9013_v61 = vadd.f32 %v4450_v54, %v4446_v46  ;;  %v9662_v37 = vld [vmem:[#allocation19_spill] sm:$0xff] }
 0xe06   : > { %v5783_v23 = vclamps-f32 %v6073_v34, 3.0  ;;  %v4604_v54 = vunpack.c.l.bf16 %v9662_v37  ;;  %v4605_v43 = vunpack.c.h.bf16 %v9662_v37  ;;  %v9663_v12 = vld [vmem:[#allocation47_spill] sm:$0xff] }
 0xe07   : > { %5784 = vmatmul.mubr.msk.bf16.vlgmr.msra.gmra.mxu1 %vm1632_vm1, %v4482_v15  ;;  %4456 = vst.msk [vmem:[#allocation3 + $0x50] sm:$0xff] %vm589_vm2, %v9013_v61 }
 0xe08   : > { %v4447_v33 = vsel %vm4405_vm10, %v5783_v23, 0.0  ;;  %v4425_v22 = vsel %vm4405_vm10, %v5783_v23, %v4421_v53  ;;  %4552 = vmatpush1.bf16.msra.mxu1 %v8760_v11  ;;  %4532 = vmatprep.mubr.bf16.mxu1 %v9602_v7  ;;  %v4818_v11 = vld [vmem:[%s9448_s2 + $0x68] sm:$0xff] }
 0xe09   : > { %4432 = vrot.lane.b32.xlu0 %v4425_v22, %s6956_s17  ;;  %4836 = vperm.xlu1 %6204, %v4821_v49   ;;  %v9027_v14 = vadd.f32 %v4451_v47, %v4447_v33  ;;  %vm4820_vm15 = vcmp.gt.f32.partialorder %v4818_v11, 0.5  ;;  %v4621_v22 = vunpack.c.h.bf16 %v9663_v12 }
 0xe0a   : > { %4553 = vmatprep.subr.bf16.mxu1 %v8768_v0  ;;  %v4822_v0 = vsel %vm4820_vm15, 1, %v9602_v7 }
 0xe0b   : > { %4457 = vst.msk [vmem:[#allocation3 + $0x58] sm:$0xff] %vm589_vm2, %v9027_v14 }
 0xe0c   : > { %4554 = vmatpush1.bf16.msra.mxu1 %v8774_v52 }
 0xe0d   : > { %4555 = vmatprep.subr.bf16.mxu1 %v8778_v38  ;;  %6207 = vset.pattern.permute.xlu1 %v9602_v7 }
 0xe0e   : > { %4839 = vperm.xlu0 %6205, %v4822_v0  }
 0xe10   : > { %4556 = vmatpush1.bf16.msra.mxu1 %v8783_v58 }
 0xe11   : > { %4557 = vmatprep.subr.bf16.mxu1 %v8787_v6 }
 0xe12   : > { %6206 = vset.pattern.permute.xlu0 %v9602_v7 }
 0xe13   : > { %4824 = vperm.xlu0 %6206, %v4821_v49  }
 0xe14   : > { %4558 = vmatpush1.bf16.msra.mxu1 %v8791_v16 }
 0xe15   : > { %4927 = vmatprep.subr.bf16.mxu1 %v8795_v57 }
 0xe77   : > { %v4431_v52 = vpop.permute.xlu1 %4430 }
 0xe78   : > { %4436 = vst.msk [vmem:[#allocation6 + $0x10] sm:$0xff] %vm2271_vm11, %v4431_v52 }
 0xe7b   : > { %v4433_v38 = vpop.permute.xlu0 %4432 }
 0xe7c   : > { %4437 = vst.msk [vmem:[#allocation6 + $0x18] sm:$0xff] %vm2271_vm11, %v4433_v38 }
 0xe7f   : > { %v4851_v58 = vld [vmem:[#allocation6 + $0x10] sm:$0xff] }
 0xe80   : > { %4855 = vrot.lane.b32.xlu1 %v4851_v58, %s6954_s3 }
 0xe83   : > { %v4852_v6 = vld [vmem:[#allocation6 + $0x18] sm:$0xff] }
 0xe84   : > { %4857 = vrot.lane.b32.xlu1 %v4852_v6, %s6954_s3  ;;  %v4483_v16 = vpack.c.bf16 %v4852_v6, %v4851_v58  ;;  %v9664_v58 = vld [vmem:[#allocation49_spill] sm:$0xff] }
 0xe85   : > { %v4624_v6 = vunpack.c.l.bf16 %v9664_v58 }
 0xe86   : > { %5785 = vmatmul.mubr.msk.bf16.gmra.mxu1 %vm1632_vm1, %v4483_v16 }
 0xe87   : > { %4575 = vmatprep.mubr.bf16.mxu1 %v9602_v7 }
 0xe88   : > { %4827 = vperm.xlu1 %6207, %v4822_v0  }
 0xe8e   : > { %5786 = vmatmul.mubr.msk.bf16.vlgmr.msra.gmra.mxu1 %vm1632_vm1, %v4482_v15  ;;  %v4620_v15 = vunpack.c.l.bf16 %v9663_v12 }
 0xe8f   : > { %4585 = vmatprep.mubr.bf16.mxu1 %v9602_v7  ;;  %4928 = vmatpush1.bf16.msra.mxu1 %v8814_v42  ;;  %v9661_v42 = vld [vmem:[#allocation18_spill] sm:$0xff] }
 0xe90   : > { %4929 = vmatprep.subr.bf16.mxu1 %v8818_v20  ;;  %v4600_v20 = vunpack.c.l.bf16 %v9661_v42 }
 0xe93   : > { %4930 = vmatpush1.bf16.msra.mxu1 %v8822_v19 }
 0xe94   : > { %4931 = vmatprep.subr.bf16.mxu1 %v8826_v31  ;;  %v4601_v31 = vunpack.c.h.bf16 %v9661_v42 }
 0xe96   : > { %5787 = vmatmul.mubr.msk.bf16.gmra.mxu1 %vm1632_vm1, %v4483_v16 }
 0xe97   : > { %4932 = vmatpush1.bf16.msra.mxu1 %v8831_v26  ;;  %4951 = vmatprep.mubr.bf16.mxu1 %v9602_v7 }
 0xe98   : > { %4933 = vmatprep.subr.bf16.mxu1 %v8836_v48 }
 0xe9b   : > { %4934 = vmatpush1.bf16.msra.mxu1 %v8840_v24 }
 0xe9c   : > { %4980 = vmatprep.subr.bf16.mxu1 %v8844_v55 }
 0xec7   : > { %v4524_v49 = vpop.f32.mrf.mxu1 }
 0xec8   : > { %v4608_v19 = vadd.f32 %v4600_v20, %v4524_v49  ;;  %v4625_v20 = vunpack.c.h.bf16 %v9664_v58  ;;  %v9667_v58 = vld [vmem:[#allocation58_spill] sm:$0xff] }
 0xec9   : > { %v4526_v57 = vpop.f32.mrf.mxu1 }
 0xeca   : > { %v4609_v53 = vadd.f32 %v4601_v31, %v4526_v57  ;;  %v5788_v8 = vmul.f32 -1.442695, %v4608_v19 }
 0xecb   : > { %v4528_v62 = vpop.f32.mrf.mxu1 }
 0xecc   : > { %v4612_v48 = vadd.f32 %v4604_v54, %v4528_v62  ;;  %v5790_v46 = vmul.f32 -1.442695, %v4609_v53  ;;  %6658 = vpow2.f32 %v5788_v8 }
 0xecd   : > { %v4530_v26 = vpop.f32.mrf.mxu1 }
 0xece   : > { %v4613_v24 = vadd.f32 %v4605_v43, %v4530_v26  ;;  %v5789_v55 = vmul.f32 -1.442695, %v4612_v48  ;;  %6660 = vpow2.f32 %v5790_v46  ;;  %v9665_v26 = vld [vmem:[#allocation36_spill] sm:$0xff] }
 0xecf   : > { %v4602_v8 = vunpack.c.l.bf16 %v9665_v26  ;;  %v4603_v48 = vunpack.c.h.bf16 %v9665_v26 }
 0xed0   : > { %v5791_v34 = vmul.f32 -1.442695, %v4613_v24  ;;  %6662 = vpow2.f32 %v5789_v55 }
 0xed2   : > { %6664 = vpow2.f32 %v5791_v34 }
 0xed9   : > { %v6659_v23 = vpop.eup %6658 }
 0xeda   : > { %v4646_v16 = vadd.f32 1.0, %v6659_v23 }
 0xedb   : > { %v6661_v0 = vpop.eup %6660 }
 0xedc   : > { %v4658_v19 = vadd.f32 1.0, %v6661_v0 }
 0xedd   : > { %v6663_v62 = vpop.eup %6662 }
 0xede   : > { %v4647_v46 = vadd.f32 1.0, %v6663_v62 }
 0xedf   : > { %v6665_v53 = vpop.eup %6664 }
 0xee0   : > { %v4659_v34 = vadd.f32 1.0, %v6665_v53 }
 0xf46   : > { %v4534_v47 = vpop.f32.mrf.mxu1 }
 0xf47   : > { %v4628_v33 = vadd.f32 %v4620_v15, %v4534_v47  ;;  %v9666_v47 = vld [vmem:[#allocation37_spill] sm:$0xff] }
 0xf48   : > { %v4536_v11 = vpop.f32.mrf.mxu1  ;;  %v4606_v23 = vunpack.c.l.bf16 %v9666_v47  ;;  %v4607_v0 = vunpack.c.h.bf16 %v9666_v47 }
 0xf49   : > { %v5796_v52 = vmul.f32 -1.442695, %v4628_v33  ;;  %v4629_v38 = vadd.f32 %v4621_v22, %v4536_v11 }
 0xf4a   : > { %v4538_v49 = vpop.f32.mrf.mxu1 }
 0xf4b   : > { %6666 = vpow2.f32 %v5796_v52  ;;  %v5798_v57 = vmul.f32 -1.442695, %v4629_v38  ;;  %v4632_v42 = vadd.f32 %v4624_v6, %v4538_v49  ;;  %v4622_v6 = vunpack.c.l.bf16 %v9667_v58 }
 0xf4c   : > { %v4540_v31 = vpop.f32.mrf.mxu1 }
 0xf4d   : > { %6668 = vpow2.f32 %v5798_v57  ;;  %v5797_v37 = vmul.f32 -1.442695, %v4632_v42  ;;  %v4633_v54 = vadd.f32 %v4625_v20, %v4540_v31  ;;  %v4623_v42 = vunpack.c.h.bf16 %v9667_v58 }
 0xf4e   : > { %6670 = vrcp.f32 %v4646_v16  ;;  %v4577_v43 = vpop.f32.mrf.mxu1 }
 0xf4f   : > { %6672 = vpow2.f32 %v5797_v37  ;;  %v5799_v24 = vmul.f32 -1.442695, %v4633_v54  ;;  %v4610_v55 = vadd.f32 %v4602_v8, %v4577_v43  ;;  %v9668_v54 = vld [vmem:[#allocation59_spill] sm:$0xff] }
 0xf50   : > { %6674 = vrcp.f32 %v4658_v19  ;;  %v4579_v12 = vpop.f32.mrf.mxu1  ;;  %v4626_v26 = vunpack.c.l.bf16 %v9668_v54 }
 0xf51   : > { %6676 = vpow2.f32 %v5799_v24  ;;  %v4611_v15 = vadd.f32 %v4603_v48, %v4579_v12 }
 0xf52   : > { %6678 = vtanh.f32 %v4610_v55  ;;  %v4581_v33 = vpop.f32.mrf.mxu1 }
 0xf53   : > { %6680 = vrcp.f32 %v4647_v46  ;;  %v5792_v22 = vmul.f32 -1.442695, %v4611_v15  ;;  %v4614_v11 = vadd.f32 %v4606_v23, %v4581_v33  ;;  %v4627_v46 = vunpack.c.h.bf16 %v9668_v54 }
 0xf54   : > { %6682 = vrcp.f32 %v4659_v34  ;;  %v4583_v52 = vpop.f32.mrf.mxu1 }
 0xf55   : > { %6684 = vpow2.f32 %v5792_v22  ;;  %v4615_v38 = vadd.f32 %v4607_v0, %v4583_v52  ;;  %v9669_v22 = vclamps-f32 %v8871_v39, 3.0  ;;  %v9670_v39 = vclamps-f32 %v8884_v60, 3.0 }
 0xf56   : > { %6686 = vtanh.f32 %v4614_v11  ;;  %v4587_v16 = vpop.f32.mrf.mxu1 }
 0xf57   : > { %v5793_v49 = vmul.f32 -1.442695, %v4615_v38  ;;  %v4630_v57 = vadd.f32 %v4622_v6, %v4587_v16  ;;  %v9083_v11 = vsel %vm4392_vm12, %v9669_v22, %v8868_v2  ;;  %v9093_v2 = vsel %vm4393_vm13, %v9670_v39, %v8878_v32 }
 0xf58   : > { %v6667_v20 = vpop.eup %6666  ;;  %v4589_v62 = vpop.f32.mrf.mxu1 }
 0xf59   : > { %v4698_v19 = vadd.f32 1.0, %v6667_v20  ;;  %6688 = vpow2.f32 %v5793_v49  ;;  %v4631_v31 = vadd.f32 %v4623_v42, %v4589_v62 }
 0xf5a   : > { %v6669_v53 = vpop.eup %6668  ;;  %6690 = vtanh.f32 %v4630_v57  ;;  %v4591_v37 = vpop.f32.mrf.mxu1 }
 0xf5b   : > { %v6671_v8 = vpop.eup %6670  ;;  %6692 = vrcp.f32 %v4698_v19  ;;  %v4710_v43 = vadd.f32 1.0, %v6669_v53  ;;  %v5800_v48 = vmul.f32 -1.442695, %v4631_v31  ;;  %v4634_v55 = vadd.f32 %v4626_v26, %v4591_v37 }
 0xf5c   : > { %v6673_v24 = vpop.eup %6672  ;;  %v4593_v34 = vpop.f32.mrf.mxu1 }
 0xf5d   : > { %v6675_v12 = vpop.eup %6674  ;;  %6694 = vrcp.f32 %v4710_v43  ;;  %v4699_v15 = vadd.f32 1.0, %v6673_v24  ;;  %v4635_v47 = vadd.f32 %v4627_v46, %v4593_v34 }
 0xf5e   : > { %v6677_v23 = vpop.eup %6676  ;;  %6696 = vpow2.f32 %v5800_v48  ;;  %v4680_v6 = vmul.f32 %v6675_v12, %v9083_v11 }
 0xf5f   : > { %v6679_v33 = vpop.eup %6678  ;;  %6698 = vrcp.f32 %v4699_v15  ;;  %v4711_v0 = vadd.f32 1.0, %v6677_v23  ;;  %v5801_v52 = vmul.f32 -1.442695, %v4635_v47 }
 0xf60   : > { %v6681_v38 = vpop.eup %6680  ;;  %6700 = vtanh.f32 %v4634_v55  ;;  %v4678_v58 = vmul.f32 %v6679_v33, %v6671_v8  ;;  %v9105_v55 = vpop.permute.xlu1 %4836 }
 0xf61   : > { %v6683_v16 = vpop.eup %6682  ;;  %6702 = vrcp.f32 %v4711_v0  ;;  %vm4841_vm0 = vcmp.eq.s32.totalorder %v9105_v55, 1  ;;  %v9109_v0 = vpop.permute.xlu0 %4839 }
 0xf62   : > { %v6685_v49 = vpop.eup %6684  ;;  %6704 = vpow2.f32 %v5801_v52  ;;  %v9086_v57 = vadd.f32 %v4680_v6, %v4678_v58  ;;  %v4681_v19 = vmul.f32 %v6683_v16, %v9093_v2  ;;  %vm4842_vm3 = vcmp.eq.s32.totalorder %v9109_v0, 1  ;;  %v6884_v0 = vld [vmem:[%s7076_s11 + $0x48] ss:$16 sps:$4 sm:$0xff]  }
 0xf63   : > { %v6687_v42 = vpop.eup %6686  ;;  %v4672_v5 = vadd.f32 1.0, %v6685_v49 }
 0xf64   : > { %v5794_v20 = vclamps-f32 %v9086_v57, 3.0  ;;  %v4679_v62 = vmul.f32 %v6687_v42, %v6681_v38 }
 0xf65   : > { %6706 = vrcp.f32 %v4672_v5 }
 0xf66   : > { %v6689_v31 = vpop.eup %6688  ;;  %6708 = vtanh.f32 %v5794_v20  ;;  %v9099_v53 = vadd.f32 %v4681_v19, %v4679_v62 }
 0xf67   : > { %v6691_v37 = vpop.eup %6690  ;;  %v4673_v54 = vadd.f32 1.0, %v6689_v31 }
 0xf68   : > { %v6693_v60 = vpop.eup %6692  ;;  %v5795_v9 = vclamps-f32 %v9099_v53, 3.0 }
 0xf69   : > { %6710 = vrcp.f32 %v4673_v54  ;;  %v4730_v32 = vmul.f32 %v6693_v60, %v6691_v37 }
 0xf6a   : > { %v6695_v26 = vpop.eup %6694  ;;  %6712 = vtanh.f32 %v5795_v9 }
 0xf6b   : > { %v6697_v8 = vpop.eup %6696  ;;  %v4732_v43 = vmul.f32 %v6695_v26, %v8899_v21 }
 0xf6c   : > { %v6699_v48 = vpop.eup %6698  ;;  %v4724_v46 = vadd.f32 1.0, %v6697_v8 }
 0xf6d   : > { %v6701_v24 = vpop.eup %6700  ;;  %v4734_v34 = vadd.f32 %v4732_v43, %v4730_v32 }
 0xf6e   : > { %v6703_v12 = vpop.eup %6702  ;;  %v4731_v15 = vmul.f32 %v6701_v24, %v6699_v48  ;;  %6714 = vrcp.f32 %v4724_v46 }
 0xf6f   : > { %v6705_v47 = vpop.eup %6704  ;;  %v5802_v23 = vclamps-f32 %v4734_v34, 3.0  ;;  %v4733_v33 = vmul.f32 %v6703_v12, %v8905_v45  ;;  %v4885_v12 = vld [vmem:[#allocation3 + $0x60] sm:$0xff] }
 0xf70   : > { %v4725_v22 = vadd.f32 1.0, %v6705_v47 }
 0xf71   : > { %6716 = vtanh.f32 %v5802_v23  ;;  %v4735_v52 = vadd.f32 %v4733_v33, %v4731_v15  ;;  %v9114_v38 = vsel %vm4841_vm0, %v5802_v23, %v8899_v21  ;;  %v5246_v23 = vld [vmem:[%s9448_s2 + $0x70] sm:$0xff] }
 0xf72   : > { %v6707_v58 = vpop.eup %6706  ;;  %6718 = vrcp.f32 %v4725_v22  ;;  %vm5248_vm6 = vcmp.gt.f32.partialorder %v5246_v23, 0.5  ;;  %v9682_v23 = vld [vmem:[#allocation48_spill] sm:$0xff] }
 0xf73   : > { %v6709_v6 = vpop.eup %6708  ;;  %v5803_v16 = vclamps-f32 %v4735_v52, 3.0  ;;  %v4886_v52 = vld [vmem:[#allocation3 + $0x68] sm:$0xff] }
 0xf74   : > { %v4690_v49 = vmul.f32 %v6709_v6, %v6707_v58 }
 0xf75   : > { %6720 = vtanh.f32 %v5803_v16  ;;  %v9120_v42 = vsel %vm4842_vm3, %v5803_v16, %v8905_v45 }
 0xf76   : > { %v6711_v39 = vpop.eup %6710 }
 0xf77   : > { %v6713_v5 = vpop.eup %6712 }
 0xf78   : > { %v4691_v62 = vmul.f32 %v6713_v5, %v6711_v39 }
 0xf7a   : > { %v4756_v19 = vpack.c.bf16 %v4691_v62, %v4690_v49  ;;  %v5247_v62 = vld [vmem:[%s9448_s2 + $0x78] sm:$0xff] }
 0xf7b   : > { %v6715_v21 = vpop.eup %6714  ;;  %vm5249_vm7 = vcmp.gt.f32.partialorder %v5247_v62, 0.5 }
 0xf7c   : > { %4793 = vmatmul.mubr.bf16.vlgmr.msra.gmra.mxu0 %v4756_v19 }
 0xf7d   : > { %6103 = vmatpush3.bf16.msra.mxu0 %v8908_v41  ;;  %v4856_v41 = vpop.permute.xlu1 %4855 }
 0xf7e   : > { %v6717_v31 = vpop.eup %6716  ;;  %6104 = vmatprep.subr.bf16.mxu0 %v8912_v40 }
 0xf7f   : > { %v4742_v37 = vmul.f32 %v6717_v31, %v6715_v21  ;;  %v6719_v54 = vpop.eup %6718  ;;  %v4888_v31 = vmul.f32 %v4886_v52, %v7825_v28 }
 0xf81   : > { %6105 = vmatpush3.bf16.msra.mxu0 %v8916_v29  ;;  %v4877_v29 = vld [vmem:[#allocation2 + $0x60] sm:$0xff] }
 0xf82   : > { %v6721_v60 = vpop.eup %6720  ;;  %6106 = vmatprep.subr.bf16.mxu0 %v8920_v17 }
 0xf83   : > { %v4743_v45 = vmul.f32 %v6721_v60, %v6719_v54 }
 0xf85   : > { %v4759_v32 = vpack.c.bf16 %v4743_v45, %v4742_v37  ;;  %6107 = vmatpush3.bf16.msra.mxu0 %v8924_v1  ;;  %v4858_v1 = vpop.permute.xlu1 %4857  ;;  %v5250_v37 = vsel %vm5248_vm6, 1, %v9602_v7  ;;  %v6882_v45 = vld [vmem:[%s7076_s11 + $0x68] ss:$16 sps:$4 sm:$0xff]  }
 0xf86   : > { %6108 = vmatprep.subr.bf16.mxu0 %v8928_v50  ;;  %v9139_v50 = vpop.permute.xlu0 %4824 }
 0xf87   : > { %4800 = vmatprep.mubr.bf16.mxu0 %v4759_v32  ;;  %vm4829_vm4 = vcmp.eq.s32.totalorder %v9139_v50, 1 }
 0xf88   : > { %4801 = vmatmul.mubr.bf16.gmra.mxu0 %v9600_v25 }
 0xf89   : > { %6109 = vmatpush3.bf16.msra.mxu0 %v8933_v27  ;;  %5221 = vmatprep.mubr.bf16.mxu0 %v9600_v25 }
 0xf8a   : > { %6110 = vmatprep.subr.bf16.mxu0 %v8938_v51  ;;  %v4879_v51 = vmul.f32 %v4877_v29, %v7825_v28  ;;  %v6885_v29 = vld [vmem:[%s7076_s11 + $0x2c] ss:$16 sps:$4 sm:$0xff]  }
 0xf8d   : > { %6111 = vmatpush3.bf16.msra.mxu0 %v8942_v36 }
 0xf8e   : > { %6112 = vmatprep.subr.bf16.mxu0 %v8946_v44 }
 0xf91   : > { %6113 = vmatpush3.bf16.msra.mxu0 %v8950_v4  ;;  %v4878_v4 = vld [vmem:[#allocation2 + $0x68] sm:$0xff] }
 0xf92   : > { %6114 = vmatprep.subr.bf16.mxu0 %v8954_v59  ;;  %v4880_v43 = vmul.f32 %v4878_v4, %v7825_v28  ;;  %v9675_v4 = vld [vmem:[#allocation66_spill] sm:$0xff] }
 0xf95   : > { %6115 = vmatpush3.bf16.msra.mxu0 %v8958_v30  ;;  %v9143_v30 = vpop.permute.xlu1 %4827 }
 0xf96   : > { %6116 = vmatprep.subr.bf16.mxu0 %v8962_v18  ;;  %vm4830_vm5 = vcmp.eq.s32.totalorder %v9143_v30, 1 }
 0xf99   : > { %6117 = vmatpush3.bf16.msra.mxu0 %v8966_v13 }
0x103c   : > { %v6090_v40 = vpop.f32.mrf.mxu0 }
0x103e   : > { %v6091_v17 = vpop.f32.mrf.mxu0 }
0x103f   : > { %v6092_v27 = vadd.f32 %v6091_v17, %v6090_v40  ;;  %v6883_v40 = vld [vmem:[%s7076_s11 + $0x4c] ss:$16 sps:$4 sm:$0xff]   ;;  %v6886_v17 = vld [vmem:[%s7076_s11 + $0x28] ss:$16 sps:$4 sm:$0xff]  }
0x1040   : > { %v6093_v36 = vpop.f32.mrf.mxu0 }
0x1041   : > { %v5804_v44 = vclamps-f32 %v6092_v27, 3.0  ;;  %v6888_v27 = vld [vmem:[%s7076_s11 + $0x8] ss:$16 sps:$4 sm:$0xff]  }
0x1042   : > { %v6094_v59 = vpop.f32.mrf.mxu0 }
0x1043   : > { %v4849_v18 = vsel %vm4829_vm4, %v5804_v44, %v9006_v10  ;;  %v4875_v13 = vsel %vm4829_vm4, %v5804_v44, 0.0  ;;  %v6095_v26 = vadd.f32 %v6094_v59, %v6093_v36  ;;  %v9672_v36 = vld [vmem:[#allocation67_spill] sm:$0xff]  ;;  %v9673_v44 = vld [vmem:[#allocation69_spill] sm:$0xff] }
0x1044   : > { %4863 = vst.msk [vmem:[#allocation6] sm:$0xff] %vm589_vm2, %v4849_v18  ;;  %v9151_v8 = vadd.f32 %v4879_v51, %v4875_v13  ;;  %v9671_v51 = vld [vmem:[#allocation62_spill] sm:$0xff] }
0x1045   : > { %v5805_v48 = vclamps-f32 %v6095_v26, 3.0 }
0x1046   : > { %4891 = vst.msk [vmem:[#allocation2 + $0x60] sm:$0xff] %vm589_vm2, %v9151_v8 }
0x1047   : > { %v4850_v10 = vsel %vm4830_vm5, %v5805_v48, %v9008_v35  ;;  %v4876_v46 = vsel %vm4830_vm5, %v5805_v48, 0.0  ;;  %v4887_v35 = vmul.f32 %v4885_v12, %v7825_v28  ;;  %v9678_v48 = vld [vmem:[#allocation38_spill] sm:$0xff] }
0x1048   : > { %4864 = vst.msk [vmem:[#allocation6 + $0x8] sm:$0xff] %vm589_vm2, %v4850_v10  ;;  %v9163_v24 = vadd.f32 %v4880_v43, %v4876_v46  ;;  %v6096_v34 = vpop.f32.mrf.mxu0  ;;  %v9677_v43 = vld [vmem:[#allocation63_spill] sm:$0xff]  ;;  %v9679_v46 = vld [vmem:[#allocation68_spill] sm:$0xff]  ;;  %v9680_v12 = vld [vmem:[#allocation70_spill] sm:$0xff] }
0x104a   : > { %4892 = vst.msk [vmem:[#allocation2 + $0x68] sm:$0xff] %vm589_vm2, %v9163_v24  ;;  %v6097_v15 = vpop.f32.mrf.mxu0 }
0x104b   : > { %v6098_v47 = vadd.f32 %v6097_v15, %v6096_v34  ;;  %v9175_v39 = vld [vmem:[#allocation6] sm:$0xff] }
0x104c   : > { %v6099_v33 = vpop.f32.mrf.mxu0 }
0x104d   : > { %v5806_v22 = vclamps-f32 %v6098_v47, 3.0 }
0x104e   : > { %v6100_v58 = vpop.f32.mrf.mxu0 }
0x104f   : > { %v4883_v6 = vsel %vm4841_vm0, %v5806_v22, 0.0  ;;  %v6101_v16 = vadd.f32 %v6100_v58, %v6099_v33  ;;  %v4861_v49 = vsel %vm4841_vm0, %v5806_v22, %v4856_v41  ;;  %v9177_v5 = vld [vmem:[#allocation6 + $0x8] sm:$0xff]  ;;  %v5251_v41 = vsel %vm5249_vm7, 1, %v9602_v7  ;;  %v9684_v58 = vld [vmem:[#allocation64_spill] sm:$0xff] }
0x1050   : > { %4867 = vrot.lane.b32.xlu1 %v4861_v49, %s6956_s17  ;;  %v4911_v19 = vpack.c.bf16 %v9177_v5, %v9175_v39  ;;  %v4889_v21 = vadd.f32 %v4887_v35, %v4883_v6  ;;  %v9683_v35 = vld [vmem:[#allocation22_spill] sm:$0xff]  ;;  %v9685_v6 = vld [vmem:[#allocation40_spill] sm:$0xff] }
0x1051   : > { %v5807_v55 = vclamps-f32 %v6101_v16, 3.0 }
0x1052   : > { %5808 = vmatmul.mubr.msk.bf16.vlgmr.msra.gmra.mxu1 %vm1632_vm1, %v4911_v19  ;;  %4893 = vst.msk [vmem:[#allocation3 + $0x60] sm:$0xff] %vm589_vm2, %v4889_v21 }
0x1053   : > { %v4884_v54 = vsel %vm4842_vm3, %v5807_v55, 0.0  ;;  %v4862_v60 = vsel %vm4842_vm3, %v5807_v55, %v4858_v1  ;;  %4981 = vmatpush1.bf16.msra.mxu1 %v6882_v45  ;;  %4961 = vmatprep.mubr.bf16.mxu1 %v9602_v7  ;;  %v6887_v1 = vld [vmem:[%s7076_s11 + $0xc] ss:$16 sps:$4 sm:$0xff]   ;;  %s5905_s11 = sshll.u32 %s7031_s13, 10  ;;  %s9695_s13 = sand.u32 1, %s6941_s10  }
0x1054   : > { %5253 = vperm.xlu1 %6207, %v5250_v37   ;;  %4869 = vrot.lane.b32.xlu0 %v4862_v60, %s6956_s17  ;;  %v9196_v32 = vadd.f32 %v4888_v31, %v4884_v54  ;;  %v9687_v45 = vld [vmem:[#allocation21_spill] sm:$0xff]  ;;  %s9395_s26 = scalar_lea.hbm %s9455_s9, %s5905_s11  ;;  %s9404_s29 = scalar_lea.sflag [#allocation10], %s9695_s13 }
0x1055   : > { %4982 = vmatprep.subr.bf16.mxu1 %v6883_v40 }
0x1056   : > { %4894 = vst.msk [vmem:[#allocation3 + $0x68] sm:$0xff] %vm589_vm2, %v9196_v32 }
0x1057   : > { %4983 = vmatpush1.bf16.msra.mxu1 %v6884_v0 }
0x1058   : > { %5256 = vperm.xlu0 %6206, %v5251_v41   ;;  %6208 = vset.pattern.permute.xlu1 %v9604_v63 }
0x1059   : > { %5265 = vperm.xlu1 %6208, %v5250_v37   ;;  %4984 = vmatprep.subr.bf16.mxu1 %v6885_v29 }
0x105b   : > { %4985 = vmatpush1.bf16.msra.mxu1 %v6886_v17 }
0x105c   : > { %6209 = vset.pattern.permute.xlu0 %v9604_v63  ;;  %4986 = vmatprep.subr.bf16.mxu1 %v6887_v1  ;;  %v9674_v63 = vld [vmem:[#allocation25_spill] sm:$0xff] }
0x105d   : > { %5268 = vperm.xlu0 %6209, %v5251_v41  }
0x105f   : > { %4987 = vmatpush1.bf16.msra.mxu1 %v6888_v27 }
0x1061   : > { %2299 = vrot.lane.b32.xlu0 %v9671_v51, %s6954_s3 }
0x1065   : > { %3167 = vrot.lane.b32.xlu0 %v8308_v56, %s6954_s3  ;;  %v9676_v56 = vld [vmem:[#allocation23_spill] sm:$0xff] }
0x1069   : > { %2727 = vrot.lane.b32.xlu0 %v9672_v36, %s6957_s27  ;;  %v4831_v36 = vsel %vm4829_vm4, %v5794_v20, %v9083_v11 }
0x106d   : > { %2738 = vrot.lane.b32.xlu0 %v9673_v44, %s6956_s17 }
0x1071   : > { %3594 = vrot.lane.b32.xlu0 %v9674_v63, %s6957_s27 }
0x1075   : > { %3604 = vrot.lane.b32.xlu0 %v8576_v3, %s6956_s17 }
0x1079   : > { %4033 = vrot.lane.b32.xlu0 %v9675_v4, %s6954_s3 }
0x107d   : > { %4899 = vrot.lane.b32.xlu0 %v4889_v21, %s6954_s3  ;;  %v9686_v21 = vld [vmem:[#allocation20_spill] sm:$0xff] }
0x107e   : > { %v5030_v31 = vunpack.c.h.bf16 %v9686_v21 }
0x1081   : > { %4460 = vrot.lane.b32.xlu0 %v9676_v56, %s6957_s27  ;;  %v4832_v56 = vsel %vm4830_vm5, %v5795_v9, %v9093_v2 }
0x1085   : > { %4470 = vrot.lane.b32.xlu0 %v9013_v61, %s6956_s17 }
0x10c2   : > { %v4868_v59 = vpop.permute.xlu1 %4867 }
0x10c3   : > { %4873 = vst.msk [vmem:[#allocation6 + $0x10] sm:$0xff] %vm2271_vm11, %v4868_v59 }
0x10c6   : > { %v4870_v18 = vpop.permute.xlu0 %4869 }
0x10c7   : > { %4874 = vst.msk [vmem:[#allocation6 + $0x18] sm:$0xff] %vm2271_vm11, %v4870_v18  ;;  %v9688_v18 = vld [vmem:[#allocation65_spill] sm:$0xff] }
0x10ca   : > { %v5280_v13 = vld [vmem:[#allocation6 + $0x10] sm:$0xff] }
0x10cb   : > { %5284 = vrot.lane.b32.xlu1 %v5280_v13, %s6954_s3 }
0x10ce   : > { %v5281_v3 = vld [vmem:[#allocation6 + $0x18] sm:$0xff] }
0x10cf   : > { %5286 = vrot.lane.b32.xlu1 %v5281_v3, %s6954_s3  ;;  %v4912_v26 = vpack.c.bf16 %v5281_v3, %v5280_v13  ;;  %v9289_v27 = vpop.permute.xlu1 %5253 }
0x10d1   : > { %5809 = vmatmul.mubr.msk.bf16.gmra.mxu1 %vm1632_vm1, %v4912_v26 }
0x10d2   : > { %5004 = vmatprep.mubr.bf16.mxu1 %v9602_v7 }
0x10d3   : > { %v9234_v61 = vpop.permute.xlu0 %5256  ;;  %2301 = vrot.lane.b32.xlu1 %v9677_v43, %s6954_s3 }
0x10d4   : > { %v9296_v44 = vpop.permute.xlu1 %5265  ;;  %vm5259_vm10 = vcmp.eq.s32.totalorder %v9234_v61, 1 }
0x10d5   : > { %vm5270_vm12 = vcmp.eq.s32.totalorder %v9296_v44, 1 }
0x10d7   : > { %3169 = vrot.lane.b32.xlu1 %v9678_v48, %s6954_s3 }
0x10d8   : > { %v9240_v10 = vpop.permute.xlu0 %5268 }
0x10d9   : > { %5810 = vmatmul.mubr.msk.bf16.vlgmr.msra.gmra.mxu1 %vm1632_vm1, %v4911_v19  ;;  %vm5271_vm13 = vcmp.eq.s32.totalorder %v9240_v10, 1 }
0x10da   : > { %5014 = vmatprep.mubr.bf16.mxu1 %v9602_v7  ;;  %v9681_v7 = vld [vmem:[#allocation27_spill] sm:$0xff] }
0x10db   : > { %2729 = vrot.lane.b32.xlu1 %v9679_v46, %s6957_s27  ;;  %v5033_v46 = vunpack.c.l.bf16 %v9687_v45 }
0x10dc   : > { %v2300_v34 = vpop.permute.xlu0 %2299 }
0x10dd   : > { %2306 = vst.msk [vmem:[%s7093_s14 + $0x18] sm:$0xff] %vm2305_vm8, %v2300_v34 }
0x10df   : > { %2740 = vrot.lane.b32.xlu1 %v9680_v12, %s6956_s17 }
0x10e0   : > { %v3168_v15 = vpop.permute.xlu0 %3167 }
0x10e1   : > { %3173 = vst.msk [vmem:[%s7093_s14 + $0x10] sm:$0xff] %vm2305_vm8, %v3168_v15  ;;  %5811 = vmatmul.mubr.msk.bf16.gmra.mxu1 %vm1632_vm1, %v4912_v26  ;;  %vm5258_vm1 = vcmp.eq.s32.totalorder %v9289_v27, 1 }
0x10e3   : > { %3596 = vrot.lane.b32.xlu1 %v9681_v7, %s6957_s27  ;;  %v9689_v7 = vld [vmem:[#allocation50_spill] sm:$0xff] }
0x10e4   : > { %v2728_v47 = vpop.permute.xlu0 %2727 }
0x10e5   : > { %2734 = vst.msk [vmem:[%s7093_s14] sm:$0xff] %vm2733_vm9, %v2728_v47  ;;  %v5049_v47 = vunpack.c.l.bf16 %v9689_v7 }
0x10e7   : > { %3606 = vrot.lane.b32.xlu1 %v9682_v23, %s6956_s17 }
0x10e8   : > { %v2739_v33 = vpop.permute.xlu0 %2738 }
0x10e9   : > { %2744 = vst.msk [vmem:[%s7093_s14 + $0x18] sm:$0xff] %vm2271_vm11, %v2739_v33 }
0x10ea   : > { %4895 = vst.msk [vmem:[%s7093_s14 + $0x18] sm:$0xff] %vm589_vm2, %v9151_v8 }
0x10eb   : > { %4035 = vrot.lane.b32.xlu1 %v9683_v35, %s6954_s3  ;;  %v5050_v35 = vunpack.c.h.bf16 %v9689_v7 }
0x10ec   : > { %v3595_v22 = vpop.permute.xlu0 %3594 }
0x10ed   : > { %3600 = vst.msk [vmem:[%s7093_s14 + $0x8] sm:$0xff] %vm2733_vm9, %v3595_v22 }
0x10ef   : > { %4901 = vrot.lane.b32.xlu1 %v9196_v32, %s6954_s3  ;;  %v5034_v32 = vunpack.c.h.bf16 %v9687_v45  ;;  %v9691_v45 = vld [vmem:[#allocation39_spill] sm:$0xff]  ;;  %s5358_s3 = sshll.u32 %s7093_s14, 4  ;;  %s9397_s3 = int_to_ptr.vmem [resolvable:$true] %s5358_s3 }
0x10f0   : > { %v3605_v52 = vpop.permute.xlu0 %3604  ;;  %s6889_s18 = scalar_lea.vmem %s9397_s3, 1024  ;;  %p6896_p2 = scmp.lt.s32.totalorder %s9397_s3, %s6894_s24 }
0x10f1   : > { %3610 = vst.msk [vmem:[%s7093_s14 + $0x10] sm:$0xff] %vm2271_vm11, %v3605_v52  ;;  %p6890_p13 = scmp.ne.s32.totalorder %s9397_s3, %s6889_s18  ;;  %p6897_p3 = scmp.lt.s32.totalorder %s6895_s20, %s6889_s18 }
0x10f2   : > { %4029 = vst.msk [vmem:[%s7093_s14 + $0x10] sm:$0xff] %vm589_vm2, %v9684_v58 }
0x10f3   : > { %4462 = vrot.lane.b32.xlu1 %v9685_v6, %s6957_s27  ;;  %p6891_p0 = pnand %p6890_p13, %p7048_p5  ;;  %p6898_p4 = por %p6897_p3, %p6896_p2 }
0x10f4   : > { %v4034_v8 = vpop.permute.xlu0 %4033 }
0x10f5   : > { %4039 = vst.msk [vmem:[%s7093_s14 + $0x8] sm:$0xff] %vm2305_vm8, %v4034_v8  ;;  %v9690_v8 = vld [vmem:[#allocation52_spill] sm:$0xff]  ;;  %p6892_p1 = pneg %p6891_p0 }
0x10f7   : > { %4472 = vrot.lane.b32.xlu1 %v9027_v14, %s6956_s17  ;;  %p6899_p7 = pnand %p6898_p4, %p6892_p1 }
0x10f8   : > { %v4900_v16 = vpop.permute.xlu0 %4899 }
0x10f9   : > { %4905 = vst.msk [vmem:[%s7093_s14] sm:$0xff] %vm2305_vm8, %v4900_v16  ;;  %v5053_v16 = vunpack.c.l.bf16 %v9690_v8 }
0x10fc   : > { %v4461_v49 = vpop.permute.xlu0 %4460 }
0x10fd   : > { %4466 = vst.msk [vmem:[%s7093_s14 + $0x10] sm:$0xff] %vm2733_vm9, %v4461_v49 }
0x1100   : > { %v4471_v62 = vpop.permute.xlu0 %4470 }
0x1101   : > { %4476 = vst.msk [vmem:[%s7093_s14 + $0x8] sm:$0xff] %vm2271_vm11, %v4471_v62 }
0x1112   : > { %v4953_v19 = vpop.f32.mrf.mxu1 }
0x1114   : > { %v4955_v55 = vpop.f32.mrf.mxu1 }
0x1115   : > { %v5038_v37 = vadd.f32 %v5030_v31, %v4955_v55 }
0x1116   : > { %v4957_v54 = vpop.f32.mrf.mxu1 }
0x1117   : > { %v5814_v60 = vmul.f32 -1.442695, %v5038_v37  ;;  %v5041_v12 = vadd.f32 %v5033_v46, %v4957_v54 }
0x1118   : > { %v4959_v41 = vpop.f32.mrf.mxu1 }
0x1119   : > { %6722 = vpow2.f32 %v5814_v60  ;;  %v5042_v14 = vadd.f32 %v5034_v32, %v4959_v41  ;;  %v5813_v15 = vmul.f32 -1.442695, %v5041_v12  ;;  %v5031_v32 = vunpack.c.l.bf16 %v9691_v45 }
0x111b   : > { %v5815_v40 = vmul.f32 -1.442695, %v5042_v14 }
0x111d   : > { %6724 = vpow2.f32 %v5815_v40 }
0x1126   : > { %v6723_v0 = vpop.eup %6722 }
0x1127   : > { %v5087_v29 = vadd.f32 1.0, %v6723_v0  ;;  %v5032_v0 = vunpack.c.h.bf16 %v9691_v45 }
0x1129   : > { %6726 = vrcp.f32 %v5087_v29 }
0x112a   : > { %v6725_v17 = vpop.eup %6724 }
0x112b   : > { %v5088_v1 = vadd.f32 1.0, %v6725_v17 }
0x112d   : > { %6728 = vrcp.f32 %v5088_v1 }
0x1136   : > { %v6727_v51 = vpop.eup %6726 }
0x1137   : > { %v9298_v63 = vmul.f32 %v6727_v51, %v4831_v36  ;;  %v9692_v51 = vld [vmem:[#allocation41_spill] sm:$0xff] }
0x1138   : > { %v5035_v36 = vunpack.c.l.bf16 %v9692_v51 }
0x113a   : > { %v6729_v4 = vpop.eup %6728 }
0x113b   : > { %v9305_v59 = vmul.f32 %v6729_v4, %v4832_v56 }
0x113d   : > { %v9307_v57 = vpop.permute.xlu1 %5284 }
0x1141   : > { %v9309_v11 = vpop.permute.xlu1 %5286 }
0x1145   : > { %v2302_v20 = vpop.permute.xlu1 %2301 }
0x1146   : > { %2307 = vst.msk [vmem:[%s7093_s14 + $0x38] sm:$0xff] %vm2305_vm8, %v2302_v20 }
0x1149   : > { %v3170_v50 = vpop.permute.xlu1 %3169 }
0x114a   : > { %3174 = vst.msk [vmem:[%s7093_s14 + $0x30] sm:$0xff] %vm2305_vm8, %v3170_v50  ;;  %v5036_v50 = vunpack.c.h.bf16 %v9692_v51 }
0x114d   : > { %v2730_v53 = vpop.permute.xlu1 %2729 }
0x114e   : > { %2735 = vst.msk [vmem:[%s7093_s14 + $0x20] sm:$0xff] %vm2733_vm9, %v2730_v53 }
0x1151   : > { %v2741_v2 = vpop.permute.xlu1 %2740 }
0x1152   : > { %2745 = vst.msk [vmem:[%s7093_s14 + $0x38] sm:$0xff] %vm2271_vm11, %v2741_v2 }
0x1153   : > { %4896 = vst.msk [vmem:[%s7093_s14 + $0x38] sm:$0xff] %vm589_vm2, %v9163_v24  ;;  %v5029_v24 = vunpack.c.l.bf16 %v9686_v21  ;;  %v5054_v21 = vunpack.c.h.bf16 %v9690_v8 }
0x1155   : > { %v3597_v9 = vpop.permute.xlu1 %3596  ;;  %v5037_v48 = vadd.f32 %v5029_v24, %v4953_v19 }
0x1156   : > { %3601 = vst.msk [vmem:[%s7093_s14 + $0x28] sm:$0xff] %vm2733_vm9, %v3597_v9  ;;  %v9693_v9 = vld [vmem:[#allocation60_spill] sm:$0xff] }
0x1157   : > { %v5812_v34 = vmul.f32 -1.442695, %v5037_v48 }
0x1159   : > { %v3607_v30 = vpop.permute.xlu1 %3606  ;;  %6730 = vpow2.f32 %v5812_v34 }
0x115a   : > { %3611 = vst.msk [vmem:[%s7093_s14 + $0x30] sm:$0xff] %vm2271_vm11, %v3607_v30  ;;  %6732 = vpow2.f32 %v5813_v15  ;;  %v5051_v30 = vunpack.c.l.bf16 %v9693_v9  ;;  %v9694_v15 = vld [vmem:[#allocation61_spill] sm:$0xff] }
0x115b   : > { %4030 = vst.msk [vmem:[%s7093_s14 + $0x30] sm:$0xff] %vm589_vm2, %v9688_v18  ;;  %v5055_v7 = vunpack.c.l.bf16 %v9694_v15 }
0x115d   : > { %v4036_v13 = vpop.permute.xlu1 %4035 }
0x115e   : > { %4040 = vst.msk [vmem:[%s7093_s14 + $0x28] sm:$0xff] %vm2305_vm8, %v4036_v13 }
0x1161   : > { %v4902_v3 = vpop.permute.xlu1 %4901 }
0x1162   : > { %4906 = vst.msk [vmem:[%s7093_s14 + $0x20] sm:$0xff] %vm2305_vm8, %v4902_v3 }
0x1165   : > { %v4463_v26 = vpop.permute.xlu1 %4462 }
0x1166   : > { %4467 = vst.msk [vmem:[%s7093_s14 + $0x30] sm:$0xff] %vm2733_vm9, %v4463_v26  ;;  %v6731_v52 = vpop.eup %6730  ;;  %v5052_v26 = vunpack.c.h.bf16 %v9693_v9 }
0x1167   : > { %v5075_v31 = vadd.f32 1.0, %v6731_v52  ;;  %v6733_v37 = vpop.eup %6732 }
0x1168   : > { %v5076_v29 = vadd.f32 1.0, %v6733_v37 }
0x1169   : > { %v4473_v43 = vpop.permute.xlu1 %4472 }
0x116a   : > { %4477 = vst.msk [vmem:[%s7093_s14 + $0x28] sm:$0xff] %vm2271_vm11, %v4473_v43 }
0x1191   : > { %v4963_v23 = vpop.f32.mrf.mxu1 }
0x1192   : > { %v5057_v33 = vadd.f32 %v5049_v47, %v4963_v23 }
0x1193   : > { %v4965_v22 = vpop.f32.mrf.mxu1 }
0x1194   : > { %v5820_v58 = vmul.f32 -1.442695, %v5057_v33  ;;  %v5058_v6 = vadd.f32 %v5050_v35, %v4965_v22  ;;  %v5056_v33 = vunpack.c.h.bf16 %v9694_v15 }
0x1195   : > { %v4967_v49 = vpop.f32.mrf.mxu1 }
0x1196   : > { %6734 = vpow2.f32 %v5820_v58  ;;  %v5822_v62 = vmul.f32 -1.442695, %v5058_v6  ;;  %v5061_v19 = vadd.f32 %v5053_v16, %v4967_v49 }
0x1197   : > { %v4969_v55 = vpop.f32.mrf.mxu1 }
0x1198   : > { %6736 = vpow2.f32 %v5822_v62  ;;  %v5821_v54 = vmul.f32 -1.442695, %v5061_v19  ;;  %v5062_v60 = vadd.f32 %v5054_v21, %v4969_v55 }
0x1199   : > { %v5006_v41 = vpop.f32.mrf.mxu1 }
0x119a   : > { %6738 = vpow2.f32 %v5821_v54  ;;  %v5823_v14 = vmul.f32 -1.442695, %v5062_v60  ;;  %v5039_v40 = vadd.f32 %v5031_v32, %v5006_v41 }
0x119b   : > { %6740 = vrcp.f32 %v5075_v31  ;;  %v5008_v17 = vpop.f32.mrf.mxu1 }
0x119c   : > { %6742 = vpow2.f32 %v5823_v14  ;;  %v5040_v1 = vadd.f32 %v5032_v0, %v5008_v17 }
0x119d   : > { %6744 = vtanh.f32 %v5039_v40  ;;  %v5010_v4 = vpop.f32.mrf.mxu1 }
0x119e   : > { %v5816_v56 = vmul.f32 -1.442695, %v5040_v1  ;;  %v5043_v20 = vadd.f32 %v5035_v36, %v5010_v4  ;;  %6746 = vrcp.f32 %v5076_v29 }
0x119f   : > { %v5012_v53 = vpop.f32.mrf.mxu1 }
0x11a0   : > { %6748 = vpow2.f32 %v5816_v56  ;;  %v5044_v2 = vadd.f32 %v5036_v50, %v5012_v53 }
0x11a1   : > { %6750 = vtanh.f32 %v5043_v20  ;;  %v5016_v18 = vpop.f32.mrf.mxu1 }
0x11a2   : > { %v5817_v13 = vmul.f32 -1.442695, %v5044_v2  ;;  %v5059_v3 = vadd.f32 %v5051_v30, %v5016_v18 }
0x11a3   : > { %v6735_v43 = vpop.eup %6734  ;;  %v5018_v24 = vpop.f32.mrf.mxu1 }
0x11a4   : > { %v5127_v48 = vadd.f32 1.0, %v6735_v43  ;;  %6752 = vpow2.f32 %v5817_v13  ;;  %v5060_v46 = vadd.f32 %v5052_v26, %v5018_v24 }
0x11a5   : > { %v6737_v34 = vpop.eup %6736  ;;  %6754 = vtanh.f32 %v5059_v3  ;;  %v5020_v12 = vpop.f32.mrf.mxu1 }
0x11a6   : > { %6756 = vrcp.f32 %v5127_v48  ;;  %v5139_v47 = vadd.f32 1.0, %v6737_v34  ;;  %v5824_v23 = vmul.f32 -1.442695, %v5060_v46  ;;  %v5063_v22 = vadd.f32 %v5055_v7, %v5020_v12 }
0x11a7   : > { %v6739_v35 = vpop.eup %6738  ;;  %v5022_v52 = vpop.f32.mrf.mxu1 }
0x11a8   : > { %v6741_v58 = vpop.eup %6740  ;;  %6758 = vrcp.f32 %v5139_v47  ;;  %v5128_v6 = vadd.f32 1.0, %v6739_v35  ;;  %v5064_v8 = vadd.f32 %v5056_v33, %v5022_v52 }
0x11a9   : > { %v6743_v16 = vpop.eup %6742  ;;  %6760 = vpow2.f32 %v5824_v23 }
0x11aa   : > { %v6745_v49 = vpop.eup %6744  ;;  %6762 = vrcp.f32 %v5128_v6  ;;  %v5140_v62 = vadd.f32 1.0, %v6743_v16  ;;  %v5825_v19 = vmul.f32 -1.442695, %v5064_v8 }
0x11ab   : > { %v5107_v21 = vmul.f32 %v6745_v49, %v6741_v58  ;;  %6764 = vtanh.f32 %v5063_v22  ;;  %v6747_v31 = vpop.eup %6746  ;;  %v5306_v22 = vld [vmem:[#allocation2 + $0x70] sm:$0xff]  ;;  %v5307_v49 = vld [vmem:[#allocation2 + $0x78] sm:$0xff] }
0x11ac   : > { %6766 = vrcp.f32 %v5140_v62  ;;  %v5308_v8 = vmul.f32 %v5306_v22, %v7825_v28 }
0x11ad   : > { %v6749_v55 = vpop.eup %6748  ;;  %v5111_v37 = vadd.f32 %v9298_v63, %v5107_v21  ;;  %6768 = vpow2.f32 %v5825_v19 }
0x11ae   : > { %v6751_v54 = vpop.eup %6750  ;;  %v5101_v60 = vadd.f32 1.0, %v6749_v55 }
0x11af   : > { %v5818_v45 = vclamps-f32 %v5111_v37, 3.0  ;;  %v5108_v32 = vmul.f32 %v6751_v54, %v6747_v31 }
0x11b0   : > { %6770 = vrcp.f32 %v5101_v60 }
0x11b1   : > { %v6753_v41 = vpop.eup %6752  ;;  %6772 = vtanh.f32 %v5818_v45  ;;  %v5112_v14 = vadd.f32 %v9305_v59, %v5108_v32  ;;  %v5314_v45 = vld [vmem:[#allocation3 + $0x70] sm:$0xff] }
0x11b2   : > { %v6755_v40 = vpop.eup %6754  ;;  %v5102_v0 = vadd.f32 1.0, %v6753_v41 }
0x11b3   : > { %v6757_v29 = vpop.eup %6756  ;;  %v5819_v17 = vclamps-f32 %v5112_v14, 3.0  ;;  %v5316_v14 = vmul.f32 %v5314_v45, %v7825_v28 }
0x11b4   : > { %6774 = vrcp.f32 %v5102_v0  ;;  %v5159_v1 = vmul.f32 %v6757_v29, %v6755_v40  ;;  %v5315_v0 = vld [vmem:[#allocation3 + $0x78] sm:$0xff] }
0x11b5   : > { %v6759_v51 = vpop.eup %6758  ;;  %6776 = vtanh.f32 %v5819_v17 }
0x11b6   : > { %v6761_v36 = vpop.eup %6760  ;;  %v5161_v63 = vmul.f32 %v6759_v51, %v9114_v38 }
0x11b7   : > { %v6763_v4 = vpop.eup %6762  ;;  %v5153_v56 = vadd.f32 1.0, %v6761_v36 }
0x11b8   : > { %v6765_v20 = vpop.eup %6764  ;;  %v5163_v50 = vadd.f32 %v5161_v63, %v5159_v1  ;;  %v5317_v1 = vmul.f32 %v5315_v0, %v7825_v28 }
0x11b9   : > { %v6767_v53 = vpop.eup %6766  ;;  %v5160_v2 = vmul.f32 %v6765_v20, %v6763_v4  ;;  %6778 = vrcp.f32 %v5153_v56 }
0x11ba   : > { %v6769_v9 = vpop.eup %6768  ;;  %v5826_v30 = vclamps-f32 %v5163_v50, 3.0  ;;  %v5162_v59 = vmul.f32 %v6767_v53, %v9120_v42 }
0x11bb   : > { %v5154_v18 = vadd.f32 1.0, %v6769_v9 }
0x11bc   : > { %6780 = vtanh.f32 %v5826_v30  ;;  %v5164_v13 = vadd.f32 %v5162_v59, %v5160_v2 }
0x11bd   : > { %v6771_v3 = vpop.eup %6770  ;;  %6782 = vrcp.f32 %v5154_v18 }
0x11be   : > { %v6773_v26 = vpop.eup %6772  ;;  %v5827_v43 = vclamps-f32 %v5164_v13, 3.0 }
0x11bf   : > { %v5119_v24 = vmul.f32 %v6773_v26, %v6771_v3 }
0x11c0   : > { %6784 = vtanh.f32 %v5827_v43 }
0x11c1   : > { %v6775_v38 = vpop.eup %6774 }
0x11c2   : > { %v6777_v48 = vpop.eup %6776 }
0x11c3   : > { %v5120_v46 = vmul.f32 %v6777_v48, %v6775_v38 }
0x11c5   : > { %v5185_v34 = vpack.c.bf16 %v5120_v46, %v5119_v24 }
0x11c6   : > { %v6779_v12 = vpop.eup %6778 }
0x11c7   : > { %5222 = vmatmul.mubr.bf16.vlgmr.msra.gmra.mxu0 %v5185_v34 }
0x11c9   : > { %v6781_v15 = vpop.eup %6780 }
0x11ca   : > { %v5171_v7 = vmul.f32 %v6781_v15, %v6779_v12  ;;  %v6783_v47 = vpop.eup %6782 }
0x11cd   : > { %v6785_v42 = vpop.eup %6784 }
0x11ce   : > { %v5172_v23 = vmul.f32 %v6785_v42, %v6783_v47 }
0x11d0   : > { %v5188_v33 = vpack.c.bf16 %v5172_v23, %v5171_v7 }
0x11d2   : > { %5229 = vmatprep.mubr.bf16.mxu0 %v5188_v33 }
0x11d3   : > { %5230 = vmatmul.mubr.bf16.gmra.mxu0 %v9600_v25  ;;  %v5309_v25 = vmul.f32 %v5307_v49, %v7825_v28 }
0x1287   : > { %v6118_v35 = vpop.f32.mrf.mxu0 }
0x1289   : > { %v6119_v52 = vpop.f32.mrf.mxu0 }
0x128a   : > { %v6120_v58 = vadd.f32 %v6119_v52, %v6118_v35 }
0x128b   : > { %v6121_v6 = vpop.f32.mrf.mxu0 }
0x128c   : > { %v5828_v16 = vclamps-f32 %v6120_v58, 3.0 }
0x128d   : > { %v6122_v62 = vpop.f32.mrf.mxu0 }
0x128e   : > { %v5278_v19 = vsel %vm5258_vm1, %v5828_v16, %v9175_v39  ;;  %v5304_v21 = vsel %vm5258_vm1, %v5828_v16, 0.0  ;;  %v6123_v31 = vadd.f32 %v6122_v62, %v6121_v6 }
0x128f   : > { %5292 = vst.msk [vmem:[#allocation6] sm:$0xff] %vm589_vm2, %v5278_v19  ;;  %v5310_v55 = vadd.f32 %v5308_v8, %v5304_v21 }
0x1290   : > { %v5829_v37 = vclamps-f32 %v6123_v31, 3.0 }
0x1291   : > { %5326 = vrot.lane.b32.xlu0 %v5310_v55, %s6957_s27  ;;  %5320 = vst.msk [vmem:[#allocation2 + $0x70] sm:$0xff] %vm589_vm2, %v5310_v55 }
0x1292   : > { %v5279_v54 = vsel %vm5259_vm10, %v5829_v37, %v9177_v5  ;;  %v5305_v27 = vsel %vm5259_vm10, %v5829_v37, 0.0 }
0x1293   : > { %5293 = vst.msk [vmem:[#allocation6 + $0x8] sm:$0xff] %vm589_vm2, %v5279_v54  ;;  %v6124_v39 = vpop.f32.mrf.mxu0  ;;  %v5311_v60 = vadd.f32 %v5309_v25, %v5305_v27 }
0x1295   : > { %5328 = vrot.lane.b32.xlu1 %v5311_v60, %s6957_s27  ;;  %5321 = vst.msk [vmem:[#allocation2 + $0x78] sm:$0xff] %vm589_vm2, %v5311_v60  ;;  %v6125_v32 = vpop.f32.mrf.mxu0 }
0x1296   : > { %v6126_v41 = vadd.f32 %v6125_v32, %v6124_v39 }
0x1297   : > { %v6127_v61 = vpop.f32.mrf.mxu0 }
0x1298   : > { %v5830_v40 = vclamps-f32 %v6126_v41, 3.0 }
0x1299   : > { %v6128_v5 = vpop.f32.mrf.mxu0 }
0x129a   : > { %v5312_v29 = vsel %vm5270_vm12, %v5830_v40, 0.0  ;;  %v6129_v17 = vadd.f32 %v6128_v5, %v6127_v61  ;;  %v5290_v56 = vsel %vm5270_vm12, %v5830_v40, %v9307_v57 }
0x129b   : > { %v5318_v51 = vadd.f32 %v5316_v14, %v5312_v29 }
0x129c   : > { %v5831_v36 = vclamps-f32 %v6129_v17, 3.0 }
0x129d   : > { %5336 = vrot.lane.b32.xlu0 %v5318_v51, %s6956_s17  ;;  %5322 = vst.msk [vmem:[#allocation3 + $0x70] sm:$0xff] %vm589_vm2, %v5318_v51 }
0x129e   : > { %v5313_v63 = vsel %vm5271_vm13, %v5831_v36, 0.0  ;;  %v5291_v28 = vsel %vm5271_vm13, %v5831_v36, %v9309_v11 }
0x129f   : > { %v5319_v4 = vadd.f32 %v5317_v1, %v5313_v63 }
0x12a1   : > { %5323 = vst.msk [vmem:[#allocation3 + $0x78] sm:$0xff] %vm589_vm2, %v5319_v4  ;;  %5338 = vrot.lane.b32.xlu1 %v5319_v4, %s6956_s17  ;;  %5296 = vrot.lane.b32.xlu0 %v5290_v56, %s6956_s17 }
0x12a5   : > { %5298 = vrot.lane.b32.xlu1 %v5291_v28, %s6956_s17 }
0x1303   : > { %v5327_v10 = vpop.permute.xlu0 %5326 }
0x1304   : > { %5332 = vst.msk [vmem:[%s7093_s14 + $0x18] sm:$0xff] %vm2733_vm9, %v5327_v10 }
0x1307   : > { %v5329_v20 = vpop.permute.xlu1 %5328 }
0x1308   : > { %5333 = vst.msk [vmem:[%s7093_s14 + $0x38] sm:$0xff] %vm2733_vm9, %v5329_v20 }
0x130f   : > { %v5337_v44 = vpop.permute.xlu0 %5336 }
0x1310   : > { %5342 = vst.msk [vmem:[%s7093_s14] sm:$0xff] %vm2271_vm11, %v5337_v44 }
0x1313   : > { %v5297_v57 = vpop.permute.xlu0 %5296  ;;  %v5339_v11 = vpop.permute.xlu1 %5338 }
0x1314   : > { %5302 = vst.msk [vmem:[#allocation6 + $0x10] sm:$0xff] %vm2271_vm11, %v5297_v57  ;;  %5343 = vst.msk [vmem:[%s7093_s14 + $0x20] sm:$0xff] %vm2271_vm11, %v5339_v11 }
0x1315   : > { %6902 = shalt.err (!%p6899_p7)
}
0x1316   : > { %s6903_s14 = scalar_lea.hbm %s9395_s26, 1024  ;;  %s6907_s16 = scalar_lea.hbm %s9455_s9, 2048 }
0x1317   : > { %p6904_p8 = scmp.ne.s32.totalorder %s9395_s26, %s6903_s14  ;;  %p6908_p11 = scmp.lt.s32.totalorder %s9395_s26, %s9455_s9 }
0x1318   : > { %p6909_p12 = scmp.lt.s32.totalorder %s6907_s16, %s6903_s14 }
0x1319   : > { %p6905_p9 = pnand %p6904_p8, %p7048_p5 }
0x131a   : > { %p6910_p13 = por %p6909_p12, %p6908_p11 }
0x131b   : > { %p6906_p10 = pneg %p6905_p9 }
0x131d   : > { %p6911_p0 = pnand %p6910_p13, %p6906_p10 }
0x131f   : > { %6914 = shalt.err (!%p6911_p0)
}
0x1320   : > { %s6959_s30 = smov 512   ;;  %v5299_v50 = vpop.permute.xlu1 %5298 }
0x1321   : > { %6134 = dma.vmem_to_hbm [thread:$0]  (%p7048_p5), %s9397_s3, 1024, %s9395_s26, %s9404_s29, %s6959_s30, %s6959_s30, %s6956_s17   ;;  %5303 = vst.msk [vmem:[#allocation6 + $0x18] sm:$0xff] %vm2271_vm11, %v5299_v50 }
0x1322 PF: > { %s9696_s27 = sld [smem:[#allocation14_spill]] }
0x1323   : > { %s9697_s11 = sld [smem:[#allocation12_spill]] }
0x1328   : > { %p6140_p1 = scmp.ge.s32.totalorder %s9696_s27, 2 }
0x1329   : > { %s5373_s25 = sand.u32 1, %s9697_s11  }
0x132a   : > { %p6137_p2 = pnand %p6140_p1, %p7052_p6  ;;  %s5374_s13 = scalar_lea.sflag [#allocation10], %s5373_s25 }
0x132c   : > { %p6138_p3 = pneg %p6137_p2 }
0x132e   : > { %6932 = dma.done.wait (%p6138_p3), %s5374_s13, 1024  }
0x132f   : > { %6934 = vsyncadd (%p6138_p3), %s5374_s13, 4294966272  ;;  %s9699_s12 = sld [smem:[#allocation15_spill]]  ;;  %s9702_s30 = smov %s6941_s10 }
0x1330   : > { %s9700_s19 = sld [smem:[#allocation13_spill]] }
0x1331   : > { %s9701_s11 = sld [smem:[#allocation16_spill]] }
0x1335   : > { %p19_p5 = scmp.ge.s32.totalorder %s9699_s12, 4  }
0x1336   : > { %s9703_s10 = smov %s9700_s19 }
0x1337   :  { %21 = sbr.rel (!%p19_p5) target bundleno = 5 (0x5), region = 110 }
0x133c   :  { %5379 = vsyncpa [#allocation10], 1 }
0x133d   :  { %5381 = vsyncpa [#allocation10 + $0x1], 1 }

</bundles_post_ra>
